<compile_context>
chip_gen: v7x
topology: tpu7x:2x2x1
jax: 0.10.0
libtpu: 0.0.40
codegen_flags: <defaults>
</compile_context>

<pallas_src>
import jax
import jax.numpy as jnp
from jax.experimental import pallas as pl
from jax.experimental.pallas import tpu as pltpu


# ----------------------------------------------------------------------------
# Fused Pallas kernel: conv1 + ReLU + conv2 + ReLU + fc3 + ReLU + fc4
# ----------------------------------------------------------------------------
def _conv_dqn_kernel(p1_ref, w1_ref, b1_ref, w2_ref, b2_ref, w3_ref, b3_ref,
                     w4_ref, b4_ref, out_ref, a1_ref, a2_ref):
    B = out_ref.shape[0]
    H1 = 7          # conv1 output height/width
    H2 = 6          # conv2 output height/width
    S2 = H2 * H2    # 36 spatial positions after conv2

    # ---- conv1 + ReLU: one matmul on the pre-built im2col matrix (B*49, 9C).
    y1 = jnp.dot(p1_ref[...], w1_ref[...], preferred_element_type=jnp.float32)
    a1_ref[...] = jnp.maximum(y1 + b1_ref[...], 0.0)          # (B*49, 32)

    # ---- conv2 + ReLU: in-kernel im2col, 4 accumulated matmuls per row block.
    b2 = b2_ref[...]                                          # (1, 64)
    w2 = [w2_ref[k] for k in range(4)]                        # 4 x (32, 64)
    for b in range(B):
        base = b * H1 * H1
        for h2 in range(H2):
            acc = None
            for ky in range(2):
                for kx in range(2):
                    r0 = base + (h2 + ky) * H1 + kx
                    patch = a1_ref[pl.ds(r0, H2), :]          # (6, 32), static
                    d = jnp.dot(patch, w2[ky * 2 + kx],
                                preferred_element_type=jnp.float32)
                    acc = d if acc is None else acc + d
            a2_ref[b, pl.ds(h2 * H2, H2), :] = jnp.maximum(acc + b2, 0.0)

    # ---- fc3 + ReLU: 36 accumulated (B,64)@(64,512) matmuls.
    # w3 was pre-permuted to (s, c, n) = (36, 64, 512) so no flatten is needed.
    acc3 = jnp.zeros((B, 512), jnp.float32)
    for s in range(S2):
        a_s = a2_ref[:, s, :].astype(jnp.bfloat16)            # (B, 64)
        acc3 = acc3 + jnp.dot(a_s, w3_ref[s],
                              preferred_element_type=jnp.float32)
    h3 = jnp.maximum(acc3 + b3_ref[...], 0.0).astype(jnp.bfloat16)   # (B, 512)

    # ---- fc4
    out = jnp.dot(h3, w4_ref[...], preferred_element_type=jnp.float32)
    out_ref[...] = (out + b4_ref[...]).astype(out_ref.dtype)


# ----------------------------------------------------------------------------
# One-time weight preparation (outside jit): transposes / permutations / casts.
# ----------------------------------------------------------------------------
def prepare_params(params):
    c1w = params["conv1_w"]                    # (32, C, 3, 3)  OIHW
    c2w = params["conv2_w"]                    # (64, 32, 2, 2) OIHW
    f3w = params["fc3_w"]                      # (512, 2304)
    f4w = params["fc4_w"]                      # (A, 512)
    C = c1w.shape[1]
    A = f4w.shape[0]

    # conv1 weights as an im2col matrix, row order (ky, kx, c).
    w1 = jnp.transpose(c1w, (2, 3, 1, 0)).reshape(9 * C, 32).astype(jnp.float32)
    # conv2 weights as 4 (32, 64) tiles indexed by ky*2+kx.
    w2 = jnp.transpose(c2w, (2, 3, 1, 0)).reshape(4, 32, 64).astype(jnp.float32)
    # fc3 weights pre-transposed and permuted from PyTorch's (c, h, w) flatten
    # order to the kernel's (s=(h,w), c) activation layout: (36, 64, 512).
    w3 = jnp.transpose(f3w.reshape(512, 64, 6, 6),
                       (2, 3, 1, 0)).reshape(36, 64, 512).astype(jnp.bfloat16)
    # fc4 pre-transposed to (K, N).
    w4 = jnp.transpose(f4w, (1, 0)).astype(jnp.bfloat16)       # (512, A)

    return {
        "w1": w1, "b1": params["conv1_b"].reshape(1, 32).astype(jnp.float32),
        "w2": w2, "b2": params["conv2_b"].reshape(1, 64).astype(jnp.float32),
        "w3": w3, "b3": params["fc3_b"].reshape(1, 512).astype(jnp.float32),
        "w4": w4, "b4": params["fc4_b"].reshape(1, A).astype(jnp.float32),
    }


# ----------------------------------------------------------------------------
# Forward pass: tiny im2col of the raw input (XLA glue), then one fused kernel.
# ----------------------------------------------------------------------------
def conv_dqn_forward(prep, x):
    B, C, H, W = x.shape
    KH = KW = 3
    Ho, Wo = H - KH + 1, W - KW + 1            # 7, 7
    A = prep["w4"].shape[1]

    # im2col of the ~4 KB network input; row = (b, y, x), col = (ky, kx, c).
    xn = jnp.transpose(x, (0, 2, 3, 1))        # (B, 9, 9, C)
    cols = [xn[:, ky:ky + Ho, kx:kx + Wo, :]
            for ky in range(KH) for kx in range(KW)]
    p1 = jnp.stack(cols, axis=3).reshape(B * Ho * Wo, KH * KW * C)
    p1 = p1.astype(jnp.float32)

    flops = 2 * B * (49 * (9 * C) * 32 + 36 * 4 * 32 * 64
                     + 2304 * 512 + 512 * A)
    bytes_accessed = (p1.size * 4 + prep["w1"].size * 4 + prep["w2"].size * 4
                      + prep["w3"].size * 2 + prep["w4"].size * 2
                      + (32 + 64 + 512 + A) * 4 + B * A * 4)

    return pl.pallas_call(
        _conv_dqn_kernel,
        out_shape=jax.ShapeDtypeStruct((B, A), jnp.float32),
        scratch_shapes=[
            pltpu.VMEM((B * Ho * Wo, 32), jnp.float32),   # conv1 activations
            pltpu.VMEM((B, 36, 64), jnp.float32),         # conv2 activations
        ],
        compiler_params=pltpu.CompilerParams(
            vmem_limit_bytes=32 * 1024 * 1024),
        cost_estimate=pl.CostEstimate(flops=flops, transcendentals=0,
                                      bytes_accessed=bytes_accessed),
    )(p1, prep["w1"], prep["b1"], prep["w2"], prep["b2"],
      prep["w3"], prep["b3"], prep["w4"], prep["b4"])


# ----------------------------------------------------------------------------
# ConvDQN parameters (deterministic init, PyTorch-default-style uniform bounds)
# ----------------------------------------------------------------------------
def init_params(key, num_inputs=6, num_actions=6):
    def u(k, shape, fan_in):
        bound = 1.0 / (fan_in ** 0.5)
        return jax.random.uniform(k, shape, jnp.float32,
                                  minval=-bound, maxval=bound)

    ks = jax.random.split(key, 8)
    f1, f2, f3, f4 = num_inputs * 3 * 3, 32 * 2 * 2, 2304, 512
    return {
        "conv1_w": u(ks[0], (32, num_inputs, 3, 3), f1),
        "conv1_b": u(ks[1], (32,), f1),
        "conv2_w": u(ks[2], (64, 32, 2, 2), f2),
        "conv2_b": u(ks[3], (64,), f2),
        "fc3_w":   u(ks[4], (512, 2304), f3),
        "fc3_b":   u(ks[5], (512,), f3),
        "fc4_w":   u(ks[6], (num_actions, 512), f4),
        "fc4_b":   u(ks[7], (num_actions,), f4),
    }


# ----------------------------------------------------------------------------
# Pure-JAX f32 reference (same math, XLA conv) for a correctness check
# ----------------------------------------------------------------------------
def reference_forward(params, x):
    dn1 = jax.lax.conv_dimension_numbers(
        x.shape, params["conv1_w"].shape, ("NCHW", "OIHW", "NCHW"))
    y = jax.lax.conv_general_dilated(
        x, params["conv1_w"], (1, 1), "VALID", dimension_numbers=dn1)
    y = jnp.maximum(y + params["conv1_b"][None, :, None, None], 0.0)
    dn2 = jax.lax.conv_dimension_numbers(
        y.shape, params["conv2_w"].shape, ("NCHW", "OIHW", "NCHW"))
    y = jax.lax.conv_general_dilated(
        y, params["conv2_w"], (1, 1), "VALID", dimension_numbers=dn2)
    y = jnp.maximum(y + params["conv2_b"][None, :, None, None], 0.0)
    y = y.reshape(y.shape[0], -1)
    y = jnp.maximum(y @ params["fc3_w"].T + params["fc3_b"], 0.0)
    return y @ params["fc4_w"].T + params["fc4_b"]


if __name__ == "__main__":
    key = jax.random.PRNGKey(0)
    k_param, k_x = jax.random.split(key)

    params = init_params(k_param, num_inputs=6, num_actions=6)
    x = jax.random.normal(k_x, (2, 6, 9, 9), dtype=jnp.float32)  # (B, C, H, W)

    # Weight prep runs once, outside the jitted forward (no per-step transposes).
    prep = prepare_params(params)

    fwd = jax.jit(conv_dqn_forward)
    out = jax.block_until_ready(fwd(prep, x))
    assert out.shape == (2, 6), out.shape

    ref = jax.block_until_ready(jax.jit(reference_forward)(params, x))
    # fc3/fc4 run with bf16 operands (f32 accumulation) -> loosened tolerance.
    assert jnp.allclose(out, ref, atol=3e-2, rtol=3e-2), \
        float(jnp.max(jnp.abs(out - ref)))

    print("KERNEL_OK")
</pallas_src>

<mosaic_0001>
module attributes {stable_mosaic.version = 11 : i64} {
  func.func @_conv_dqn_kernel(%arg0: memref<98x54xf32, #tpu.memory_space<vmem>>, %arg1: memref<54x32xf32, #tpu.memory_space<vmem>>, %arg2: memref<1x32xf32, #tpu.memory_space<vmem>>, %arg3: memref<4x32x64xf32, #tpu.memory_space<vmem>>, %arg4: memref<1x64xf32, #tpu.memory_space<vmem>>, %arg5: memref<36x64x512xbf16, #tpu.memory_space<vmem>>, %arg6: memref<1x512xf32, #tpu.memory_space<vmem>>, %arg7: memref<512x6xbf16, #tpu.memory_space<vmem>>, %arg8: memref<1x6xf32, #tpu.memory_space<vmem>>, %arg9: memref<2x6xf32, #tpu.memory_space<vmem>>, %arg10: memref<98x32xf32, #tpu.memory_space<vmem>>, %arg11: memref<2x36x64xf32, #tpu.memory_space<vmem>>) attributes {dimension_semantics = [], scalar_prefetch = 0 : i64, scratch_operands = 2 : i64, tpu.core_type = #tpu.core_type<tc>} {
    %c0 = arith.constant 0 : index
    %c0_0 = arith.constant 0 : index
    %0 = vector.load %arg0[%c0, %c0_0] : memref<98x54xf32, #tpu.memory_space<vmem>>, vector<98x54xf32>
    %c0_1 = arith.constant 0 : index
    %c0_2 = arith.constant 0 : index
    %1 = vector.load %arg1[%c0_1, %c0_2] : memref<54x32xf32, #tpu.memory_space<vmem>>, vector<54x32xf32>
    %cst = arith.constant dense<0.000000e+00> : vector<98x32xf32>
    %2 = tpu.matmul %0, %1, %cst {dimension_numbers = #tpu.dot_dimension_numbers<[1], [0], [0], [1], [0, 0, 1, 1], [], []>} : vector<98x54xf32>, vector<54x32xf32>, vector<98x32xf32> -> vector<98x32xf32>
    %c0_3 = arith.constant 0 : index
    %c0_4 = arith.constant 0 : index
    %3 = vector.load %arg2[%c0_3, %c0_4] : memref<1x32xf32, #tpu.memory_space<vmem>>, vector<1x32xf32>
    %4 = vector.broadcast %3 : vector<1x32xf32> to vector<98x32xf32>
    %5 = arith.addf %2, %4 : vector<98x32xf32>
    %cst_5 = arith.constant 0.000000e+00 : f32
    %6 = vector.broadcast %cst_5 : f32 to vector<98x32xf32>
    %7 = arith.maximumf %5, %6 : vector<98x32xf32>
    %c0_6 = arith.constant 0 : index
    %c0_7 = arith.constant 0 : index
    %8 = vector.load %arg10[%c0_6, %c0_7] : memref<98x32xf32, #tpu.memory_space<vmem>>, vector<98x32xf32>
    tpu.vector_store %arg10[%c0_6, %c0_7], %7 {strides = array<i32>} : memref<98x32xf32, #tpu.memory_space<vmem>>, vector<98x32xf32>,
    %c0_8 = arith.constant 0 : index
    %c0_9 = arith.constant 0 : index
    %9 = vector.load %arg4[%c0_8, %c0_9] : memref<1x64xf32, #tpu.memory_space<vmem>>, vector<1x64xf32>
    %c0_10 = arith.constant 0 : index
    %c0_11 = arith.constant 0 : index
    %c0_12 = arith.constant 0 : index
    %10 = vector.load %arg3[%c0_10, %c0_11, %c0_12] : memref<4x32x64xf32, #tpu.memory_space<vmem>>, vector<1x32x64xf32>
    %11 = vector.shape_cast %10 : vector<1x32x64xf32> to vector<32x64xf32>
    %c1 = arith.constant 1 : index
    %c0_13 = arith.constant 0 : index
    %c0_14 = arith.constant 0 : index
    %12 = vector.load %arg3[%c1, %c0_13, %c0_14] : memref<4x32x64xf32, #tpu.memory_space<vmem>>, vector<1x32x64xf32>
    %13 = vector.shape_cast %12 : vector<1x32x64xf32> to vector<32x64xf32>
    %c2 = arith.constant 2 : index
    %c0_15 = arith.constant 0 : index
    %c0_16 = arith.constant 0 : index
    %14 = vector.load %arg3[%c2, %c0_15, %c0_16] : memref<4x32x64xf32, #tpu.memory_space<vmem>>, vector<1x32x64xf32>
    %15 = vector.shape_cast %14 : vector<1x32x64xf32> to vector<32x64xf32>
    %c3 = arith.constant 3 : index
    %c0_17 = arith.constant 0 : index
    %c0_18 = arith.constant 0 : index
    %16 = vector.load %arg3[%c3, %c0_17, %c0_18] : memref<4x32x64xf32, #tpu.memory_space<vmem>>, vector<1x32x64xf32>
    %17 = vector.shape_cast %16 : vector<1x32x64xf32> to vector<32x64xf32>
    %c0_19 = arith.constant 0 : index
    %c0_20 = arith.constant 0 : index
    %18 = vector.load %arg10[%c0_19, %c0_20] : memref<98x32xf32, #tpu.memory_space<vmem>>, vector<6x32xf32>
    %cst_21 = arith.constant dense<0.000000e+00> : vector<6x64xf32>
    %19 = tpu.matmul %18, %11, %cst_21 {dimension_numbers = #tpu.dot_dimension_numbers<[1], [0], [0], [1], [0, 0, 1, 1], [], []>} : vector<6x32xf32>, vector<32x64xf32>, vector<6x64xf32> -> vector<6x64xf32>
    %c1_22 = arith.constant 1 : index
    %c0_23 = arith.constant 0 : index
    %20 = vector.load %arg10[%c1_22, %c0_23] : memref<98x32xf32, #tpu.memory_space<vmem>>, vector<6x32xf32>
    %cst_24 = arith.constant dense<0.000000e+00> : vector<6x64xf32>
    %21 = tpu.matmul %20, %13, %cst_24 {dimension_numbers = #tpu.dot_dimension_numbers<[1], [0], [0], [1], [0, 0, 1, 1], [], []>} : vector<6x32xf32>, vector<32x64xf32>, vector<6x64xf32> -> vector<6x64xf32>
    %22 = arith.addf %19, %21 : vector<6x64xf32>
    %c7 = arith.constant 7 : index
    %c0_25 = arith.constant 0 : index
    %23 = vector.load %arg10[%c7, %c0_25] : memref<98x32xf32, #tpu.memory_space<vmem>>, vector<6x32xf32>
    %cst_26 = arith.constant dense<0.000000e+00> : vector<6x64xf32>
    %24 = tpu.matmul %23, %15, %cst_26 {dimension_numbers = #tpu.dot_dimension_numbers<[1], [0], [0], [1], [0, 0, 1, 1], [], []>} : vector<6x32xf32>, vector<32x64xf32>, vector<6x64xf32> -> vector<6x64xf32>
    %25 = arith.addf %22, %24 : vector<6x64xf32>
    %c8 = arith.constant 8 : index
    %c0_27 = arith.constant 0 : index
    %26 = vector.load %arg10[%c8, %c0_27] : memref<98x32xf32, #tpu.memory_space<vmem>>, vector<6x32xf32>
    %cst_28 = arith.constant dense<0.000000e+00> : vector<6x64xf32>
    %27 = tpu.matmul %26, %17, %cst_28 {dimension_numbers = #tpu.dot_dimension_numbers<[1], [0], [0], [1], [0, 0, 1, 1], [], []>} : vector<6x32xf32>, vector<32x64xf32>, vector<6x64xf32> -> vector<6x64xf32>
    %28 = arith.addf %25, %27 : vector<6x64xf32>
    %29 = vector.broadcast %9 : vector<1x64xf32> to vector<6x64xf32>
    %30 = arith.addf %28, %29 : vector<6x64xf32>
    %cst_29 = arith.constant 0.000000e+00 : f32
    %31 = vector.broadcast %cst_29 : f32 to vector<6x64xf32>
    %32 = arith.maximumf %30, %31 : vector<6x64xf32>
    %c0_30 = arith.constant 0 : index
    %c0_31 = arith.constant 0 : index
    %c0_32 = arith.constant 0 : index
    %33 = vector.load %arg11[%c0_30, %c0_31, %c0_32] : memref<2x36x64xf32, #tpu.memory_space<vmem>>, vector<1x6x64xf32>
    %34 = vector.shape_cast %33 : vector<1x6x64xf32> to vector<6x64xf32>
    %35 = vector.shape_cast %32 : vector<6x64xf32> to vector<1x6x64xf32>
    tpu.vector_store %arg11[%c0_30, %c0_31, %c0_32], %35 {strides = array<i32>} : memref<2x36x64xf32, #tpu.memory_space<vmem>>, vector<1x6x64xf32>,
    %c7_33 = arith.constant 7 : index
    %c0_34 = arith.constant 0 : index
    %36 = vector.load %arg10[%c7_33, %c0_34] : memref<98x32xf32, #tpu.memory_space<vmem>>, vector<6x32xf32>
    %cst_35 = arith.constant dense<0.000000e+00> : vector<6x64xf32>
    %37 = tpu.matmul %36, %11, %cst_35 {dimension_numbers = #tpu.dot_dimension_numbers<[1], [0], [0], [1], [0, 0, 1, 1], [], []>} : vector<6x32xf32>, vector<32x64xf32>, vector<6x64xf32> -> vector<6x64xf32>
    %c8_36 = arith.constant 8 : index
    %c0_37 = arith.constant 0 : index
    %38 = vector.load %arg10[%c8_36, %c0_37] : memref<98x32xf32, #tpu.memory_space<vmem>>, vector<6x32xf32>
    %cst_38 = arith.constant dense<0.000000e+00> : vector<6x64xf32>
    %39 = tpu.matmul %38, %13, %cst_38 {dimension_numbers = #tpu.dot_dimension_numbers<[1], [0], [0], [1], [0, 0, 1, 1], [], []>} : vector<6x32xf32>, vector<32x64xf32>, vector<6x64xf32> -> vector<6x64xf32>
    %40 = arith.addf %37, %39 : vector<6x64xf32>
    %c14 = arith.constant 14 : index
    %c0_39 = arith.constant 0 : index
    %41 = vector.load %arg10[%c14, %c0_39] : memref<98x32xf32, #tpu.memory_space<vmem>>, vector<6x32xf32>
    %cst_40 = arith.constant dense<0.000000e+00> : vector<6x64xf32>
    %42 = tpu.matmul %41, %15, %cst_40 {dimension_numbers = #tpu.dot_dimension_numbers<[1], [0], [0], [1], [0, 0, 1, 1], [], []>} : vector<6x32xf32>, vector<32x64xf32>, vector<6x64xf32> -> vector<6x64xf32>
    %43 = arith.addf %40, %42 : vector<6x64xf32>
    %c15 = arith.constant 15 : index
    %c0_41 = arith.constant 0 : index
    %44 = vector.load %arg10[%c15, %c0_41] : memref<98x32xf32, #tpu.memory_space<vmem>>, vector<6x32xf32>
    %cst_42 = arith.constant dense<0.000000e+00> : vector<6x64xf32>
    %45 = tpu.matmul %44, %17, %cst_42 {dimension_numbers = #tpu.dot_dimension_numbers<[1], [0], [0], [1], [0, 0, 1, 1], [], []>} : vector<6x32xf32>, vector<32x64xf32>, vector<6x64xf32> -> vector<6x64xf32>
    %46 = arith.addf %43, %45 : vector<6x64xf32>
    %47 = vector.broadcast %9 : vector<1x64xf32> to vector<6x64xf32>
    %48 = arith.addf %46, %47 : vector<6x64xf32>
    %cst_43 = arith.constant 0.000000e+00 : f32
    %49 = vector.broadcast %cst_43 : f32 to vector<6x64xf32>
    %50 = arith.maximumf %48, %49 : vector<6x64xf32>
    %c0_44 = arith.constant 0 : index
    %c6 = arith.constant 6 : index
    %c0_45 = arith.constant 0 : index
    %51 = vector.load %arg11[%c0_44, %c6, %c0_45] : memref<2x36x64xf32, #tpu.memory_space<vmem>>, vector<1x6x64xf32>
    %52 = vector.shape_cast %51 : vector<1x6x64xf32> to vector<6x64xf32>
    %53 = vector.shape_cast %50 : vector<6x64xf32> to vector<1x6x64xf32>
    tpu.vector_store %arg11[%c0_44, %c6, %c0_45], %53 {strides = array<i32>} : memref<2x36x64xf32, #tpu.memory_space<vmem>>, vector<1x6x64xf32>,
    %c14_46 = arith.constant 14 : index
    %c0_47 = arith.constant 0 : index
    %54 = vector.load %arg10[%c14_46, %c0_47] : memref<98x32xf32, #tpu.memory_space<vmem>>, vector<6x32xf32>
    %cst_48 = arith.constant dense<0.000000e+00> : vector<6x64xf32>
    %55 = tpu.matmul %54, %11, %cst_48 {dimension_numbers = #tpu.dot_dimension_numbers<[1], [0], [0], [1], [0, 0, 1, 1], [], []>} : vector<6x32xf32>, vector<32x64xf32>, vector<6x64xf32> -> vector<6x64xf32>
    %c15_49 = arith.constant 15 : index
    %c0_50 = arith.constant 0 : index
    %56 = vector.load %arg10[%c15_49, %c0_50] : memref<98x32xf32, #tpu.memory_space<vmem>>, vector<6x32xf32>
    %cst_51 = arith.constant dense<0.000000e+00> : vector<6x64xf32>
    %57 = tpu.matmul %56, %13, %cst_51 {dimension_numbers = #tpu.dot_dimension_numbers<[1], [0], [0], [1], [0, 0, 1, 1], [], []>} : vector<6x32xf32>, vector<32x64xf32>, vector<6x64xf32> -> vector<6x64xf32>
    %58 = arith.addf %55, %57 : vector<6x64xf32>
    %c21 = arith.constant 21 : index
    %c0_52 = arith.constant 0 : index
    %59 = vector.load %arg10[%c21, %c0_52] : memref<98x32xf32, #tpu.memory_space<vmem>>, vector<6x32xf32>
    %cst_53 = arith.constant dense<0.000000e+00> : vector<6x64xf32>
    %60 = tpu.matmul %59, %15, %cst_53 {dimension_numbers = #tpu.dot_dimension_numbers<[1], [0], [0], [1], [0, 0, 1, 1], [], []>} : vector<6x32xf32>, vector<32x64xf32>, vector<6x64xf32> -> vector<6x64xf32>
    %61 = arith.addf %58, %60 : vector<6x64xf32>
    %c22 = arith.constant 22 : index
    %c0_54 = arith.constant 0 : index
    %62 = vector.load %arg10[%c22, %c0_54] : memref<98x32xf32, #tpu.memory_space<vmem>>, vector<6x32xf32>
    %cst_55 = arith.constant dense<0.000000e+00> : vector<6x64xf32>
    %63 = tpu.matmul %62, %17, %cst_55 {dimension_numbers = #tpu.dot_dimension_numbers<[1], [0], [0], [1], [0, 0, 1, 1], [], []>} : vector<6x32xf32>, vector<32x64xf32>, vector<6x64xf32> -> vector<6x64xf32>
    %64 = arith.addf %61, %63 : vector<6x64xf32>
    %65 = vector.broadcast %9 : vector<1x64xf32> to vector<6x64xf32>
    %66 = arith.addf %64, %65 : vector<6x64xf32>
    %cst_56 = arith.constant 0.000000e+00 : f32
    %67 = vector.broadcast %cst_56 : f32 to vector<6x64xf32>
    %68 = arith.maximumf %66, %67 : vector<6x64xf32>
    %c0_57 = arith.constant 0 : index
    %c12 = arith.constant 12 : index
    %c0_58 = arith.constant 0 : index
    %69 = vector.load %arg11[%c0_57, %c12, %c0_58] : memref<2x36x64xf32, #tpu.memory_space<vmem>>, vector<1x6x64xf32>
    %70 = vector.shape_cast %69 : vector<1x6x64xf32> to vector<6x64xf32>
    %71 = vector.shape_cast %68 : vector<6x64xf32> to vector<1x6x64xf32>
    tpu.vector_store %arg11[%c0_57, %c12, %c0_58], %71 {strides = array<i32>} : memref<2x36x64xf32, #tpu.memory_space<vmem>>, vector<1x6x64xf32>,
    %c21_59 = arith.constant 21 : index
    %c0_60 = arith.constant 0 : index
    %72 = vector.load %arg10[%c21_59, %c0_60] : memref<98x32xf32, #tpu.memory_space<vmem>>, vector<6x32xf32>
    %cst_61 = arith.constant dense<0.000000e+00> : vector<6x64xf32>
    %73 = tpu.matmul %72, %11, %cst_61 {dimension_numbers = #tpu.dot_dimension_numbers<[1], [0], [0], [1], [0, 0, 1, 1], [], []>} : vector<6x32xf32>, vector<32x64xf32>, vector<6x64xf32> -> vector<6x64xf32>
    %c22_62 = arith.constant 22 : index
    %c0_63 = arith.constant 0 : index
    %74 = vector.load %arg10[%c22_62, %c0_63] : memref<98x32xf32, #tpu.memory_space<vmem>>, vector<6x32xf32>
    %cst_64 = arith.constant dense<0.000000e+00> : vector<6x64xf32>
    %75 = tpu.matmul %74, %13, %cst_64 {dimension_numbers = #tpu.dot_dimension_numbers<[1], [0], [0], [1], [0, 0, 1, 1], [], []>} : vector<6x32xf32>, vector<32x64xf32>, vector<6x64xf32> -> vector<6x64xf32>
    %76 = arith.addf %73, %75 : vector<6x64xf32>
    %c28 = arith.constant 28 : index
    %c0_65 = arith.constant 0 : index
    %77 = vector.load %arg10[%c28, %c0_65] : memref<98x32xf32, #tpu.memory_space<vmem>>, vector<6x32xf32>
    %cst_66 = arith.constant dense<0.000000e+00> : vector<6x64xf32>
    %78 = tpu.matmul %77, %15, %cst_66 {dimension_numbers = #tpu.dot_dimension_numbers<[1], [0], [0], [1], [0, 0, 1, 1], [], []>} : vector<6x32xf32>, vector<32x64xf32>, vector<6x64xf32> -> vector<6x64xf32>
    %79 = arith.addf %76, %78 : vector<6x64xf32>
    %c29 = arith.constant 29 : index
    %c0_67 = arith.constant 0 : index
    %80 = vector.load %arg10[%c29, %c0_67] : memref<98x32xf32, #tpu.memory_space<vmem>>, vector<6x32xf32>
    %cst_68 = arith.constant dense<0.000000e+00> : vector<6x64xf32>
    %81 = tpu.matmul %80, %17, %cst_68 {dimension_numbers = #tpu.dot_dimension_numbers<[1], [0], [0], [1], [0, 0, 1, 1], [], []>} : vector<6x32xf32>, vector<32x64xf32>, vector<6x64xf32> -> vector<6x64xf32>
    %82 = arith.addf %79, %81 : vector<6x64xf32>
    %83 = vector.broadcast %9 : vector<1x64xf32> to vector<6x64xf32>
    %84 = arith.addf %82, %83 : vector<6x64xf32>
    %cst_69 = arith.constant 0.000000e+00 : f32
    %85 = vector.broadcast %cst_69 : f32 to vector<6x64xf32>
    %86 = arith.maximumf %84, %85 : vector<6x64xf32>
    %c0_70 = arith.constant 0 : index
    %c18 = arith.constant 18 : index
    %c0_71 = arith.constant 0 : index
    %87 = vector.load %arg11[%c0_70, %c18, %c0_71] : memref<2x36x64xf32, #tpu.memory_space<vmem>>, vector<1x6x64xf32>
    %88 = vector.shape_cast %87 : vector<1x6x64xf32> to vector<6x64xf32>
    %89 = vector.shape_cast %86 : vector<6x64xf32> to vector<1x6x64xf32>
    tpu.vector_store %arg11[%c0_70, %c18, %c0_71], %89 {strides = array<i32>} : memref<2x36x64xf32, #tpu.memory_space<vmem>>, vector<1x6x64xf32>,
    %c28_72 = arith.constant 28 : index
    %c0_73 = arith.constant 0 : index
    %90 = vector.load %arg10[%c28_72, %c0_73] : memref<98x32xf32, #tpu.memory_space<vmem>>, vector<6x32xf32>
    %cst_74 = arith.constant dense<0.000000e+00> : vector<6x64xf32>
    %91 = tpu.matmul %90, %11, %cst_74 {dimension_numbers = #tpu.dot_dimension_numbers<[1], [0], [0], [1], [0, 0, 1, 1], [], []>} : vector<6x32xf32>, vector<32x64xf32>, vector<6x64xf32> -> vector<6x64xf32>
    %c29_75 = arith.constant 29 : index
    %c0_76 = arith.constant 0 : index
    %92 = vector.load %arg10[%c29_75, %c0_76] : memref<98x32xf32, #tpu.memory_space<vmem>>, vector<6x32xf32>
    %cst_77 = arith.constant dense<0.000000e+00> : vector<6x64xf32>
    %93 = tpu.matmul %92, %13, %cst_77 {dimension_numbers = #tpu.dot_dimension_numbers<[1], [0], [0], [1], [0, 0, 1, 1], [], []>} : vector<6x32xf32>, vector<32x64xf32>, vector<6x64xf32> -> vector<6x64xf32>
    %94 = arith.addf %91, %93 : vector<6x64xf32>
    %c35 = arith.constant 35 : index
    %c0_78 = arith.constant 0 : index
    %95 = vector.load %arg10[%c35, %c0_78] : memref<98x32xf32, #tpu.memory_space<vmem>>, vector<6x32xf32>
    %cst_79 = arith.constant dense<0.000000e+00> : vector<6x64xf32>
    %96 = tpu.matmul %95, %15, %cst_79 {dimension_numbers = #tpu.dot_dimension_numbers<[1], [0], [0], [1], [0, 0, 1, 1], [], []>} : vector<6x32xf32>, vector<32x64xf32>, vector<6x64xf32> -> vector<6x64xf32>
    %97 = arith.addf %94, %96 : vector<6x64xf32>
    %c36 = arith.constant 36 : index
    %c0_80 = arith.constant 0 : index
    %98 = vector.load %arg10[%c36, %c0_80] : memref<98x32xf32, #tpu.memory_space<vmem>>, vector<6x32xf32>
    %cst_81 = arith.constant dense<0.000000e+00> : vector<6x64xf32>
    %99 = tpu.matmul %98, %17, %cst_81 {dimension_numbers = #tpu.dot_dimension_numbers<[1], [0], [0], [1], [0, 0, 1, 1], [], []>} : vector<6x32xf32>, vector<32x64xf32>, vector<6x64xf32> -> vector<6x64xf32>
    %100 = arith.addf %97, %99 : vector<6x64xf32>
    %101 = vector.broadcast %9 : vector<1x64xf32> to vector<6x64xf32>
    %102 = arith.addf %100, %101 : vector<6x64xf32>
    %cst_82 = arith.constant 0.000000e+00 : f32
    %103 = vector.broadcast %cst_82 : f32 to vector<6x64xf32>
    %104 = arith.maximumf %102, %103 : vector<6x64xf32>
    %c0_83 = arith.constant 0 : index
    %c24 = arith.constant 24 : index
    %c0_84 = arith.constant 0 : index
    %105 = vector.load %arg11[%c0_83, %c24, %c0_84] : memref<2x36x64xf32, #tpu.memory_space<vmem>>, vector<1x6x64xf32>
    %106 = vector.shape_cast %105 : vector<1x6x64xf32> to vector<6x64xf32>
    %107 = vector.shape_cast %104 : vector<6x64xf32> to vector<1x6x64xf32>
    tpu.vector_store %arg11[%c0_83, %c24, %c0_84], %107 {strides = array<i32>} : memref<2x36x64xf32, #tpu.memory_space<vmem>>, vector<1x6x64xf32>,
    %c35_85 = arith.constant 35 : index
    %c0_86 = arith.constant 0 : index
    %108 = vector.load %arg10[%c35_85, %c0_86] : memref<98x32xf32, #tpu.memory_space<vmem>>, vector<6x32xf32>
    %cst_87 = arith.constant dense<0.000000e+00> : vector<6x64xf32>
    %109 = tpu.matmul %108, %11, %cst_87 {dimension_numbers = #tpu.dot_dimension_numbers<[1], [0], [0], [1], [0, 0, 1, 1], [], []>} : vector<6x32xf32>, vector<32x64xf32>, vector<6x64xf32> -> vector<6x64xf32>
    %c36_88 = arith.constant 36 : index
    %c0_89 = arith.constant 0 : index
    %110 = vector.load %arg10[%c36_88, %c0_89] : memref<98x32xf32, #tpu.memory_space<vmem>>, vector<6x32xf32>
    %cst_90 = arith.constant dense<0.000000e+00> : vector<6x64xf32>
    %111 = tpu.matmul %110, %13, %cst_90 {dimension_numbers = #tpu.dot_dimension_numbers<[1], [0], [0], [1], [0, 0, 1, 1], [], []>} : vector<6x32xf32>, vector<32x64xf32>, vector<6x64xf32> -> vector<6x64xf32>
    %112 = arith.addf %109, %111 : vector<6x64xf32>
    %c42 = arith.constant 42 : index
    %c0_91 = arith.constant 0 : index
    %113 = vector.load %arg10[%c42, %c0_91] : memref<98x32xf32, #tpu.memory_space<vmem>>, vector<6x32xf32>
    %cst_92 = arith.constant dense<0.000000e+00> : vector<6x64xf32>
    %114 = tpu.matmul %113, %15, %cst_92 {dimension_numbers = #tpu.dot_dimension_numbers<[1], [0], [0], [1], [0, 0, 1, 1], [], []>} : vector<6x32xf32>, vector<32x64xf32>, vector<6x64xf32> -> vector<6x64xf32>
    %115 = arith.addf %112, %114 : vector<6x64xf32>
    %c43 = arith.constant 43 : index
    %c0_93 = arith.constant 0 : index
    %116 = vector.load %arg10[%c43, %c0_93] : memref<98x32xf32, #tpu.memory_space<vmem>>, vector<6x32xf32>
    %cst_94 = arith.constant dense<0.000000e+00> : vector<6x64xf32>
    %117 = tpu.matmul %116, %17, %cst_94 {dimension_numbers = #tpu.dot_dimension_numbers<[1], [0], [0], [1], [0, 0, 1, 1], [], []>} : vector<6x32xf32>, vector<32x64xf32>, vector<6x64xf32> -> vector<6x64xf32>
    %118 = arith.addf %115, %117 : vector<6x64xf32>
    %119 = vector.broadcast %9 : vector<1x64xf32> to vector<6x64xf32>
    %120 = arith.addf %118, %119 : vector<6x64xf32>
    %cst_95 = arith.constant 0.000000e+00 : f32
    %121 = vector.broadcast %cst_95 : f32 to vector<6x64xf32>
    %122 = arith.maximumf %120, %121 : vector<6x64xf32>
    %c0_96 = arith.constant 0 : index
    %c30 = arith.constant 30 : index
    %c0_97 = arith.constant 0 : index
    %123 = vector.load %arg11[%c0_96, %c30, %c0_97] : memref<2x36x64xf32, #tpu.memory_space<vmem>>, vector<1x6x64xf32>
    %124 = vector.shape_cast %123 : vector<1x6x64xf32> to vector<6x64xf32>
    %125 = vector.shape_cast %122 : vector<6x64xf32> to vector<1x6x64xf32>
    tpu.vector_store %arg11[%c0_96, %c30, %c0_97], %125 {strides = array<i32>} : memref<2x36x64xf32, #tpu.memory_space<vmem>>, vector<1x6x64xf32>,
    %c49 = arith.constant 49 : index
    %c0_98 = arith.constant 0 : index
    %126 = vector.load %arg10[%c49, %c0_98] : memref<98x32xf32, #tpu.memory_space<vmem>>, vector<6x32xf32>
    %cst_99 = arith.constant dense<0.000000e+00> : vector<6x64xf32>
    %127 = tpu.matmul %126, %11, %cst_99 {dimension_numbers = #tpu.dot_dimension_numbers<[1], [0], [0], [1], [0, 0, 1, 1], [], []>} : vector<6x32xf32>, vector<32x64xf32>, vector<6x64xf32> -> vector<6x64xf32>
    %c50 = arith.constant 50 : index
    %c0_100 = arith.constant 0 : index
    %128 = vector.load %arg10[%c50, %c0_100] : memref<98x32xf32, #tpu.memory_space<vmem>>, vector<6x32xf32>
    %cst_101 = arith.constant dense<0.000000e+00> : vector<6x64xf32>
    %129 = tpu.matmul %128, %13, %cst_101 {dimension_numbers = #tpu.dot_dimension_numbers<[1], [0], [0], [1], [0, 0, 1, 1], [], []>} : vector<6x32xf32>, vector<32x64xf32>, vector<6x64xf32> -> vector<6x64xf32>
    %130 = arith.addf %127, %129 : vector<6x64xf32>
    %c56 = arith.constant 56 : index
    %c0_102 = arith.constant 0 : index
    %131 = vector.load %arg10[%c56, %c0_102] : memref<98x32xf32, #tpu.memory_space<vmem>>, vector<6x32xf32>
    %cst_103 = arith.constant dense<0.000000e+00> : vector<6x64xf32>
    %132 = tpu.matmul %131, %15, %cst_103 {dimension_numbers = #tpu.dot_dimension_numbers<[1], [0], [0], [1], [0, 0, 1, 1], [], []>} : vector<6x32xf32>, vector<32x64xf32>, vector<6x64xf32> -> vector<6x64xf32>
    %133 = arith.addf %130, %132 : vector<6x64xf32>
    %c57 = arith.constant 57 : index
    %c0_104 = arith.constant 0 : index
    %134 = vector.load %arg10[%c57, %c0_104] : memref<98x32xf32, #tpu.memory_space<vmem>>, vector<6x32xf32>
    %cst_105 = arith.constant dense<0.000000e+00> : vector<6x64xf32>
    %135 = tpu.matmul %134, %17, %cst_105 {dimension_numbers = #tpu.dot_dimension_numbers<[1], [0], [0], [1], [0, 0, 1, 1], [], []>} : vector<6x32xf32>, vector<32x64xf32>, vector<6x64xf32> -> vector<6x64xf32>
    %136 = arith.addf %133, %135 : vector<6x64xf32>
    %137 = vector.broadcast %9 : vector<1x64xf32> to vector<6x64xf32>
    %138 = arith.addf %136, %137 : vector<6x64xf32>
    %cst_106 = arith.constant 0.000000e+00 : f32
    %139 = vector.broadcast %cst_106 : f32 to vector<6x64xf32>
    %140 = arith.maximumf %138, %139 : vector<6x64xf32>
    %c1_107 = arith.constant 1 : index
    %c0_108 = arith.constant 0 : index
    %c0_109 = arith.constant 0 : index
    %141 = vector.load %arg11[%c1_107, %c0_108, %c0_109] : memref<2x36x64xf32, #tpu.memory_space<vmem>>, vector<1x6x64xf32>
    %142 = vector.shape_cast %141 : vector<1x6x64xf32> to vector<6x64xf32>
    %143 = vector.shape_cast %140 : vector<6x64xf32> to vector<1x6x64xf32>
    tpu.vector_store %arg11[%c1_107, %c0_108, %c0_109], %143 {strides = array<i32>} : memref<2x36x64xf32, #tpu.memory_space<vmem>>, vector<1x6x64xf32>,
    %c56_110 = arith.constant 56 : index
    %c0_111 = arith.constant 0 : index
    %144 = vector.load %arg10[%c56_110, %c0_111] : memref<98x32xf32, #tpu.memory_space<vmem>>, vector<6x32xf32>
    %cst_112 = arith.constant dense<0.000000e+00> : vector<6x64xf32>
    %145 = tpu.matmul %144, %11, %cst_112 {dimension_numbers = #tpu.dot_dimension_numbers<[1], [0], [0], [1], [0, 0, 1, 1], [], []>} : vector<6x32xf32>, vector<32x64xf32>, vector<6x64xf32> -> vector<6x64xf32>
    %c57_113 = arith.constant 57 : index
    %c0_114 = arith.constant 0 : index
    %146 = vector.load %arg10[%c57_113, %c0_114] : memref<98x32xf32, #tpu.memory_space<vmem>>, vector<6x32xf32>
    %cst_115 = arith.constant dense<0.000000e+00> : vector<6x64xf32>
    %147 = tpu.matmul %146, %13, %cst_115 {dimension_numbers = #tpu.dot_dimension_numbers<[1], [0], [0], [1], [0, 0, 1, 1], [], []>} : vector<6x32xf32>, vector<32x64xf32>, vector<6x64xf32> -> vector<6x64xf32>
    %148 = arith.addf %145, %147 : vector<6x64xf32>
    %c63 = arith.constant 63 : index
    %c0_116 = arith.constant 0 : index
    %149 = vector.load %arg10[%c63, %c0_116] : memref<98x32xf32, #tpu.memory_space<vmem>>, vector<6x32xf32>
    %cst_117 = arith.constant dense<0.000000e+00> : vector<6x64xf32>
    %150 = tpu.matmul %149, %15, %cst_117 {dimension_numbers = #tpu.dot_dimension_numbers<[1], [0], [0], [1], [0, 0, 1, 1], [], []>} : vector<6x32xf32>, vector<32x64xf32>, vector<6x64xf32> -> vector<6x64xf32>
    %151 = arith.addf %148, %150 : vector<6x64xf32>
    %c64 = arith.constant 64 : index
    %c0_118 = arith.constant 0 : index
    %152 = vector.load %arg10[%c64, %c0_118] : memref<98x32xf32, #tpu.memory_space<vmem>>, vector<6x32xf32>
    %cst_119 = arith.constant dense<0.000000e+00> : vector<6x64xf32>
    %153 = tpu.matmul %152, %17, %cst_119 {dimension_numbers = #tpu.dot_dimension_numbers<[1], [0], [0], [1], [0, 0, 1, 1], [], []>} : vector<6x32xf32>, vector<32x64xf32>, vector<6x64xf32> -> vector<6x64xf32>
    %154 = arith.addf %151, %153 : vector<6x64xf32>
    %155 = vector.broadcast %9 : vector<1x64xf32> to vector<6x64xf32>
    %156 = arith.addf %154, %155 : vector<6x64xf32>
    %cst_120 = arith.constant 0.000000e+00 : f32
    %157 = vector.broadcast %cst_120 : f32 to vector<6x64xf32>
    %158 = arith.maximumf %156, %157 : vector<6x64xf32>
    %c1_121 = arith.constant 1 : index
    %c6_122 = arith.constant 6 : index
    %c0_123 = arith.constant 0 : index
    %159 = vector.load %arg11[%c1_121, %c6_122, %c0_123] : memref<2x36x64xf32, #tpu.memory_space<vmem>>, vector<1x6x64xf32>
    %160 = vector.shape_cast %159 : vector<1x6x64xf32> to vector<6x64xf32>
    %161 = vector.shape_cast %158 : vector<6x64xf32> to vector<1x6x64xf32>
    tpu.vector_store %arg11[%c1_121, %c6_122, %c0_123], %161 {strides = array<i32>} : memref<2x36x64xf32, #tpu.memory_space<vmem>>, vector<1x6x64xf32>,
    %c63_124 = arith.constant 63 : index
    %c0_125 = arith.constant 0 : index
    %162 = vector.load %arg10[%c63_124, %c0_125] : memref<98x32xf32, #tpu.memory_space<vmem>>, vector<6x32xf32>
    %cst_126 = arith.constant dense<0.000000e+00> : vector<6x64xf32>
    %163 = tpu.matmul %162, %11, %cst_126 {dimension_numbers = #tpu.dot_dimension_numbers<[1], [0], [0], [1], [0, 0, 1, 1], [], []>} : vector<6x32xf32>, vector<32x64xf32>, vector<6x64xf32> -> vector<6x64xf32>
    %c64_127 = arith.constant 64 : index
    %c0_128 = arith.constant 0 : index
    %164 = vector.load %arg10[%c64_127, %c0_128] : memref<98x32xf32, #tpu.memory_space<vmem>>, vector<6x32xf32>
    %cst_129 = arith.constant dense<0.000000e+00> : vector<6x64xf32>
    %165 = tpu.matmul %164, %13, %cst_129 {dimension_numbers = #tpu.dot_dimension_numbers<[1], [0], [0], [1], [0, 0, 1, 1], [], []>} : vector<6x32xf32>, vector<32x64xf32>, vector<6x64xf32> -> vector<6x64xf32>
    %166 = arith.addf %163, %165 : vector<6x64xf32>
    %c70 = arith.constant 70 : index
    %c0_130 = arith.constant 0 : index
    %167 = vector.load %arg10[%c70, %c0_130] : memref<98x32xf32, #tpu.memory_space<vmem>>, vector<6x32xf32>
    %cst_131 = arith.constant dense<0.000000e+00> : vector<6x64xf32>
    %168 = tpu.matmul %167, %15, %cst_131 {dimension_numbers = #tpu.dot_dimension_numbers<[1], [0], [0], [1], [0, 0, 1, 1], [], []>} : vector<6x32xf32>, vector<32x64xf32>, vector<6x64xf32> -> vector<6x64xf32>
    %169 = arith.addf %166, %168 : vector<6x64xf32>
    %c71 = arith.constant 71 : index
    %c0_132 = arith.constant 0 : index
    %170 = vector.load %arg10[%c71, %c0_132] : memref<98x32xf32, #tpu.memory_space<vmem>>, vector<6x32xf32>
    %cst_133 = arith.constant dense<0.000000e+00> : vector<6x64xf32>
    %171 = tpu.matmul %170, %17, %cst_133 {dimension_numbers = #tpu.dot_dimension_numbers<[1], [0], [0], [1], [0, 0, 1, 1], [], []>} : vector<6x32xf32>, vector<32x64xf32>, vector<6x64xf32> -> vector<6x64xf32>
    %172 = arith.addf %169, %171 : vector<6x64xf32>
    %173 = vector.broadcast %9 : vector<1x64xf32> to vector<6x64xf32>
    %174 = arith.addf %172, %173 : vector<6x64xf32>
    %cst_134 = arith.constant 0.000000e+00 : f32
    %175 = vector.broadcast %cst_134 : f32 to vector<6x64xf32>
    %176 = arith.maximumf %174, %175 : vector<6x64xf32>
    %c1_135 = arith.constant 1 : index
    %c12_136 = arith.constant 12 : index
    %c0_137 = arith.constant 0 : index
    %177 = vector.load %arg11[%c1_135, %c12_136, %c0_137] : memref<2x36x64xf32, #tpu.memory_space<vmem>>, vector<1x6x64xf32>
    %178 = vector.shape_cast %177 : vector<1x6x64xf32> to vector<6x64xf32>
    %179 = vector.shape_cast %176 : vector<6x64xf32> to vector<1x6x64xf32>
    tpu.vector_store %arg11[%c1_135, %c12_136, %c0_137], %179 {strides = array<i32>} : memref<2x36x64xf32, #tpu.memory_space<vmem>>, vector<1x6x64xf32>,
    %c70_138 = arith.constant 70 : index
    %c0_139 = arith.constant 0 : index
    %180 = vector.load %arg10[%c70_138, %c0_139] : memref<98x32xf32, #tpu.memory_space<vmem>>, vector<6x32xf32>
    %cst_140 = arith.constant dense<0.000000e+00> : vector<6x64xf32>
    %181 = tpu.matmul %180, %11, %cst_140 {dimension_numbers = #tpu.dot_dimension_numbers<[1], [0], [0], [1], [0, 0, 1, 1], [], []>} : vector<6x32xf32>, vector<32x64xf32>, vector<6x64xf32> -> vector<6x64xf32>
    %c71_141 = arith.constant 71 : index
    %c0_142 = arith.constant 0 : index
    %182 = vector.load %arg10[%c71_141, %c0_142] : memref<98x32xf32, #tpu.memory_space<vmem>>, vector<6x32xf32>
    %cst_143 = arith.constant dense<0.000000e+00> : vector<6x64xf32>
    %183 = tpu.matmul %182, %13, %cst_143 {dimension_numbers = #tpu.dot_dimension_numbers<[1], [0], [0], [1], [0, 0, 1, 1], [], []>} : vector<6x32xf32>, vector<32x64xf32>, vector<6x64xf32> -> vector<6x64xf32>
    %184 = arith.addf %181, %183 : vector<6x64xf32>
    %c77 = arith.constant 77 : index
    %c0_144 = arith.constant 0 : index
    %185 = vector.load %arg10[%c77, %c0_144] : memref<98x32xf32, #tpu.memory_space<vmem>>, vector<6x32xf32>
    %cst_145 = arith.constant dense<0.000000e+00> : vector<6x64xf32>
    %186 = tpu.matmul %185, %15, %cst_145 {dimension_numbers = #tpu.dot_dimension_numbers<[1], [0], [0], [1], [0, 0, 1, 1], [], []>} : vector<6x32xf32>, vector<32x64xf32>, vector<6x64xf32> -> vector<6x64xf32>
    %187 = arith.addf %184, %186 : vector<6x64xf32>
    %c78 = arith.constant 78 : index
    %c0_146 = arith.constant 0 : index
    %188 = vector.load %arg10[%c78, %c0_146] : memref<98x32xf32, #tpu.memory_space<vmem>>, vector<6x32xf32>
    %cst_147 = arith.constant dense<0.000000e+00> : vector<6x64xf32>
    %189 = tpu.matmul %188, %17, %cst_147 {dimension_numbers = #tpu.dot_dimension_numbers<[1], [0], [0], [1], [0, 0, 1, 1], [], []>} : vector<6x32xf32>, vector<32x64xf32>, vector<6x64xf32> -> vector<6x64xf32>
    %190 = arith.addf %187, %189 : vector<6x64xf32>
    %191 = vector.broadcast %9 : vector<1x64xf32> to vector<6x64xf32>
    %192 = arith.addf %190, %191 : vector<6x64xf32>
    %cst_148 = arith.constant 0.000000e+00 : f32
    %193 = vector.broadcast %cst_148 : f32 to vector<6x64xf32>
    %194 = arith.maximumf %192, %193 : vector<6x64xf32>
    %c1_149 = arith.constant 1 : index
    %c18_150 = arith.constant 18 : index
    %c0_151 = arith.constant 0 : index
    %195 = vector.load %arg11[%c1_149, %c18_150, %c0_151] : memref<2x36x64xf32, #tpu.memory_space<vmem>>, vector<1x6x64xf32>
    %196 = vector.shape_cast %195 : vector<1x6x64xf32> to vector<6x64xf32>
    %197 = vector.shape_cast %194 : vector<6x64xf32> to vector<1x6x64xf32>
    tpu.vector_store %arg11[%c1_149, %c18_150, %c0_151], %197 {strides = array<i32>} : memref<2x36x64xf32, #tpu.memory_space<vmem>>, vector<1x6x64xf32>,
    %c77_152 = arith.constant 77 : index
    %c0_153 = arith.constant 0 : index
    %198 = vector.load %arg10[%c77_152, %c0_153] : memref<98x32xf32, #tpu.memory_space<vmem>>, vector<6x32xf32>
    %cst_154 = arith.constant dense<0.000000e+00> : vector<6x64xf32>
    %199 = tpu.matmul %198, %11, %cst_154 {dimension_numbers = #tpu.dot_dimension_numbers<[1], [0], [0], [1], [0, 0, 1, 1], [], []>} : vector<6x32xf32>, vector<32x64xf32>, vector<6x64xf32> -> vector<6x64xf32>
    %c78_155 = arith.constant 78 : index
    %c0_156 = arith.constant 0 : index
    %200 = vector.load %arg10[%c78_155, %c0_156] : memref<98x32xf32, #tpu.memory_space<vmem>>, vector<6x32xf32>
    %cst_157 = arith.constant dense<0.000000e+00> : vector<6x64xf32>
    %201 = tpu.matmul %200, %13, %cst_157 {dimension_numbers = #tpu.dot_dimension_numbers<[1], [0], [0], [1], [0, 0, 1, 1], [], []>} : vector<6x32xf32>, vector<32x64xf32>, vector<6x64xf32> -> vector<6x64xf32>
    %202 = arith.addf %199, %201 : vector<6x64xf32>
    %c84 = arith.constant 84 : index
    %c0_158 = arith.constant 0 : index
    %203 = vector.load %arg10[%c84, %c0_158] : memref<98x32xf32, #tpu.memory_space<vmem>>, vector<6x32xf32>
    %cst_159 = arith.constant dense<0.000000e+00> : vector<6x64xf32>
    %204 = tpu.matmul %203, %15, %cst_159 {dimension_numbers = #tpu.dot_dimension_numbers<[1], [0], [0], [1], [0, 0, 1, 1], [], []>} : vector<6x32xf32>, vector<32x64xf32>, vector<6x64xf32> -> vector<6x64xf32>
    %205 = arith.addf %202, %204 : vector<6x64xf32>
    %c85 = arith.constant 85 : index
    %c0_160 = arith.constant 0 : index
    %206 = vector.load %arg10[%c85, %c0_160] : memref<98x32xf32, #tpu.memory_space<vmem>>, vector<6x32xf32>
    %cst_161 = arith.constant dense<0.000000e+00> : vector<6x64xf32>
    %207 = tpu.matmul %206, %17, %cst_161 {dimension_numbers = #tpu.dot_dimension_numbers<[1], [0], [0], [1], [0, 0, 1, 1], [], []>} : vector<6x32xf32>, vector<32x64xf32>, vector<6x64xf32> -> vector<6x64xf32>
    %208 = arith.addf %205, %207 : vector<6x64xf32>
    %209 = vector.broadcast %9 : vector<1x64xf32> to vector<6x64xf32>
    %210 = arith.addf %208, %209 : vector<6x64xf32>
    %cst_162 = arith.constant 0.000000e+00 : f32
    %211 = vector.broadcast %cst_162 : f32 to vector<6x64xf32>
    %212 = arith.maximumf %210, %211 : vector<6x64xf32>
    %c1_163 = arith.constant 1 : index
    %c24_164 = arith.constant 24 : index
    %c0_165 = arith.constant 0 : index
    %213 = vector.load %arg11[%c1_163, %c24_164, %c0_165] : memref<2x36x64xf32, #tpu.memory_space<vmem>>, vector<1x6x64xf32>
    %214 = vector.shape_cast %213 : vector<1x6x64xf32> to vector<6x64xf32>
    %215 = vector.shape_cast %212 : vector<6x64xf32> to vector<1x6x64xf32>
    tpu.vector_store %arg11[%c1_163, %c24_164, %c0_165], %215 {strides = array<i32>} : memref<2x36x64xf32, #tpu.memory_space<vmem>>, vector<1x6x64xf32>,
    %c84_166 = arith.constant 84 : index
    %c0_167 = arith.constant 0 : index
    %216 = vector.load %arg10[%c84_166, %c0_167] : memref<98x32xf32, #tpu.memory_space<vmem>>, vector<6x32xf32>
    %cst_168 = arith.constant dense<0.000000e+00> : vector<6x64xf32>
    %217 = tpu.matmul %216, %11, %cst_168 {dimension_numbers = #tpu.dot_dimension_numbers<[1], [0], [0], [1], [0, 0, 1, 1], [], []>} : vector<6x32xf32>, vector<32x64xf32>, vector<6x64xf32> -> vector<6x64xf32>
    %c85_169 = arith.constant 85 : index
    %c0_170 = arith.constant 0 : index
    %218 = vector.load %arg10[%c85_169, %c0_170] : memref<98x32xf32, #tpu.memory_space<vmem>>, vector<6x32xf32>
    %cst_171 = arith.constant dense<0.000000e+00> : vector<6x64xf32>
    %219 = tpu.matmul %218, %13, %cst_171 {dimension_numbers = #tpu.dot_dimension_numbers<[1], [0], [0], [1], [0, 0, 1, 1], [], []>} : vector<6x32xf32>, vector<32x64xf32>, vector<6x64xf32> -> vector<6x64xf32>
    %220 = arith.addf %217, %219 : vector<6x64xf32>
    %c91 = arith.constant 91 : index
    %c0_172 = arith.constant 0 : index
    %221 = vector.load %arg10[%c91, %c0_172] : memref<98x32xf32, #tpu.memory_space<vmem>>, vector<6x32xf32>
    %cst_173 = arith.constant dense<0.000000e+00> : vector<6x64xf32>
    %222 = tpu.matmul %221, %15, %cst_173 {dimension_numbers = #tpu.dot_dimension_numbers<[1], [0], [0], [1], [0, 0, 1, 1], [], []>} : vector<6x32xf32>, vector<32x64xf32>, vector<6x64xf32> -> vector<6x64xf32>
    %223 = arith.addf %220, %222 : vector<6x64xf32>
    %c92 = arith.constant 92 : index
    %c0_174 = arith.constant 0 : index
    %224 = vector.load %arg10[%c92, %c0_174] : memref<98x32xf32, #tpu.memory_space<vmem>>, vector<6x32xf32>
    %cst_175 = arith.constant dense<0.000000e+00> : vector<6x64xf32>
    %225 = tpu.matmul %224, %17, %cst_175 {dimension_numbers = #tpu.dot_dimension_numbers<[1], [0], [0], [1], [0, 0, 1, 1], [], []>} : vector<6x32xf32>, vector<32x64xf32>, vector<6x64xf32> -> vector<6x64xf32>
    %226 = arith.addf %223, %225 : vector<6x64xf32>
    %227 = vector.broadcast %9 : vector<1x64xf32> to vector<6x64xf32>
    %228 = arith.addf %226, %227 : vector<6x64xf32>
    %cst_176 = arith.constant 0.000000e+00 : f32
    %229 = vector.broadcast %cst_176 : f32 to vector<6x64xf32>
    %230 = arith.maximumf %228, %229 : vector<6x64xf32>
    %c1_177 = arith.constant 1 : index
    %c30_178 = arith.constant 30 : index
    %c0_179 = arith.constant 0 : index
    %231 = vector.load %arg11[%c1_177, %c30_178, %c0_179] : memref<2x36x64xf32, #tpu.memory_space<vmem>>, vector<1x6x64xf32>
    %232 = vector.shape_cast %231 : vector<1x6x64xf32> to vector<6x64xf32>
    %233 = vector.shape_cast %230 : vector<6x64xf32> to vector<1x6x64xf32>
    tpu.vector_store %arg11[%c1_177, %c30_178, %c0_179], %233 {strides = array<i32>} : memref<2x36x64xf32, #tpu.memory_space<vmem>>, vector<1x6x64xf32>,
    %cst_180 = arith.constant 0.000000e+00 : f32
    %234 = vector.broadcast %cst_180 : f32 to vector<2x512xf32>
    %c0_181 = arith.constant 0 : index
    %c0_182 = arith.constant 0 : index
    %c0_183 = arith.constant 0 : index
    %235 = vector.load %arg11[%c0_181, %c0_182, %c0_183] : memref<2x36x64xf32, #tpu.memory_space<vmem>>, vector<2x1x64xf32>
    %236 = vector.shape_cast %235 : vector<2x1x64xf32> to vector<2x64xf32>
    %237 = arith.truncf %236 : vector<2x64xf32> to vector<2x64xbf16>
    %c0_184 = arith.constant 0 : index
    %c0_185 = arith.constant 0 : index
    %c0_186 = arith.constant 0 : index
    %238 = vector.load %arg5[%c0_184, %c0_185, %c0_186] : memref<36x64x512xbf16, #tpu.memory_space<vmem>>, vector<1x64x512xbf16>
    %239 = vector.shape_cast %238 : vector<1x64x512xbf16> to vector<64x512xbf16>
    %cst_187 = arith.constant dense<0.000000e+00> : vector<2x512xf32>
    %240 = tpu.matmul %237, %239, %cst_187 {dimension_numbers = #tpu.dot_dimension_numbers<[1], [0], [0], [1], [0, 0, 1, 1], [], []>} : vector<2x64xbf16>, vector<64x512xbf16>, vector<2x512xf32> -> vector<2x512xf32>
    %241 = arith.addf %234, %240 : vector<2x512xf32>
    %c0_188 = arith.constant 0 : index
    %c1_189 = arith.constant 1 : index
    %c0_190 = arith.constant 0 : index
    %242 = vector.load %arg11[%c0_188, %c1_189, %c0_190] : memref<2x36x64xf32, #tpu.memory_space<vmem>>, vector<2x1x64xf32>
    %243 = vector.shape_cast %242 : vector<2x1x64xf32> to vector<2x64xf32>
    %244 = arith.truncf %243 : vector<2x64xf32> to vector<2x64xbf16>
    %c1_191 = arith.constant 1 : index
    %c0_192 = arith.constant 0 : index
    %c0_193 = arith.constant 0 : index
    %245 = vector.load %arg5[%c1_191, %c0_192, %c0_193] : memref<36x64x512xbf16, #tpu.memory_space<vmem>>, vector<1x64x512xbf16>
    %246 = vector.shape_cast %245 : vector<1x64x512xbf16> to vector<64x512xbf16>
    %cst_194 = arith.constant dense<0.000000e+00> : vector<2x512xf32>
    %247 = tpu.matmul %244, %246, %cst_194 {dimension_numbers = #tpu.dot_dimension_numbers<[1], [0], [0], [1], [0, 0, 1, 1], [], []>} : vector<2x64xbf16>, vector<64x512xbf16>, vector<2x512xf32> -> vector<2x512xf32>
    %248 = arith.addf %241, %247 : vector<2x512xf32>
    %c0_195 = arith.constant 0 : index
    %c2_196 = arith.constant 2 : index
    %c0_197 = arith.constant 0 : index
    %249 = vector.load %arg11[%c0_195, %c2_196, %c0_197] : memref<2x36x64xf32, #tpu.memory_space<vmem>>, vector<2x1x64xf32>
    %250 = vector.shape_cast %249 : vector<2x1x64xf32> to vector<2x64xf32>
    %251 = arith.truncf %250 : vector<2x64xf32> to vector<2x64xbf16>
    %c2_198 = arith.constant 2 : index
    %c0_199 = arith.constant 0 : index
    %c0_200 = arith.constant 0 : index
    %252 = vector.load %arg5[%c2_198, %c0_199, %c0_200] : memref<36x64x512xbf16, #tpu.memory_space<vmem>>, vector<1x64x512xbf16>
    %253 = vector.shape_cast %252 : vector<1x64x512xbf16> to vector<64x512xbf16>
    %cst_201 = arith.constant dense<0.000000e+00> : vector<2x512xf32>
    %254 = tpu.matmul %251, %253, %cst_201 {dimension_numbers = #tpu.dot_dimension_numbers<[1], [0], [0], [1], [0, 0, 1, 1], [], []>} : vector<2x64xbf16>, vector<64x512xbf16>, vector<2x512xf32> -> vector<2x512xf32>
    %255 = arith.addf %248, %254 : vector<2x512xf32>
    %c0_202 = arith.constant 0 : index
    %c3_203 = arith.constant 3 : index
    %c0_204 = arith.constant 0 : index
    %256 = vector.load %arg11[%c0_202, %c3_203, %c0_204] : memref<2x36x64xf32, #tpu.memory_space<vmem>>, vector<2x1x64xf32>
    %257 = vector.shape_cast %256 : vector<2x1x64xf32> to vector<2x64xf32>
    %258 = arith.truncf %257 : vector<2x64xf32> to vector<2x64xbf16>
    %c3_205 = arith.constant 3 : index
    %c0_206 = arith.constant 0 : index
    %c0_207 = arith.constant 0 : index
    %259 = vector.load %arg5[%c3_205, %c0_206, %c0_207] : memref<36x64x512xbf16, #tpu.memory_space<vmem>>, vector<1x64x512xbf16>
    %260 = vector.shape_cast %259 : vector<1x64x512xbf16> to vector<64x512xbf16>
    %cst_208 = arith.constant dense<0.000000e+00> : vector<2x512xf32>
    %261 = tpu.matmul %258, %260, %cst_208 {dimension_numbers = #tpu.dot_dimension_numbers<[1], [0], [0], [1], [0, 0, 1, 1], [], []>} : vector<2x64xbf16>, vector<64x512xbf16>, vector<2x512xf32> -> vector<2x512xf32>
    %262 = arith.addf %255, %261 : vector<2x512xf32>
    %c0_209 = arith.constant 0 : index
    %c4 = arith.constant 4 : index
    %c0_210 = arith.constant 0 : index
    %263 = vector.load %arg11[%c0_209, %c4, %c0_210] : memref<2x36x64xf32, #tpu.memory_space<vmem>>, vector<2x1x64xf32>
    %264 = vector.shape_cast %263 : vector<2x1x64xf32> to vector<2x64xf32>
    %265 = arith.truncf %264 : vector<2x64xf32> to vector<2x64xbf16>
    %c4_211 = arith.constant 4 : index
    %c0_212 = arith.constant 0 : index
    %c0_213 = arith.constant 0 : index
    %266 = vector.load %arg5[%c4_211, %c0_212, %c0_213] : memref<36x64x512xbf16, #tpu.memory_space<vmem>>, vector<1x64x512xbf16>
    %267 = vector.shape_cast %266 : vector<1x64x512xbf16> to vector<64x512xbf16>
    %cst_214 = arith.constant dense<0.000000e+00> : vector<2x512xf32>
    %268 = tpu.matmul %265, %267, %cst_214 {dimension_numbers = #tpu.dot_dimension_numbers<[1], [0], [0], [1], [0, 0, 1, 1], [], []>} : vector<2x64xbf16>, vector<64x512xbf16>, vector<2x512xf32> -> vector<2x512xf32>
    %269 = arith.addf %262, %268 : vector<2x512xf32>
    %c0_215 = arith.constant 0 : index
    %c5 = arith.constant 5 : index
    %c0_216 = arith.constant 0 : index
    %270 = vector.load %arg11[%c0_215, %c5, %c0_216] : memref<2x36x64xf32, #tpu.memory_space<vmem>>, vector<2x1x64xf32>
    %271 = vector.shape_cast %270 : vector<2x1x64xf32> to vector<2x64xf32>
    %272 = arith.truncf %271 : vector<2x64xf32> to vector<2x64xbf16>
    %c5_217 = arith.constant 5 : index
    %c0_218 = arith.constant 0 : index
    %c0_219 = arith.constant 0 : index
    %273 = vector.load %arg5[%c5_217, %c0_218, %c0_219] : memref<36x64x512xbf16, #tpu.memory_space<vmem>>, vector<1x64x512xbf16>
    %274 = vector.shape_cast %273 : vector<1x64x512xbf16> to vector<64x512xbf16>
    %cst_220 = arith.constant dense<0.000000e+00> : vector<2x512xf32>
    %275 = tpu.matmul %272, %274, %cst_220 {dimension_numbers = #tpu.dot_dimension_numbers<[1], [0], [0], [1], [0, 0, 1, 1], [], []>} : vector<2x64xbf16>, vector<64x512xbf16>, vector<2x512xf32> -> vector<2x512xf32>
    %276 = arith.addf %269, %275 : vector<2x512xf32>
    %c0_221 = arith.constant 0 : index
    %c6_222 = arith.constant 6 : index
    %c0_223 = arith.constant 0 : index
    %277 = vector.load %arg11[%c0_221, %c6_222, %c0_223] : memref<2x36x64xf32, #tpu.memory_space<vmem>>, vector<2x1x64xf32>
    %278 = vector.shape_cast %277 : vector<2x1x64xf32> to vector<2x64xf32>
    %279 = arith.truncf %278 : vector<2x64xf32> to vector<2x64xbf16>
    %c6_224 = arith.constant 6 : index
    %c0_225 = arith.constant 0 : index
    %c0_226 = arith.constant 0 : index
    %280 = vector.load %arg5[%c6_224, %c0_225, %c0_226] : memref<36x64x512xbf16, #tpu.memory_space<vmem>>, vector<1x64x512xbf16>
    %281 = vector.shape_cast %280 : vector<1x64x512xbf16> to vector<64x512xbf16>
    %cst_227 = arith.constant dense<0.000000e+00> : vector<2x512xf32>
    %282 = tpu.matmul %279, %281, %cst_227 {dimension_numbers = #tpu.dot_dimension_numbers<[1], [0], [0], [1], [0, 0, 1, 1], [], []>} : vector<2x64xbf16>, vector<64x512xbf16>, vector<2x512xf32> -> vector<2x512xf32>
    %283 = arith.addf %276, %282 : vector<2x512xf32>
    %c0_228 = arith.constant 0 : index
    %c7_229 = arith.constant 7 : index
    %c0_230 = arith.constant 0 : index
    %284 = vector.load %arg11[%c0_228, %c7_229, %c0_230] : memref<2x36x64xf32, #tpu.memory_space<vmem>>, vector<2x1x64xf32>
    %285 = vector.shape_cast %284 : vector<2x1x64xf32> to vector<2x64xf32>
    %286 = arith.truncf %285 : vector<2x64xf32> to vector<2x64xbf16>
    %c7_231 = arith.constant 7 : index
    %c0_232 = arith.constant 0 : index
    %c0_233 = arith.constant 0 : index
    %287 = vector.load %arg5[%c7_231, %c0_232, %c0_233] : memref<36x64x512xbf16, #tpu.memory_space<vmem>>, vector<1x64x512xbf16>
    %288 = vector.shape_cast %287 : vector<1x64x512xbf16> to vector<64x512xbf16>
    %cst_234 = arith.constant dense<0.000000e+00> : vector<2x512xf32>
    %289 = tpu.matmul %286, %288, %cst_234 {dimension_numbers = #tpu.dot_dimension_numbers<[1], [0], [0], [1], [0, 0, 1, 1], [], []>} : vector<2x64xbf16>, vector<64x512xbf16>, vector<2x512xf32> -> vector<2x512xf32>
    %290 = arith.addf %283, %289 : vector<2x512xf32>
    %c0_235 = arith.constant 0 : index
    %c8_236 = arith.constant 8 : index
    %c0_237 = arith.constant 0 : index
    %291 = vector.load %arg11[%c0_235, %c8_236, %c0_237] : memref<2x36x64xf32, #tpu.memory_space<vmem>>, vector<2x1x64xf32>
    %292 = vector.shape_cast %291 : vector<2x1x64xf32> to vector<2x64xf32>
    %293 = arith.truncf %292 : vector<2x64xf32> to vector<2x64xbf16>
    %c8_238 = arith.constant 8 : index
    %c0_239 = arith.constant 0 : index
    %c0_240 = arith.constant 0 : index
    %294 = vector.load %arg5[%c8_238, %c0_239, %c0_240] : memref<36x64x512xbf16, #tpu.memory_space<vmem>>, vector<1x64x512xbf16>
    %295 = vector.shape_cast %294 : vector<1x64x512xbf16> to vector<64x512xbf16>
    %cst_241 = arith.constant dense<0.000000e+00> : vector<2x512xf32>
    %296 = tpu.matmul %293, %295, %cst_241 {dimension_numbers = #tpu.dot_dimension_numbers<[1], [0], [0], [1], [0, 0, 1, 1], [], []>} : vector<2x64xbf16>, vector<64x512xbf16>, vector<2x512xf32> -> vector<2x512xf32>
    %297 = arith.addf %290, %296 : vector<2x512xf32>
    %c0_242 = arith.constant 0 : index
    %c9 = arith.constant 9 : index
    %c0_243 = arith.constant 0 : index
    %298 = vector.load %arg11[%c0_242, %c9, %c0_243] : memref<2x36x64xf32, #tpu.memory_space<vmem>>, vector<2x1x64xf32>
    %299 = vector.shape_cast %298 : vector<2x1x64xf32> to vector<2x64xf32>
    %300 = arith.truncf %299 : vector<2x64xf32> to vector<2x64xbf16>
    %c9_244 = arith.constant 9 : index
    %c0_245 = arith.constant 0 : index
    %c0_246 = arith.constant 0 : index
    %301 = vector.load %arg5[%c9_244, %c0_245, %c0_246] : memref<36x64x512xbf16, #tpu.memory_space<vmem>>, vector<1x64x512xbf16>
    %302 = vector.shape_cast %301 : vector<1x64x512xbf16> to vector<64x512xbf16>
    %cst_247 = arith.constant dense<0.000000e+00> : vector<2x512xf32>
    %303 = tpu.matmul %300, %302, %cst_247 {dimension_numbers = #tpu.dot_dimension_numbers<[1], [0], [0], [1], [0, 0, 1, 1], [], []>} : vector<2x64xbf16>, vector<64x512xbf16>, vector<2x512xf32> -> vector<2x512xf32>
    %304 = arith.addf %297, %303 : vector<2x512xf32>
    %c0_248 = arith.constant 0 : index
    %c10 = arith.constant 10 : index
    %c0_249 = arith.constant 0 : index
    %305 = vector.load %arg11[%c0_248, %c10, %c0_249] : memref<2x36x64xf32, #tpu.memory_space<vmem>>, vector<2x1x64xf32>
    %306 = vector.shape_cast %305 : vector<2x1x64xf32> to vector<2x64xf32>
    %307 = arith.truncf %306 : vector<2x64xf32> to vector<2x64xbf16>
    %c10_250 = arith.constant 10 : index
    %c0_251 = arith.constant 0 : index
    %c0_252 = arith.constant 0 : index
    %308 = vector.load %arg5[%c10_250, %c0_251, %c0_252] : memref<36x64x512xbf16, #tpu.memory_space<vmem>>, vector<1x64x512xbf16>
    %309 = vector.shape_cast %308 : vector<1x64x512xbf16> to vector<64x512xbf16>
    %cst_253 = arith.constant dense<0.000000e+00> : vector<2x512xf32>
    %310 = tpu.matmul %307, %309, %cst_253 {dimension_numbers = #tpu.dot_dimension_numbers<[1], [0], [0], [1], [0, 0, 1, 1], [], []>} : vector<2x64xbf16>, vector<64x512xbf16>, vector<2x512xf32> -> vector<2x512xf32>
    %311 = arith.addf %304, %310 : vector<2x512xf32>
    %c0_254 = arith.constant 0 : index
    %c11 = arith.constant 11 : index
    %c0_255 = arith.constant 0 : index
    %312 = vector.load %arg11[%c0_254, %c11, %c0_255] : memref<2x36x64xf32, #tpu.memory_space<vmem>>, vector<2x1x64xf32>
    %313 = vector.shape_cast %312 : vector<2x1x64xf32> to vector<2x64xf32>
    %314 = arith.truncf %313 : vector<2x64xf32> to vector<2x64xbf16>
    %c11_256 = arith.constant 11 : index
    %c0_257 = arith.constant 0 : index
    %c0_258 = arith.constant 0 : index
    %315 = vector.load %arg5[%c11_256, %c0_257, %c0_258] : memref<36x64x512xbf16, #tpu.memory_space<vmem>>, vector<1x64x512xbf16>
    %316 = vector.shape_cast %315 : vector<1x64x512xbf16> to vector<64x512xbf16>
    %cst_259 = arith.constant dense<0.000000e+00> : vector<2x512xf32>
    %317 = tpu.matmul %314, %316, %cst_259 {dimension_numbers = #tpu.dot_dimension_numbers<[1], [0], [0], [1], [0, 0, 1, 1], [], []>} : vector<2x64xbf16>, vector<64x512xbf16>, vector<2x512xf32> -> vector<2x512xf32>
    %318 = arith.addf %311, %317 : vector<2x512xf32>
    %c0_260 = arith.constant 0 : index
    %c12_261 = arith.constant 12 : index
    %c0_262 = arith.constant 0 : index
    %319 = vector.load %arg11[%c0_260, %c12_261, %c0_262] : memref<2x36x64xf32, #tpu.memory_space<vmem>>, vector<2x1x64xf32>
    %320 = vector.shape_cast %319 : vector<2x1x64xf32> to vector<2x64xf32>
    %321 = arith.truncf %320 : vector<2x64xf32> to vector<2x64xbf16>
    %c12_263 = arith.constant 12 : index
    %c0_264 = arith.constant 0 : index
    %c0_265 = arith.constant 0 : index
    %322 = vector.load %arg5[%c12_263, %c0_264, %c0_265] : memref<36x64x512xbf16, #tpu.memory_space<vmem>>, vector<1x64x512xbf16>
    %323 = vector.shape_cast %322 : vector<1x64x512xbf16> to vector<64x512xbf16>
    %cst_266 = arith.constant dense<0.000000e+00> : vector<2x512xf32>
    %324 = tpu.matmul %321, %323, %cst_266 {dimension_numbers = #tpu.dot_dimension_numbers<[1], [0], [0], [1], [0, 0, 1, 1], [], []>} : vector<2x64xbf16>, vector<64x512xbf16>, vector<2x512xf32> -> vector<2x512xf32>
    %325 = arith.addf %318, %324 : vector<2x512xf32>
    %c0_267 = arith.constant 0 : index
    %c13 = arith.constant 13 : index
    %c0_268 = arith.constant 0 : index
    %326 = vector.load %arg11[%c0_267, %c13, %c0_268] : memref<2x36x64xf32, #tpu.memory_space<vmem>>, vector<2x1x64xf32>
    %327 = vector.shape_cast %326 : vector<2x1x64xf32> to vector<2x64xf32>
    %328 = arith.truncf %327 : vector<2x64xf32> to vector<2x64xbf16>
    %c13_269 = arith.constant 13 : index
    %c0_270 = arith.constant 0 : index
    %c0_271 = arith.constant 0 : index
    %329 = vector.load %arg5[%c13_269, %c0_270, %c0_271] : memref<36x64x512xbf16, #tpu.memory_space<vmem>>, vector<1x64x512xbf16>
    %330 = vector.shape_cast %329 : vector<1x64x512xbf16> to vector<64x512xbf16>
    %cst_272 = arith.constant dense<0.000000e+00> : vector<2x512xf32>
    %331 = tpu.matmul %328, %330, %cst_272 {dimension_numbers = #tpu.dot_dimension_numbers<[1], [0], [0], [1], [0, 0, 1, 1], [], []>} : vector<2x64xbf16>, vector<64x512xbf16>, vector<2x512xf32> -> vector<2x512xf32>
    %332 = arith.addf %325, %331 : vector<2x512xf32>
    %c0_273 = arith.constant 0 : index
    %c14_274 = arith.constant 14 : index
    %c0_275 = arith.constant 0 : index
    %333 = vector.load %arg11[%c0_273, %c14_274, %c0_275] : memref<2x36x64xf32, #tpu.memory_space<vmem>>, vector<2x1x64xf32>
    %334 = vector.shape_cast %333 : vector<2x1x64xf32> to vector<2x64xf32>
    %335 = arith.truncf %334 : vector<2x64xf32> to vector<2x64xbf16>
    %c14_276 = arith.constant 14 : index
    %c0_277 = arith.constant 0 : index
    %c0_278 = arith.constant 0 : index
    %336 = vector.load %arg5[%c14_276, %c0_277, %c0_278] : memref<36x64x512xbf16, #tpu.memory_space<vmem>>, vector<1x64x512xbf16>
    %337 = vector.shape_cast %336 : vector<1x64x512xbf16> to vector<64x512xbf16>
    %cst_279 = arith.constant dense<0.000000e+00> : vector<2x512xf32>
    %338 = tpu.matmul %335, %337, %cst_279 {dimension_numbers = #tpu.dot_dimension_numbers<[1], [0], [0], [1], [0, 0, 1, 1], [], []>} : vector<2x64xbf16>, vector<64x512xbf16>, vector<2x512xf32> -> vector<2x512xf32>
    %339 = arith.addf %332, %338 : vector<2x512xf32>
    %c0_280 = arith.constant 0 : index
    %c15_281 = arith.constant 15 : index
    %c0_282 = arith.constant 0 : index
    %340 = vector.load %arg11[%c0_280, %c15_281, %c0_282] : memref<2x36x64xf32, #tpu.memory_space<vmem>>, vector<2x1x64xf32>
    %341 = vector.shape_cast %340 : vector<2x1x64xf32> to vector<2x64xf32>
    %342 = arith.truncf %341 : vector<2x64xf32> to vector<2x64xbf16>
    %c15_283 = arith.constant 15 : index
    %c0_284 = arith.constant 0 : index
    %c0_285 = arith.constant 0 : index
    %343 = vector.load %arg5[%c15_283, %c0_284, %c0_285] : memref<36x64x512xbf16, #tpu.memory_space<vmem>>, vector<1x64x512xbf16>
    %344 = vector.shape_cast %343 : vector<1x64x512xbf16> to vector<64x512xbf16>
    %cst_286 = arith.constant dense<0.000000e+00> : vector<2x512xf32>
    %345 = tpu.matmul %342, %344, %cst_286 {dimension_numbers = #tpu.dot_dimension_numbers<[1], [0], [0], [1], [0, 0, 1, 1], [], []>} : vector<2x64xbf16>, vector<64x512xbf16>, vector<2x512xf32> -> vector<2x512xf32>
    %346 = arith.addf %339, %345 : vector<2x512xf32>
    %c0_287 = arith.constant 0 : index
    %c16 = arith.constant 16 : index
    %c0_288 = arith.constant 0 : index
    %347 = vector.load %arg11[%c0_287, %c16, %c0_288] : memref<2x36x64xf32, #tpu.memory_space<vmem>>, vector<2x1x64xf32>
    %348 = vector.shape_cast %347 : vector<2x1x64xf32> to vector<2x64xf32>
    %349 = arith.truncf %348 : vector<2x64xf32> to vector<2x64xbf16>
    %c16_289 = arith.constant 16 : index
    %c0_290 = arith.constant 0 : index
    %c0_291 = arith.constant 0 : index
    %350 = vector.load %arg5[%c16_289, %c0_290, %c0_291] : memref<36x64x512xbf16, #tpu.memory_space<vmem>>, vector<1x64x512xbf16>
    %351 = vector.shape_cast %350 : vector<1x64x512xbf16> to vector<64x512xbf16>
    %cst_292 = arith.constant dense<0.000000e+00> : vector<2x512xf32>
    %352 = tpu.matmul %349, %351, %cst_292 {dimension_numbers = #tpu.dot_dimension_numbers<[1], [0], [0], [1], [0, 0, 1, 1], [], []>} : vector<2x64xbf16>, vector<64x512xbf16>, vector<2x512xf32> -> vector<2x512xf32>
    %353 = arith.addf %346, %352 : vector<2x512xf32>
    %c0_293 = arith.constant 0 : index
    %c17 = arith.constant 17 : index
    %c0_294 = arith.constant 0 : index
    %354 = vector.load %arg11[%c0_293, %c17, %c0_294] : memref<2x36x64xf32, #tpu.memory_space<vmem>>, vector<2x1x64xf32>
    %355 = vector.shape_cast %354 : vector<2x1x64xf32> to vector<2x64xf32>
    %356 = arith.truncf %355 : vector<2x64xf32> to vector<2x64xbf16>
    %c17_295 = arith.constant 17 : index
    %c0_296 = arith.constant 0 : index
    %c0_297 = arith.constant 0 : index
    %357 = vector.load %arg5[%c17_295, %c0_296, %c0_297] : memref<36x64x512xbf16, #tpu.memory_space<vmem>>, vector<1x64x512xbf16>
    %358 = vector.shape_cast %357 : vector<1x64x512xbf16> to vector<64x512xbf16>
    %cst_298 = arith.constant dense<0.000000e+00> : vector<2x512xf32>
    %359 = tpu.matmul %356, %358, %cst_298 {dimension_numbers = #tpu.dot_dimension_numbers<[1], [0], [0], [1], [0, 0, 1, 1], [], []>} : vector<2x64xbf16>, vector<64x512xbf16>, vector<2x512xf32> -> vector<2x512xf32>
    %360 = arith.addf %353, %359 : vector<2x512xf32>
    %c0_299 = arith.constant 0 : index
    %c18_300 = arith.constant 18 : index
    %c0_301 = arith.constant 0 : index
    %361 = vector.load %arg11[%c0_299, %c18_300, %c0_301] : memref<2x36x64xf32, #tpu.memory_space<vmem>>, vector<2x1x64xf32>
    %362 = vector.shape_cast %361 : vector<2x1x64xf32> to vector<2x64xf32>
    %363 = arith.truncf %362 : vector<2x64xf32> to vector<2x64xbf16>
    %c18_302 = arith.constant 18 : index
    %c0_303 = arith.constant 0 : index
    %c0_304 = arith.constant 0 : index
    %364 = vector.load %arg5[%c18_302, %c0_303, %c0_304] : memref<36x64x512xbf16, #tpu.memory_space<vmem>>, vector<1x64x512xbf16>
    %365 = vector.shape_cast %364 : vector<1x64x512xbf16> to vector<64x512xbf16>
    %cst_305 = arith.constant dense<0.000000e+00> : vector<2x512xf32>
    %366 = tpu.matmul %363, %365, %cst_305 {dimension_numbers = #tpu.dot_dimension_numbers<[1], [0], [0], [1], [0, 0, 1, 1], [], []>} : vector<2x64xbf16>, vector<64x512xbf16>, vector<2x512xf32> -> vector<2x512xf32>
    %367 = arith.addf %360, %366 : vector<2x512xf32>
    %c0_306 = arith.constant 0 : index
    %c19 = arith.constant 19 : index
    %c0_307 = arith.constant 0 : index
    %368 = vector.load %arg11[%c0_306, %c19, %c0_307] : memref<2x36x64xf32, #tpu.memory_space<vmem>>, vector<2x1x64xf32>
    %369 = vector.shape_cast %368 : vector<2x1x64xf32> to vector<2x64xf32>
    %370 = arith.truncf %369 : vector<2x64xf32> to vector<2x64xbf16>
    %c19_308 = arith.constant 19 : index
    %c0_309 = arith.constant 0 : index
    %c0_310 = arith.constant 0 : index
    %371 = vector.load %arg5[%c19_308, %c0_309, %c0_310] : memref<36x64x512xbf16, #tpu.memory_space<vmem>>, vector<1x64x512xbf16>
    %372 = vector.shape_cast %371 : vector<1x64x512xbf16> to vector<64x512xbf16>
    %cst_311 = arith.constant dense<0.000000e+00> : vector<2x512xf32>
    %373 = tpu.matmul %370, %372, %cst_311 {dimension_numbers = #tpu.dot_dimension_numbers<[1], [0], [0], [1], [0, 0, 1, 1], [], []>} : vector<2x64xbf16>, vector<64x512xbf16>, vector<2x512xf32> -> vector<2x512xf32>
    %374 = arith.addf %367, %373 : vector<2x512xf32>
    %c0_312 = arith.constant 0 : index
    %c20 = arith.constant 20 : index
    %c0_313 = arith.constant 0 : index
    %375 = vector.load %arg11[%c0_312, %c20, %c0_313] : memref<2x36x64xf32, #tpu.memory_space<vmem>>, vector<2x1x64xf32>
    %376 = vector.shape_cast %375 : vector<2x1x64xf32> to vector<2x64xf32>
    %377 = arith.truncf %376 : vector<2x64xf32> to vector<2x64xbf16>
    %c20_314 = arith.constant 20 : index
    %c0_315 = arith.constant 0 : index
    %c0_316 = arith.constant 0 : index
    %378 = vector.load %arg5[%c20_314, %c0_315, %c0_316] : memref<36x64x512xbf16, #tpu.memory_space<vmem>>, vector<1x64x512xbf16>
    %379 = vector.shape_cast %378 : vector<1x64x512xbf16> to vector<64x512xbf16>
    %cst_317 = arith.constant dense<0.000000e+00> : vector<2x512xf32>
    %380 = tpu.matmul %377, %379, %cst_317 {dimension_numbers = #tpu.dot_dimension_numbers<[1], [0], [0], [1], [0, 0, 1, 1], [], []>} : vector<2x64xbf16>, vector<64x512xbf16>, vector<2x512xf32> -> vector<2x512xf32>
    %381 = arith.addf %374, %380 : vector<2x512xf32>
    %c0_318 = arith.constant 0 : index
    %c21_319 = arith.constant 21 : index
    %c0_320 = arith.constant 0 : index
    %382 = vector.load %arg11[%c0_318, %c21_319, %c0_320] : memref<2x36x64xf32, #tpu.memory_space<vmem>>, vector<2x1x64xf32>
    %383 = vector.shape_cast %382 : vector<2x1x64xf32> to vector<2x64xf32>
    %384 = arith.truncf %383 : vector<2x64xf32> to vector<2x64xbf16>
    %c21_321 = arith.constant 21 : index
    %c0_322 = arith.constant 0 : index
    %c0_323 = arith.constant 0 : index
    %385 = vector.load %arg5[%c21_321, %c0_322, %c0_323] : memref<36x64x512xbf16, #tpu.memory_space<vmem>>, vector<1x64x512xbf16>
    %386 = vector.shape_cast %385 : vector<1x64x512xbf16> to vector<64x512xbf16>
    %cst_324 = arith.constant dense<0.000000e+00> : vector<2x512xf32>
    %387 = tpu.matmul %384, %386, %cst_324 {dimension_numbers = #tpu.dot_dimension_numbers<[1], [0], [0], [1], [0, 0, 1, 1], [], []>} : vector<2x64xbf16>, vector<64x512xbf16>, vector<2x512xf32> -> vector<2x512xf32>
    %388 = arith.addf %381, %387 : vector<2x512xf32>
    %c0_325 = arith.constant 0 : index
    %c22_326 = arith.constant 22 : index
    %c0_327 = arith.constant 0 : index
    %389 = vector.load %arg11[%c0_325, %c22_326, %c0_327] : memref<2x36x64xf32, #tpu.memory_space<vmem>>, vector<2x1x64xf32>
    %390 = vector.shape_cast %389 : vector<2x1x64xf32> to vector<2x64xf32>
    %391 = arith.truncf %390 : vector<2x64xf32> to vector<2x64xbf16>
    %c22_328 = arith.constant 22 : index
    %c0_329 = arith.constant 0 : index
    %c0_330 = arith.constant 0 : index
    %392 = vector.load %arg5[%c22_328, %c0_329, %c0_330] : memref<36x64x512xbf16, #tpu.memory_space<vmem>>, vector<1x64x512xbf16>
    %393 = vector.shape_cast %392 : vector<1x64x512xbf16> to vector<64x512xbf16>
    %cst_331 = arith.constant dense<0.000000e+00> : vector<2x512xf32>
    %394 = tpu.matmul %391, %393, %cst_331 {dimension_numbers = #tpu.dot_dimension_numbers<[1], [0], [0], [1], [0, 0, 1, 1], [], []>} : vector<2x64xbf16>, vector<64x512xbf16>, vector<2x512xf32> -> vector<2x512xf32>
    %395 = arith.addf %388, %394 : vector<2x512xf32>
    %c0_332 = arith.constant 0 : index
    %c23 = arith.constant 23 : index
    %c0_333 = arith.constant 0 : index
    %396 = vector.load %arg11[%c0_332, %c23, %c0_333] : memref<2x36x64xf32, #tpu.memory_space<vmem>>, vector<2x1x64xf32>
    %397 = vector.shape_cast %396 : vector<2x1x64xf32> to vector<2x64xf32>
    %398 = arith.truncf %397 : vector<2x64xf32> to vector<2x64xbf16>
    %c23_334 = arith.constant 23 : index
    %c0_335 = arith.constant 0 : index
    %c0_336 = arith.constant 0 : index
    %399 = vector.load %arg5[%c23_334, %c0_335, %c0_336] : memref<36x64x512xbf16, #tpu.memory_space<vmem>>, vector<1x64x512xbf16>
    %400 = vector.shape_cast %399 : vector<1x64x512xbf16> to vector<64x512xbf16>
    %cst_337 = arith.constant dense<0.000000e+00> : vector<2x512xf32>
    %401 = tpu.matmul %398, %400, %cst_337 {dimension_numbers = #tpu.dot_dimension_numbers<[1], [0], [0], [1], [0, 0, 1, 1], [], []>} : vector<2x64xbf16>, vector<64x512xbf16>, vector<2x512xf32> -> vector<2x512xf32>
    %402 = arith.addf %395, %401 : vector<2x512xf32>
    %c0_338 = arith.constant 0 : index
    %c24_339 = arith.constant 24 : index
    %c0_340 = arith.constant 0 : index
    %403 = vector.load %arg11[%c0_338, %c24_339, %c0_340] : memref<2x36x64xf32, #tpu.memory_space<vmem>>, vector<2x1x64xf32>
    %404 = vector.shape_cast %403 : vector<2x1x64xf32> to vector<2x64xf32>
    %405 = arith.truncf %404 : vector<2x64xf32> to vector<2x64xbf16>
    %c24_341 = arith.constant 24 : index
    %c0_342 = arith.constant 0 : index
    %c0_343 = arith.constant 0 : index
    %406 = vector.load %arg5[%c24_341, %c0_342, %c0_343] : memref<36x64x512xbf16, #tpu.memory_space<vmem>>, vector<1x64x512xbf16>
    %407 = vector.shape_cast %406 : vector<1x64x512xbf16> to vector<64x512xbf16>
    %cst_344 = arith.constant dense<0.000000e+00> : vector<2x512xf32>
    %408 = tpu.matmul %405, %407, %cst_344 {dimension_numbers = #tpu.dot_dimension_numbers<[1], [0], [0], [1], [0, 0, 1, 1], [], []>} : vector<2x64xbf16>, vector<64x512xbf16>, vector<2x512xf32> -> vector<2x512xf32>
    %409 = arith.addf %402, %408 : vector<2x512xf32>
    %c0_345 = arith.constant 0 : index
    %c25 = arith.constant 25 : index
    %c0_346 = arith.constant 0 : index
    %410 = vector.load %arg11[%c0_345, %c25, %c0_346] : memref<2x36x64xf32, #tpu.memory_space<vmem>>, vector<2x1x64xf32>
    %411 = vector.shape_cast %410 : vector<2x1x64xf32> to vector<2x64xf32>
    %412 = arith.truncf %411 : vector<2x64xf32> to vector<2x64xbf16>
    %c25_347 = arith.constant 25 : index
    %c0_348 = arith.constant 0 : index
    %c0_349 = arith.constant 0 : index
    %413 = vector.load %arg5[%c25_347, %c0_348, %c0_349] : memref<36x64x512xbf16, #tpu.memory_space<vmem>>, vector<1x64x512xbf16>
    %414 = vector.shape_cast %413 : vector<1x64x512xbf16> to vector<64x512xbf16>
    %cst_350 = arith.constant dense<0.000000e+00> : vector<2x512xf32>
    %415 = tpu.matmul %412, %414, %cst_350 {dimension_numbers = #tpu.dot_dimension_numbers<[1], [0], [0], [1], [0, 0, 1, 1], [], []>} : vector<2x64xbf16>, vector<64x512xbf16>, vector<2x512xf32> -> vector<2x512xf32>
    %416 = arith.addf %409, %415 : vector<2x512xf32>
    %c0_351 = arith.constant 0 : index
    %c26 = arith.constant 26 : index
    %c0_352 = arith.constant 0 : index
    %417 = vector.load %arg11[%c0_351, %c26, %c0_352] : memref<2x36x64xf32, #tpu.memory_space<vmem>>, vector<2x1x64xf32>
    %418 = vector.shape_cast %417 : vector<2x1x64xf32> to vector<2x64xf32>
    %419 = arith.truncf %418 : vector<2x64xf32> to vector<2x64xbf16>
    %c26_353 = arith.constant 26 : index
    %c0_354 = arith.constant 0 : index
    %c0_355 = arith.constant 0 : index
    %420 = vector.load %arg5[%c26_353, %c0_354, %c0_355] : memref<36x64x512xbf16, #tpu.memory_space<vmem>>, vector<1x64x512xbf16>
    %421 = vector.shape_cast %420 : vector<1x64x512xbf16> to vector<64x512xbf16>
    %cst_356 = arith.constant dense<0.000000e+00> : vector<2x512xf32>
    %422 = tpu.matmul %419, %421, %cst_356 {dimension_numbers = #tpu.dot_dimension_numbers<[1], [0], [0], [1], [0, 0, 1, 1], [], []>} : vector<2x64xbf16>, vector<64x512xbf16>, vector<2x512xf32> -> vector<2x512xf32>
    %423 = arith.addf %416, %422 : vector<2x512xf32>
    %c0_357 = arith.constant 0 : index
    %c27 = arith.constant 27 : index
    %c0_358 = arith.constant 0 : index
    %424 = vector.load %arg11[%c0_357, %c27, %c0_358] : memref<2x36x64xf32, #tpu.memory_space<vmem>>, vector<2x1x64xf32>
    %425 = vector.shape_cast %424 : vector<2x1x64xf32> to vector<2x64xf32>
    %426 = arith.truncf %425 : vector<2x64xf32> to vector<2x64xbf16>
    %c27_359 = arith.constant 27 : index
    %c0_360 = arith.constant 0 : index
    %c0_361 = arith.constant 0 : index
    %427 = vector.load %arg5[%c27_359, %c0_360, %c0_361] : memref<36x64x512xbf16, #tpu.memory_space<vmem>>, vector<1x64x512xbf16>
    %428 = vector.shape_cast %427 : vector<1x64x512xbf16> to vector<64x512xbf16>
    %cst_362 = arith.constant dense<0.000000e+00> : vector<2x512xf32>
    %429 = tpu.matmul %426, %428, %cst_362 {dimension_numbers = #tpu.dot_dimension_numbers<[1], [0], [0], [1], [0, 0, 1, 1], [], []>} : vector<2x64xbf16>, vector<64x512xbf16>, vector<2x512xf32> -> vector<2x512xf32>
    %430 = arith.addf %423, %429 : vector<2x512xf32>
    %c0_363 = arith.constant 0 : index
    %c28_364 = arith.constant 28 : index
    %c0_365 = arith.constant 0 : index
    %431 = vector.load %arg11[%c0_363, %c28_364, %c0_365] : memref<2x36x64xf32, #tpu.memory_space<vmem>>, vector<2x1x64xf32>
    %432 = vector.shape_cast %431 : vector<2x1x64xf32> to vector<2x64xf32>
    %433 = arith.truncf %432 : vector<2x64xf32> to vector<2x64xbf16>
    %c28_366 = arith.constant 28 : index
    %c0_367 = arith.constant 0 : index
    %c0_368 = arith.constant 0 : index
    %434 = vector.load %arg5[%c28_366, %c0_367, %c0_368] : memref<36x64x512xbf16, #tpu.memory_space<vmem>>, vector<1x64x512xbf16>
    %435 = vector.shape_cast %434 : vector<1x64x512xbf16> to vector<64x512xbf16>
    %cst_369 = arith.constant dense<0.000000e+00> : vector<2x512xf32>
    %436 = tpu.matmul %433, %435, %cst_369 {dimension_numbers = #tpu.dot_dimension_numbers<[1], [0], [0], [1], [0, 0, 1, 1], [], []>} : vector<2x64xbf16>, vector<64x512xbf16>, vector<2x512xf32> -> vector<2x512xf32>
    %437 = arith.addf %430, %436 : vector<2x512xf32>
    %c0_370 = arith.constant 0 : index
    %c29_371 = arith.constant 29 : index
    %c0_372 = arith.constant 0 : index
    %438 = vector.load %arg11[%c0_370, %c29_371, %c0_372] : memref<2x36x64xf32, #tpu.memory_space<vmem>>, vector<2x1x64xf32>
    %439 = vector.shape_cast %438 : vector<2x1x64xf32> to vector<2x64xf32>
    %440 = arith.truncf %439 : vector<2x64xf32> to vector<2x64xbf16>
    %c29_373 = arith.constant 29 : index
    %c0_374 = arith.constant 0 : index
    %c0_375 = arith.constant 0 : index
    %441 = vector.load %arg5[%c29_373, %c0_374, %c0_375] : memref<36x64x512xbf16, #tpu.memory_space<vmem>>, vector<1x64x512xbf16>
    %442 = vector.shape_cast %441 : vector<1x64x512xbf16> to vector<64x512xbf16>
    %cst_376 = arith.constant dense<0.000000e+00> : vector<2x512xf32>
    %443 = tpu.matmul %440, %442, %cst_376 {dimension_numbers = #tpu.dot_dimension_numbers<[1], [0], [0], [1], [0, 0, 1, 1], [], []>} : vector<2x64xbf16>, vector<64x512xbf16>, vector<2x512xf32> -> vector<2x512xf32>
    %444 = arith.addf %437, %443 : vector<2x512xf32>
    %c0_377 = arith.constant 0 : index
    %c30_378 = arith.constant 30 : index
    %c0_379 = arith.constant 0 : index
    %445 = vector.load %arg11[%c0_377, %c30_378, %c0_379] : memref<2x36x64xf32, #tpu.memory_space<vmem>>, vector<2x1x64xf32>
    %446 = vector.shape_cast %445 : vector<2x1x64xf32> to vector<2x64xf32>
    %447 = arith.truncf %446 : vector<2x64xf32> to vector<2x64xbf16>
    %c30_380 = arith.constant 30 : index
    %c0_381 = arith.constant 0 : index
    %c0_382 = arith.constant 0 : index
    %448 = vector.load %arg5[%c30_380, %c0_381, %c0_382] : memref<36x64x512xbf16, #tpu.memory_space<vmem>>, vector<1x64x512xbf16>
    %449 = vector.shape_cast %448 : vector<1x64x512xbf16> to vector<64x512xbf16>
    %cst_383 = arith.constant dense<0.000000e+00> : vector<2x512xf32>
    %450 = tpu.matmul %447, %449, %cst_383 {dimension_numbers = #tpu.dot_dimension_numbers<[1], [0], [0], [1], [0, 0, 1, 1], [], []>} : vector<2x64xbf16>, vector<64x512xbf16>, vector<2x512xf32> -> vector<2x512xf32>
    %451 = arith.addf %444, %450 : vector<2x512xf32>
    %c0_384 = arith.constant 0 : index
    %c31 = arith.constant 31 : index
    %c0_385 = arith.constant 0 : index
    %452 = vector.load %arg11[%c0_384, %c31, %c0_385] : memref<2x36x64xf32, #tpu.memory_space<vmem>>, vector<2x1x64xf32>
    %453 = vector.shape_cast %452 : vector<2x1x64xf32> to vector<2x64xf32>
    %454 = arith.truncf %453 : vector<2x64xf32> to vector<2x64xbf16>
    %c31_386 = arith.constant 31 : index
    %c0_387 = arith.constant 0 : index
    %c0_388 = arith.constant 0 : index
    %455 = vector.load %arg5[%c31_386, %c0_387, %c0_388] : memref<36x64x512xbf16, #tpu.memory_space<vmem>>, vector<1x64x512xbf16>
    %456 = vector.shape_cast %455 : vector<1x64x512xbf16> to vector<64x512xbf16>
    %cst_389 = arith.constant dense<0.000000e+00> : vector<2x512xf32>
    %457 = tpu.matmul %454, %456, %cst_389 {dimension_numbers = #tpu.dot_dimension_numbers<[1], [0], [0], [1], [0, 0, 1, 1], [], []>} : vector<2x64xbf16>, vector<64x512xbf16>, vector<2x512xf32> -> vector<2x512xf32>
    %458 = arith.addf %451, %457 : vector<2x512xf32>
    %c0_390 = arith.constant 0 : index
    %c32 = arith.constant 32 : index
    %c0_391 = arith.constant 0 : index
    %459 = vector.load %arg11[%c0_390, %c32, %c0_391] : memref<2x36x64xf32, #tpu.memory_space<vmem>>, vector<2x1x64xf32>
    %460 = vector.shape_cast %459 : vector<2x1x64xf32> to vector<2x64xf32>
    %461 = arith.truncf %460 : vector<2x64xf32> to vector<2x64xbf16>
    %c32_392 = arith.constant 32 : index
    %c0_393 = arith.constant 0 : index
    %c0_394 = arith.constant 0 : index
    %462 = vector.load %arg5[%c32_392, %c0_393, %c0_394] : memref<36x64x512xbf16, #tpu.memory_space<vmem>>, vector<1x64x512xbf16>
    %463 = vector.shape_cast %462 : vector<1x64x512xbf16> to vector<64x512xbf16>
    %cst_395 = arith.constant dense<0.000000e+00> : vector<2x512xf32>
    %464 = tpu.matmul %461, %463, %cst_395 {dimension_numbers = #tpu.dot_dimension_numbers<[1], [0], [0], [1], [0, 0, 1, 1], [], []>} : vector<2x64xbf16>, vector<64x512xbf16>, vector<2x512xf32> -> vector<2x512xf32>
    %465 = arith.addf %458, %464 : vector<2x512xf32>
    %c0_396 = arith.constant 0 : index
    %c33 = arith.constant 33 : index
    %c0_397 = arith.constant 0 : index
    %466 = vector.load %arg11[%c0_396, %c33, %c0_397] : memref<2x36x64xf32, #tpu.memory_space<vmem>>, vector<2x1x64xf32>
    %467 = vector.shape_cast %466 : vector<2x1x64xf32> to vector<2x64xf32>
    %468 = arith.truncf %467 : vector<2x64xf32> to vector<2x64xbf16>
    %c33_398 = arith.constant 33 : index
    %c0_399 = arith.constant 0 : index
    %c0_400 = arith.constant 0 : index
    %469 = vector.load %arg5[%c33_398, %c0_399, %c0_400] : memref<36x64x512xbf16, #tpu.memory_space<vmem>>, vector<1x64x512xbf16>
    %470 = vector.shape_cast %469 : vector<1x64x512xbf16> to vector<64x512xbf16>
    %cst_401 = arith.constant dense<0.000000e+00> : vector<2x512xf32>
    %471 = tpu.matmul %468, %470, %cst_401 {dimension_numbers = #tpu.dot_dimension_numbers<[1], [0], [0], [1], [0, 0, 1, 1], [], []>} : vector<2x64xbf16>, vector<64x512xbf16>, vector<2x512xf32> -> vector<2x512xf32>
    %472 = arith.addf %465, %471 : vector<2x512xf32>
    %c0_402 = arith.constant 0 : index
    %c34 = arith.constant 34 : index
    %c0_403 = arith.constant 0 : index
    %473 = vector.load %arg11[%c0_402, %c34, %c0_403] : memref<2x36x64xf32, #tpu.memory_space<vmem>>, vector<2x1x64xf32>
    %474 = vector.shape_cast %473 : vector<2x1x64xf32> to vector<2x64xf32>
    %475 = arith.truncf %474 : vector<2x64xf32> to vector<2x64xbf16>
    %c34_404 = arith.constant 34 : index
    %c0_405 = arith.constant 0 : index
    %c0_406 = arith.constant 0 : index
    %476 = vector.load %arg5[%c34_404, %c0_405, %c0_406] : memref<36x64x512xbf16, #tpu.memory_space<vmem>>, vector<1x64x512xbf16>
    %477 = vector.shape_cast %476 : vector<1x64x512xbf16> to vector<64x512xbf16>
    %cst_407 = arith.constant dense<0.000000e+00> : vector<2x512xf32>
    %478 = tpu.matmul %475, %477, %cst_407 {dimension_numbers = #tpu.dot_dimension_numbers<[1], [0], [0], [1], [0, 0, 1, 1], [], []>} : vector<2x64xbf16>, vector<64x512xbf16>, vector<2x512xf32> -> vector<2x512xf32>
    %479 = arith.addf %472, %478 : vector<2x512xf32>
    %c0_408 = arith.constant 0 : index
    %c35_409 = arith.constant 35 : index
    %c0_410 = arith.constant 0 : index
    %480 = vector.load %arg11[%c0_408, %c35_409, %c0_410] : memref<2x36x64xf32, #tpu.memory_space<vmem>>, vector<2x1x64xf32>
    %481 = vector.shape_cast %480 : vector<2x1x64xf32> to vector<2x64xf32>
    %482 = arith.truncf %481 : vector<2x64xf32> to vector<2x64xbf16>
    %c35_411 = arith.constant 35 : index
    %c0_412 = arith.constant 0 : index
    %c0_413 = arith.constant 0 : index
    %483 = vector.load %arg5[%c35_411, %c0_412, %c0_413] : memref<36x64x512xbf16, #tpu.memory_space<vmem>>, vector<1x64x512xbf16>
    %484 = vector.shape_cast %483 : vector<1x64x512xbf16> to vector<64x512xbf16>
    %cst_414 = arith.constant dense<0.000000e+00> : vector<2x512xf32>
    %485 = tpu.matmul %482, %484, %cst_414 {dimension_numbers = #tpu.dot_dimension_numbers<[1], [0], [0], [1], [0, 0, 1, 1], [], []>} : vector<2x64xbf16>, vector<64x512xbf16>, vector<2x512xf32> -> vector<2x512xf32>
    %486 = arith.addf %479, %485 : vector<2x512xf32>
    %c0_415 = arith.constant 0 : index
    %c0_416 = arith.constant 0 : index
    %487 = vector.load %arg6[%c0_415, %c0_416] : memref<1x512xf32, #tpu.memory_space<vmem>>, vector<1x512xf32>
    %488 = vector.broadcast %487 : vector<1x512xf32> to vector<2x512xf32>
    %489 = arith.addf %486, %488 : vector<2x512xf32>
    %cst_417 = arith.constant 0.000000e+00 : f32
    %490 = vector.broadcast %cst_417 : f32 to vector<2x512xf32>
    %491 = arith.maximumf %489, %490 : vector<2x512xf32>
    %492 = arith.truncf %491 : vector<2x512xf32> to vector<2x512xbf16>
    %c0_418 = arith.constant 0 : index
    %c0_419 = arith.constant 0 : index
    %493 = vector.load %arg7[%c0_418, %c0_419] : memref<512x6xbf16, #tpu.memory_space<vmem>>, vector<512x6xbf16>
    %cst_420 = arith.constant dense<0.000000e+00> : vector<2x6xf32>
    %494 = tpu.matmul %492, %493, %cst_420 {dimension_numbers = #tpu.dot_dimension_numbers<[1], [0], [0], [1], [0, 0, 1, 1], [], []>} : vector<2x512xbf16>, vector<512x6xbf16>, vector<2x6xf32> -> vector<2x6xf32>
    %c0_421 = arith.constant 0 : index
    %c0_422 = arith.constant 0 : index
    %495 = vector.load %arg8[%c0_421, %c0_422] : memref<1x6xf32, #tpu.memory_space<vmem>>, vector<1x6xf32>
    %496 = vector.broadcast %495 : vector<1x6xf32> to vector<2x6xf32>
    %497 = arith.addf %494, %496 : vector<2x6xf32>
    %c0_423 = arith.constant 0 : index
    %c0_424 = arith.constant 0 : index
    %498 = vector.load %arg9[%c0_423, %c0_424] : memref<2x6xf32, #tpu.memory_space<vmem>>, vector<2x6xf32>
    tpu.vector_store %arg9[%c0_423, %c0_424], %497 {strides = array<i32>} : memref<2x6xf32, #tpu.memory_space<vmem>>, vector<2x6xf32>,
    return
  }
}

</mosaic_0001>

<bundles_post_ra>
// kernel: conv_dqn_forward.1
= control target key start
LH: loop header
LB: loop body
LE: loop exit
PB: predicated region body
PF: predicated region fallthrough
CT: control target
= control target key end

     0   :  { %14 = vsyncpa [#allocation5], 0  ;;  %s15434_s0 = inlined_call_operand.vmem [shape: f32[98,54], index: 0, kind: input, shape index: {}]   ;;  %s15435_s1 = inlined_call_operand.vmem [shape: f32[54,32], index: 1, kind: input, shape index: {}]   ;;  %s15436_s2 = inlined_call_operand.hbm [shape: f32[1,32], index: 2, kind: input, shape index: {}]   ;;  %s15437_s3 = inlined_call_operand.vmem [shape: f32[4,32,64], index: 3, kind: input, shape index: {}]   ;;  %s15438_s4 = inlined_call_operand.hbm [shape: f32[1,64], index: 4, kind: input, shape index: {}]   ;;  %s15439_s5 = inlined_call_operand.hbm [shape: bf16[36,64,512], index: 5, kind: input, shape index: {}]   ;;  %s15440_s6 = inlined_call_operand.hbm [shape: f32[1,512], index: 6, kind: input, shape index: {}]   ;;  %s15441_s7 = inlined_call_operand.vmem [shape: bf16[512,6], index: 7, kind: input, shape index: {}]   ;;  %s15442_s8 = inlined_call_operand.hbm [shape: f32[1,6], index: 8, kind: input, shape index: {}]   ;;  %s15443_s9 = inlined_call_operand.hbm [shape: f32[2,6], index: 9, kind: output, shape index: {}]  }
   0x1   :  { %15 = vsyncpa [#allocation8], 0 }
   0x2   :  { %16 = vsyncpa [#allocation11], 0 }
   0x3   :  { %17 = vsyncpa [#allocation6], 0  ;;  %s14431_s30 = smov [#allocation7]   ;;  %s14432_s11 = smov [#allocation10]  }
   0x4   :  { %s40_s10 = sshll.u32 %s14431_s30, 4  ;;  %s62_s12 = sshll.u32 %s14432_s11, 4  ;;  %s41_s10 = int_to_ptr.vmem [resolvable:$true] %s40_s10  ;;  %s63_s12 = int_to_ptr.vmem [resolvable:$true] %s62_s12 }
   0x5   :  { %s14291_s15 = scalar_lea.hbm %s15438_s4, 16 }
   0x6   :  { %p14292_p0 = scmp.ne.s32.totalorder %s15438_s4, %s14291_s15  ;;  %p14295_p1 = scmp.lt.u32.totalorder %s14291_s15, %s15438_s4 }
   0x8   :  { %p14297_p2 = pnand %p14295_p1, %p14292_p0 }
   0xa   :  { %14300 = shalt.err (!%p14297_p2)
}
   0xb   :  { %s14301_s20 = scalar_lea.vmem %s41_s10, 16  ;;  %s14305_s21 = scalar_lea.vmem %s41_s10, 32 }
   0xc   :  { %p14302_p3 = scmp.ne.s32.totalorder %s41_s10, %s14301_s20  ;;  %p14306_p4 = scmp.lt.s32.totalorder %s41_s10, %s41_s10 }
   0xd   :  { %p14307_p5 = scmp.lt.s32.totalorder %s14305_s21, %s14301_s20 }
   0xf   :  { %p14308_p6 = por %p14307_p5, %p14306_p4 }
  0x11   :  { %p14309_p7 = pnand %p14308_p6, %p14302_p3 }
  0x13   :  { %14312 = shalt.err (!%p14309_p7)
}
  0x14   :  { %43 = dma.hbm_to_vmem [thread:$0]  %s15438_s4, 16, %s41_s10, [#allocation8]  }
  0x15   :  { %s14313_s26 = scalar_lea.hbm %s15440_s6, 64 }
  0x16   :  { %p14314_p8 = scmp.ne.s32.totalorder %s15440_s6, %s14313_s26  ;;  %p14317_p9 = scmp.lt.u32.totalorder %s14313_s26, %s15440_s6 }
  0x18   :  { %p14319_p10 = pnand %p14317_p9, %p14314_p8 }
  0x1a   :  { %14322 = shalt.err (!%p14319_p10)
}
  0x1b   :  { %s14323_s11 = scalar_lea.vmem %s63_s12, 64  ;;  %p14328_p12 = scmp.lt.s32.totalorder %s63_s12, %s63_s12 }
  0x1c   :  { %p14324_p11 = scmp.ne.s32.totalorder %s63_s12, %s14323_s11  ;;  %p14329_p13 = scmp.lt.s32.totalorder %s14323_s11, %s14323_s11 }
  0x1e   :  { %p14330_p0 = por %p14329_p13, %p14328_p12 }
  0x20   :  { %p14331_p1 = pnand %p14330_p0, %p14324_p11 }
  0x22   :  { %14334 = shalt.err (!%p14331_p1)
}
  0x23   :  { %65 = dma.hbm_to_vmem [thread:$0]  %s15440_s6, 64, %s63_s12, [#allocation11]  }
  0x24   :  { %s14433_s13 = smov [#allocation4]   ;;  %s14434_s15 = smov [#allocation9]  }
  0x25   :  { %s28_s14 = sshll.u32 %s14433_s13, 4  ;;  %s49_s16 = sshll.u32 %s14434_s15, 4  ;;  %s29_s14 = int_to_ptr.vmem [resolvable:$true] %s28_s14  ;;  %s14517_s16 = int_to_ptr.vmem [resolvable:$true] %s49_s16 }
  0x26   :  { %s14335_s19 = scalar_lea.hbm %s15436_s2, 16 }
  0x27   :  { %p14336_p2 = scmp.ne.s32.totalorder %s15436_s2, %s14335_s19  ;;  %p14339_p3 = scmp.lt.u32.totalorder %s14335_s19, %s15436_s2 }
  0x29   :  { %p14341_p4 = pnand %p14339_p3, %p14336_p2 }
  0x2b   :  { %14344 = shalt.err (!%p14341_p4)
}
  0x2c   :  { %s14345_s6 = scalar_lea.vmem %s29_s14, 16  ;;  %s14349_s12 = scalar_lea.vmem %s29_s14, 32 }
  0x2d   :  { %p14346_p5 = scmp.ne.s32.totalorder %s29_s14, %s14345_s6  ;;  %p14350_p6 = scmp.lt.s32.totalorder %s29_s14, %s29_s14 }
  0x2e   :  { %p14351_p7 = scmp.lt.s32.totalorder %s14349_s12, %s14345_s6 }
  0x30   :  { %p14352_p8 = por %p14351_p7, %p14350_p6 }
  0x32   :  { %p14353_p9 = pnand %p14352_p8, %p14346_p5 }
  0x34   :  { %14356 = shalt.err (!%p14353_p9)
}
  0x35   :  { %31 = dma.hbm_to_vmem [thread:$0]  %s15436_s2, 16, %s29_s14, [#allocation5]  }
  0x36   :  { %s14357_s28 = scalar_lea.hbm %s15439_s5, 73728 }
  0x37   :  { %p14358_p10 = scmp.ne.s32.totalorder %s15439_s5, %s14357_s28  ;;  %p14361_p11 = scmp.lt.u32.totalorder %s14357_s28, %s15439_s5 }
  0x39   :  { %p14363_p12 = pnand %p14361_p11, %p14358_p10 }
  0x3b   :  { %14366 = shalt.err (!%p14363_p12)
}
  0x3c   :  { %s14367_s10 = scalar_lea.vmem %s14517_s16, 73728  ;;  %p14372_p0 = scmp.lt.s32.totalorder %s14517_s16, %s14517_s16 }
  0x3d   :  { %p14368_p13 = scmp.ne.s32.totalorder %s14517_s16, %s14367_s10  ;;  %p14373_p1 = scmp.lt.s32.totalorder %s14367_s10, %s14367_s10 }
  0x3f   :  { %p14374_p2 = por %p14373_p1, %p14372_p0 }
  0x41   :  { %p14375_p3 = pnand %p14374_p2, %p14368_p13 }
  0x43   :  { %14378 = shalt.err (!%p14375_p3)
}
  0x44   :  { %s14435_s2 = smov 256   ;;  %s14436_s13 = smov 16  }
  0x45   :  { %55 = dma.hbm_to_vmem [thread:$0]  %s15439_s5, 73728, %s14517_s16, [#allocation8], %s14435_s2, %s14435_s2, %s14436_s13  }
  0x46   :  { %s14437_s17 = smov [#allocation12]   ;;  %s14379_s21 = scalar_lea.hbm %s15442_s8, 16 }
  0x47   :  { %s74_s18 = sshll.u32 %s14437_s17, 4  ;;  %p14380_p4 = scmp.ne.s32.totalorder %s15442_s8, %s14379_s21  ;;  %s75_s18 = int_to_ptr.vmem [resolvable:$true] %s74_s18 }
  0x48   :  { %p14383_p5 = scmp.lt.u32.totalorder %s14379_s21, %s15442_s8 }
  0x4a   :  { %p14385_p6 = pnand %p14383_p5, %p14380_p4 }
  0x4c   :  { %14388 = shalt.err (!%p14385_p6)
}
  0x4d   :  { %s14389_s24 = scalar_lea.vmem %s75_s18, 16  ;;  %s14393_s5 = scalar_lea.vmem %s75_s18, 32 }
  0x4e   :  { %p14390_p7 = scmp.ne.s32.totalorder %s75_s18, %s14389_s24  ;;  %p14394_p8 = scmp.lt.s32.totalorder %s75_s18, %s75_s18 }
  0x4f   :  { %p14395_p9 = scmp.lt.s32.totalorder %s14393_s5, %s14389_s24 }
  0x51   :  { %p14396_p10 = por %p14395_p9, %p14394_p8 }
  0x53   :  { %p14397_p11 = pnand %p14396_p10, %p14390_p7 }
  0x55   :  { %14400 = shalt.err (!%p14397_p11)
}
  0x56   :  { %77 = dma.hbm_to_vmem [thread:$0]  %s15442_s8, 16, %s75_s18, [#allocation11]  }
  0x57   :  { %14423 = dma.done.wait [#allocation5], 16  }
  0x58   :  { %14424 = vsyncadd [#allocation5], 4294967280 }
  0x59   :  { %14425 = dma.done.wait [#allocation8], 73744  }
  0x5a   :  { %14426 = vsyncadd [#allocation8], 4294893552 }
  0x5b   :  { %14427 = dma.done.wait [#allocation11], 80  }
  0x5c   :  { %14428 = vsyncadd [#allocation11], 4294967216  ;;  %v14438_v0 = vmov 0.0|0.0   ;;  %vm14439_vm0 = vmmov 0   ;;  %v14440_v1 = vmov 0.0   ;;  %v107_v2 = vld [vmem:[%s15435_s1] sm:$0xff] }
  0x5d   :  { %13086 = vmatprep.subr.bf16.mxu0 %v14438_v0  ;;  %12519 = vmatprep.mubr.msk.f32.mxu0 %vm14439_vm0, %v14440_v1  ;;  %v108_v3 = vld [vmem:[%s15435_s1 + $0x8] sm:$0xff]  ;;  %v109_v4 = vld [vmem:[%s15435_s1 + $0x10] sm:$0xff]  ;;  %v110_v6 = vld [vmem:[%s15435_s1 + $0x18] sm:$0xff]  ;;  %vm161_vm1 = vcmask 1045504   ;;  %vm121_vm2 = vcmask 441344   ;;  %vm308_vm3 = vcmask 261120  }
  0x5e   :  { %13095 = vmatprep.subr.bf16.mxu1 %v14438_v0  ;;  %12566 = vmatprep.mubr.msk.f32.mxu1 %vm14439_vm0, %v14440_v1  ;;  %v13087_v5 = vpack.c.bf16 %v108_v3, %v107_v2  ;;  %v13090_v7 = vpack.c.bf16 %v110_v6, %v109_v4  ;;  %v111_v8 = vld [vmem:[%s15435_s1 + $0x20] sm:$0xff]  ;;  %v112_v9 = vld [vmem:[%s15435_s1 + $0x28] sm:$0xff]  ;;  %v113_v11 = vld [vmem:[%s15435_s1 + $0x30] sm:$0x3f]  ;;  %vm321_vm4 = vcmask 254976   ;;  %vm649_vm5 = vcmask 521216  }
  0x5f   :  { %v13093_v10 = vpack.c.bf16 %v112_v9, %v111_v8  ;;  %v94_v12 = vld [vmem:[%s15434_s0] sm:$0xff]  ;;  %v95_v13 = vld [vmem:[%s15434_s0 + $0x8] sm:$0xff]  ;;  %v96_v14 = vld [vmem:[%s15434_s0 + $0x10] sm:$0xff]  ;;  %vm4009_vm6 = vcmask 1041409   ;;  %vm4092_vm7 = vcmask 523264   ;;  %vm11425_vm8 = vcmask 41984  }
  0x60   :  { %13088 = vmatpush3.bf16.msra.mxu0 %v13087_v5  ;;  %v97_v15 = vld [vmem:[%s15434_s0 + $0x18] sm:$0xff]  ;;  %v98_v16 = vld [vmem:[%s15434_s0 + $0x20] sm:$0xff]  ;;  %v99_v17 = vld [vmem:[%s15434_s0 + $0x28] sm:$0xff] }
  0x61   :  { %13089 = vmatprep.subr.bf16.mxu0 %v14438_v0  ;;  %v100_v18 = vld [vmem:[%s15434_s0 + $0x30] sm:$0xff]  ;;  %v101_v19 = vld [vmem:[%s15434_s0 + $0x38] sm:$0xff]  ;;  %v102_v20 = vld [vmem:[%s15434_s0 + $0x40] sm:$0xff] }
  0x62   :  { %v103_v21 = vld [vmem:[%s15434_s0 + $0x48] sm:$0xff]  ;;  %v104_v22 = vld [vmem:[%s15434_s0 + $0x50] sm:$0xff]  ;;  %v105_v23 = vld [vmem:[%s15434_s0 + $0x58] sm:$0xff] }
  0x63   :  { %v106_v24 = vld [vmem:[%s15434_s0 + $0x60] sm:$0x3]  ;;  %v11460_v26 = vld [vmem:[%s15437_s3 + $0x28] sm:$0xff]  ;;  %v11461_v28 = vld [vmem:[%s15437_s3 + $0x30] sm:$0xff] }
  0x64   :  { %13091 = vmatpush3.bf16.msra.mxu0 %v13090_v7  ;;  %v11459_v25 = vld [vmem:[%s15437_s3 + $0x20] sm:$0xff]  ;;  %v11462_v29 = vld [vmem:[%s15437_s3 + $0x38] sm:$0xff]  ;;  %v325_v41 = vld [vmem:[%s15437_s3 + $0x8] sm:$0xff] }
  0x65   :  { %13092 = vmatprep.subr.bf16.mxu0 %v14438_v0  ;;  %v14673_v27 = vpack.c.bf16 %v11460_v26, %v11459_v25  ;;  %v14687_v30 = vpack.c.bf16 %v11462_v29, %v11461_v28  ;;  %v14693_v31 = vld [vmem:[#allocation4] ss:$0 sm:$0xff]  ;;  %v324_v40 = vld [vmem:[%s15437_s3] sm:$0xff]  ;;  %v326_v47 = vld [vmem:[%s15437_s3 + $0x10] sm:$0xff] }
  0x66   :  { %v14706_v45 = vpack.c.bf16 %v325_v41, %v324_v40  ;;  %v327_v48 = vld [vmem:[%s15437_s3 + $0x18] sm:$0xff]  ;;  %v11463_v54 = vld [vmem:[%s15437_s3 + $0x40] sm:$0xff]  ;;  %v11464_v55 = vld [vmem:[%s15437_s3 + $0x48] sm:$0xff] }
  0x67   :  { %13097 = vmatpush3.bf16.msra.mxu1 %v14673_v27  ;;  %v14718_v53 = vpack.c.bf16 %v327_v48, %v326_v47  ;;  %v14731_v58 = vpack.c.bf16 %v11464_v55, %v11463_v54  ;;  %v11465_v61 = vld [vmem:[%s15437_s3 + $0x50] sm:$0xff]  ;;  %v11466_v62 = vld [vmem:[%s15437_s3 + $0x58] sm:$0xff]  ;;  %v11467_v8 = vld [vmem:[%s15437_s3 + $0x60] sm:$0xff] }
  0x68   :  { %13094 = vmatpush3.bf16.msra.mxu0 %v13093_v10  ;;  %13098 = vmatprep.subr.bf16.mxu1 %v14438_v0  ;;  %v14745_v7 = vpack.c.bf16 %v11466_v62, %v11465_v61  ;;  %v11468_v9 = vld [vmem:[%s15437_s3 + $0x68] sm:$0xff] }
  0x69   :  { %12517 = vmatprep.subr.mxu0 %v14440_v1 }
  0x6b   :  { %13100 = vmatpush3.bf16.msra.mxu1 %v14687_v30 }
  0x6c   :  { %12518 = vmatpush3.msk.msra.mxu0 %vm161_vm1, %v113_v11  ;;  %13101 = vmatprep.subr.bf16.mxu1 %v14438_v0 }
  0x6d   :  { %12520 = vmatmul.mubr.msk.f32.vlgmr.msra.gmra.mrb[0].mxu0 %vm121_vm2, %v94_v12  ;;  %13143 = vmatprep.subr.bf16.mxu0 %v14438_v0  ;;  %v14763_v12 = vpack.c.bf16 %v11468_v9, %v11467_v8 }
  0x6e   :  { %12522 = vmatprep.mubr.msk.f32.mxu0 %vm14439_vm0, %v14440_v1  ;;  %13145 = vmatpush3.bf16.msra.mxu0 %v14673_v27 }
  0x6f   :  { %13146 = vmatprep.subr.bf16.mxu0 %v14438_v0 }
  0x71   :  { %12523 = vmatmul.mubr.msk.f32.gmra.mrb[2].mxu0 %vm121_vm2, %v95_v13 }
  0x72   :  { %12525 = vmatprep.mubr.msk.f32.mxu0 %vm14439_vm0, %v14440_v1  ;;  %13148 = vmatpush3.bf16.msra.mxu0 %v14687_v30 }
  0x73   :  { %13155 = vmatprep.subr.bf16.mxu0 %v14438_v0 }
  0x75   :  { %12526 = vmatmul.mubr.msk.f32.gmra.mrb[4].mxu0 %vm121_vm2, %v96_v14 }
  0x76   :  { %12528 = vmatprep.mubr.msk.f32.mxu0 %vm14439_vm0, %v14440_v1 }
  0x79   :  { %12529 = vmatmul.mubr.msk.f32.gmra.mrb[6].mxu0 %vm121_vm2, %v97_v15  ;;  %v11469_v15 = vld [vmem:[%s15437_s3 + $0x70] sm:$0xff] }
  0x7a   :  { %12531 = vmatprep.mubr.msk.f32.mxu0 %vm14439_vm0, %v14440_v1 }
  0x7d   :  { %12532 = vmatmul.mubr.msk.f32.gmra.mrb[8].mxu0 %vm121_vm2, %v98_v16  ;;  %v11470_v16 = vld [vmem:[%s15437_s3 + $0x78] sm:$0xff] }
  0x7e   :  { %12534 = vmatprep.mubr.msk.f32.mxu0 %vm14439_vm0, %v14440_v1 }
  0x81   :  { %12535 = vmatmul.mubr.msk.f32.gmra.mrb[10].mxu0 %vm121_vm2, %v99_v17 }
  0x82   :  { %12537 = vmatprep.mubr.msk.f32.mxu0 %vm14439_vm0, %v14440_v1 }
  0x85   :  { %12538 = vmatmul.mubr.msk.f32.gmra.mrb[12].mxu0 %vm121_vm2, %v100_v18 }
  0x86   :  { %12540 = vmatprep.mubr.msk.f32.mxu0 %vm14439_vm0, %v14440_v1 }
  0x89   :  { %12541 = vmatmul.mubr.msk.f32.gmra.mrb[14].mxu0 %vm121_vm2, %v101_v19 }
  0x8a   :  { %12543 = vmatprep.mubr.msk.f32.mxu0 %vm14439_vm0, %v14440_v1 }
  0x8d   :  { %12544 = vmatmul.mubr.msk.f32.gmra.mrb[16].mxu0 %vm121_vm2, %v102_v20 }
  0x8e   :  { %12546 = vmatprep.mubr.msk.f32.mxu0 %vm14439_vm0, %v14440_v1 }
  0x91   :  { %12547 = vmatmul.mubr.msk.f32.gmra.mrb[18].mxu0 %vm121_vm2, %v103_v21 }
  0x92   :  { %12549 = vmatprep.mubr.msk.f32.mxu0 %vm14439_vm0, %v14440_v1 }
  0x95   :  { %12550 = vmatmul.mubr.msk.f32.gmra.mrb[20].mxu0 %vm121_vm2, %v104_v22  ;;  %v14778_v22 = vpack.c.bf16 %v11470_v16, %v11469_v15 }
  0x96   :  { %12552 = vmatprep.mubr.msk.f32.mxu0 %vm14439_vm0, %v14440_v1 }
  0x99   :  { %12553 = vmatmul.mubr.msk.f32.gmra.mrb[22].mxu0 %vm121_vm2, %v105_v23 }
  0x9a   :  { %12555 = vmatprep.mubr.msk.f32.mxu0 %vm14439_vm0, %v14440_v1 }
  0x9d   :  { %12556 = vmatmul.mubr.msk.f32.gmra.mrb[24].mxu0 %vm121_vm2, %v106_v24 }
  0x9e   :  { %12654 = vmatprep.mubr.msk.f32.mxu0 %vm14439_vm0, %v14440_v1 }
 0x140   :  { %v231_v32 = vpop.f32.mrb[0].mxu0 }
 0x141   :  { %v232_v33 = vadd.f32 %v14693_v31, %v231_v32  ;;  %v12521_v34 = vpop.f32.mrb[1].mxu0 }
 0x143   :  { %v295_v35 = vmax.f32 %v232_v33, 0.0 }
 0x144   :  { %v236_v36 = vpop.f32.mrb[2].mxu0 }
 0x145   :  { %309 = vst.msk [vmem:[#allocation2] sm:$0xff] %vm308_vm3, %v295_v35  ;;  %v237_v37 = vadd.f32 %v14693_v31, %v236_v36  ;;  %v12524_v38 = vpop.f32.mrb[3].mxu0 }
 0x147   :  { %v296_v39 = vmax.f32 %v237_v37, 0.0 }
 0x148   :  { %v241_v42 = vpop.f32.mrb[4].mxu0 }
 0x149   :  { %310 = vst.msk [vmem:[#allocation2 + $0x8] sm:$0xff] %vm308_vm3, %v296_v39  ;;  %v242_v43 = vadd.f32 %v14693_v31, %v241_v42  ;;  %v12527_v44 = vpop.f32.mrb[5].mxu0 }
 0x14b   :  { %v297_v46 = vmax.f32 %v242_v43, 0.0 }
 0x14c   :  { %v344_v49 = vld [vmem:[#allocation2 + $0x1] sm:$0x3f]  ;;  %v246_v50 = vpop.f32.mrb[6].mxu0 }
 0x14d   :  { %12567 = vmatmul.mubr.msk.f32.vlgmr.msra.gmra.mrb[0].mxu1 %vm308_vm3, %v344_v49  ;;  %311 = vst.msk [vmem:[#allocation2 + $0x10] sm:$0xff] %vm308_vm3, %v297_v46  ;;  %v247_v51 = vadd.f32 %v14693_v31, %v246_v50  ;;  %v12530_v52 = vpop.f32.mrb[7].mxu0  ;;  %v343_v63 = vld [vmem:[#allocation2] sm:$0x3f] }
 0x14e   :  { %13103 = vmatpush3.bf16.msra.mxu1 %v14706_v45  ;;  %12577 = vmatprep.mubr.msk.f32.mxu1 %vm14439_vm0, %v14440_v1 }
 0x14f   :  { %13104 = vmatprep.subr.bf16.mxu1 %v14438_v0  ;;  %v298_v56 = vmax.f32 %v247_v51, 0.0 }
 0x150   :  { %v251_v57 = vpop.f32.mrb[8].mxu0  ;;  %v491_v17 = vld [vmem:[#allocation2 + $0x7] sm:$0x3f] }
 0x151   :  { %312 = vst.msk [vmem:[#allocation2 + $0x18] sm:$0xff] %vm308_vm3, %v298_v56  ;;  %v252_v59 = vadd.f32 %v14693_v31, %v251_v57  ;;  %v12533_v60 = vpop.f32.mrb[9].mxu0  ;;  %v566_v29 = vld [vmem:[#allocation2 + $0x8] sm:$0x3f] }
 0x152   :  { %13106 = vmatpush3.bf16.msra.mxu1 %v14718_v53  ;;  %v652_v38 = vld [vmem:[#allocation2 + $0x8] sm:$0x3f] }
 0x153   :  { %13107 = vmatprep.subr.bf16.mxu1 %v14438_v0  ;;  %v299_v3 = vmax.f32 %v252_v59, 0.0  ;;  %v651_v40 = vld [vmem:[#allocation2 + $0x7] sm:$0x3f] }
 0x154   :  { %v953_v2 = vld [vmem:[#allocation2 + $0xf] sm:$0x3f]  ;;  %v256_v4 = vpop.f32.mrb[10].mxu0 }
 0x155   :  { %12578 = vmatmul.mubr.msk.f32.vlgmr.msra.gmra.mrb[2].mxu1 %vm308_vm3, %v343_v63  ;;  %12655 = vmatmul.mubr.msk.f32.vlgmr.msra.gmra.mrb[26].mxu0 %vm308_vm3, %v953_v2  ;;  %v257_v5 = vadd.f32 %v14693_v31, %v256_v4  ;;  %v12536_v6 = vpop.f32.mrb[11].mxu0  ;;  %313 = vst.msk [vmem:[#allocation2 + $0x20] sm:$0xff] %vm308_vm3, %v299_v3  ;;  %v799_v47 = vld [vmem:[#allocation2 + $0xe] sm:$0x3f] }
 0x156   :  { %13109 = vmatpush3.bf16.msra.mxu1 %v14731_v58  ;;  %12588 = vmatprep.mubr.msk.f32.mxu1 %vm14439_vm0, %v14440_v1  ;;  %v874_v49 = vld [vmem:[#allocation2 + $0xf] sm:$0x3f] }
 0x157   :  { %13110 = vmatprep.subr.bf16.mxu1 %v14438_v0  ;;  %13157 = vmatpush3.bf16.msra.mxu0 %v14731_v58  ;;  %v300_v10 = vmax.f32 %v257_v5, 0.0  ;;  %v952_v56 = vld [vmem:[#allocation2 + $0xe] sm:$0x3f] }
 0x158   :  { %13158 = vmatprep.subr.bf16.mxu0 %v14438_v0  ;;  %12676 = vmatprep.mubr.msk.f32.mxu0 %vm14439_vm0, %v14440_v1  ;;  %v261_v11 = vpop.f32.mrb[12].mxu0  ;;  %v1100_v18 = vld [vmem:[#allocation2 + $0x15] sm:$0x3f] }
 0x159   :  { %314 = vst.msk [vmem:[#allocation2 + $0x28] sm:$0xff] %vm308_vm3, %v300_v10  ;;  %v262_v13 = vadd.f32 %v14693_v31, %v261_v11  ;;  %v12539_v14 = vpop.f32.mrb[13].mxu0  ;;  %v1254_v32 = vld [vmem:[#allocation2 + $0x16] sm:$0x3f] }
 0x15a   :  { %13112 = vmatpush3.bf16.msra.mxu1 %v14745_v7  ;;  %v1175_v59 = vld [vmem:[#allocation2 + $0x16] sm:$0x3f] }
 0x15b   :  { %13113 = vmatprep.subr.bf16.mxu1 %v14438_v0  ;;  %13160 = vmatpush3.bf16.msra.mxu0 %v14745_v7  ;;  %v301_v19 = vmax.f32 %v262_v13, 0.0 }
 0x15c   :  { %13167 = vmatprep.subr.bf16.mxu0 %v14438_v0  ;;  %v266_v20 = vpop.f32.mrb[14].mxu0  ;;  %v1401_v39 = vld [vmem:[#allocation2 + $0x1c] sm:$0x3f] }
 0x15d   :  { %12589 = vmatmul.mubr.msk.f32.vlgmr.msra.gmra.mrb[4].mxu1 %vm308_vm3, %v491_v17  ;;  %v267_v21 = vadd.f32 %v14693_v31, %v266_v20  ;;  %315 = vst.msk [vmem:[#allocation2 + $0x30] sm:$0xff] %vm308_vm3, %v301_v19  ;;  %v12542_v23 = vpop.f32.mrb[15].mxu0  ;;  %v1555_v41 = vld [vmem:[#allocation2 + $0x1d] sm:$0x3f] }
 0x15e   :  { %13115 = vmatpush3.bf16.msra.mxu1 %v14763_v12  ;;  %12599 = vmatprep.mubr.msk.f32.mxu1 %vm14439_vm0, %v14440_v1  ;;  %v1476_v4 = vld [vmem:[#allocation2 + $0x1d] sm:$0x3f] }
 0x15f   :  { %13116 = vmatprep.subr.bf16.mxu1 %v14438_v0  ;;  %12677 = vmatmul.mubr.msk.f32.vlgmr.msra.gmra.mrb[28].mxu0 %vm308_vm3, %v1100_v18  ;;  %v302_v24 = vmax.f32 %v267_v21, 0.0  ;;  %v1554_v6 = vld [vmem:[#allocation2 + $0x1c] sm:$0x3f] }
 0x160   :  { %13169 = vmatpush3.bf16.msra.mxu0 %v14673_v27  ;;  %12698 = vmatprep.mubr.msk.f32.mxu0 %vm14439_vm0, %v14440_v1  ;;  %v271_v25 = vpop.f32.mrb[16].mxu0  ;;  %v1702_v48 = vld [vmem:[#allocation2 + $0x23] sm:$0x3f]  ;;  %v2003_v57 = vld [vmem:[#allocation2 + $0x2a] sm:$0x3f] }
 0x161   :  { %13170 = vmatprep.subr.bf16.mxu0 %v14438_v0  ;;  %316 = vst.msk [vmem:[#allocation2 + $0x38] sm:$0xff] %vm308_vm3, %v302_v24  ;;  %v272_v26 = vadd.f32 %v14693_v31, %v271_v25  ;;  %v12545_v28 = vpop.f32.mrb[17].mxu0  ;;  %v1856_v50 = vld [vmem:[#allocation2 + $0x24] sm:$0x3f] }
 0x162   :  { %13118 = vmatpush3.bf16.msra.mxu1 %v14778_v22  ;;  %v1777_v9 = vld [vmem:[#allocation2 + $0x24] sm:$0x3f] }
 0x163   :  { %13119 = vmatprep.subr.bf16.mxu1 %v14438_v0  ;;  %v303_v33 = vmax.f32 %v272_v26, 0.0  ;;  %v1855_v11 = vld [vmem:[#allocation2 + $0x23] sm:$0x3f] }
 0x164   :  { %13172 = vmatpush3.bf16.msra.mxu0 %v14687_v30  ;;  %v276_v34 = vpop.f32.mrb[18].mxu0  ;;  %v2157_v60 = vld [vmem:[#allocation2 + $0x32] sm:$0x3f]  ;;  %v2078_v14 = vld [vmem:[#allocation2 + $0x2b] sm:$0x3f] }
 0x165   :  { %12600 = vmatmul.mubr.msk.f32.vlgmr.msra.gmra.mrb[6].mxu1 %vm308_vm3, %v566_v29  ;;  %13179 = vmatprep.subr.bf16.mxu0 %v14438_v0  ;;  %v277_v35 = vadd.f32 %v14693_v31, %v276_v34  ;;  %317 = vst.msk [vmem:[#allocation2 + $0x40] sm:$0xff] %vm308_vm3, %v303_v33  ;;  %v12548_v36 = vpop.f32.mrb[19].mxu0  ;;  %v2156_v16 = vld [vmem:[#allocation2 + $0x31] sm:$0x3f] }
 0x166   :  { %13121 = vmatpush3.bf16.msra.mxu1 %v14673_v27  ;;  %12610 = vmatprep.mubr.msk.f32.mxu1 %vm14439_vm0, %v14440_v1 }
 0x167   :  { %13122 = vmatprep.subr.bf16.mxu1 %v14438_v0  ;;  %12699 = vmatmul.mubr.msk.f32.vlgmr.msra.gmra.mrb[30].mxu0 %vm308_vm3, %v1254_v32  ;;  %v304_v37 = vmax.f32 %v277_v35, 0.0 }
 0x168   :  { %13181 = vmatpush3.bf16.msra.mxu0 %v14731_v58  ;;  %12720 = vmatprep.mubr.msk.f32.mxu0 %vm14439_vm0, %v14440_v1  ;;  %v281_v42 = vpop.f32.mrb[20].mxu0  ;;  %v2304_v3 = vld [vmem:[#allocation2 + $0x38] sm:$0x3f] }
 0x169   :  { %13182 = vmatprep.subr.bf16.mxu0 %v14438_v0  ;;  %318 = vst.msk [vmem:[#allocation2 + $0x48] sm:$0xff] %vm308_vm3, %v304_v37  ;;  %v282_v43 = vadd.f32 %v14693_v31, %v281_v42  ;;  %v12551_v44 = vpop.f32.mrb[21].mxu0  ;;  %v2459_v5 = vld [vmem:[#allocation2 + $0x39] sm:$0x3f]  ;;  %v13403_v42 = vld [vmem:[#allocation9 + $0xa4] ss:$16 sps:$4 sm:$0xff]  }
 0x16a   :  { %13124 = vmatpush3.bf16.msra.mxu1 %v14687_v30  ;;  %v2379_v18 = vld [vmem:[#allocation2 + $0x39] sm:$0x3f]  ;;  %v13404_v44 = vld [vmem:[#allocation9 + $0xa8] ss:$16 sps:$4 sm:$0xff]  }
 0x16b   :  { %13125 = vmatprep.subr.bf16.mxu1 %v14438_v0  ;;  %v305_v46 = vmax.f32 %v282_v43, 0.0  ;;  %v2458_v20 = vld [vmem:[#allocation2 + $0x38] sm:$0x3f] }
 0x16c   :  { %13184 = vmatpush3.bf16.msra.mxu0 %v14745_v7  ;;  %v286_v51 = vpop.f32.mrb[22].mxu0  ;;  %v2606_v8 = vld [vmem:[#allocation2 + $0x3f] sm:$0x3f] }
 0x16d   :  { %12611 = vmatmul.mubr.msk.f32.vlgmr.msra.gmra.mrb[8].mxu1 %vm308_vm3, %v652_v38  ;;  %13191 = vmatprep.subr.bf16.mxu0 %v14438_v0  ;;  %319 = vst.msk [vmem:[#allocation2 + $0x50] sm:$0xff] %vm308_vm3, %v305_v46  ;;  %v287_v52 = vadd.f32 %v14693_v31, %v286_v51  ;;  %v12554_v54 = vpop.f32.mrb[23].mxu0  ;;  %v2760_v10 = vld [vmem:[#allocation2 + $0x40] sm:$0x3f]  ;;  %v13406_v46 = vld [vmem:[#allocation9 + $0xac] ss:$16 sps:$4 sm:$0xff]  }
 0x16e   :  { %13127 = vmatpush3.bf16.msra.mxu1 %v14706_v45  ;;  %12621 = vmatprep.mubr.msk.f32.mxu1 %vm14439_vm0, %v14440_v1  ;;  %v2681_v23 = vld [vmem:[#allocation2 + $0x40] sm:$0x3f] }
 0x16f   :  { %13128 = vmatprep.subr.bf16.mxu1 %v14438_v0  ;;  %12721 = vmatmul.mubr.msk.f32.vlgmr.msra.gmra.mrb[32].mxu0 %vm308_vm3, %v1401_v39  ;;  %v306_v55 = vmax.f32 %v287_v52, 0.0  ;;  %v13397_v38 = vld [vmem:[#allocation9 + $0x84] ss:$16 sps:$4 sm:$0xff]   ;;  %v13395_v39 = vld [vmem:[#allocation9 + $0x80] ss:$16 sps:$4 sm:$0xff]  }
 0x170   :  { %13193 = vmatpush3.bf16.msra.mxu0 %v14673_v27  ;;  %12742 = vmatprep.mubr.msk.f32.mxu0 %vm14439_vm0, %v14440_v1  ;;  %v291_v61 = vpop.f32.mrb[24].mxu0  ;;  %v2907_v13 = vld [vmem:[#allocation2 + $0x46] sm:$0x3f]  ;;  %v15094_v52 = vld [vmem:[#allocation7] ss:$0 sm:$0xff] }
 0x171   :  { %13194 = vmatprep.subr.bf16.mxu0 %v14438_v0  ;;  %320 = vst.msk [vmem:[#allocation2 + $0x58] sm:$0xff] %vm308_vm3, %v306_v55  ;;  %v292_v62 = vadd.f32 %v14693_v31, %v291_v61  ;;  %v12557_v63 = vpop.f32.mrb[25].mxu0  ;;  %v1253_v31 = vld [vmem:[#allocation2 + $0x15] sm:$0x3f]  ;;  %v3061_v15 = vld [vmem:[#allocation2 + $0x47] sm:$0x3f] }
 0x172   :  { %13130 = vmatpush3.bf16.msra.mxu1 %v14718_v53  ;;  %v13410_v51 = vld [vmem:[#allocation9 + $0xc8] ss:$16 sps:$4 sm:$0xff]   ;;  %v13413_v61 = vld [vmem:[#allocation9 + $0xe0] ss:$16 sps:$4 sm:$0xff]  }
 0x173   :  { %13131 = vmatprep.subr.bf16.mxu1 %v14438_v0  ;;  %v307_v2 = vmax.f32 %v292_v62, 0.0  ;;  %v13416_v62 = vld [vmem:[#allocation9 + $0xe8] ss:$16 sps:$4 sm:$0xff]  }
 0x174   :  { %13196 = vmatpush3.bf16.msra.mxu0 %v14687_v30  ;;  %v3208_v17 = vld [vmem:[#allocation2 + $0x4d] sm:$0x3f] }
 0x175   :  { %12622 = vmatmul.mubr.msk.f32.vlgmr.msra.gmra.mrb[10].mxu1 %vm308_vm3, %v651_v40  ;;  %13203 = vmatprep.subr.bf16.mxu0 %v14438_v0  ;;  %322 = vst.msk [vmem:[#allocation2 + $0x60] sm:$0x3] %vm321_vm4, %v307_v2  ;;  %v3362_v19 = vld [vmem:[#allocation2 + $0x4e] sm:$0x3f]  ;;  %v13398_v40 = vld [vmem:[#allocation9 + $0x88] ss:$16 sps:$4 sm:$0xff]  }
 0x176   :  { %13133 = vmatpush3.bf16.msra.mxu1 %v14731_v58  ;;  %12632 = vmatprep.mubr.msk.f32.mxu1 %vm14439_vm0, %v14440_v1  ;;  %v3283_v25 = vld [vmem:[#allocation2 + $0x4e] sm:$0x3f] }
 0x177   :  { %13134 = vmatprep.subr.bf16.mxu1 %v14438_v0  ;;  %12743 = vmatmul.mubr.msk.f32.vlgmr.msra.gmra.mrb[34].mxu0 %vm308_vm3, %v1555_v41  ;;  %v3361_v26 = vld [vmem:[#allocation2 + $0x4d] sm:$0x3f] }
 0x178   :  { %13205 = vmatpush3.bf16.msra.mxu0 %v14731_v58  ;;  %12764 = vmatprep.mubr.msk.f32.mxu0 %vm14439_vm0, %v14440_v1  ;;  %v3509_v21 = vld [vmem:[#allocation2 + $0x54] sm:$0x3f]  ;;  %v13401_v41 = vld [vmem:[#allocation9 + $0xa0] ss:$16 sps:$4 sm:$0xff]  }
 0x179   :  { %13206 = vmatprep.subr.bf16.mxu0 %v14438_v0  ;;  %v3663_v24 = vld [vmem:[#allocation2 + $0x55] sm:$0x3f] }
 0x17a   :  { %13136 = vmatpush3.bf16.msra.mxu1 %v14745_v7  ;;  %v3584_v28 = vld [vmem:[#allocation2 + $0x55] sm:$0x3f] }
 0x17b   :  { %13137 = vmatprep.subr.bf16.mxu1 %v14438_v0  ;;  %v3662_v29 = vld [vmem:[#allocation2 + $0x54] sm:$0x3f] }
 0x17c   :  { %13208 = vmatpush3.bf16.msra.mxu0 %v14745_v7  ;;  %v3885_v33 = vld [vmem:[#allocation2 + $0x5c] sm:$0x3f] }
 0x17d   :  { %12633 = vmatmul.mubr.msk.f32.vlgmr.msra.gmra.mrb[12].mxu1 %vm308_vm3, %v799_v47  ;;  %13215 = vmatprep.subr.bf16.mxu0 %v14438_v0 }
 0x17e   :  { %13139 = vmatpush3.bf16.msra.mxu1 %v14763_v12  ;;  %12643 = vmatprep.mubr.msk.f32.mxu1 %vm14439_vm0, %v14440_v1 }
 0x17f   :  { %13140 = vmatprep.subr.bf16.mxu1 %v14438_v0  ;;  %12765 = vmatmul.mubr.msk.f32.vlgmr.msra.gmra.mrb[36].mxu0 %vm308_vm3, %v1702_v48  ;;  %v13409_v48 = vld [vmem:[#allocation9 + $0xc4] ss:$16 sps:$4 sm:$0xff]  }
 0x180   :  { %13217 = vmatpush3.bf16.msra.mxu0 %v14673_v27  ;;  %12786 = vmatprep.mubr.msk.f32.mxu0 %vm14439_vm0, %v14440_v1 }
 0x181   :  { %13218 = vmatprep.subr.bf16.mxu0 %v14438_v0 }
 0x182   :  { %13142 = vmatpush3.bf16.msra.mxu1 %v14778_v22 }
 0x183   :  { %13149 = vmatprep.subr.bf16.mxu1 %v14438_v0 }
 0x184   :  { %13220 = vmatpush3.bf16.msra.mxu0 %v14687_v30 }
 0x185   :  { %12644 = vmatmul.mubr.msk.f32.vlgmr.msra.gmra.mrb[14].mxu1 %vm308_vm3, %v874_v49  ;;  %13227 = vmatprep.subr.bf16.mxu0 %v14438_v0  ;;  %v13407_v49 = vld [vmem:[#allocation9 + $0xc0] ss:$16 sps:$4 sm:$0xff]  }
 0x186   :  { %13151 = vmatpush3.bf16.msra.mxu1 %v14706_v45  ;;  %12665 = vmatprep.mubr.msk.f32.mxu1 %vm14439_vm0, %v14440_v1 }
 0x187   :  { %13152 = vmatprep.subr.bf16.mxu1 %v14438_v0  ;;  %12787 = vmatmul.mubr.msk.f32.vlgmr.msra.gmra.mrb[38].mxu0 %vm308_vm3, %v1856_v50  ;;  %v13412_v50 = vld [vmem:[#allocation9 + $0xcc] ss:$16 sps:$4 sm:$0xff]  }
 0x188   :  { %13229 = vmatpush3.bf16.msra.mxu0 %v14731_v58  ;;  %12808 = vmatprep.mubr.msk.f32.mxu0 %vm14439_vm0, %v14440_v1 }
 0x189   :  { %13230 = vmatprep.subr.bf16.mxu0 %v14438_v0 }
 0x18a   :  { %13154 = vmatpush3.bf16.msra.mxu1 %v14718_v53 }
 0x18b   :  { %13161 = vmatprep.subr.bf16.mxu1 %v14438_v0 }
 0x18c   :  { %13232 = vmatpush3.bf16.msra.mxu0 %v14745_v7 }
 0x18d   :  { %12666 = vmatmul.mubr.msk.f32.vlgmr.msra.gmra.mrb[16].mxu1 %vm308_vm3, %v952_v56  ;;  %13239 = vmatprep.subr.bf16.mxu0 %v14438_v0 }
 0x18e   :  { %13163 = vmatpush3.bf16.msra.mxu1 %v14763_v12  ;;  %12687 = vmatprep.mubr.msk.f32.mxu1 %vm14439_vm0, %v14440_v1 }
 0x18f   :  { %13164 = vmatprep.subr.bf16.mxu1 %v14438_v0  ;;  %12809 = vmatmul.mubr.msk.f32.vlgmr.msra.gmra.mrb[40].mxu0 %vm308_vm3, %v2003_v57  ;;  %v13415_v57 = vld [vmem:[#allocation9 + $0xe4] ss:$16 sps:$4 sm:$0xff]  }
 0x190   :  { %13241 = vmatpush3.bf16.msra.mxu0 %v14673_v27  ;;  %12830 = vmatprep.mubr.msk.f32.mxu0 %vm14439_vm0, %v14440_v1 }
 0x191   :  { %13242 = vmatprep.subr.bf16.mxu0 %v14438_v0 }
 0x192   :  { %13166 = vmatpush3.bf16.msra.mxu1 %v14778_v22 }
 0x193   :  { %13173 = vmatprep.subr.bf16.mxu1 %v14438_v0 }
 0x194   :  { %13244 = vmatpush3.bf16.msra.mxu0 %v14687_v30 }
 0x195   :  { %12688 = vmatmul.mubr.msk.f32.vlgmr.msra.gmra.mrb[18].mxu1 %vm308_vm3, %v1175_v59  ;;  %13251 = vmatprep.subr.bf16.mxu0 %v14438_v0  ;;  %v13418_v59 = vld [vmem:[#allocation9 + $0xec] ss:$16 sps:$4 sm:$0xff]  }
 0x196   :  { %13175 = vmatpush3.bf16.msra.mxu1 %v14706_v45  ;;  %12709 = vmatprep.mubr.msk.f32.mxu1 %vm14439_vm0, %v14440_v1 }
 0x197   :  { %13176 = vmatprep.subr.bf16.mxu1 %v14438_v0  ;;  %12831 = vmatmul.mubr.msk.f32.vlgmr.msra.gmra.mrb[42].mxu0 %vm308_vm3, %v2157_v60 }
 0x198   :  { %13253 = vmatpush3.bf16.msra.mxu0 %v14731_v58  ;;  %12852 = vmatprep.mubr.msk.f32.mxu0 %vm14439_vm0, %v14440_v1 }
 0x199   :  { %13254 = vmatprep.subr.bf16.mxu0 %v14438_v0 }
 0x19a   :  { %13178 = vmatpush3.bf16.msra.mxu1 %v14718_v53 }
 0x19b   :  { %13185 = vmatprep.subr.bf16.mxu1 %v14438_v0 }
 0x19c   :  { %13256 = vmatpush3.bf16.msra.mxu0 %v14745_v7 }
 0x19d   :  { %12710 = vmatmul.mubr.msk.f32.vlgmr.msra.gmra.mrb[20].mxu1 %vm308_vm3, %v1253_v31  ;;  %13263 = vmatprep.subr.bf16.mxu0 %v14438_v0 }
 0x19e   :  { %13187 = vmatpush3.bf16.msra.mxu1 %v14763_v12  ;;  %12731 = vmatprep.mubr.msk.f32.mxu1 %vm14439_vm0, %v14440_v1 }
 0x19f   :  { %13188 = vmatprep.subr.bf16.mxu1 %v14438_v0  ;;  %12853 = vmatmul.mubr.msk.f32.vlgmr.msra.gmra.mrb[44].mxu0 %vm308_vm3, %v2304_v3  ;;  %v13421_v3 = vld [vmem:[#allocation9 + $0x4] ss:$16 sps:$4 sm:$0xff]  }
 0x1a0   :  { %13265 = vmatpush3.bf16.msra.mxu0 %v14673_v27  ;;  %12874 = vmatprep.mubr.msk.f32.mxu0 %vm14439_vm0, %v14440_v1 }
 0x1a1   :  { %13266 = vmatprep.subr.bf16.mxu0 %v14438_v0 }
 0x1a2   :  { %13190 = vmatpush3.bf16.msra.mxu1 %v14778_v22 }
 0x1a3   :  { %13197 = vmatprep.subr.bf16.mxu1 %v14438_v0 }
 0x1a4   :  { %13268 = vmatpush3.bf16.msra.mxu0 %v14687_v30 }
 0x1a5   :  { %12732 = vmatmul.mubr.msk.f32.vlgmr.msra.gmra.mrb[22].mxu1 %vm308_vm3, %v1476_v4  ;;  %13275 = vmatprep.subr.bf16.mxu0 %v14438_v0  ;;  %v13424_v4 = vld [vmem:[#allocation9 + $0xc] ss:$16 sps:$4 sm:$0xff]  }
 0x1a6   :  { %13199 = vmatpush3.bf16.msra.mxu1 %v14706_v45  ;;  %12753 = vmatprep.mubr.msk.f32.mxu1 %vm14439_vm0, %v14440_v1 }
 0x1a7   :  { %13200 = vmatprep.subr.bf16.mxu1 %v14438_v0  ;;  %12875 = vmatmul.mubr.msk.f32.vlgmr.msra.gmra.mrb[46].mxu0 %vm308_vm3, %v2459_v5  ;;  %v14441_v5 = vmov 0  }
 0x1a8   :  { %13277 = vmatpush3.bf16.msra.mxu0 %v14731_v58  ;;  %12896 = vmatprep.mubr.msk.f32.mxu0 %vm14439_vm0, %v14440_v1 }
 0x1a9   :  { %13278 = vmatprep.subr.bf16.mxu0 %v14438_v0 }
 0x1aa   :  { %13202 = vmatpush3.bf16.msra.mxu1 %v14718_v53 }
 0x1ab   :  { %13209 = vmatprep.subr.bf16.mxu1 %v14438_v0 }
 0x1ac   :  { %13280 = vmatpush3.bf16.msra.mxu0 %v14745_v7 }
 0x1ad   :  { %12754 = vmatmul.mubr.msk.f32.vlgmr.msra.gmra.mrb[24].mxu1 %vm308_vm3, %v1554_v6  ;;  %13287 = vmatprep.subr.bf16.mxu0 %v14438_v0 }
 0x1ae   :  { %13211 = vmatpush3.bf16.msra.mxu1 %v14763_v12  ;;  %12775 = vmatprep.mubr.msk.f32.mxu1 %vm14439_vm0, %v14440_v1 }
 0x1af   :  { %13212 = vmatprep.subr.bf16.mxu1 %v14438_v0  ;;  %12897 = vmatmul.mubr.msk.f32.vlgmr.msra.gmra.mrb[48].mxu0 %vm308_vm3, %v2606_v8 }
 0x1b0   :  { %13289 = vmatpush3.bf16.msra.mxu0 %v14673_v27  ;;  %12918 = vmatprep.mubr.msk.f32.mxu0 %vm14439_vm0, %v14440_v1 }
 0x1b1   :  { %13290 = vmatprep.subr.bf16.mxu0 %v14438_v0 }
 0x1b2   :  { %13214 = vmatpush3.bf16.msra.mxu1 %v14778_v22 }
 0x1b3   :  { %13221 = vmatprep.subr.bf16.mxu1 %v14438_v0 }
 0x1b4   :  { %13292 = vmatpush3.bf16.msra.mxu0 %v14687_v30 }
 0x1b5   :  { %12776 = vmatmul.mubr.msk.f32.vlgmr.msra.gmra.mrb[26].mxu1 %vm308_vm3, %v1777_v9  ;;  %13299 = vmatprep.subr.bf16.mxu0 %v14438_v0 }
 0x1b6   :  { %13223 = vmatpush3.bf16.msra.mxu1 %v14706_v45  ;;  %12797 = vmatprep.mubr.msk.f32.mxu1 %vm14439_vm0, %v14440_v1 }
 0x1b7   :  { %13224 = vmatprep.subr.bf16.mxu1 %v14438_v0  ;;  %12919 = vmatmul.mubr.msk.f32.vlgmr.msra.gmra.mrb[50].mxu0 %vm308_vm3, %v2760_v10 }
 0x1b8   :  { %13301 = vmatpush3.bf16.msra.mxu0 %v14731_v58  ;;  %12940 = vmatprep.mubr.msk.f32.mxu0 %vm14439_vm0, %v14440_v1 }
 0x1b9   :  { %13302 = vmatprep.subr.bf16.mxu0 %v14438_v0 }
 0x1ba   :  { %13226 = vmatpush3.bf16.msra.mxu1 %v14718_v53 }
 0x1bb   :  { %13233 = vmatprep.subr.bf16.mxu1 %v14438_v0 }
 0x1bc   :  { %13304 = vmatpush3.bf16.msra.mxu0 %v14745_v7 }
 0x1bd   :  { %12798 = vmatmul.mubr.msk.f32.vlgmr.msra.gmra.mrb[28].mxu1 %vm308_vm3, %v1855_v11  ;;  %13311 = vmatprep.subr.bf16.mxu0 %v14438_v0 }
 0x1be   :  { %13235 = vmatpush3.bf16.msra.mxu1 %v14763_v12  ;;  %12819 = vmatprep.mubr.msk.f32.mxu1 %vm14439_vm0, %v14440_v1 }
 0x1bf   :  { %13236 = vmatprep.subr.bf16.mxu1 %v14438_v0  ;;  %12941 = vmatmul.mubr.msk.f32.vlgmr.msra.gmra.mrb[52].mxu0 %vm308_vm3, %v2907_v13 }
 0x1c0   :  { %13313 = vmatpush3.bf16.msra.mxu0 %v14673_v27  ;;  %12962 = vmatprep.mubr.msk.f32.mxu0 %vm14439_vm0, %v14440_v1 }
 0x1c1   :  { %13314 = vmatprep.subr.bf16.mxu0 %v14438_v0 }
 0x1c2   :  { %13238 = vmatpush3.bf16.msra.mxu1 %v14778_v22 }
 0x1c3   :  { %13245 = vmatprep.subr.bf16.mxu1 %v14438_v0 }
 0x1c4   :  { %13316 = vmatpush3.bf16.msra.mxu0 %v14687_v30 }
 0x1c5   :  { %12820 = vmatmul.mubr.msk.f32.vlgmr.msra.gmra.mrb[30].mxu1 %vm308_vm3, %v2078_v14  ;;  %13323 = vmatprep.subr.bf16.mxu0 %v14438_v0 }
 0x1c6   :  { %13247 = vmatpush3.bf16.msra.mxu1 %v14706_v45  ;;  %12841 = vmatprep.mubr.msk.f32.mxu1 %vm14439_vm0, %v14440_v1 }
 0x1c7   :  { %13248 = vmatprep.subr.bf16.mxu1 %v14438_v0  ;;  %12963 = vmatmul.mubr.msk.f32.vlgmr.msra.gmra.mrb[54].mxu0 %vm308_vm3, %v3061_v15 }
 0x1c8   :  { %13325 = vmatpush3.bf16.msra.mxu0 %v14731_v58  ;;  %12984 = vmatprep.mubr.msk.f32.mxu0 %vm14439_vm0, %v14440_v1 }
 0x1c9   :  { %13326 = vmatprep.subr.bf16.mxu0 %v14438_v0 }
 0x1ca   :  { %13250 = vmatpush3.bf16.msra.mxu1 %v14718_v53 }
 0x1cb   :  { %13257 = vmatprep.subr.bf16.mxu1 %v14438_v0 }
 0x1cc   :  { %13328 = vmatpush3.bf16.msra.mxu0 %v14745_v7 }
 0x1cd   :  { %12842 = vmatmul.mubr.msk.f32.vlgmr.msra.gmra.mrb[32].mxu1 %vm308_vm3, %v2156_v16  ;;  %13335 = vmatprep.subr.bf16.mxu0 %v14438_v0 }
 0x1ce   :  { %13259 = vmatpush3.bf16.msra.mxu1 %v14763_v12  ;;  %12863 = vmatprep.mubr.msk.f32.mxu1 %vm14439_vm0, %v14440_v1 }
 0x1cf   :  { %13260 = vmatprep.subr.bf16.mxu1 %v14438_v0  ;;  %12985 = vmatmul.mubr.msk.f32.vlgmr.msra.gmra.mrb[56].mxu0 %vm308_vm3, %v3208_v17 }
 0x1d0   :  { %13337 = vmatpush3.bf16.msra.mxu0 %v14673_v27  ;;  %13006 = vmatprep.mubr.msk.f32.mxu0 %vm14439_vm0, %v14440_v1 }
 0x1d1   :  { %13338 = vmatprep.subr.bf16.mxu0 %v14438_v0 }
 0x1d2   :  { %13262 = vmatpush3.bf16.msra.mxu1 %v14778_v22 }
 0x1d3   :  { %13269 = vmatprep.subr.bf16.mxu1 %v14438_v0 }
 0x1d4   :  { %13340 = vmatpush3.bf16.msra.mxu0 %v14687_v30 }
 0x1d5   :  { %12864 = vmatmul.mubr.msk.f32.vlgmr.msra.gmra.mrb[34].mxu1 %vm308_vm3, %v2379_v18  ;;  %13347 = vmatprep.subr.bf16.mxu0 %v14438_v0 }
 0x1d6   :  { %13271 = vmatpush3.bf16.msra.mxu1 %v14706_v45  ;;  %12885 = vmatprep.mubr.msk.f32.mxu1 %vm14439_vm0, %v14440_v1 }
 0x1d7   :  { %13272 = vmatprep.subr.bf16.mxu1 %v14438_v0  ;;  %13007 = vmatmul.mubr.msk.f32.vlgmr.msra.gmra.mrb[58].mxu0 %vm308_vm3, %v3362_v19 }
 0x1d8   :  { %13349 = vmatpush3.bf16.msra.mxu0 %v14731_v58  ;;  %13028 = vmatprep.mubr.msk.f32.mxu0 %vm14439_vm0, %v14440_v1 }
 0x1d9   :  { %13350 = vmatprep.subr.bf16.mxu0 %v14438_v0 }
 0x1da   :  { %13274 = vmatpush3.bf16.msra.mxu1 %v14718_v53 }
 0x1db   :  { %13281 = vmatprep.subr.bf16.mxu1 %v14438_v0 }
 0x1dc   :  { %13352 = vmatpush3.bf16.msra.mxu0 %v14745_v7 }
 0x1dd   :  { %12886 = vmatmul.mubr.msk.f32.vlgmr.msra.gmra.mrb[36].mxu1 %vm308_vm3, %v2458_v20  ;;  %13359 = vmatprep.subr.bf16.mxu0 %v14438_v0 }
 0x1de   :  { %13283 = vmatpush3.bf16.msra.mxu1 %v14763_v12  ;;  %12907 = vmatprep.mubr.msk.f32.mxu1 %vm14439_vm0, %v14440_v1 }
 0x1df   :  { %13284 = vmatprep.subr.bf16.mxu1 %v14438_v0  ;;  %13029 = vmatmul.mubr.msk.f32.vlgmr.msra.gmra.mrb[60].mxu0 %vm308_vm3, %v3509_v21 }
 0x1e0   :  { %13361 = vmatpush3.bf16.msra.mxu0 %v14673_v27  ;;  %13050 = vmatprep.mubr.msk.f32.mxu0 %vm14439_vm0, %v14440_v1  ;;  %v2759_v27 = vld [vmem:[#allocation2 + $0x3f] sm:$0x3f] }
 0x1e1   :  { %13362 = vmatprep.subr.bf16.mxu0 %v14438_v0 }
 0x1e2   :  { %13286 = vmatpush3.bf16.msra.mxu1 %v14778_v22 }
 0x1e3   :  { %13293 = vmatprep.subr.bf16.mxu1 %v14438_v0 }
 0x1e4   :  { %13364 = vmatpush3.bf16.msra.mxu0 %v14687_v30  ;;  %v3810_v30 = vld [vmem:[#allocation2 + $0x5b] sm:$0x3f] }
 0x1e5   :  { %12908 = vmatmul.mubr.msk.f32.vlgmr.msra.gmra.mrb[38].mxu1 %vm308_vm3, %v2681_v23  ;;  %13371 = vmatprep.subr.bf16.mxu0 %v14438_v0 }
 0x1e6   :  { %13295 = vmatpush3.bf16.msra.mxu1 %v14706_v45  ;;  %12929 = vmatprep.mubr.msk.f32.mxu1 %vm14439_vm0, %v14440_v1 }
 0x1e7   :  { %13296 = vmatprep.subr.bf16.mxu1 %v14438_v0  ;;  %13051 = vmatmul.mubr.msk.f32.vlgmr.msra.gmra.mrb[62].mxu0 %vm308_vm3, %v3663_v24 }
 0x1e8   :  { %13373 = vmatpush3.bf16.msra.mxu0 %v14731_v58  ;;  %13072 = vmatprep.mubr.msk.f32.mxu0 %vm14439_vm0, %v14440_v1  ;;  %v2982_v58 = vld [vmem:[#allocation2 + $0x47] sm:$0x3f] }
 0x1e9   :  { %13374 = vmatprep.subr.bf16.mxu0 %v14438_v0 }
 0x1ea   :  { %13298 = vmatpush3.bf16.msra.mxu1 %v14718_v53 }
 0x1eb   :  { %13305 = vmatprep.subr.bf16.mxu1 %v14438_v0 }
 0x1ec   :  { %13376 = vmatpush3.bf16.msra.mxu0 %v14745_v7  ;;  %v3060_v7 = vld [vmem:[#allocation2 + $0x46] sm:$0x3f] }
 0x1ed   :  { %12930 = vmatmul.mubr.msk.f32.vlgmr.msra.gmra.mrb[40].mxu1 %vm308_vm3, %v2759_v27  ;;  %4096 = vmatprep.subr.bf16.mxu0 %v13397_v38 }
 0x1ee   :  { %13307 = vmatpush3.bf16.msra.mxu1 %v14763_v12  ;;  %12951 = vmatprep.mubr.msk.f32.mxu1 %vm14439_vm0, %v14440_v1 }
 0x1ef   :  { %13308 = vmatprep.subr.bf16.mxu1 %v14438_v0  ;;  %13073 = vmatmul.mubr.msk.f32.vlgmr.msra.gmra.mrb[64].mxu0 %vm308_vm3, %v3810_v30 }
 0x1f0   :  { %4097 = vmatpush1.bf16.msra.mxu0 %v13395_v39  ;;  %4128 = vmatprep.mubr.bf16.mxu0 %v14441_v5 }
 0x1f1   :  { %4098 = vmatprep.subr.bf16.mxu0 %v13403_v42 }
 0x1f2   :  { %13310 = vmatpush3.bf16.msra.mxu1 %v14778_v22 }
 0x1f3   :  { %13317 = vmatprep.subr.bf16.mxu1 %v14438_v0 }
 0x1f4   :  { %4099 = vmatpush1.bf16.msra.mxu0 %v13401_v41 }
 0x1f5   :  { %12952 = vmatmul.mubr.msk.f32.vlgmr.msra.gmra.mrb[42].mxu1 %vm308_vm3, %v2982_v58  ;;  %4100 = vmatprep.subr.bf16.mxu0 %v13409_v48 }
 0x1f6   :  { %13319 = vmatpush3.bf16.msra.mxu1 %v14706_v45  ;;  %12973 = vmatprep.mubr.msk.f32.mxu1 %vm14439_vm0, %v14440_v1 }
 0x1f7   :  { %13320 = vmatprep.subr.bf16.mxu1 %v14438_v0 }
 0x1f8   :  { %4101 = vmatpush1.bf16.msra.mxu0 %v13407_v49 }
 0x1f9   :  { %4102 = vmatprep.subr.bf16.mxu0 %v13415_v57 }
 0x1fa   :  { %13322 = vmatpush3.bf16.msra.mxu1 %v14718_v53 }
 0x1fb   :  { %13329 = vmatprep.subr.bf16.mxu1 %v14438_v0 }
 0x1fc   :  { %4103 = vmatpush1.bf16.msra.mxu0 %v13413_v61 }
 0x1fd   :  { %12974 = vmatmul.mubr.msk.f32.vlgmr.msra.gmra.mrb[44].mxu1 %vm308_vm3, %v3060_v7  ;;  %4268 = vmatprep.subr.bf16.mxu0 %v13421_v3 }
 0x1fe   :  { %13331 = vmatpush3.bf16.msra.mxu1 %v14763_v12  ;;  %12995 = vmatprep.mubr.msk.f32.mxu1 %vm14439_vm0, %v14440_v1 }
 0x1ff   :  { %13332 = vmatprep.subr.bf16.mxu1 %v14438_v0 }
 0x202   :  { %13334 = vmatpush3.bf16.msra.mxu1 %v14778_v22 }
 0x203   :  { %13341 = vmatprep.subr.bf16.mxu1 %v14438_v0 }
 0x205   :  { %12996 = vmatmul.mubr.msk.f32.vlgmr.msra.gmra.mrb[46].mxu1 %vm308_vm3, %v3283_v25 }
 0x206   :  { %13343 = vmatpush3.bf16.msra.mxu1 %v14706_v45  ;;  %13017 = vmatprep.mubr.msk.f32.mxu1 %vm14439_vm0, %v14440_v1 }
 0x207   :  { %13344 = vmatprep.subr.bf16.mxu1 %v14438_v0 }
 0x20a   :  { %13346 = vmatpush3.bf16.msra.mxu1 %v14718_v53 }
 0x20b   :  { %13353 = vmatprep.subr.bf16.mxu1 %v14438_v0 }
 0x20d   :  { %13018 = vmatmul.mubr.msk.f32.vlgmr.msra.gmra.mrb[48].mxu1 %vm308_vm3, %v3361_v26 }
 0x20e   :  { %13355 = vmatpush3.bf16.msra.mxu1 %v14763_v12  ;;  %13039 = vmatprep.mubr.msk.f32.mxu1 %vm14439_vm0, %v14440_v1 }
 0x20f   :  { %13356 = vmatprep.subr.bf16.mxu1 %v14438_v0 }
 0x212   :  { %13358 = vmatpush3.bf16.msra.mxu1 %v14778_v22 }
 0x213   :  { %13365 = vmatprep.subr.bf16.mxu1 %v14438_v0 }
 0x215   :  { %13040 = vmatmul.mubr.msk.f32.vlgmr.msra.gmra.mrb[50].mxu1 %vm308_vm3, %v3584_v28 }
 0x216   :  { %13367 = vmatpush3.bf16.msra.mxu1 %v14706_v45  ;;  %13061 = vmatprep.mubr.msk.f32.mxu1 %vm14439_vm0, %v14440_v1 }
 0x217   :  { %13368 = vmatprep.subr.bf16.mxu1 %v14438_v0 }
 0x21a   :  { %13370 = vmatpush3.bf16.msra.mxu1 %v14718_v53 }
 0x21b   :  { %13377 = vmatprep.subr.bf16.mxu1 %v14438_v0 }
 0x21d   :  { %13062 = vmatmul.mubr.msk.f32.vlgmr.msra.gmra.mrb[52].mxu1 %vm308_vm3, %v3662_v29 }
 0x21e   :  { %13379 = vmatpush3.bf16.msra.mxu1 %v14763_v12  ;;  %13083 = vmatprep.mubr.msk.f32.mxu1 %vm14439_vm0, %v14440_v1  ;;  %v13400_v12 = vld [vmem:[#allocation9 + $0x8c] ss:$16 sps:$4 sm:$0xff]  }
 0x21f   :  { %13380 = vmatprep.subr.bf16.mxu1 %v14438_v0 }
 0x220   :  { %v414_v45 = vpop.f32.mrb[0].mxu1 }
 0x221   :  { %v12568_v32 = vpop.f32.mrb[1].mxu1 }
 0x222   :  { %13382 = vmatpush3.bf16.msra.mxu1 %v14778_v22 }
 0x223   :  { %4137 = vmatprep.subr.bf16.mxu1 %v13400_v12 }
 0x225   :  { %13084 = vmatmul.mubr.msk.f32.vlgmr.msra.gmra.mrb[54].mxu1 %vm308_vm3, %v3885_v33 }
 0x226   :  { %4138 = vmatpush1.bf16.msra.mxu1 %v13398_v40  ;;  %4169 = vmatprep.mubr.bf16.mxu1 %v14441_v5 }
 0x227   :  { %4139 = vmatprep.subr.bf16.mxu1 %v13406_v46 }
 0x228   :  { %v487_v53 = vpop.f32.mrb[2].mxu1  ;;  %v15090_v34 = vpop.f32.mrb[26].mxu0 }
 0x229   :  { %v488_v35 = vadd.f32 %v487_v53, %v414_v45  ;;  %v12579_v36 = vpop.f32.mrb[3].mxu1  ;;  %v12656_v37 = vpop.f32.mrb[27].mxu0 }
 0x22a   :  { %4140 = vmatpush1.bf16.msra.mxu1 %v13404_v44 }
 0x22b   :  { %4141 = vmatprep.subr.bf16.mxu1 %v13412_v50 }
 0x22e   :  { %4142 = vmatpush1.bf16.msra.mxu1 %v13410_v51 }
 0x22f   :  { %4143 = vmatprep.subr.bf16.mxu1 %v13418_v59 }
 0x230   :  { %v561_v0 = vpop.f32.mrb[4].mxu1 }
 0x231   :  { %v565_v1 = vadd.f32 %v561_v0, %v488_v35  ;;  %v12590_v22 = vpop.f32.mrb[5].mxu1 }
 0x232   :  { %v15092_v43 = vpop.f32.mrb[28].mxu0  ;;  %4144 = vmatpush1.bf16.msra.mxu1 %v13416_v62 }
 0x233   :  { %v12678_v47 = vpop.f32.mrb[29].mxu0  ;;  %4309 = vmatprep.subr.bf16.mxu1 %v13424_v4 }
 0x238   :  { %v636_v54 = vpop.f32.mrb[6].mxu1 }
 0x239   :  { %v640_v55 = vadd.f32 %v636_v54, %v565_v1  ;;  %v12601_v56 = vpop.f32.mrb[7].mxu1 }
 0x23a   :  { %v1324_v60 = vpop.f32.mrb[30].mxu0 }
 0x23b   :  { %v647_v63 = vadd.f32 %v15094_v52, %v640_v55  ;;  %v12700_v2 = vpop.f32.mrb[31].mxu0 }
 0x23d   :  { %v648_v31 = vmax.f32 %v647_v63, 0.0 }
 0x23f   :  { %650 = vst.msk [vmem:[#allocation3] sm:$0x3f] %vm649_vm5, %v648_v31 }
 0x240   :  { %v722_v6 = vpop.f32.mrb[8].mxu1 }
 0x241   :  { %v12612_v8 = vpop.f32.mrb[9].mxu1 }
 0x242   :  { %v1471_v9 = vpop.f32.mrb[32].mxu0 }
 0x243   :  { %v12722_v10 = vpop.f32.mrb[33].mxu0 }
 0x248   :  { %v795_v11 = vpop.f32.mrb[10].mxu1 }
 0x249   :  { %v796_v13 = vadd.f32 %v795_v11, %v722_v6  ;;  %v12623_v14 = vpop.f32.mrb[11].mxu1 }
 0x24a   :  { %v1625_v15 = vpop.f32.mrb[34].mxu0 }
 0x24b   :  { %v12744_v16 = vpop.f32.mrb[35].mxu0 }
 0x250   :  { %v869_v17 = vpop.f32.mrb[12].mxu1 }
 0x251   :  { %v873_v18 = vadd.f32 %v869_v17, %v796_v13  ;;  %v12634_v19 = vpop.f32.mrb[13].mxu1 }
 0x252   :  { %v1772_v20 = vpop.f32.mrb[36].mxu0 }
 0x253   :  { %v12766_v21 = vpop.f32.mrb[37].mxu0 }
 0x258   :  { %v944_v23 = vpop.f32.mrb[14].mxu1 }
 0x259   :  { %v948_v24 = vadd.f32 %v944_v23, %v873_v18  ;;  %v12645_v27 = vpop.f32.mrb[15].mxu1 }
 0x25a   :  { %v1926_v30 = vpop.f32.mrb[38].mxu0 }
 0x25b   :  { %v949_v58 = vadd.f32 %v15094_v52, %v948_v24  ;;  %v12788_v7 = vpop.f32.mrb[39].mxu0 }
 0x25d   :  { %v950_v25 = vmax.f32 %v949_v58, 0.0 }
 0x25f   :  { %951 = vst.msk [vmem:[#allocation3 + $0x6] sm:$0x3f] %vm649_vm5, %v950_v25 }
 0x260   :  { %v1096_v26 = vpop.f32.mrb[16].mxu1 }
 0x261   :  { %v1097_v28 = vadd.f32 %v1096_v26, %v15090_v34  ;;  %v12667_v29 = vpop.f32.mrb[17].mxu1 }
 0x262   :  { %v2073_v45 = vpop.f32.mrb[40].mxu0 }
 0x263   :  { %v1174_v32 = vadd.f32 %v15092_v43, %v1097_v28  ;;  %v12810_v33 = vpop.f32.mrb[41].mxu0 }
 0x268   :  { %v1245_v53 = vpop.f32.mrb[18].mxu1 }
 0x269   :  { %v1249_v35 = vadd.f32 %v1245_v53, %v1174_v32  ;;  %v12689_v36 = vpop.f32.mrb[19].mxu1 }
 0x26a   :  { %v2227_v37 = vpop.f32.mrb[42].mxu0 }
 0x26b   :  { %v1250_v38 = vadd.f32 %v15094_v52, %v1249_v35  ;;  %v12832_v12 = vpop.f32.mrb[43].mxu0 }
 0x26d   :  { %v1251_v39 = vmax.f32 %v1250_v38, 0.0 }
 0x26f   :  { %1252 = vst.msk [vmem:[#allocation3 + $0xc] sm:$0x3f] %vm649_vm5, %v1251_v39 }
 0x270   :  { %v1397_v40 = vpop.f32.mrb[20].mxu1 }
 0x271   :  { %v1398_v0 = vadd.f32 %v1397_v40, %v1324_v60  ;;  %v12711_v1 = vpop.f32.mrb[21].mxu1 }
 0x272   :  { %v2374_v22 = vpop.f32.mrb[44].mxu0 }
 0x273   :  { %v1475_v34 = vadd.f32 %v1471_v9, %v1398_v0  ;;  %v12854_v41 = vpop.f32.mrb[45].mxu0 }
 0x278   :  { %v1546_v42 = vpop.f32.mrb[22].mxu1 }
 0x279   :  { %v1550_v44 = vadd.f32 %v1546_v42, %v1475_v34  ;;  %v12733_v43 = vpop.f32.mrb[23].mxu1 }
 0x27a   :  { %v2529_v46 = vpop.f32.mrb[46].mxu0 }
 0x27b   :  { %v1551_v47 = vadd.f32 %v15094_v52, %v1550_v44  ;;  %v12876_v48 = vpop.f32.mrb[47].mxu0 }
 0x27c   :  { %v13419_v48 = vld [vmem:[#allocation9] ss:$16 sps:$4 sm:$0xff]  }
 0x27d   :  { %v1552_v49 = vmax.f32 %v1551_v47, 0.0 }
 0x27f   :  { %1553 = vst.msk [vmem:[#allocation3 + $0x12] sm:$0x3f] %vm649_vm5, %v1552_v49  ;;  %v13422_v49 = vld [vmem:[#allocation9 + $0x8] ss:$16 sps:$4 sm:$0xff]  }
 0x280   :  { %v1698_v50 = vpop.f32.mrb[24].mxu1 }
 0x281   :  { %v1699_v51 = vadd.f32 %v1698_v50, %v1625_v15  ;;  %v12755_v54 = vpop.f32.mrb[25].mxu1 }
 0x282   :  { %v2676_v55 = vpop.f32.mrb[48].mxu0  ;;  %v13427_v54 = vld [vmem:[#allocation9 + $0x24] ss:$16 sps:$4 sm:$0xff]  }
 0x283   :  { %v1776_v56 = vadd.f32 %v1772_v20, %v1699_v51  ;;  %v12898_v57 = vpop.f32.mrb[49].mxu0 }
 0x288   :  { %v1847_v59 = vpop.f32.mrb[26].mxu1 }
 0x289   :  { %v1851_v60 = vadd.f32 %v1847_v59, %v1776_v56  ;;  %v12777_v61 = vpop.f32.mrb[27].mxu1  ;;  %v13425_v59 = vld [vmem:[#allocation9 + $0x20] ss:$16 sps:$4 sm:$0xff]  }
 0x28a   :  { %v15108_v62 = vpop.f32.mrb[50].mxu0 }
 0x28b   :  { %v1852_v63 = vadd.f32 %v15094_v52, %v1851_v60  ;;  %v12920_v2 = vpop.f32.mrb[51].mxu0 }
 0x28c   :  { %v13433_v2 = vld [vmem:[#allocation9 + $0x44] ss:$16 sps:$4 sm:$0xff]  }
 0x28d   :  { %v1853_v31 = vmax.f32 %v1852_v63, 0.0  ;;  %v13428_v63 = vld [vmem:[#allocation9 + $0x28] ss:$16 sps:$4 sm:$0xff]  }
 0x28f   :  { %1854 = vst.msk [vmem:[#allocation3 + $0x18] sm:$0x3f] %vm649_vm5, %v1853_v31  ;;  %v13436_v31 = vld [vmem:[#allocation9 + $0x4c] ss:$16 sps:$4 sm:$0xff]  }
 0x290   :  { %v1999_v3 = vpop.f32.mrb[28].mxu1 }
 0x291   :  { %v2000_v4 = vadd.f32 %v1999_v3, %v1926_v30  ;;  %v12799_v6 = vpop.f32.mrb[29].mxu1  ;;  %v3963_v3 = vld [vmem:[#allocation3] sm:$0x1] }
 0x292   :  { %v15112_v8 = vpop.f32.mrb[52].mxu0 }
 0x293   :  { %v2077_v9 = vadd.f32 %v2073_v45, %v2000_v4  ;;  %v12942_v10 = vpop.f32.mrb[53].mxu0 }
 0x298   :  { %v2148_v11 = vpop.f32.mrb[30].mxu1 }
 0x299   :  { %v2152_v13 = vadd.f32 %v2148_v11, %v2077_v9  ;;  %v12821_v14 = vpop.f32.mrb[31].mxu1  ;;  %v13434_v11 = vld [vmem:[#allocation9 + $0x48] ss:$16 sps:$4 sm:$0xff]  }
 0x29a   :  { %v15114_v15 = vpop.f32.mrb[54].mxu0  ;;  %v13439_v14 = vld [vmem:[#allocation9 + $0x64] ss:$16 sps:$4 sm:$0xff]  }
 0x29b   :  { %v2153_v16 = vadd.f32 %v15094_v52, %v2152_v13  ;;  %v12964_v17 = vpop.f32.mrb[55].mxu0  ;;  %v3965_v13 = vpack.c.bf16 %v3963_v3, %v3963_v3 }
 0x29d   :  { %v2154_v18 = vmax.f32 %v2153_v16, 0.0  ;;  %v13442_v16 = vld [vmem:[#allocation9 + $0x6c] ss:$16 sps:$4 sm:$0xff]  }
 0x29f   :  { %2155 = vst.msk [vmem:[#allocation3 + $0x1e] sm:$0x3f] %vm649_vm5, %v2154_v18 }
 0x2a0   :  { %v2300_v19 = vpop.f32.mrb[32].mxu1 }
 0x2a1   :  { %v2301_v20 = vadd.f32 %v2300_v19, %v2227_v37  ;;  %v12843_v21 = vpop.f32.mrb[33].mxu1  ;;  %v3983_v37 = vld [vmem:[#allocation3 + $0x1] sm:$0x1] }
 0x2a2   :  { %v15118_v23 = vpop.f32.mrb[56].mxu0  ;;  %v3985_v12 = vpack.c.bf16 %v3983_v37, %v3983_v37  ;;  %v4180_v21 = vunpack.c.l.b16 %v3965_v13  ;;  %v13476_v13 = vld [vmem:[#allocation9 + $0x1a8] ss:$16 sps:$4 sm:$0xff]  }
 0x2a3   :  { %v2378_v24 = vadd.f32 %v2374_v22, %v2301_v20  ;;  %v12986_v27 = vpop.f32.mrb[57].mxu0  ;;  %v13440_v20 = vld [vmem:[#allocation9 + $0x68] ss:$16 sps:$4 sm:$0xff]  }
 0x2a4   :  { %v4006_v42 = vunpack.c.l.b16 %v3985_v12  ;;  %v13445_v27 = vld [vmem:[#allocation9 + $0x104] ss:$16 sps:$4 sm:$0xff]   ;;  %v13452_v12 = vld [vmem:[#allocation9 + $0x128] ss:$16 sps:$4 sm:$0xff]  }
 0x2a8   :  { %v2449_v30 = vpop.f32.mrb[34].mxu1 }
 0x2a9   :  { %v2453_v58 = vadd.f32 %v2449_v30, %v2378_v24  ;;  %v12865_v7 = vpop.f32.mrb[35].mxu1  ;;  %v13448_v30 = vld [vmem:[#allocation9 + $0x10c] ss:$16 sps:$4 sm:$0xff]  }
 0x2aa   :  { %v15120_v25 = vpop.f32.mrb[58].mxu0 }
 0x2ab   :  { %v2454_v26 = vadd.f32 %v15094_v52, %v2453_v58  ;;  %v13008_v28 = vpop.f32.mrb[59].mxu0 }
 0x2ad   :  { %v2455_v29 = vmax.f32 %v2454_v26, 0.0 }
 0x2af   :  { %2457 = vst.msk [vmem:[#allocation3 + $0x28] sm:$0x3f] %vm649_vm5, %v2455_v29  ;;  %v13443_v29 = vld [vmem:[#allocation9 + $0x100] ss:$16 sps:$4 sm:$0xff]  }
 0x2b0   :  { %v2602_v45 = vpop.f32.mrb[36].mxu1 }
 0x2b1   :  { %v2603_v32 = vadd.f32 %v2602_v45, %v2529_v46  ;;  %v12887_v33 = vpop.f32.mrb[37].mxu1  ;;  %v13446_v45 = vld [vmem:[#allocation9 + $0x108] ss:$16 sps:$4 sm:$0xff]  }
 0x2b2   :  { %v15124_v53 = vpop.f32.mrb[60].mxu0  ;;  %v13451_v33 = vld [vmem:[#allocation9 + $0x124] ss:$16 sps:$4 sm:$0xff]  }
 0x2b3   :  { %v2680_v35 = vadd.f32 %v2676_v55, %v2603_v32  ;;  %v13030_v36 = vpop.f32.mrb[61].mxu0  ;;  %v13430_v55 = vld [vmem:[#allocation9 + $0x2c] ss:$16 sps:$4 sm:$0xff]  }
 0x2b6   :  { %v3984_v38 = vld [vmem:[#allocation3 + $0x29] sm:$0x1]  ;;  %v3964_v46 = vld [vmem:[#allocation3 + $0x28] sm:$0x1]  ;;  %v4351_v26 = vld [vmem:[#allocation3 + $0x2a] sm:$0x1] }
 0x2b7   :  { %v3986_v39 = vpack.c.bf16 %v3984_v38, %v3984_v38  ;;  %v3966_v56 = vpack.c.bf16 %v3964_v46, %v3964_v46  ;;  %v4353_v36 = vpack.c.bf16 %v4351_v26, %v4351_v26  ;;  %v13449_v38 = vld [vmem:[#allocation9 + $0x120] ss:$16 sps:$4 sm:$0xff]  }
 0x2b8   :  { %v2751_v40 = vpop.f32.mrb[38].mxu1 }
 0x2b9   :  { %v2755_v0 = vadd.f32 %v2751_v40, %v2680_v35  ;;  %v12909_v1 = vpop.f32.mrb[39].mxu1  ;;  %v4007_v22 = vunpack.c.l.b16 %v3986_v39  ;;  %v4181_v9 = vunpack.c.l.b16 %v3966_v56  ;;  %v13454_v35 = vld [vmem:[#allocation9 + $0x12c] ss:$16 sps:$4 sm:$0xff]   ;;  %v13469_v56 = vld [vmem:[#allocation9 + $0x184] ss:$16 sps:$4 sm:$0xff]  }
 0x2ba   :  { %v15126_v34 = vpop.f32.mrb[62].mxu0  ;;  %v13460_v1 = vld [vmem:[#allocation9 + $0x14c] ss:$16 sps:$4 sm:$0xff]  }
 0x2bb   :  { %v2756_v41 = vadd.f32 %v15094_v52, %v2755_v0  ;;  %v4008_v44 = vrot.slane %v4007_v22, 7  ;;  %v13052_v43 = vpop.f32.mrb[63].mxu0  ;;  %v4182_v17 = vrot.slane %v4181_v9, 7  ;;  %v13457_v0 = vld [vmem:[#allocation9 + $0x144] ss:$16 sps:$4 sm:$0xff]  }
 0x2bc   :  { %v4350_v22 = vld [vmem:[#allocation3 + $0x2] sm:$0x1]  ;;  %v13458_v43 = vld [vmem:[#allocation9 + $0x148] ss:$16 sps:$4 sm:$0xff]  }
 0x2bd   :  { %v2757_v47 = vmax.f32 %v2756_v41, 0.0  ;;  %v4010_v50 = vsel %vm4009_vm6, %v4008_v44, %v4006_v42  ;;  %v4183_v7 = vsel %vm4009_vm6, %v4182_v17, %v4180_v21  ;;  %v4374_v42 = vunpack.c.l.b16 %v4353_v36  ;;  %v13455_v44 = vld [vmem:[#allocation9 + $0x140] ss:$16 sps:$4 sm:$0xff]   ;;  %v13478_v9 = vld [vmem:[#allocation9 + $0x1ac] ss:$16 sps:$4 sm:$0xff]  }
 0x2be   :  { %v4011_v51 = vpack.c.b16 %v4010_v50, %v4010_v50  ;;  %v4184_v32 = vpack.c.b16 %v4183_v7, %v4183_v7  ;;  %v4352_v46 = vpack.c.bf16 %v4350_v22, %v4350_v22  ;;  %v13481_v17 = vld [vmem:[#allocation9 + $0x1c4] ss:$16 sps:$4 sm:$0xff]   ;;  %v13479_v21 = vld [vmem:[#allocation9 + $0x1c0] ss:$16 sps:$4 sm:$0xff]  }
 0x2bf   :  { %2758 = vst.msk [vmem:[#allocation3 + $0x2e] sm:$0x3f] %vm649_vm5, %v2757_v47  ;;  %v13466_v47 = vld [vmem:[#allocation9 + $0x16c] ss:$16 sps:$4 sm:$0xff]  }
 0x2c0   :  { %v2903_v57 = vpop.f32.mrb[40].mxu1  ;;  %11536 = vmatmul.mubr.msk.bf16.vlgmr.msra.gmra.mrb[68].mxu0 %vm4092_vm7, %v4011_v51  ;;  %11537 = vmatmul.mubr.msk.bf16.vlgmr.msra.gmra.mrb[56].mxu1 %vm4092_vm7, %v4011_v51  ;;  %v13464_v51 = vld [vmem:[#allocation9 + $0x168] ss:$16 sps:$4 sm:$0xff]  }
 0x2c1   :  { %v2904_v60 = vadd.f32 %v2903_v57, %v15108_v62  ;;  %4269 = vmatpush1.bf16.msra.mxu0 %v13419_v48  ;;  %4310 = vmatpush1.bf16.msra.mxu1 %v13422_v49  ;;  %v12931_v61 = vpop.f32.mrb[41].mxu1  ;;  %v13431_v62 = vld [vmem:[#allocation9 + $0x40] ss:$16 sps:$4 sm:$0xff]   ;;  %v4375_v48 = vrot.slane %v4374_v42, 7  ;;  %v13472_v57 = vld [vmem:[#allocation9 + $0x18c] ss:$16 sps:$4 sm:$0xff]  }
 0x2c2   :  { %4270 = vmatprep.subr.bf16.mxu0 %v13427_v54  ;;  %4311 = vmatprep.subr.bf16.mxu1 %v13430_v55  ;;  %v15134_v4 = vpop.f32.mrb[64].mxu0  ;;  %v4373_v54 = vunpack.c.l.b16 %v4352_v46  ;;  %v4548_v61 = vld [vmem:[#allocation3 + $0x2b] sm:$0x1]  ;;  %v13497_v42 = vld [vmem:[#allocation9 + $0x220] ss:$16 sps:$4 sm:$0xff]  }
 0x2c3   :  { %v2981_v6 = vadd.f32 %v15112_v8, %v2904_v60  ;;  %4300 = vmatprep.mubr.bf16.mxu0 %v14441_v5  ;;  %4341 = vmatprep.mubr.bf16.mxu1 %v14441_v5  ;;  %v13074_v10 = vpop.f32.mrb[65].mxu0  ;;  %v13437_v8 = vld [vmem:[#allocation9 + $0x60] ss:$16 sps:$4 sm:$0xff]  }
 0x2c4   :  { %v4376_v60 = vsel %vm4009_vm6, %v4375_v48, %v4373_v54  ;;  %v4550_v10 = vpack.c.bf16 %v4548_v61, %v4548_v61  ;;  %v4744_v48 = vld [vmem:[#allocation3 + $0x4] sm:$0x1] }
 0x2c5   :  { %4271 = vmatpush1.bf16.msra.mxu0 %v13425_v59  ;;  %4312 = vmatpush1.bf16.msra.mxu1 %v13428_v63  ;;  %v4377_v3 = vpack.c.b16 %v4376_v60, %v4376_v60  ;;  %v4746_v54 = vpack.c.bf16 %v4744_v48, %v4744_v48  ;;  %v13512_v60 = vld [vmem:[#allocation9 + $0x268] ss:$16 sps:$4 sm:$0xff]  }
 0x2c6   :  { %4272 = vmatprep.subr.bf16.mxu0 %v13433_v2  ;;  %4313 = vmatprep.subr.bf16.mxu1 %v13436_v31  ;;  %v13467_v2 = vld [vmem:[#allocation9 + $0x180] ss:$16 sps:$4 sm:$0xff]   ;;  %v13470_v31 = vld [vmem:[#allocation9 + $0x188] ss:$16 sps:$4 sm:$0xff]  }
 0x2c7   :  { %v4767_v61 = vunpack.c.l.b16 %v4746_v54  ;;  %v13568_v54 = vld [vmem:[#allocation9 + $0x38c] ss:$16 sps:$4 sm:$0xff]  }
 0x2c8   :  { %v3052_v18 = vpop.f32.mrb[42].mxu1 }
 0x2c9   :  { %v3056_v19 = vadd.f32 %v3052_v18, %v2981_v6  ;;  %4273 = vmatpush1.bf16.msra.mxu0 %v13431_v62  ;;  %4314 = vmatpush1.bf16.msra.mxu1 %v13434_v11  ;;  %v12953_v24 = vpop.f32.mrb[43].mxu1  ;;  %v13475_v6 = vld [vmem:[#allocation9 + $0x1a4] ss:$16 sps:$4 sm:$0xff]   ;;  %v13473_v11 = vld [vmem:[#allocation9 + $0x1a0] ss:$16 sps:$4 sm:$0xff]  }
 0x2ca   :  { %4274 = vmatprep.subr.bf16.mxu0 %v13439_v14  ;;  %4315 = vmatprep.subr.bf16.mxu1 %v13442_v16  ;;  %v13484_v18 = vld [vmem:[#allocation9 + $0x1cc] ss:$16 sps:$4 sm:$0xff]   ;;  %v13482_v24 = vld [vmem:[#allocation9 + $0x1c8] ss:$16 sps:$4 sm:$0xff]  }
 0x2cb   :  { %v3057_v58 = vadd.f32 %v15094_v52, %v3056_v19  ;;  %v4547_v19 = vld [vmem:[#allocation3 + $0x3] sm:$0x1] }
 0x2cd   :  { %v3058_v28 = vmax.f32 %v3057_v58, 0.0  ;;  %4275 = vmatpush1.bf16.msra.mxu0 %v13437_v8  ;;  %4316 = vmatpush1.bf16.msra.mxu1 %v13440_v20  ;;  %v4571_v20 = vunpack.c.l.b16 %v4550_v10 }
 0x2ce   :  { %4461 = vmatprep.subr.bf16.mxu0 %v13445_v27  ;;  %4502 = vmatprep.subr.bf16.mxu1 %v13448_v30  ;;  %v4549_v27 = vpack.c.bf16 %v4547_v19, %v4547_v19  ;;  %v13490_v30 = vld [vmem:[#allocation9 + $0x1ec] ss:$16 sps:$4 sm:$0xff]   ;;  %v13529_v19 = vld [vmem:[#allocation9 + $0x2c4] ss:$16 sps:$4 sm:$0xff]  }
 0x2cf   :  { %3059 = vst.msk [vmem:[#allocation3 + $0x34] sm:$0x3f] %vm649_vm5, %v3058_v28  ;;  %v4572_v58 = vrot.slane %v4571_v20, 7  ;;  %v13488_v28 = vld [vmem:[#allocation9 + $0x1e8] ss:$16 sps:$4 sm:$0xff]  }
 0x2d0   :  { %11554 = vmatmul.mubr.msk.bf16.vlgmr.msra.gmra.mrb[72].mxu0 %vm4092_vm7, %v4184_v32  ;;  %11555 = vmatmul.mubr.msk.bf16.vlgmr.msra.gmra.mrb[60].mxu1 %vm4092_vm7, %v4184_v32  ;;  %v3204_v37 = vpop.f32.mrb[44].mxu1  ;;  %v13493_v32 = vld [vmem:[#allocation9 + $0x204] ss:$16 sps:$4 sm:$0xff]   ;;  %v4941_v20 = vld [vmem:[#allocation3 + $0x5] sm:$0x1] }
 0x2d1   :  { %4462 = vmatpush1.bf16.msra.mxu0 %v13443_v29  ;;  %4503 = vmatpush1.bf16.msra.mxu1 %v13446_v45  ;;  %v3205_v39 = vadd.f32 %v3204_v37, %v15114_v15  ;;  %v12975_v40 = vpop.f32.mrb[45].mxu1  ;;  %v13463_v15 = vld [vmem:[#allocation9 + $0x164] ss:$16 sps:$4 sm:$0xff]   ;;  %v4570_v29 = vunpack.c.l.b16 %v4549_v27  ;;  %v4745_v37 = vld [vmem:[#allocation3 + $0x2c] sm:$0x1] }
 0x2d2   :  { %4463 = vmatprep.subr.bf16.mxu0 %v13451_v33  ;;  %4504 = vmatprep.subr.bf16.mxu1 %v13454_v35  ;;  %v13496_v33 = vld [vmem:[#allocation9 + $0x20c] ss:$16 sps:$4 sm:$0xff]   ;;  %v4747_v22 = vpack.c.bf16 %v4745_v37, %v4745_v37  ;;  %v13530_v27 = vld [vmem:[#allocation9 + $0x2c8] ss:$16 sps:$4 sm:$0xff]  }
 0x2d3   :  { %v3282_v41 = vadd.f32 %v15118_v23, %v3205_v39  ;;  %4493 = vmatprep.mubr.bf16.mxu0 %v14441_v5  ;;  %4534 = vmatprep.mubr.bf16.mxu1 %v14441_v5  ;;  %v13461_v23 = vld [vmem:[#allocation9 + $0x160] ss:$16 sps:$4 sm:$0xff]   ;;  %v4573_v36 = vsel %vm4009_vm6, %v4572_v58, %v4570_v29  ;;  %v13494_v39 = vld [vmem:[#allocation9 + $0x208] ss:$16 sps:$4 sm:$0xff]   ;;  %v13538_v58 = vld [vmem:[#allocation9 + $0x2ec] ss:$16 sps:$4 sm:$0xff]  }
 0x2d4   :  { %v4574_v40 = vpack.c.b16 %v4573_v36, %v4573_v36  ;;  %v13541_v29 = vld [vmem:[#allocation9 + $0x304] ss:$16 sps:$4 sm:$0xff]   ;;  %v13542_v36 = vld [vmem:[#allocation9 + $0x308] ss:$16 sps:$4 sm:$0xff]  }
 0x2d5   :  { %4464 = vmatpush1.bf16.msra.mxu0 %v13449_v38  ;;  %4505 = vmatpush1.bf16.msra.mxu1 %v13452_v12  ;;  %v13491_v12 = vld [vmem:[#allocation9 + $0x200] ss:$16 sps:$4 sm:$0xff]  }
 0x2d6   :  { %4465 = vmatprep.subr.bf16.mxu0 %v13457_v0  ;;  %4506 = vmatprep.subr.bf16.mxu1 %v13460_v1  ;;  %v13499_v0 = vld [vmem:[#allocation9 + $0x224] ss:$16 sps:$4 sm:$0xff]   ;;  %v13502_v1 = vld [vmem:[#allocation9 + $0x22c] ss:$16 sps:$4 sm:$0xff]  }
 0x2d8   :  { %v3353_v49 = vpop.f32.mrb[46].mxu1 }
 0x2d9   :  { %v3357_v50 = vadd.f32 %v3353_v49, %v3282_v41  ;;  %4466 = vmatpush1.bf16.msra.mxu0 %v13455_v44  ;;  %4507 = vmatpush1.bf16.msra.mxu1 %v13458_v43  ;;  %v12997_v55 = vpop.f32.mrb[47].mxu1  ;;  %v13500_v44 = vld [vmem:[#allocation9 + $0x228] ss:$16 sps:$4 sm:$0xff]  }
 0x2da   :  { %4467 = vmatprep.subr.bf16.mxu0 %v13463_v15  ;;  %4508 = vmatprep.subr.bf16.mxu1 %v13466_v47  ;;  %v13505_v15 = vld [vmem:[#allocation9 + $0x244] ss:$16 sps:$4 sm:$0xff]   ;;  %v13508_v47 = vld [vmem:[#allocation9 + $0x24c] ss:$16 sps:$4 sm:$0xff]  }
 0x2db   :  { %v3358_v59 = vadd.f32 %v15094_v52, %v3357_v50  ;;  %v4768_v50 = vunpack.c.l.b16 %v4747_v22  ;;  %v13514_v55 = vld [vmem:[#allocation9 + $0x26c] ss:$16 sps:$4 sm:$0xff]  }
 0x2dc   :  { %v13556_v22 = vld [vmem:[#allocation9 + $0x34c] ss:$16 sps:$4 sm:$0xff]  }
 0x2dd   :  { %v3359_v63 = vmax.f32 %v3358_v59, 0.0  ;;  %4468 = vmatpush1.bf16.msra.mxu0 %v13461_v23  ;;  %4509 = vmatpush1.bf16.msra.mxu1 %v13464_v51  ;;  %v13503_v23 = vld [vmem:[#allocation9 + $0x240] ss:$16 sps:$4 sm:$0xff]   ;;  %v13506_v51 = vld [vmem:[#allocation9 + $0x248] ss:$16 sps:$4 sm:$0xff]  }
 0x2de   :  { %4658 = vmatprep.subr.bf16.mxu0 %v13469_v56  ;;  %4699 = vmatprep.subr.bf16.mxu1 %v13472_v57  ;;  %v4769_v56 = vrot.slane %v4768_v50, 7  ;;  %v13560_v50 = vld [vmem:[#allocation9 + $0x368] ss:$16 sps:$4 sm:$0xff]  }
 0x2df   :  { %3360 = vst.msk [vmem:[#allocation3 + $0x3a] sm:$0x3f] %vm649_vm5, %v3359_v63 }
 0x2e0   :  { %11572 = vmatmul.mubr.msk.bf16.vlgmr.msra.gmra.mrb[76].mxu0 %vm4092_vm7, %v4377_v3  ;;  %11573 = vmatmul.mubr.msk.bf16.vlgmr.msra.gmra.mrb[64].mxu1 %vm4092_vm7, %v4377_v3  ;;  %v3505_v62 = vpop.f32.mrb[48].mxu1 }
 0x2e1   :  { %4659 = vmatpush1.bf16.msra.mxu0 %v13467_v2  ;;  %4700 = vmatpush1.bf16.msra.mxu1 %v13470_v31  ;;  %v3506_v14 = vadd.f32 %v3505_v62, %v15120_v25  ;;  %v13019_v16 = vpop.f32.mrb[49].mxu1  ;;  %v13487_v25 = vld [vmem:[#allocation9 + $0x1e4] ss:$16 sps:$4 sm:$0xff]   ;;  %v13520_v31 = vld [vmem:[#allocation9 + $0x28c] ss:$16 sps:$4 sm:$0xff]  }
 0x2e2   :  { %4660 = vmatprep.subr.bf16.mxu0 %v13475_v6  ;;  %4701 = vmatprep.subr.bf16.mxu1 %v13478_v9  ;;  %v13517_v2 = vld [vmem:[#allocation9 + $0x284] ss:$16 sps:$4 sm:$0xff]   ;;  %v4770_v6 = vsel %vm4009_vm6, %v4769_v56, %v4767_v61  ;;  %v4942_v9 = vld [vmem:[#allocation3 + $0x2d] sm:$0x1]  ;;  %v13515_v62 = vld [vmem:[#allocation9 + $0x280] ss:$16 sps:$4 sm:$0xff]  }
 0x2e3   :  { %v3583_v8 = vadd.f32 %v15124_v53, %v3506_v14  ;;  %4690 = vmatprep.mubr.bf16.mxu0 %v14441_v5  ;;  %4731 = vmatprep.mubr.bf16.mxu1 %v14441_v5  ;;  %v13485_v53 = vld [vmem:[#allocation9 + $0x1e0] ss:$16 sps:$4 sm:$0xff]   ;;  %v13523_v14 = vld [vmem:[#allocation9 + $0x2a4] ss:$16 sps:$4 sm:$0xff]   ;;  %v13526_v16 = vld [vmem:[#allocation9 + $0x2ac] ss:$16 sps:$4 sm:$0xff]  }
 0x2e4   :  { %v13563_v56 = vld [vmem:[#allocation9 + $0x380] ss:$16 sps:$4 sm:$0xff]  }
 0x2e5   :  { %4661 = vmatpush1.bf16.msra.mxu0 %v13473_v11  ;;  %4702 = vmatpush1.bf16.msra.mxu1 %v13476_v13  ;;  %v13518_v11 = vld [vmem:[#allocation9 + $0x288] ss:$16 sps:$4 sm:$0xff]   ;;  %v4771_v13 = vpack.c.b16 %v4770_v6, %v4770_v6  ;;  %v5335_v6 = vld [vmem:[#allocation3 + $0x7] sm:$0x1] }
 0x2e6   :  { %4662 = vmatprep.subr.bf16.mxu0 %v13481_v17  ;;  %4703 = vmatprep.subr.bf16.mxu1 %v13484_v18  ;;  %v4944_v17 = vpack.c.bf16 %v4942_v9, %v4942_v9  ;;  %v13524_v18 = vld [vmem:[#allocation9 + $0x2a8] ss:$16 sps:$4 sm:$0xff]  }
 0x2e8   :  { %v3654_v7 = vpop.f32.mrb[50].mxu1 }
 0x2e9   :  { %v3658_v26 = vadd.f32 %v3654_v7, %v3583_v8  ;;  %4663 = vmatpush1.bf16.msra.mxu0 %v13479_v21  ;;  %4704 = vmatpush1.bf16.msra.mxu1 %v13482_v24  ;;  %v13041_v45 = vpop.f32.mrb[51].mxu1  ;;  %v13532_v8 = vld [vmem:[#allocation9 + $0x2cc] ss:$16 sps:$4 sm:$0xff]   ;;  %v4965_v21 = vunpack.c.l.b16 %v4944_v17  ;;  %v13527_v24 = vld [vmem:[#allocation9 + $0x2c0] ss:$16 sps:$4 sm:$0xff]  }
 0x2ea   :  { %4664 = vmatprep.subr.bf16.mxu0 %v13487_v25  ;;  %4705 = vmatprep.subr.bf16.mxu1 %v13490_v30  ;;  %v4943_v25 = vpack.c.bf16 %v4941_v20, %v4941_v20  ;;  %v13535_v30 = vld [vmem:[#allocation9 + $0x2e4] ss:$16 sps:$4 sm:$0xff]   ;;  %v13544_v45 = vld [vmem:[#allocation9 + $0x30c] ss:$16 sps:$4 sm:$0xff]   ;;  %v13581_v17 = vld [vmem:[#allocation9 + $0x3e0] ss:$16 sps:$4 sm:$0xff]  }
 0x2eb   :  { %v3659_v35 = vadd.f32 %v15094_v52, %v3658_v26  ;;  %v4966_v7 = vrot.slane %v4965_v21, 7  ;;  %v13533_v26 = vld [vmem:[#allocation9 + $0x2e0] ss:$16 sps:$4 sm:$0xff]   ;;  %v5533_v21 = vld [vmem:[#allocation3 + $0x30] sm:$0x1] }
 0x2ed   :  { %v3660_v38 = vmax.f32 %v3659_v35, 0.0  ;;  %4665 = vmatpush1.bf16.msra.mxu0 %v13485_v53  ;;  %4706 = vmatpush1.bf16.msra.mxu1 %v13488_v28  ;;  %v13536_v53 = vld [vmem:[#allocation9 + $0x2e8] ss:$16 sps:$4 sm:$0xff]   ;;  %v4964_v28 = vunpack.c.l.b16 %v4943_v25  ;;  %v13539_v35 = vld [vmem:[#allocation9 + $0x300] ss:$16 sps:$4 sm:$0xff]  }
 0x2ee   :  { %4855 = vmatprep.subr.bf16.mxu0 %v13493_v32  ;;  %4896 = vmatprep.subr.bf16.mxu1 %v13496_v33  ;;  %v5139_v33 = vld [vmem:[#allocation3 + $0x2e] sm:$0x1] }
 0x2ef   :  { %3661 = vst.msk [vmem:[#allocation3 + $0x40] sm:$0x3f] %vm649_vm5, %v3660_v38  ;;  %v4967_v32 = vsel %vm4009_vm6, %v4966_v7, %v4964_v28  ;;  %v13547_v38 = vld [vmem:[#allocation9 + $0x324] ss:$16 sps:$4 sm:$0xff]   ;;  %v5535_v7 = vpack.c.bf16 %v5533_v21, %v5533_v21  ;;  %v13647_v21 = vld [vmem:[#allocation9 + $0x540] ss:$16 sps:$4 sm:$0xff]  }
 0x2f0   :  { %11590 = vmatmul.mubr.msk.bf16.vlgmr.msra.gmra.mrb[80].mxu0 %vm4092_vm7, %v4574_v40  ;;  %11591 = vmatmul.mubr.msk.bf16.vlgmr.msra.gmra.mrb[68].mxu1 %vm4092_vm7, %v4574_v40  ;;  %v3806_v41 = vpop.f32.mrb[52].mxu1  ;;  %v4968_v37 = vpack.c.b16 %v4967_v32, %v4967_v32  ;;  %v13545_v40 = vld [vmem:[#allocation9 + $0x320] ss:$16 sps:$4 sm:$0xff]   ;;  %v13601_v28 = vld [vmem:[#allocation9 + $0x444] ss:$16 sps:$4 sm:$0xff]  }
 0x2f1   :  { %4856 = vmatpush1.bf16.msra.mxu0 %v13491_v12  ;;  %4897 = vmatpush1.bf16.msra.mxu1 %v13494_v39  ;;  %v3807_v43 = vadd.f32 %v3806_v41, %v15126_v34  ;;  %v13063_v46 = vpop.f32.mrb[53].mxu1  ;;  %v13511_v34 = vld [vmem:[#allocation9 + $0x264] ss:$16 sps:$4 sm:$0xff]   ;;  %v13550_v12 = vld [vmem:[#allocation9 + $0x32c] ss:$16 sps:$4 sm:$0xff]   ;;  %v5141_v39 = vpack.c.bf16 %v5139_v33, %v5139_v33  ;;  %v5556_v32 = vunpack.c.l.b16 %v5535_v7 }
 0x2f2   :  { %4857 = vmatprep.subr.bf16.mxu0 %v13499_v0  ;;  %4898 = vmatprep.subr.bf16.mxu1 %v13502_v1  ;;  %v13548_v0 = vld [vmem:[#allocation9 + $0x328] ss:$16 sps:$4 sm:$0xff]   ;;  %v13553_v1 = vld [vmem:[#allocation9 + $0x344] ss:$16 sps:$4 sm:$0xff]   ;;  %v5138_v41 = vld [vmem:[#allocation3 + $0x6] sm:$0x1] }
 0x2f3   :  { %v3884_v49 = vadd.f32 %v15134_v4, %v3807_v43  ;;  %4887 = vmatprep.mubr.bf16.mxu0 %v14441_v5  ;;  %4928 = vmatprep.mubr.bf16.mxu1 %v14441_v5  ;;  %v13509_v4 = vld [vmem:[#allocation9 + $0x260] ss:$16 sps:$4 sm:$0xff]   ;;  %v13554_v43 = vld [vmem:[#allocation9 + $0x348] ss:$16 sps:$4 sm:$0xff]   ;;  %v5140_v46 = vpack.c.bf16 %v5138_v41, %v5138_v41 }
 0x2f4   :  { %v13599_v33 = vld [vmem:[#allocation9 + $0x440] ss:$16 sps:$4 sm:$0xff]  }
 0x2f5   :  { %4858 = vmatpush1.bf16.msra.mxu0 %v13497_v42  ;;  %4899 = vmatpush1.bf16.msra.mxu1 %v13500_v44  ;;  %v5162_v42 = vunpack.c.l.b16 %v5141_v39  ;;  %v13551_v44 = vld [vmem:[#allocation9 + $0x340] ss:$16 sps:$4 sm:$0xff]  }
 0x2f6   :  { %4859 = vmatprep.subr.bf16.mxu0 %v13505_v15  ;;  %4900 = vmatprep.subr.bf16.mxu1 %v13508_v47  ;;  %v13559_v15 = vld [vmem:[#allocation9 + $0x364] ss:$16 sps:$4 sm:$0xff]   ;;  %v13562_v47 = vld [vmem:[#allocation9 + $0x36c] ss:$16 sps:$4 sm:$0xff]   ;;  %v13605_v39 = vld [vmem:[#allocation9 + $0x460] ss:$16 sps:$4 sm:$0xff]  }
 0x2f7   :  { %v5163_v48 = vrot.slane %v5162_v42, 7  ;;  %v5730_v42 = vld [vmem:[#allocation3 + $0x31] sm:$0x1]  ;;  %v13653_v7 = vld [vmem:[#allocation9 + $0x560] ss:$16 sps:$4 sm:$0xff]  }
 0x2f8   :  { %v3955_v57 = vpop.f32.mrb[54].mxu1 }
 0x2f9   :  { %v3959_v59 = vadd.f32 %v3955_v57, %v3884_v49  ;;  %4860 = vmatpush1.bf16.msra.mxu0 %v13503_v23  ;;  %4901 = vmatpush1.bf16.msra.mxu1 %v13506_v51  ;;  %v13085_v63 = vpop.f32.mrb[55].mxu1  ;;  %v13557_v49 = vld [vmem:[#allocation9 + $0x360] ss:$16 sps:$4 sm:$0xff]   ;;  %v5161_v23 = vunpack.c.l.b16 %v5140_v46  ;;  %v13565_v51 = vld [vmem:[#allocation9 + $0x384] ss:$16 sps:$4 sm:$0xff]  }
 0x2fa   :  { %4861 = vmatprep.subr.bf16.mxu0 %v13511_v34  ;;  %4902 = vmatprep.subr.bf16.mxu1 %v13514_v55  ;;  %v5336_v55 = vld [vmem:[#allocation3 + $0x2f] sm:$0x1]  ;;  %v13569_v63 = vld [vmem:[#allocation9 + $0x3a0] ss:$16 sps:$4 sm:$0xff]  }
 0x2fb   :  { %v3960_v3 = vadd.f32 %v15094_v52, %v3959_v59  ;;  %v13521_v52 = vld [vmem:[#allocation9 + $0x2a0] ss:$16 sps:$4 sm:$0xff]   ;;  %v5164_v34 = vsel %vm4009_vm6, %v5163_v48, %v5161_v23  ;;  %v13566_v57 = vld [vmem:[#allocation9 + $0x388] ss:$16 sps:$4 sm:$0xff]   ;;  %v5338_v61 = vpack.c.bf16 %v5336_v55, %v5336_v55  ;;  %v5732_v48 = vpack.c.bf16 %v5730_v42, %v5730_v42  ;;  %v13625_v23 = vld [vmem:[#allocation9 + $0x4c4] ss:$16 sps:$4 sm:$0xff]  }
 0x2fc   :  { %v5165_v59 = vpack.c.b16 %v5164_v34, %v5164_v34  ;;  %v13623_v55 = vld [vmem:[#allocation9 + $0x4c0] ss:$16 sps:$4 sm:$0xff]  }
 0x2fd   :  { %v3961_v10 = vmax.f32 %v3960_v3, 0.0  ;;  %4862 = vmatpush1.bf16.msra.mxu0 %v13509_v4  ;;  %4903 = vmatpush1.bf16.msra.mxu1 %v13512_v60  ;;  %v13571_v4 = vld [vmem:[#allocation9 + $0x3a4] ss:$16 sps:$4 sm:$0xff]   ;;  %v13574_v60 = vld [vmem:[#allocation9 + $0x3ac] ss:$16 sps:$4 sm:$0xff]   ;;  %v5359_v9 = vunpack.c.l.b16 %v5338_v61  ;;  %v5753_v34 = vunpack.c.l.b16 %v5732_v48 }
 0x2fe   :  { %5052 = vmatprep.subr.bf16.mxu0 %v13517_v2  ;;  %5093 = vmatprep.subr.bf16.mxu1 %v13520_v31  ;;  %v13572_v2 = vld [vmem:[#allocation9 + $0x3a8] ss:$16 sps:$4 sm:$0xff]   ;;  %v13577_v31 = vld [vmem:[#allocation9 + $0x3c4] ss:$16 sps:$4 sm:$0xff]   ;;  %v13580_v3 = vld [vmem:[#allocation9 + $0x3cc] ss:$16 sps:$4 sm:$0xff]  }
 0x2ff   :  { %3962 = vst.msk [vmem:[#allocation3 + $0x46] sm:$0x3f] %vm649_vm5, %v3961_v10  ;;  %v13575_v10 = vld [vmem:[#allocation9 + $0x3c0] ss:$16 sps:$4 sm:$0xff]  }
 0x300   :  { %11608 = vmatmul.mubr.msk.bf16.vlgmr.msra.gmra.mrb[84].mxu0 %vm4092_vm7, %v4771_v13  ;;  %11609 = vmatmul.mubr.msk.bf16.vlgmr.msra.gmra.mrb[72].mxu1 %vm4092_vm7, %v4771_v13  ;;  %v13583_v13 = vld [vmem:[#allocation9 + $0x3e4] ss:$16 sps:$4 sm:$0xff]   ;;  %v13629_v61 = vld [vmem:[#allocation9 + $0x4e0] ss:$16 sps:$4 sm:$0xff]  }
 0x301   :  { %5053 = vmatpush1.bf16.msra.mxu0 %v13515_v62  ;;  %5094 = vmatpush1.bf16.msra.mxu1 %v13518_v11  ;;  %v13578_v62 = vld [vmem:[#allocation9 + $0x3c8] ss:$16 sps:$4 sm:$0xff]   ;;  %v5337_v11 = vpack.c.bf16 %v5335_v6, %v5335_v6  ;;  %v13671_v42 = vld [vmem:[#allocation9 + $0x5c0] ss:$16 sps:$4 sm:$0xff]  }
 0x302   :  { %5054 = vmatprep.subr.bf16.mxu0 %v13523_v14  ;;  %5095 = vmatprep.subr.bf16.mxu1 %v13526_v16  ;;  %v13586_v14 = vld [vmem:[#allocation9 + $0x3ec] ss:$16 sps:$4 sm:$0xff]   ;;  %v5360_v16 = vrot.slane %v5359_v9, 7  ;;  %v13677_v48 = vld [vmem:[#allocation9 + $0x5e0] ss:$16 sps:$4 sm:$0xff]  }
 0x303   :  { %5084 = vmatprep.mubr.bf16.mxu0 %v14441_v5  ;;  %5125 = vmatprep.mubr.bf16.mxu1 %v14441_v5  ;;  %v5927_v9 = vld [vmem:[#allocation3 + $0x32] sm:$0x1] }
 0x305   :  { %5055 = vmatpush1.bf16.msra.mxu0 %v13521_v52  ;;  %5096 = vmatpush1.bf16.msra.mxu1 %v13524_v18  ;;  %v13584_v52 = vld [vmem:[#allocation9 + $0x3e8] ss:$16 sps:$4 sm:$0xff]   ;;  %v5358_v18 = vunpack.c.l.b16 %v5337_v11 }
 0x306   :  { %5056 = vmatprep.subr.bf16.mxu0 %v13529_v19  ;;  %5097 = vmatprep.subr.bf16.mxu1 %v13532_v8  ;;  %v13589_v19 = vld [vmem:[#allocation9 + $0x404] ss:$16 sps:$4 sm:$0xff]   ;;  %v13592_v8 = vld [vmem:[#allocation9 + $0x40c] ss:$16 sps:$4 sm:$0xff]  }
 0x307   :  { %v5361_v20 = vsel %vm4009_vm6, %v5360_v16, %v5358_v18  ;;  %v5929_v16 = vpack.c.bf16 %v5927_v9, %v5927_v9  ;;  %v13649_v18 = vld [vmem:[#allocation9 + $0x544] ss:$16 sps:$4 sm:$0xff]   ;;  %v13695_v9 = vld [vmem:[#allocation9 + $0x640] ss:$16 sps:$4 sm:$0xff]  }
 0x308   :  { %v5362_v25 = vpack.c.b16 %v5361_v20, %v5361_v20 }
 0x309   :  { %5057 = vmatpush1.bf16.msra.mxu0 %v13527_v24  ;;  %5098 = vmatpush1.bf16.msra.mxu1 %v13530_v27  ;;  %v13587_v24 = vld [vmem:[#allocation9 + $0x400] ss:$16 sps:$4 sm:$0xff]   ;;  %v13590_v27 = vld [vmem:[#allocation9 + $0x408] ss:$16 sps:$4 sm:$0xff]   ;;  %v5950_v20 = vunpack.c.l.b16 %v5929_v16 }
 0x30a   :  { %5058 = vmatprep.subr.bf16.mxu0 %v13535_v30  ;;  %5099 = vmatprep.subr.bf16.mxu1 %v13538_v58  ;;  %v13595_v30 = vld [vmem:[#allocation9 + $0x424] ss:$16 sps:$4 sm:$0xff]   ;;  %v13598_v58 = vld [vmem:[#allocation9 + $0x42c] ss:$16 sps:$4 sm:$0xff]   ;;  %v13701_v16 = vld [vmem:[#allocation9 + $0x660] ss:$16 sps:$4 sm:$0xff]  }
 0x30d   :  { %5059 = vmatpush1.bf16.msra.mxu0 %v13533_v26  ;;  %5100 = vmatpush1.bf16.msra.mxu1 %v13536_v53  ;;  %v13593_v26 = vld [vmem:[#allocation9 + $0x420] ss:$16 sps:$4 sm:$0xff]   ;;  %v13596_v53 = vld [vmem:[#allocation9 + $0x428] ss:$16 sps:$4 sm:$0xff]  }
 0x30e   :  { %5249 = vmatprep.subr.bf16.mxu0 %v13541_v29  ;;  %5290 = vmatprep.subr.bf16.mxu1 %v13544_v45  ;;  %v13604_v29 = vld [vmem:[#allocation9 + $0x44c] ss:$16 sps:$4 sm:$0xff]   ;;  %v5532_v45 = vld [vmem:[#allocation3 + $0x8] sm:$0x1] }
 0x310   :  { %11626 = vmatmul.mubr.msk.bf16.vlgmr.msra.gmra.mrb[88].mxu0 %vm4092_vm7, %v4968_v37  ;;  %11627 = vmatmul.mubr.msk.bf16.vlgmr.msra.gmra.mrb[76].mxu1 %vm4092_vm7, %v4968_v37  ;;  %v13607_v37 = vld [vmem:[#allocation9 + $0x464] ss:$16 sps:$4 sm:$0xff]  }
 0x311   :  { %5250 = vmatpush1.bf16.msra.mxu0 %v13539_v35  ;;  %5291 = vmatpush1.bf16.msra.mxu1 %v13542_v36  ;;  %v13602_v35 = vld [vmem:[#allocation9 + $0x448] ss:$16 sps:$4 sm:$0xff]   ;;  %v5534_v36 = vpack.c.bf16 %v5532_v45, %v5532_v45 }
 0x312   :  { %5251 = vmatprep.subr.bf16.mxu0 %v13547_v38  ;;  %5292 = vmatprep.subr.bf16.mxu1 %v13550_v12  ;;  %v13610_v38 = vld [vmem:[#allocation9 + $0x46c] ss:$16 sps:$4 sm:$0xff]   ;;  %v5557_v12 = vrot.slane %v5556_v32, 7 }
 0x313   :  { %5281 = vmatprep.mubr.bf16.mxu0 %v14441_v5  ;;  %5322 = vmatprep.mubr.bf16.mxu1 %v14441_v5  ;;  %v6124_v32 = vld [vmem:[#allocation3 + $0x33] sm:$0x1] }
 0x315   :  { %5252 = vmatpush1.bf16.msra.mxu0 %v13545_v40  ;;  %5293 = vmatpush1.bf16.msra.mxu1 %v13548_v0  ;;  %v13608_v40 = vld [vmem:[#allocation9 + $0x468] ss:$16 sps:$4 sm:$0xff]   ;;  %v5555_v0 = vunpack.c.l.b16 %v5534_v36 }
 0x316   :  { %5253 = vmatprep.subr.bf16.mxu0 %v13553_v1  ;;  %5294 = vmatprep.subr.bf16.mxu1 %v13556_v22  ;;  %v13613_v1 = vld [vmem:[#allocation9 + $0x484] ss:$16 sps:$4 sm:$0xff]   ;;  %v13616_v22 = vld [vmem:[#allocation9 + $0x48c] ss:$16 sps:$4 sm:$0xff]  }
 0x317   :  { %v5558_v41 = vsel %vm4009_vm6, %v5557_v12, %v5555_v0  ;;  %v6126_v12 = vpack.c.bf16 %v6124_v32, %v6124_v32  ;;  %v13673_v0 = vld [vmem:[#allocation9 + $0x5c4] ss:$16 sps:$4 sm:$0xff]   ;;  %v13719_v32 = vld [vmem:[#allocation9 + $0x6c0] ss:$16 sps:$4 sm:$0xff]  }
 0x318   :  { %v5559_v46 = vpack.c.b16 %v5558_v41, %v5558_v41 }
 0x319   :  { %5254 = vmatpush1.bf16.msra.mxu0 %v13551_v44  ;;  %5295 = vmatpush1.bf16.msra.mxu1 %v13554_v43  ;;  %v13611_v44 = vld [vmem:[#allocation9 + $0x480] ss:$16 sps:$4 sm:$0xff]   ;;  %v13614_v43 = vld [vmem:[#allocation9 + $0x488] ss:$16 sps:$4 sm:$0xff]   ;;  %v6147_v41 = vunpack.c.l.b16 %v6126_v12 }
 0x31a   :  { %5255 = vmatprep.subr.bf16.mxu0 %v13559_v15  ;;  %5296 = vmatprep.subr.bf16.mxu1 %v13562_v47  ;;  %v13619_v15 = vld [vmem:[#allocation9 + $0x4a4] ss:$16 sps:$4 sm:$0xff]   ;;  %v13622_v47 = vld [vmem:[#allocation9 + $0x4ac] ss:$16 sps:$4 sm:$0xff]   ;;  %v13725_v12 = vld [vmem:[#allocation9 + $0x6e0] ss:$16 sps:$4 sm:$0xff]  }
 0x31d   :  { %5256 = vmatpush1.bf16.msra.mxu0 %v13557_v49  ;;  %5297 = vmatpush1.bf16.msra.mxu1 %v13560_v50  ;;  %v13617_v49 = vld [vmem:[#allocation9 + $0x4a0] ss:$16 sps:$4 sm:$0xff]   ;;  %v13620_v50 = vld [vmem:[#allocation9 + $0x4a8] ss:$16 sps:$4 sm:$0xff]  }
 0x31e   :  { %5446 = vmatprep.subr.bf16.mxu0 %v13565_v51  ;;  %5487 = vmatprep.subr.bf16.mxu1 %v13568_v54  ;;  %v13628_v51 = vld [vmem:[#allocation9 + $0x4cc] ss:$16 sps:$4 sm:$0xff]   ;;  %v5729_v54 = vld [vmem:[#allocation3 + $0x9] sm:$0x1] }
 0x320   :  { %11644 = vmatmul.mubr.msk.bf16.vlgmr.msra.gmra.mrb[92].mxu0 %vm4092_vm7, %v5165_v59  ;;  %11645 = vmatmul.mubr.msk.bf16.vlgmr.msra.gmra.mrb[80].mxu1 %vm4092_vm7, %v5165_v59  ;;  %v13631_v59 = vld [vmem:[#allocation9 + $0x4e4] ss:$16 sps:$4 sm:$0xff]  }
 0x321   :  { %5447 = vmatpush1.bf16.msra.mxu0 %v13563_v56  ;;  %5488 = vmatpush1.bf16.msra.mxu1 %v13566_v57  ;;  %v13626_v56 = vld [vmem:[#allocation9 + $0x4c8] ss:$16 sps:$4 sm:$0xff]   ;;  %v5731_v57 = vpack.c.bf16 %v5729_v54, %v5729_v54 }
 0x322   :  { %5448 = vmatprep.subr.bf16.mxu0 %v13571_v4  ;;  %5489 = vmatprep.subr.bf16.mxu1 %v13574_v60  ;;  %v13634_v4 = vld [vmem:[#allocation9 + $0x4ec] ss:$16 sps:$4 sm:$0xff]   ;;  %v5754_v60 = vrot.slane %v5753_v34, 7  ;;  %v6321_v34 = vld [vmem:[#allocation3 + $0x34] sm:$0x1] }
 0x323   :  { %5478 = vmatprep.mubr.bf16.mxu0 %v14441_v5  ;;  %5519 = vmatprep.mubr.bf16.mxu1 %v14441_v5 }
 0x325   :  { %5449 = vmatpush1.bf16.msra.mxu0 %v13569_v63  ;;  %5490 = vmatpush1.bf16.msra.mxu1 %v13572_v2  ;;  %v13632_v63 = vld [vmem:[#allocation9 + $0x4e8] ss:$16 sps:$4 sm:$0xff]   ;;  %v5752_v2 = vunpack.c.l.b16 %v5731_v57 }
 0x326   :  { %5450 = vmatprep.subr.bf16.mxu0 %v13577_v31  ;;  %5491 = vmatprep.subr.bf16.mxu1 %v13580_v3  ;;  %v13637_v31 = vld [vmem:[#allocation9 + $0x504] ss:$16 sps:$4 sm:$0xff]   ;;  %v13640_v3 = vld [vmem:[#allocation9 + $0x50c] ss:$16 sps:$4 sm:$0xff]  }
 0x327   :  { %v5755_v6 = vsel %vm4009_vm6, %v5754_v60, %v5752_v2  ;;  %v6323_v60 = vpack.c.bf16 %v6321_v34, %v6321_v34  ;;  %v13697_v2 = vld [vmem:[#allocation9 + $0x644] ss:$16 sps:$4 sm:$0xff]  }
 0x328   :  { %v5756_v11 = vpack.c.b16 %v5755_v6, %v5755_v6 }
 0x329   :  { %5451 = vmatpush1.bf16.msra.mxu0 %v13575_v10  ;;  %5492 = vmatpush1.bf16.msra.mxu1 %v13578_v62  ;;  %v13635_v10 = vld [vmem:[#allocation9 + $0x500] ss:$16 sps:$4 sm:$0xff]   ;;  %v13638_v62 = vld [vmem:[#allocation9 + $0x508] ss:$16 sps:$4 sm:$0xff]   ;;  %v6344_v6 = vunpack.c.l.b16 %v6323_v60 }
 0x32a   :  { %5452 = vmatprep.subr.bf16.mxu0 %v13583_v13  ;;  %5493 = vmatprep.subr.bf16.mxu1 %v13586_v14  ;;  %v13643_v13 = vld [vmem:[#allocation9 + $0x524] ss:$16 sps:$4 sm:$0xff]   ;;  %v13646_v14 = vld [vmem:[#allocation9 + $0x52c] ss:$16 sps:$4 sm:$0xff]   ;;  %v13743_v60 = vld [vmem:[#allocation9 + $0x740] ss:$16 sps:$4 sm:$0xff]  }
 0x32d   :  { %5453 = vmatpush1.bf16.msra.mxu0 %v13581_v17  ;;  %5494 = vmatpush1.bf16.msra.mxu1 %v13584_v52  ;;  %v13641_v17 = vld [vmem:[#allocation9 + $0x520] ss:$16 sps:$4 sm:$0xff]   ;;  %v13644_v52 = vld [vmem:[#allocation9 + $0x528] ss:$16 sps:$4 sm:$0xff]  }
 0x32e   :  { %5643 = vmatprep.subr.bf16.mxu0 %v13589_v19  ;;  %5684 = vmatprep.subr.bf16.mxu1 %v13592_v8  ;;  %v13652_v19 = vld [vmem:[#allocation9 + $0x54c] ss:$16 sps:$4 sm:$0xff]   ;;  %v5926_v8 = vld [vmem:[#allocation3 + $0xa] sm:$0x1] }
 0x330   :  { %11662 = vmatmul.mubr.msk.bf16.vlgmr.msra.gmra.mrb[96].mxu0 %vm4092_vm7, %v5362_v25  ;;  %11663 = vmatmul.mubr.msk.bf16.vlgmr.msra.gmra.mrb[84].mxu1 %vm4092_vm7, %v5362_v25  ;;  %v13655_v25 = vld [vmem:[#allocation9 + $0x564] ss:$16 sps:$4 sm:$0xff]  }
 0x331   :  { %5644 = vmatpush1.bf16.msra.mxu0 %v13587_v24  ;;  %5685 = vmatpush1.bf16.msra.mxu1 %v13590_v27  ;;  %v13650_v24 = vld [vmem:[#allocation9 + $0x548] ss:$16 sps:$4 sm:$0xff]   ;;  %v5928_v27 = vpack.c.bf16 %v5926_v8, %v5926_v8 }
 0x332   :  { %5645 = vmatprep.subr.bf16.mxu0 %v13595_v30  ;;  %5686 = vmatprep.subr.bf16.mxu1 %v13598_v58  ;;  %v13658_v30 = vld [vmem:[#allocation9 + $0x56c] ss:$16 sps:$4 sm:$0xff]   ;;  %v5951_v58 = vrot.slane %v5950_v20, 7  ;;  %v6518_v20 = vld [vmem:[#allocation3 + $0x35] sm:$0x1] }
 0x333   :  { %5675 = vmatprep.mubr.bf16.mxu0 %v14441_v5  ;;  %5716 = vmatprep.mubr.bf16.mxu1 %v14441_v5 }
 0x335   :  { %5646 = vmatpush1.bf16.msra.mxu0 %v13593_v26  ;;  %5687 = vmatpush1.bf16.msra.mxu1 %v13596_v53  ;;  %v13656_v26 = vld [vmem:[#allocation9 + $0x568] ss:$16 sps:$4 sm:$0xff]   ;;  %v5949_v53 = vunpack.c.l.b16 %v5928_v27 }
 0x336   :  { %5647 = vmatprep.subr.bf16.mxu0 %v13601_v28  ;;  %5688 = vmatprep.subr.bf16.mxu1 %v13604_v29  ;;  %v13661_v28 = vld [vmem:[#allocation9 + $0x584] ss:$16 sps:$4 sm:$0xff]   ;;  %v13664_v29 = vld [vmem:[#allocation9 + $0x58c] ss:$16 sps:$4 sm:$0xff]  }
 0x337   :  { %v5952_v45 = vsel %vm4009_vm6, %v5951_v58, %v5949_v53  ;;  %v6520_v58 = vpack.c.bf16 %v6518_v20, %v6518_v20  ;;  %v13721_v53 = vld [vmem:[#allocation9 + $0x6c4] ss:$16 sps:$4 sm:$0xff]   ;;  %v13766_v20 = vld [vmem:[#allocation9 + $0x7ac] ss:$16 sps:$4 sm:$0xff]  }
 0x338   :  { %v5953_v36 = vpack.c.b16 %v5952_v45, %v5952_v45 }
 0x339   :  { %5648 = vmatpush1.bf16.msra.mxu0 %v13599_v33  ;;  %5689 = vmatpush1.bf16.msra.mxu1 %v13602_v35  ;;  %v13659_v33 = vld [vmem:[#allocation9 + $0x580] ss:$16 sps:$4 sm:$0xff]   ;;  %v13662_v35 = vld [vmem:[#allocation9 + $0x588] ss:$16 sps:$4 sm:$0xff]   ;;  %v6541_v45 = vunpack.c.l.b16 %v6520_v58 }
 0x33a   :  { %5649 = vmatprep.subr.bf16.mxu0 %v13607_v37  ;;  %5690 = vmatprep.subr.bf16.mxu1 %v13610_v38  ;;  %v13667_v37 = vld [vmem:[#allocation9 + $0x5a4] ss:$16 sps:$4 sm:$0xff]   ;;  %v13670_v38 = vld [vmem:[#allocation9 + $0x5ac] ss:$16 sps:$4 sm:$0xff]   ;;  %v6911_v58 = vld [vmem:[#allocation3 + $0xf] sm:$0x1] }
 0x33d   :  { %5650 = vmatpush1.bf16.msra.mxu0 %v13605_v39  ;;  %5691 = vmatpush1.bf16.msra.mxu1 %v13608_v40  ;;  %v13665_v39 = vld [vmem:[#allocation9 + $0x5a0] ss:$16 sps:$4 sm:$0xff]   ;;  %v13668_v40 = vld [vmem:[#allocation9 + $0x5a8] ss:$16 sps:$4 sm:$0xff]  }
 0x33e   :  { %5840 = vmatprep.subr.bf16.mxu0 %v13613_v1  ;;  %5881 = vmatprep.subr.bf16.mxu1 %v13616_v22  ;;  %v13676_v1 = vld [vmem:[#allocation9 + $0x5cc] ss:$16 sps:$4 sm:$0xff]   ;;  %v6123_v22 = vld [vmem:[#allocation3 + $0xb] sm:$0x1] }
 0x340   :  { %11680 = vmatmul.mubr.msk.bf16.vlgmr.msra.gmra.mrb[100].mxu0 %vm4092_vm7, %v5559_v46  ;;  %11681 = vmatmul.mubr.msk.bf16.vlgmr.msra.gmra.mrb[88].mxu1 %vm4092_vm7, %v5559_v46  ;;  %v13679_v46 = vld [vmem:[#allocation9 + $0x5e4] ss:$16 sps:$4 sm:$0xff]  }
 0x341   :  { %5841 = vmatpush1.bf16.msra.mxu0 %v13611_v44  ;;  %5882 = vmatpush1.bf16.msra.mxu1 %v13614_v43  ;;  %v13674_v44 = vld [vmem:[#allocation9 + $0x5c8] ss:$16 sps:$4 sm:$0xff]   ;;  %v6125_v43 = vpack.c.bf16 %v6123_v22, %v6123_v22 }
 0x342   :  { %5842 = vmatprep.subr.bf16.mxu0 %v13619_v15  ;;  %5883 = vmatprep.subr.bf16.mxu1 %v13622_v47  ;;  %v13682_v15 = vld [vmem:[#allocation9 + $0x5ec] ss:$16 sps:$4 sm:$0xff]   ;;  %v6148_v47 = vrot.slane %v6147_v41, 7  ;;  %v6715_v41 = vld [vmem:[#allocation3 + $0x36] sm:$0x1] }
 0x343   :  { %5872 = vmatprep.mubr.bf16.mxu0 %v14441_v5  ;;  %5913 = vmatprep.mubr.bf16.mxu1 %v14441_v5 }
 0x345   :  { %5843 = vmatpush1.bf16.msra.mxu0 %v13617_v49  ;;  %5884 = vmatpush1.bf16.msra.mxu1 %v13620_v50  ;;  %v13680_v49 = vld [vmem:[#allocation9 + $0x5e8] ss:$16 sps:$4 sm:$0xff]   ;;  %v6146_v50 = vunpack.c.l.b16 %v6125_v43 }
 0x346   :  { %5844 = vmatprep.subr.bf16.mxu0 %v13625_v23  ;;  %5885 = vmatprep.subr.bf16.mxu1 %v13628_v51  ;;  %v13685_v23 = vld [vmem:[#allocation9 + $0x604] ss:$16 sps:$4 sm:$0xff]   ;;  %v13688_v51 = vld [vmem:[#allocation9 + $0x60c] ss:$16 sps:$4 sm:$0xff]  }
 0x347   :  { %v6149_v54 = vsel %vm4009_vm6, %v6148_v47, %v6146_v50  ;;  %v6717_v47 = vpack.c.bf16 %v6715_v41, %v6715_v41  ;;  %v13745_v50 = vld [vmem:[#allocation9 + $0x744] ss:$16 sps:$4 sm:$0xff]  }
 0x348   :  { %v6150_v57 = vpack.c.b16 %v6149_v54, %v6149_v54 }
 0x349   :  { %5845 = vmatpush1.bf16.msra.mxu0 %v13623_v55  ;;  %5886 = vmatpush1.bf16.msra.mxu1 %v13626_v56  ;;  %v13683_v55 = vld [vmem:[#allocation9 + $0x600] ss:$16 sps:$4 sm:$0xff]   ;;  %v13686_v56 = vld [vmem:[#allocation9 + $0x608] ss:$16 sps:$4 sm:$0xff]  }
 0x34a   :  { %5846 = vmatprep.subr.bf16.mxu0 %v13631_v59  ;;  %5887 = vmatprep.subr.bf16.mxu1 %v13634_v4  ;;  %v13691_v59 = vld [vmem:[#allocation9 + $0x624] ss:$16 sps:$4 sm:$0xff]   ;;  %v13694_v4 = vld [vmem:[#allocation9 + $0x62c] ss:$16 sps:$4 sm:$0xff]  }
 0x34d   :  { %5847 = vmatpush1.bf16.msra.mxu0 %v13629_v61  ;;  %5888 = vmatpush1.bf16.msra.mxu1 %v13632_v63  ;;  %v13689_v61 = vld [vmem:[#allocation9 + $0x620] ss:$16 sps:$4 sm:$0xff]   ;;  %v13692_v63 = vld [vmem:[#allocation9 + $0x628] ss:$16 sps:$4 sm:$0xff]  }
 0x34e   :  { %6037 = vmatprep.subr.bf16.mxu0 %v13637_v31  ;;  %6078 = vmatprep.subr.bf16.mxu1 %v13640_v3  ;;  %v13700_v31 = vld [vmem:[#allocation9 + $0x64c] ss:$16 sps:$4 sm:$0xff]   ;;  %v6320_v3 = vld [vmem:[#allocation3 + $0xc] sm:$0x1] }
 0x350   :  { %11698 = vmatmul.mubr.msk.bf16.vlgmr.msra.gmra.mrb[104].mxu0 %vm4092_vm7, %v5756_v11  ;;  %11699 = vmatmul.mubr.msk.bf16.vlgmr.msra.gmra.mrb[92].mxu1 %vm4092_vm7, %v5756_v11  ;;  %v13703_v11 = vld [vmem:[#allocation9 + $0x664] ss:$16 sps:$4 sm:$0xff]  }
 0x351   :  { %6038 = vmatpush1.bf16.msra.mxu0 %v13635_v10  ;;  %6079 = vmatpush1.bf16.msra.mxu1 %v13638_v62  ;;  %v13698_v10 = vld [vmem:[#allocation9 + $0x648] ss:$16 sps:$4 sm:$0xff]   ;;  %v6322_v62 = vpack.c.bf16 %v6320_v3, %v6320_v3  ;;  %v13751_v3 = vld [vmem:[#allocation9 + $0x764] ss:$16 sps:$4 sm:$0xff]  }
 0x352   :  { %6039 = vmatprep.subr.bf16.mxu0 %v13643_v13  ;;  %6080 = vmatprep.subr.bf16.mxu1 %v13646_v14  ;;  %v13706_v13 = vld [vmem:[#allocation9 + $0x66c] ss:$16 sps:$4 sm:$0xff]   ;;  %v6345_v14 = vrot.slane %v6344_v6, 7 }
 0x353   :  { %6069 = vmatprep.mubr.bf16.mxu0 %v14441_v5  ;;  %6110 = vmatprep.mubr.bf16.mxu1 %v14441_v5  ;;  %v13754_v6 = vld [vmem:[#allocation9 + $0x76c] ss:$16 sps:$4 sm:$0xff]  }
 0x355   :  { %6040 = vmatpush1.bf16.msra.mxu0 %v13641_v17  ;;  %6081 = vmatpush1.bf16.msra.mxu1 %v13644_v52  ;;  %v13704_v17 = vld [vmem:[#allocation9 + $0x668] ss:$16 sps:$4 sm:$0xff]   ;;  %v6343_v52 = vunpack.c.l.b16 %v6322_v62 }
 0x356   :  { %6041 = vmatprep.subr.bf16.mxu0 %v13649_v18  ;;  %6082 = vmatprep.subr.bf16.mxu1 %v13652_v19  ;;  %v13709_v18 = vld [vmem:[#allocation9 + $0x684] ss:$16 sps:$4 sm:$0xff]   ;;  %v13712_v19 = vld [vmem:[#allocation9 + $0x68c] ss:$16 sps:$4 sm:$0xff]   ;;  %v13752_v62 = vld [vmem:[#allocation9 + $0x768] ss:$16 sps:$4 sm:$0xff]  }
 0x357   :  { %v6346_v8 = vsel %vm4009_vm6, %v6345_v14, %v6343_v52  ;;  %v13760_v14 = vld [vmem:[#allocation9 + $0x78c] ss:$16 sps:$4 sm:$0xff]   ;;  %v13755_v52 = vld [vmem:[#allocation9 + $0x780] ss:$16 sps:$4 sm:$0xff]  }
 0x358   :  { %v6347_v27 = vpack.c.b16 %v6346_v8, %v6346_v8  ;;  %v13763_v8 = vld [vmem:[#allocation9 + $0x7a4] ss:$16 sps:$4 sm:$0xff]  }
 0x359   :  { %6042 = vmatpush1.bf16.msra.mxu0 %v13647_v21  ;;  %6083 = vmatpush1.bf16.msra.mxu1 %v13650_v24  ;;  %v13707_v21 = vld [vmem:[#allocation9 + $0x680] ss:$16 sps:$4 sm:$0xff]   ;;  %v13710_v24 = vld [vmem:[#allocation9 + $0x688] ss:$16 sps:$4 sm:$0xff]  }
 0x35a   :  { %6043 = vmatprep.subr.bf16.mxu0 %v13655_v25  ;;  %6084 = vmatprep.subr.bf16.mxu1 %v13658_v30  ;;  %v13715_v25 = vld [vmem:[#allocation9 + $0x6a4] ss:$16 sps:$4 sm:$0xff]   ;;  %v13718_v30 = vld [vmem:[#allocation9 + $0x6ac] ss:$16 sps:$4 sm:$0xff]  }
 0x35d   :  { %6044 = vmatpush1.bf16.msra.mxu0 %v13653_v7  ;;  %6085 = vmatpush1.bf16.msra.mxu1 %v13656_v26  ;;  %v13713_v7 = vld [vmem:[#allocation9 + $0x6a0] ss:$16 sps:$4 sm:$0xff]   ;;  %v13716_v26 = vld [vmem:[#allocation9 + $0x6a8] ss:$16 sps:$4 sm:$0xff]  }
 0x35e   :  { %6234 = vmatprep.subr.bf16.mxu0 %v13661_v28  ;;  %6275 = vmatprep.subr.bf16.mxu1 %v13664_v29  ;;  %v13724_v28 = vld [vmem:[#allocation9 + $0x6cc] ss:$16 sps:$4 sm:$0xff]   ;;  %v6517_v29 = vld [vmem:[#allocation3 + $0xd] sm:$0x1] }
 0x360   :  { %11716 = vmatmul.mubr.msk.bf16.vlgmr.msra.gmra.mrb[108].mxu0 %vm4092_vm7, %v5953_v36  ;;  %11717 = vmatmul.mubr.msk.bf16.vlgmr.msra.gmra.mrb[96].mxu1 %vm4092_vm7, %v5953_v36  ;;  %v13727_v36 = vld [vmem:[#allocation9 + $0x6e4] ss:$16 sps:$4 sm:$0xff]  }
 0x361   :  { %6235 = vmatpush1.bf16.msra.mxu0 %v13659_v33  ;;  %6276 = vmatpush1.bf16.msra.mxu1 %v13662_v35  ;;  %v13722_v33 = vld [vmem:[#allocation9 + $0x6c8] ss:$16 sps:$4 sm:$0xff]   ;;  %v6519_v35 = vpack.c.bf16 %v6517_v29, %v6517_v29 }
 0x362   :  { %6236 = vmatprep.subr.bf16.mxu0 %v13667_v37  ;;  %6277 = vmatprep.subr.bf16.mxu1 %v13670_v38  ;;  %v13730_v37 = vld [vmem:[#allocation9 + $0x6ec] ss:$16 sps:$4 sm:$0xff]   ;;  %v6542_v38 = vrot.slane %v6541_v45, 7 }
 0x363   :  { %6266 = vmatprep.mubr.bf16.mxu0 %v14441_v5  ;;  %6307 = vmatprep.mubr.bf16.mxu1 %v14441_v5 }
 0x365   :  { %6237 = vmatpush1.bf16.msra.mxu0 %v13665_v39  ;;  %6278 = vmatpush1.bf16.msra.mxu1 %v13668_v40  ;;  %v13728_v39 = vld [vmem:[#allocation9 + $0x6e8] ss:$16 sps:$4 sm:$0xff]   ;;  %v6540_v40 = vunpack.c.l.b16 %v6519_v35 }
 0x366   :  { %6238 = vmatprep.subr.bf16.mxu0 %v13673_v0  ;;  %6279 = vmatprep.subr.bf16.mxu1 %v13676_v1  ;;  %v13733_v0 = vld [vmem:[#allocation9 + $0x704] ss:$16 sps:$4 sm:$0xff]   ;;  %v13736_v1 = vld [vmem:[#allocation9 + $0x70c] ss:$16 sps:$4 sm:$0xff]  }
 0x367   :  { %v6543_v22 = vsel %vm4009_vm6, %v6542_v38, %v6540_v40  ;;  %v13767_v38 = vld [vmem:[#allocation9 + $0x7c0] ss:$16 sps:$4 sm:$0xff]  }
 0x368   :  { %v6544_v43 = vpack.c.b16 %v6543_v22, %v6543_v22  ;;  %v13778_v22 = vld [vmem:[#allocation9 + $0x7ec] ss:$16 sps:$4 sm:$0xff]  }
 0x369   :  { %6239 = vmatpush1.bf16.msra.mxu0 %v13671_v42  ;;  %6280 = vmatpush1.bf16.msra.mxu1 %v13674_v44  ;;  %v13731_v42 = vld [vmem:[#allocation9 + $0x700] ss:$16 sps:$4 sm:$0xff]   ;;  %v13734_v44 = vld [vmem:[#allocation9 + $0x708] ss:$16 sps:$4 sm:$0xff]  }
 0x36a   :  { %6240 = vmatprep.subr.bf16.mxu0 %v13679_v46  ;;  %6281 = vmatprep.subr.bf16.mxu1 %v13682_v15  ;;  %v13739_v46 = vld [vmem:[#allocation9 + $0x724] ss:$16 sps:$4 sm:$0xff]   ;;  %v13742_v15 = vld [vmem:[#allocation9 + $0x72c] ss:$16 sps:$4 sm:$0xff]  }
 0x36d   :  { %6241 = vmatpush1.bf16.msra.mxu0 %v13677_v48  ;;  %6282 = vmatpush1.bf16.msra.mxu1 %v13680_v49  ;;  %v13737_v48 = vld [vmem:[#allocation9 + $0x720] ss:$16 sps:$4 sm:$0xff]   ;;  %v13740_v49 = vld [vmem:[#allocation9 + $0x728] ss:$16 sps:$4 sm:$0xff]  }
 0x36e   :  { %6431 = vmatprep.subr.bf16.mxu0 %v13685_v23  ;;  %6472 = vmatprep.subr.bf16.mxu1 %v13688_v51  ;;  %v13748_v23 = vld [vmem:[#allocation9 + $0x74c] ss:$16 sps:$4 sm:$0xff]   ;;  %v6714_v51 = vld [vmem:[#allocation3 + $0xe] sm:$0x1] }
 0x370   :  { %11734 = vmatmul.mubr.msk.bf16.vlgmr.msra.gmra.mrb[112].mxu0 %vm4092_vm7, %v6150_v57  ;;  %11735 = vmatmul.mubr.msk.bf16.vlgmr.msra.gmra.mrb[100].mxu1 %vm4092_vm7, %v6150_v57 }
 0x371   :  { %6432 = vmatpush1.bf16.msra.mxu0 %v13683_v55  ;;  %6473 = vmatpush1.bf16.msra.mxu1 %v13686_v56  ;;  %v6738_v55 = vunpack.c.l.b16 %v6717_v47 }
 0x372   :  { %6433 = vmatprep.subr.bf16.mxu0 %v13691_v59  ;;  %6474 = vmatprep.subr.bf16.mxu1 %v13694_v4 }
 0x373   :  { %6463 = vmatprep.mubr.bf16.mxu0 %v14441_v5  ;;  %6504 = vmatprep.mubr.bf16.mxu1 %v14441_v5 }
 0x375   :  { %6434 = vmatpush1.bf16.msra.mxu0 %v13689_v61  ;;  %6475 = vmatpush1.bf16.msra.mxu1 %v13692_v63  ;;  %v13746_v61 = vld [vmem:[#allocation9 + $0x748] ss:$16 sps:$4 sm:$0xff]   ;;  %v6716_v63 = vpack.c.bf16 %v6714_v51, %v6714_v51  ;;  %v13787_v51 = vld [vmem:[#allocation9 + $0x824] ss:$16 sps:$4 sm:$0xff]  }
 0x376   :  { %6435 = vmatprep.subr.bf16.mxu0 %v13697_v2  ;;  %6476 = vmatprep.subr.bf16.mxu1 %v13700_v31 }
 0x379   :  { %6436 = vmatpush1.bf16.msra.mxu0 %v13695_v9  ;;  %6477 = vmatpush1.bf16.msra.mxu1 %v13698_v10  ;;  %v6739_v9 = vrot.slane %v6738_v55, 7  ;;  %v13749_v10 = vld [vmem:[#allocation9 + $0x760] ss:$16 sps:$4 sm:$0xff]  }
 0x37a   :  { %6437 = vmatprep.subr.bf16.mxu0 %v13703_v11  ;;  %6478 = vmatprep.subr.bf16.mxu1 %v13706_v13  ;;  %v6737_v11 = vunpack.c.l.b16 %v6716_v63  ;;  %v13757_v13 = vld [vmem:[#allocation9 + $0x784] ss:$16 sps:$4 sm:$0xff]   ;;  %v13785_v55 = vld [vmem:[#allocation9 + $0x820] ss:$16 sps:$4 sm:$0xff]  }
 0x37d   :  { %6438 = vmatpush1.bf16.msra.mxu0 %v13701_v16  ;;  %6479 = vmatpush1.bf16.msra.mxu1 %v13704_v17  ;;  %v6740_v16 = vsel %vm4009_vm6, %v6739_v9, %v6737_v11  ;;  %v6912_v17 = vld [vmem:[#allocation3 + $0x37] sm:$0x1] }
 0x37e   :  { %6628 = vmatprep.subr.bf16.mxu0 %v13709_v18  ;;  %6669 = vmatprep.subr.bf16.mxu1 %v13712_v19  ;;  %v13758_v18 = vld [vmem:[#allocation9 + $0x788] ss:$16 sps:$4 sm:$0xff]   ;;  %v6741_v19 = vpack.c.b16 %v6740_v16, %v6740_v16 }
 0x380   :  { %11752 = vmatmul.mubr.msk.bf16.vlgmr.msra.gmra.mrb[116].mxu0 %vm4092_vm7, %v6347_v27  ;;  %11753 = vmatmul.mubr.msk.bf16.vlgmr.msra.gmra.mrb[104].mxu1 %vm4092_vm7, %v6347_v27  ;;  %v13764_v27 = vld [vmem:[#allocation9 + $0x7a8] ss:$16 sps:$4 sm:$0xff]  }
 0x381   :  { %6629 = vmatpush1.bf16.msra.mxu0 %v13707_v21  ;;  %6670 = vmatpush1.bf16.msra.mxu1 %v13710_v24  ;;  %v6914_v21 = vpack.c.bf16 %v6912_v17, %v6912_v17  ;;  %v13761_v24 = vld [vmem:[#allocation9 + $0x7a0] ss:$16 sps:$4 sm:$0xff]  }
 0x382   :  { %6630 = vmatprep.subr.bf16.mxu0 %v13715_v25  ;;  %6671 = vmatprep.subr.bf16.mxu1 %v13718_v30  ;;  %v13769_v25 = vld [vmem:[#allocation9 + $0x7c4] ss:$16 sps:$4 sm:$0xff]   ;;  %v13772_v30 = vld [vmem:[#allocation9 + $0x7cc] ss:$16 sps:$4 sm:$0xff]  }
 0x383   :  { %6660 = vmatprep.mubr.bf16.mxu0 %v14441_v5  ;;  %6701 = vmatprep.mubr.bf16.mxu1 %v14441_v5 }
 0x385   :  { %6631 = vmatpush1.bf16.msra.mxu0 %v13713_v7  ;;  %6672 = vmatpush1.bf16.msra.mxu1 %v13716_v26 }
 0x386   :  { %6632 = vmatprep.subr.bf16.mxu0 %v13721_v53  ;;  %6673 = vmatprep.subr.bf16.mxu1 %v13724_v28  ;;  %v6935_v53 = vunpack.c.l.b16 %v6914_v21  ;;  %v13800_v21 = vld [vmem:[#allocation9 + $0x868] ss:$16 sps:$4 sm:$0xff]  }
 0x388   :  { %v6936_v41 = vrot.slane %v6935_v53, 7 }
 0x389   :  { %6633 = vmatpush1.bf16.msra.mxu0 %v13719_v32  ;;  %6674 = vmatpush1.bf16.msra.mxu1 %v13722_v33 }
 0x38a   :  { %6634 = vmatprep.subr.bf16.mxu0 %v13727_v36  ;;  %6675 = vmatprep.subr.bf16.mxu1 %v13730_v37 }
 0x38d   :  { %6635 = vmatpush1.bf16.msra.mxu0 %v13725_v12  ;;  %6676 = vmatpush1.bf16.msra.mxu1 %v13728_v39  ;;  %v13770_v12 = vld [vmem:[#allocation9 + $0x7c8] ss:$16 sps:$4 sm:$0xff]   ;;  %v6913_v39 = vpack.c.bf16 %v6911_v58, %v6911_v58  ;;  %v7306_v58 = vld [vmem:[#allocation3 + $0x39] sm:$0x1] }
 0x38e   :  { %6825 = vmatprep.subr.bf16.mxu0 %v13733_v0  ;;  %6866 = vmatprep.subr.bf16.mxu1 %v13736_v1  ;;  %v13775_v1 = vld [vmem:[#allocation9 + $0x7e4] ss:$16 sps:$4 sm:$0xff]  }
 0x390   :  { %11770 = vmatmul.mubr.msk.bf16.vlgmr.msra.gmra.mrb[120].mxu0 %vm4092_vm7, %v6544_v43  ;;  %11771 = vmatmul.mubr.msk.bf16.vlgmr.msra.gmra.mrb[108].mxu1 %vm4092_vm7, %v6544_v43  ;;  %v6934_v43 = vunpack.c.l.b16 %v6913_v39 }
 0x391   :  { %6826 = vmatpush1.bf16.msra.mxu0 %v13731_v42  ;;  %6867 = vmatpush1.bf16.msra.mxu1 %v13734_v44  ;;  %v13773_v42 = vld [vmem:[#allocation9 + $0x7e0] ss:$16 sps:$4 sm:$0xff]   ;;  %v13776_v44 = vld [vmem:[#allocation9 + $0x7e8] ss:$16 sps:$4 sm:$0xff]  }
 0x392   :  { %6827 = vmatprep.subr.bf16.mxu0 %v13739_v46  ;;  %6868 = vmatprep.subr.bf16.mxu1 %v13742_v15  ;;  %v13781_v46 = vld [vmem:[#allocation9 + $0x804] ss:$16 sps:$4 sm:$0xff]   ;;  %v13784_v15 = vld [vmem:[#allocation9 + $0x80c] ss:$16 sps:$4 sm:$0xff]   ;;  %v6937_v47 = vsel %vm4009_vm6, %v6936_v41, %v6934_v43 }
 0x393   :  { %v4130_v54 = vpop.f32.mrb[68].mxu0  ;;  %v4171_v34 = vpop.f32.mrb[56].mxu1  ;;  %6857 = vmatprep.mubr.bf16.mxu0 %v14441_v5  ;;  %6898 = vmatprep.mubr.bf16.mxu1 %v14441_v5 }
 0x394   :  { %v4132_v56 = vpop.f32.mrb[69].mxu0  ;;  %v4173_v57 = vpop.f32.mrb[57].mxu1 }
 0x395   :  { %6828 = vmatpush1.bf16.msra.mxu0 %v13737_v48  ;;  %6869 = vmatpush1.bf16.msra.mxu1 %v13740_v49  ;;  %v4134_v59 = vpop.f32.mrb[70].mxu0  ;;  %v4175_v4 = vpop.f32.mrb[58].mxu1  ;;  %v7109_v48 = vld [vmem:[#allocation3 + $0x38] sm:$0x1]  ;;  %v13779_v49 = vld [vmem:[#allocation9 + $0x800] ss:$16 sps:$4 sm:$0xff]  }
 0x396   :  { %v4135_v2 = vpop.f32.mrb[71].mxu0  ;;  %v4176_v31 = vpop.f32.mrb[59].mxu1  ;;  %6829 = vmatprep.subr.bf16.mxu0 %v13745_v50  ;;  %6870 = vmatprep.subr.bf16.mxu1 %v13748_v23  ;;  %v13782_v50 = vld [vmem:[#allocation9 + $0x808] ss:$16 sps:$4 sm:$0xff]   ;;  %v6938_v23 = vpack.c.b16 %v6937_v47, %v6937_v47  ;;  %v13796_v59 = vld [vmem:[#allocation9 + $0x84c] ss:$16 sps:$4 sm:$0xff]  }
 0x397   :  { %v7108_v4 = vld [vmem:[#allocation3 + $0x10] sm:$0x1] }
 0x398   :  { %v7110_v16 = vpack.c.bf16 %v7108_v4, %v7108_v4  ;;  %v7503_v4 = vld [vmem:[#allocation3 + $0x3a] sm:$0x1] }
 0x399   :  { %6830 = vmatpush1.bf16.msra.mxu0 %v13743_v60  ;;  %6871 = vmatpush1.bf16.msra.mxu1 %v13746_v61 }
 0x39a   :  { %6831 = vmatprep.subr.bf16.mxu0 %v13751_v3  ;;  %6872 = vmatprep.subr.bf16.mxu1 %v13754_v6 }
 0x39d   :  { %6832 = vmatpush1.bf16.msra.mxu0 %v13749_v10  ;;  %6873 = vmatpush1.bf16.msra.mxu1 %v13752_v62 }
 0x39e   :  { %7022 = vmatprep.subr.bf16.mxu0 %v13757_v13  ;;  %7063 = vmatprep.subr.bf16.mxu1 %v13760_v14  ;;  %v13791_v13 = vld [vmem:[#allocation9 + $0x840] ss:$16 sps:$4 sm:$0xff]   ;;  %v13794_v14 = vld [vmem:[#allocation9 + $0x848] ss:$16 sps:$4 sm:$0xff]  }
 0x3a0   :  { %11788 = vmatmul.mubr.msk.bf16.vlgmr.msra.gmra.mrb[124].mxu0 %vm4092_vm7, %v6741_v19  ;;  %11789 = vmatmul.mubr.msk.bf16.vlgmr.msra.gmra.mrb[112].mxu1 %vm4092_vm7, %v6741_v19  ;;  %v13802_v19 = vld [vmem:[#allocation9 + $0x86c] ss:$16 sps:$4 sm:$0xff]  }
 0x3a1   :  { %7023 = vmatpush1.bf16.msra.mxu0 %v13755_v52  ;;  %7064 = vmatpush1.bf16.msra.mxu1 %v13758_v18  ;;  %v13799_v18 = vld [vmem:[#allocation9 + $0x864] ss:$16 sps:$4 sm:$0xff]  }
 0x3a2   :  { %7024 = vmatprep.subr.bf16.mxu0 %v13763_v8  ;;  %7065 = vmatprep.subr.bf16.mxu1 %v13766_v20  ;;  %v13797_v20 = vld [vmem:[#allocation9 + $0x860] ss:$16 sps:$4 sm:$0xff]  }
 0x3a3   :  { %v4302_v7 = vpop.f32.mrb[72].mxu0  ;;  %v4343_v26 = vpop.f32.mrb[60].mxu1  ;;  %7054 = vmatprep.mubr.bf16.mxu0 %v14441_v5  ;;  %7095 = vmatprep.mubr.bf16.mxu1 %v14441_v5 }
 0x3a4   :  { %v4303_v28 = vadd.f32 %v4302_v7, %v4130_v54  ;;  %v4344_v29 = vadd.f32 %v4343_v26, %v4171_v34  ;;  %v4304_v45 = vpop.f32.mrb[73].mxu0  ;;  %v4345_v32 = vpop.f32.mrb[61].mxu1  ;;  %v13790_v54 = vld [vmem:[#allocation9 + $0x82c] ss:$16 sps:$4 sm:$0xff]   ;;  %v7111_v34 = vpack.c.bf16 %v7109_v48, %v7109_v48  ;;  %v13803_v7 = vld [vmem:[#allocation9 + $0x880] ss:$16 sps:$4 sm:$0xff]  }
 0x3a5   :  { %v4305_v33 = vadd.f32 %v4304_v45, %v4132_v56  ;;  %v4346_v35 = vadd.f32 %v4345_v32, %v4173_v57  ;;  %v4306_v36 = vpop.f32.mrb[74].mxu0  ;;  %v4347_v37 = vpop.f32.mrb[62].mxu1  ;;  %7025 = vmatpush1.bf16.msra.mxu0 %v13761_v24  ;;  %7066 = vmatpush1.bf16.msra.mxu1 %v13764_v27  ;;  %v13788_v56 = vld [vmem:[#allocation9 + $0x828] ss:$16 sps:$4 sm:$0xff]   ;;  %v13793_v57 = vld [vmem:[#allocation9 + $0x844] ss:$16 sps:$4 sm:$0xff]   ;;  %v7131_v24 = vunpack.c.l.b16 %v7110_v16  ;;  %v7308_v45 = vpack.c.bf16 %v7306_v58, %v7306_v58 }
 0x3a6   :  { %v4307_v40 = vpop.f32.mrb[75].mxu0  ;;  %v4348_v0 = vpop.f32.mrb[63].mxu1  ;;  %7026 = vmatprep.subr.bf16.mxu0 %v13769_v25  ;;  %7067 = vmatprep.subr.bf16.mxu1 %v13772_v30  ;;  %v7132_v63 = vunpack.c.l.b16 %v7111_v34  ;;  %v13805_v27 = vld [vmem:[#allocation9 + $0x884] ss:$16 sps:$4 sm:$0xff]   ;;  %v13808_v25 = vld [vmem:[#allocation9 + $0x88c] ss:$16 sps:$4 sm:$0xff]  }
 0x3a7   :  { %v13806_v26 = vld [vmem:[#allocation9 + $0x888] ss:$16 sps:$4 sm:$0xff]   ;;  %v13809_v32 = vld [vmem:[#allocation9 + $0x8a0] ss:$16 sps:$4 sm:$0xff]   ;;  %v13820_v36 = vld [vmem:[#allocation9 + $0x8cc] ss:$16 sps:$4 sm:$0xff]   ;;  %v7329_v39 = vunpack.c.l.b16 %v7308_v45 }
 0x3a8   :  { %v7133_v8 = vrot.slane %v7132_v63, 7  ;;  %v7305_v37 = vld [vmem:[#allocation3 + $0x11] sm:$0x1]  ;;  %v13824_v34 = vld [vmem:[#allocation9 + $0x8e8] ss:$16 sps:$4 sm:$0xff]  }
 0x3a9   :  { %7027 = vmatpush1.bf16.msra.mxu0 %v13767_v38  ;;  %7068 = vmatpush1.bf16.msra.mxu1 %v13770_v12  ;;  %v7307_v47 = vpack.c.bf16 %v7305_v37, %v7305_v37  ;;  %v13848_v45 = vld [vmem:[#allocation9 + $0x968] ss:$16 sps:$4 sm:$0xff]   ;;  %v7700_v37 = vld [vmem:[#allocation3 + $0x3b] sm:$0x1] }
 0x3aa   :  { %7028 = vmatprep.subr.bf16.mxu0 %v13775_v1  ;;  %7069 = vmatprep.subr.bf16.mxu1 %v13778_v22  ;;  %v7134_v30 = vsel %vm4009_vm6, %v7133_v8, %v7131_v24 }
 0x3ab   :  { %v7135_v53 = vpack.c.b16 %v7134_v30, %v7134_v30 }
 0x3ad   :  { %7029 = vmatpush1.bf16.msra.mxu0 %v13773_v42  ;;  %7070 = vmatpush1.bf16.msra.mxu1 %v13776_v44 }
 0x3ae   :  { %7219 = vmatprep.subr.bf16.mxu0 %v13781_v46  ;;  %7260 = vmatprep.subr.bf16.mxu1 %v13784_v15  ;;  %v13815_v46 = vld [vmem:[#allocation9 + $0x8c0] ss:$16 sps:$4 sm:$0xff]   ;;  %v13818_v15 = vld [vmem:[#allocation9 + $0x8c8] ss:$16 sps:$4 sm:$0xff]  }
 0x3b0   :  { %11806 = vmatmul.mubr.msk.bf16.vlgmr.msra.gmra.mrb[128].mxu0 %vm4092_vm7, %v6938_v23  ;;  %11807 = vmatmul.mubr.msk.bf16.vlgmr.msra.gmra.mrb[116].mxu1 %vm4092_vm7, %v6938_v23  ;;  %v13826_v23 = vld [vmem:[#allocation9 + $0x8ec] ss:$16 sps:$4 sm:$0xff]  }
 0x3b1   :  { %7220 = vmatpush1.bf16.msra.mxu0 %v13779_v49  ;;  %7261 = vmatpush1.bf16.msra.mxu1 %v13782_v50  ;;  %v13823_v50 = vld [vmem:[#allocation9 + $0x8e4] ss:$16 sps:$4 sm:$0xff]  }
 0x3b2   :  { %7221 = vmatprep.subr.bf16.mxu0 %v13787_v51  ;;  %7262 = vmatprep.subr.bf16.mxu1 %v13790_v54  ;;  %v7330_v51 = vrot.slane %v7329_v39, 7  ;;  %v13821_v54 = vld [vmem:[#allocation9 + $0x8e0] ss:$16 sps:$4 sm:$0xff]  }
 0x3b3   :  { %v4495_v60 = vpop.f32.mrb[76].mxu0  ;;  %v4536_v61 = vpop.f32.mrb[64].mxu1  ;;  %7251 = vmatprep.mubr.bf16.mxu0 %v14441_v5  ;;  %7292 = vmatprep.mubr.bf16.mxu1 %v14441_v5 }
 0x3b4   :  { %v4543_v2 = vadd.f32 %v4495_v60, %v4303_v28  ;;  %v4545_v31 = vadd.f32 %v4536_v61, %v4344_v29  ;;  %v4497_v3 = vpop.f32.mrb[77].mxu0  ;;  %v4538_v6 = vpop.f32.mrb[65].mxu1  ;;  %v13811_v28 = vld [vmem:[#allocation9 + $0x8a4] ss:$16 sps:$4 sm:$0xff]   ;;  %v13814_v29 = vld [vmem:[#allocation9 + $0x8ac] ss:$16 sps:$4 sm:$0xff]  }
 0x3b5   :  { %v4544_v9 = vadd.f32 %v4497_v3, %v4305_v33  ;;  %v4546_v10 = vadd.f32 %v4538_v6, %v4346_v35  ;;  %v4499_v62 = vpop.f32.mrb[78].mxu0  ;;  %v4540_v11 = vpop.f32.mrb[66].mxu1  ;;  %7222 = vmatpush1.bf16.msra.mxu0 %v13785_v55  ;;  %7263 = vmatpush1.bf16.msra.mxu1 %v13788_v56  ;;  %v13812_v33 = vld [vmem:[#allocation9 + $0x8a8] ss:$16 sps:$4 sm:$0xff]   ;;  %v13817_v35 = vld [vmem:[#allocation9 + $0x8c4] ss:$16 sps:$4 sm:$0xff]   ;;  %v7328_v55 = vunpack.c.l.b16 %v7307_v47  ;;  %v7505_v3 = vpack.c.bf16 %v7503_v4, %v7503_v4 }
 0x3b6   :  { %v4500_v17 = vpop.f32.mrb[79].mxu0  ;;  %v4541_v52 = vpop.f32.mrb[67].mxu1  ;;  %7223 = vmatprep.subr.bf16.mxu0 %v13793_v57  ;;  %7264 = vmatprep.subr.bf16.mxu1 %v13796_v59  ;;  %v13829_v56 = vld [vmem:[#allocation9 + $0x904] ss:$16 sps:$4 sm:$0xff]   ;;  %v13832_v57 = vld [vmem:[#allocation9 + $0x90c] ss:$16 sps:$4 sm:$0xff]  }
 0x3b7   :  { %v7331_v59 = vsel %vm4009_vm6, %v7330_v51, %v7328_v55  ;;  %v13827_v60 = vld [vmem:[#allocation9 + $0x900] ss:$16 sps:$4 sm:$0xff]   ;;  %v13830_v61 = vld [vmem:[#allocation9 + $0x908] ss:$16 sps:$4 sm:$0xff]   ;;  %v13844_v62 = vld [vmem:[#allocation9 + $0x94c] ss:$16 sps:$4 sm:$0xff]   ;;  %v7526_v16 = vunpack.c.l.b16 %v7505_v3 }
 0x3b8   :  { %v7332_v63 = vpack.c.b16 %v7331_v59, %v7331_v59  ;;  %v13833_v6 = vld [vmem:[#allocation9 + $0x920] ss:$16 sps:$4 sm:$0xff]   ;;  %v7502_v11 = vld [vmem:[#allocation3 + $0x12] sm:$0x1]  ;;  %v13872_v3 = vld [vmem:[#allocation9 + $0x9e8] ss:$16 sps:$4 sm:$0xff]  }
 0x3b9   :  { %7224 = vmatpush1.bf16.msra.mxu0 %v13791_v13  ;;  %7265 = vmatpush1.bf16.msra.mxu1 %v13794_v14  ;;  %v7504_v30 = vpack.c.bf16 %v7502_v11, %v7502_v11  ;;  %v7897_v11 = vld [vmem:[#allocation3 + $0x3c] sm:$0x1] }
 0x3ba   :  { %7225 = vmatprep.subr.bf16.mxu0 %v13799_v18  ;;  %7266 = vmatprep.subr.bf16.mxu1 %v13802_v19 }
 0x3bd   :  { %7226 = vmatpush1.bf16.msra.mxu0 %v13797_v20  ;;  %7267 = vmatpush1.bf16.msra.mxu1 %v13800_v21 }
 0x3be   :  { %7416 = vmatprep.subr.bf16.mxu0 %v13805_v27  ;;  %7457 = vmatprep.subr.bf16.mxu1 %v13808_v25  ;;  %v13839_v27 = vld [vmem:[#allocation9 + $0x940] ss:$16 sps:$4 sm:$0xff]   ;;  %v13842_v25 = vld [vmem:[#allocation9 + $0x948] ss:$16 sps:$4 sm:$0xff]  }
 0x3c0   :  { %11824 = vmatmul.mubr.msk.bf16.vlgmr.msra.gmra.mrb[132].mxu0 %vm4092_vm7, %v7135_v53  ;;  %11825 = vmatmul.mubr.msk.bf16.vlgmr.msra.gmra.mrb[120].mxu1 %vm4092_vm7, %v7135_v53  ;;  %v13850_v53 = vld [vmem:[#allocation9 + $0x96c] ss:$16 sps:$4 sm:$0xff]  }
 0x3c1   :  { %7417 = vmatpush1.bf16.msra.mxu0 %v13803_v7  ;;  %7458 = vmatpush1.bf16.msra.mxu1 %v13806_v26  ;;  %v13847_v26 = vld [vmem:[#allocation9 + $0x964] ss:$16 sps:$4 sm:$0xff]  }
 0x3c2   :  { %7418 = vmatprep.subr.bf16.mxu0 %v13811_v28  ;;  %7459 = vmatprep.subr.bf16.mxu1 %v13814_v29  ;;  %v7527_v28 = vrot.slane %v7526_v16, 7  ;;  %v13845_v29 = vld [vmem:[#allocation9 + $0x960] ss:$16 sps:$4 sm:$0xff]  }
 0x3c3   :  { %v4692_v38 = vpop.f32.mrb[80].mxu0  ;;  %v4733_v12 = vpop.f32.mrb[68].mxu1  ;;  %7448 = vmatprep.mubr.bf16.mxu0 %v14441_v5  ;;  %7489 = vmatprep.mubr.bf16.mxu1 %v14441_v5 }
 0x3c4   :  { %v4740_v40 = vadd.f32 %v4692_v38, %v4543_v2  ;;  %v4742_v0 = vadd.f32 %v4733_v12, %v4545_v31  ;;  %v4694_v1 = vpop.f32.mrb[81].mxu0  ;;  %v4735_v22 = vpop.f32.mrb[69].mxu1  ;;  %v13835_v2 = vld [vmem:[#allocation9 + $0x924] ss:$16 sps:$4 sm:$0xff]   ;;  %v13838_v31 = vld [vmem:[#allocation9 + $0x92c] ss:$16 sps:$4 sm:$0xff]  }
 0x3c5   :  { %v4741_v41 = vadd.f32 %v4694_v1, %v4544_v9  ;;  %v4743_v42 = vadd.f32 %v4735_v22, %v4546_v10  ;;  %v4696_v44 = vpop.f32.mrb[82].mxu0  ;;  %v4737_v43 = vpop.f32.mrb[70].mxu1  ;;  %7419 = vmatpush1.bf16.msra.mxu0 %v13809_v32  ;;  %7460 = vmatpush1.bf16.msra.mxu1 %v13812_v33  ;;  %v13836_v9 = vld [vmem:[#allocation9 + $0x928] ss:$16 sps:$4 sm:$0xff]   ;;  %v13841_v10 = vld [vmem:[#allocation9 + $0x944] ss:$16 sps:$4 sm:$0xff]   ;;  %v7525_v32 = vunpack.c.l.b16 %v7504_v30  ;;  %v7702_v1 = vpack.c.bf16 %v7700_v37, %v7700_v37 }
 0x3c6   :  { %v4697_v48 = vpop.f32.mrb[83].mxu0  ;;  %v4738_v49 = vpop.f32.mrb[71].mxu1  ;;  %7420 = vmatprep.subr.bf16.mxu0 %v13817_v35  ;;  %7461 = vmatprep.subr.bf16.mxu1 %v13820_v36  ;;  %v13853_v33 = vld [vmem:[#allocation9 + $0x984] ss:$16 sps:$4 sm:$0xff]   ;;  %v13856_v35 = vld [vmem:[#allocation9 + $0x98c] ss:$16 sps:$4 sm:$0xff]  }
 0x3c7   :  { %v7528_v36 = vsel %vm4009_vm6, %v7527_v28, %v7525_v32  ;;  %v13851_v38 = vld [vmem:[#allocation9 + $0x980] ss:$16 sps:$4 sm:$0xff]   ;;  %v13854_v12 = vld [vmem:[#allocation9 + $0x988] ss:$16 sps:$4 sm:$0xff]   ;;  %v13868_v44 = vld [vmem:[#allocation9 + $0x9cc] ss:$16 sps:$4 sm:$0xff]   ;;  %v7723_v47 = vunpack.c.l.b16 %v7702_v1 }
 0x3c8   :  { %v7529_v39 = vpack.c.b16 %v7528_v36, %v7528_v36  ;;  %v13857_v22 = vld [vmem:[#allocation9 + $0x9a0] ss:$16 sps:$4 sm:$0xff]   ;;  %v7699_v43 = vld [vmem:[#allocation3 + $0x13] sm:$0x1]  ;;  %v13896_v1 = vld [vmem:[#allocation9 + $0xa68] ss:$16 sps:$4 sm:$0xff]  }
 0x3c9   :  { %7421 = vmatpush1.bf16.msra.mxu0 %v13815_v46  ;;  %7462 = vmatpush1.bf16.msra.mxu1 %v13818_v15  ;;  %v7701_v59 = vpack.c.bf16 %v7699_v43, %v7699_v43  ;;  %v8094_v43 = vld [vmem:[#allocation3 + $0x3d] sm:$0x1] }
 0x3ca   :  { %7422 = vmatprep.subr.bf16.mxu0 %v13823_v50  ;;  %7463 = vmatprep.subr.bf16.mxu1 %v13826_v23 }
 0x3cd   :  { %7423 = vmatpush1.bf16.msra.mxu0 %v13821_v54  ;;  %7464 = vmatpush1.bf16.msra.mxu1 %v13824_v34 }
 0x3ce   :  { %7613 = vmatprep.subr.bf16.mxu0 %v13829_v56  ;;  %7654 = vmatprep.subr.bf16.mxu1 %v13832_v57  ;;  %v13863_v56 = vld [vmem:[#allocation9 + $0x9c0] ss:$16 sps:$4 sm:$0xff]   ;;  %v13866_v57 = vld [vmem:[#allocation9 + $0x9c8] ss:$16 sps:$4 sm:$0xff]  }
 0x3d0   :  { %11842 = vmatmul.mubr.msk.bf16.vlgmr.msra.gmra.mrb[136].mxu0 %vm4092_vm7, %v7332_v63  ;;  %11843 = vmatmul.mubr.msk.bf16.vlgmr.msra.gmra.mrb[124].mxu1 %vm4092_vm7, %v7332_v63  ;;  %v13874_v63 = vld [vmem:[#allocation9 + $0x9ec] ss:$16 sps:$4 sm:$0xff]  }
 0x3d1   :  { %7614 = vmatpush1.bf16.msra.mxu0 %v13827_v60  ;;  %7655 = vmatpush1.bf16.msra.mxu1 %v13830_v61  ;;  %v13871_v61 = vld [vmem:[#allocation9 + $0x9e4] ss:$16 sps:$4 sm:$0xff]  }
 0x3d2   :  { %7615 = vmatprep.subr.bf16.mxu0 %v13835_v2  ;;  %7656 = vmatprep.subr.bf16.mxu1 %v13838_v31  ;;  %v7724_v2 = vrot.slane %v7723_v47, 7  ;;  %v13869_v31 = vld [vmem:[#allocation9 + $0x9e0] ss:$16 sps:$4 sm:$0xff]  }
 0x3d3   :  { %v4889_v13 = vpop.f32.mrb[84].mxu0  ;;  %v4930_v14 = vpop.f32.mrb[72].mxu1  ;;  %7645 = vmatprep.mubr.bf16.mxu0 %v14441_v5  ;;  %7686 = vmatprep.mubr.bf16.mxu1 %v14441_v5 }
 0x3d4   :  { %v4937_v17 = vadd.f32 %v4889_v13, %v4740_v40  ;;  %v4939_v52 = vadd.f32 %v4930_v14, %v4742_v0  ;;  %v4891_v18 = vpop.f32.mrb[85].mxu0  ;;  %v4932_v19 = vpop.f32.mrb[73].mxu1  ;;  %v13859_v40 = vld [vmem:[#allocation9 + $0x9a4] ss:$16 sps:$4 sm:$0xff]   ;;  %v13862_v0 = vld [vmem:[#allocation9 + $0x9ac] ss:$16 sps:$4 sm:$0xff]  }
 0x3d5   :  { %v4938_v8 = vadd.f32 %v4891_v18, %v4741_v41  ;;  %v4940_v20 = vadd.f32 %v4932_v19, %v4743_v42  ;;  %v4893_v21 = vpop.f32.mrb[86].mxu0  ;;  %v4934_v24 = vpop.f32.mrb[74].mxu1  ;;  %7616 = vmatpush1.bf16.msra.mxu0 %v13833_v6  ;;  %7657 = vmatpush1.bf16.msra.mxu1 %v13836_v9  ;;  %v13860_v41 = vld [vmem:[#allocation9 + $0x9a8] ss:$16 sps:$4 sm:$0xff]   ;;  %v13865_v42 = vld [vmem:[#allocation9 + $0x9c4] ss:$16 sps:$4 sm:$0xff]   ;;  %v7722_v6 = vunpack.c.l.b16 %v7701_v59  ;;  %v7899_v18 = vpack.c.bf16 %v7897_v11, %v7897_v11 }
 0x3d6   :  { %v4894_v58 = vpop.f32.mrb[87].mxu0  ;;  %v4935_v7 = vpop.f32.mrb[75].mxu1  ;;  %7617 = vmatprep.subr.bf16.mxu0 %v13841_v10  ;;  %7658 = vmatprep.subr.bf16.mxu1 %v13844_v62  ;;  %v13877_v9 = vld [vmem:[#allocation9 + $0xa04] ss:$16 sps:$4 sm:$0xff]   ;;  %v13880_v10 = vld [vmem:[#allocation9 + $0xa0c] ss:$16 sps:$4 sm:$0xff]  }
 0x3d7   :  { %v7725_v62 = vsel %vm4009_vm6, %v7724_v2, %v7722_v6  ;;  %v13875_v13 = vld [vmem:[#allocation9 + $0xa00] ss:$16 sps:$4 sm:$0xff]   ;;  %v13878_v14 = vld [vmem:[#allocation9 + $0xa08] ss:$16 sps:$4 sm:$0xff]   ;;  %v13892_v21 = vld [vmem:[#allocation9 + $0xa4c] ss:$16 sps:$4 sm:$0xff]   ;;  %v7920_v30 = vunpack.c.l.b16 %v7899_v18 }
 0x3d8   :  { %v7726_v16 = vpack.c.b16 %v7725_v62, %v7725_v62  ;;  %v13881_v19 = vld [vmem:[#allocation9 + $0xa20] ss:$16 sps:$4 sm:$0xff]   ;;  %v13920_v18 = vld [vmem:[#allocation9 + $0xae8] ss:$16 sps:$4 sm:$0xff]  }
 0x3d9   :  { %7618 = vmatpush1.bf16.msra.mxu0 %v13839_v27  ;;  %7659 = vmatpush1.bf16.msra.mxu1 %v13842_v25  ;;  %v7896_v24 = vld [vmem:[#allocation3 + $0x14] sm:$0x1] }
 0x3da   :  { %7619 = vmatprep.subr.bf16.mxu0 %v13847_v26  ;;  %7660 = vmatprep.subr.bf16.mxu1 %v13850_v53  ;;  %v7898_v36 = vpack.c.bf16 %v7896_v24, %v7896_v24  ;;  %v8291_v24 = vld [vmem:[#allocation3 + $0x3e] sm:$0x1] }
 0x3dd   :  { %7620 = vmatpush1.bf16.msra.mxu0 %v13845_v29  ;;  %7661 = vmatpush1.bf16.msra.mxu1 %v13848_v45 }
 0x3de   :  { %7810 = vmatprep.subr.bf16.mxu0 %v13853_v33  ;;  %7851 = vmatprep.subr.bf16.mxu1 %v13856_v35  ;;  %v13887_v33 = vld [vmem:[#allocation9 + $0xa40] ss:$16 sps:$4 sm:$0xff]   ;;  %v13890_v35 = vld [vmem:[#allocation9 + $0xa48] ss:$16 sps:$4 sm:$0xff]  }
 0x3e0   :  { %11860 = vmatmul.mubr.msk.bf16.vlgmr.msra.gmra.mrb[140].mxu0 %vm4092_vm7, %v7529_v39  ;;  %11861 = vmatmul.mubr.msk.bf16.vlgmr.msra.gmra.mrb[128].mxu1 %vm4092_vm7, %v7529_v39  ;;  %v13898_v39 = vld [vmem:[#allocation9 + $0xa6c] ss:$16 sps:$4 sm:$0xff]  }
 0x3e1   :  { %7811 = vmatpush1.bf16.msra.mxu0 %v13851_v38  ;;  %7852 = vmatpush1.bf16.msra.mxu1 %v13854_v12  ;;  %v13895_v12 = vld [vmem:[#allocation9 + $0xa64] ss:$16 sps:$4 sm:$0xff]  }
 0x3e2   :  { %7812 = vmatprep.subr.bf16.mxu0 %v13859_v40  ;;  %7853 = vmatprep.subr.bf16.mxu1 %v13862_v0  ;;  %v7921_v40 = vrot.slane %v7920_v30, 7  ;;  %v13893_v0 = vld [vmem:[#allocation9 + $0xa60] ss:$16 sps:$4 sm:$0xff]  }
 0x3e3   :  { %v5086_v46 = vpop.f32.mrb[88].mxu0  ;;  %v5127_v15 = vpop.f32.mrb[76].mxu1  ;;  %7842 = vmatprep.mubr.bf16.mxu0 %v14441_v5  ;;  %7883 = vmatprep.mubr.bf16.mxu1 %v14441_v5 }
 0x3e4   :  { %v5134_v48 = vadd.f32 %v5086_v46, %v4937_v17  ;;  %v5136_v49 = vadd.f32 %v5127_v15, %v4939_v52  ;;  %v5088_v50 = vpop.f32.mrb[89].mxu0  ;;  %v5129_v23 = vpop.f32.mrb[77].mxu1  ;;  %v13883_v17 = vld [vmem:[#allocation9 + $0xa24] ss:$16 sps:$4 sm:$0xff]   ;;  %v13886_v52 = vld [vmem:[#allocation9 + $0xa2c] ss:$16 sps:$4 sm:$0xff]  }
 0x3e5   :  { %v5135_v51 = vadd.f32 %v5088_v50, %v4938_v8  ;;  %v5137_v54 = vadd.f32 %v5129_v23, %v4940_v20  ;;  %v5090_v34 = vpop.f32.mrb[90].mxu0  ;;  %v5131_v55 = vpop.f32.mrb[78].mxu1  ;;  %7813 = vmatpush1.bf16.msra.mxu0 %v13857_v22  ;;  %7854 = vmatpush1.bf16.msra.mxu1 %v13860_v41  ;;  %v13884_v8 = vld [vmem:[#allocation9 + $0xa28] ss:$16 sps:$4 sm:$0xff]   ;;  %v13889_v20 = vld [vmem:[#allocation9 + $0xa44] ss:$16 sps:$4 sm:$0xff]   ;;  %v7919_v22 = vunpack.c.l.b16 %v7898_v36  ;;  %v8096_v50 = vpack.c.bf16 %v8094_v43, %v8094_v43 }
 0x3e6   :  { %v5091_v4 = vpop.f32.mrb[91].mxu0  ;;  %v5132_v60 = vpop.f32.mrb[79].mxu1  ;;  %7814 = vmatprep.subr.bf16.mxu0 %v13865_v42  ;;  %7855 = vmatprep.subr.bf16.mxu1 %v13868_v44  ;;  %v13901_v41 = vld [vmem:[#allocation9 + $0xa84] ss:$16 sps:$4 sm:$0xff]   ;;  %v13904_v42 = vld [vmem:[#allocation9 + $0xa8c] ss:$16 sps:$4 sm:$0xff]  }
 0x3e7   :  { %v7922_v44 = vsel %vm4009_vm6, %v7921_v40, %v7919_v22  ;;  %v13899_v46 = vld [vmem:[#allocation9 + $0xa80] ss:$16 sps:$4 sm:$0xff]   ;;  %v13902_v15 = vld [vmem:[#allocation9 + $0xa88] ss:$16 sps:$4 sm:$0xff]   ;;  %v13916_v34 = vld [vmem:[#allocation9 + $0xacc] ss:$16 sps:$4 sm:$0xff]   ;;  %v8117_v59 = vunpack.c.l.b16 %v8096_v50 }
 0x3e8   :  { %v7923_v47 = vpack.c.b16 %v7922_v44, %v7922_v44  ;;  %v13905_v23 = vld [vmem:[#allocation9 + $0xaa0] ss:$16 sps:$4 sm:$0xff]   ;;  %v13944_v50 = vld [vmem:[#allocation9 + $0xb68] ss:$16 sps:$4 sm:$0xff]  }
 0x3e9   :  { %7815 = vmatpush1.bf16.msra.mxu0 %v13863_v56  ;;  %7856 = vmatpush1.bf16.msra.mxu1 %v13866_v57  ;;  %v8093_v55 = vld [vmem:[#allocation3 + $0x15] sm:$0x1] }
 0x3ea   :  { %7816 = vmatprep.subr.bf16.mxu0 %v13871_v61  ;;  %7857 = vmatprep.subr.bf16.mxu1 %v13874_v63  ;;  %v8095_v62 = vpack.c.bf16 %v8093_v55, %v8093_v55  ;;  %v8488_v55 = vld [vmem:[#allocation3 + $0x3f] sm:$0x1] }
 0x3ed   :  { %7817 = vmatpush1.bf16.msra.mxu0 %v13869_v31  ;;  %7858 = vmatpush1.bf16.msra.mxu1 %v13872_v3 }
 0x3ee   :  { %8007 = vmatprep.subr.bf16.mxu0 %v13877_v9  ;;  %8048 = vmatprep.subr.bf16.mxu1 %v13880_v10  ;;  %v13911_v9 = vld [vmem:[#allocation9 + $0xac0] ss:$16 sps:$4 sm:$0xff]   ;;  %v13914_v10 = vld [vmem:[#allocation9 + $0xac8] ss:$16 sps:$4 sm:$0xff]  }
 0x3f0   :  { %11878 = vmatmul.mubr.msk.bf16.vlgmr.msra.gmra.mrb[144].mxu0 %vm4092_vm7, %v7726_v16  ;;  %11879 = vmatmul.mubr.msk.bf16.vlgmr.msra.gmra.mrb[132].mxu1 %vm4092_vm7, %v7726_v16  ;;  %v13922_v16 = vld [vmem:[#allocation9 + $0xaec] ss:$16 sps:$4 sm:$0xff]  }
 0x3f1   :  { %8008 = vmatpush1.bf16.msra.mxu0 %v13875_v13  ;;  %8049 = vmatpush1.bf16.msra.mxu1 %v13878_v14  ;;  %v13919_v14 = vld [vmem:[#allocation9 + $0xae4] ss:$16 sps:$4 sm:$0xff]  }
 0x3f2   :  { %8009 = vmatprep.subr.bf16.mxu0 %v13883_v17  ;;  %8050 = vmatprep.subr.bf16.mxu1 %v13886_v52  ;;  %v8118_v17 = vrot.slane %v8117_v59, 7  ;;  %v13917_v52 = vld [vmem:[#allocation9 + $0xae0] ss:$16 sps:$4 sm:$0xff]  }
 0x3f3   :  { %v5283_v27 = vpop.f32.mrb[92].mxu0  ;;  %v5324_v25 = vpop.f32.mrb[80].mxu1  ;;  %8039 = vmatprep.mubr.bf16.mxu0 %v14441_v5  ;;  %8080 = vmatprep.mubr.bf16.mxu1 %v14441_v5 }
 0x3f4   :  { %v5331_v58 = vadd.f32 %v5283_v27, %v5134_v48  ;;  %v5333_v7 = vadd.f32 %v5324_v25, %v5136_v49  ;;  %v5285_v26 = vpop.f32.mrb[93].mxu0  ;;  %v5326_v53 = vpop.f32.mrb[81].mxu1  ;;  %v13907_v48 = vld [vmem:[#allocation9 + $0xaa4] ss:$16 sps:$4 sm:$0xff]   ;;  %v13910_v49 = vld [vmem:[#allocation9 + $0xaac] ss:$16 sps:$4 sm:$0xff]  }
 0x3f5   :  { %v5332_v28 = vadd.f32 %v5285_v26, %v5135_v51  ;;  %v5334_v29 = vadd.f32 %v5326_v53, %v5137_v54  ;;  %v5287_v45 = vpop.f32.mrb[94].mxu0  ;;  %v5328_v32 = vpop.f32.mrb[82].mxu1  ;;  %8010 = vmatpush1.bf16.msra.mxu0 %v13881_v19  ;;  %8051 = vmatpush1.bf16.msra.mxu1 %v13884_v8  ;;  %v13908_v51 = vld [vmem:[#allocation9 + $0xaa8] ss:$16 sps:$4 sm:$0xff]   ;;  %v13913_v54 = vld [vmem:[#allocation9 + $0xac4] ss:$16 sps:$4 sm:$0xff]   ;;  %v8116_v19 = vunpack.c.l.b16 %v8095_v62  ;;  %v8293_v26 = vpack.c.bf16 %v8291_v24, %v8291_v24 }
 0x3f6   :  { %v5288_v37 = vpop.f32.mrb[95].mxu0  ;;  %v5329_v38 = vpop.f32.mrb[83].mxu1  ;;  %8011 = vmatprep.subr.bf16.mxu0 %v13889_v20  ;;  %8052 = vmatprep.subr.bf16.mxu1 %v13892_v21  ;;  %v13925_v8 = vld [vmem:[#allocation9 + $0xb04] ss:$16 sps:$4 sm:$0xff]   ;;  %v13928_v20 = vld [vmem:[#allocation9 + $0xb0c] ss:$16 sps:$4 sm:$0xff]  }
 0x3f7   :  { %v8119_v21 = vsel %vm4009_vm6, %v8118_v17, %v8116_v19  ;;  %v13923_v27 = vld [vmem:[#allocation9 + $0xb00] ss:$16 sps:$4 sm:$0xff]   ;;  %v13926_v25 = vld [vmem:[#allocation9 + $0xb08] ss:$16 sps:$4 sm:$0xff]   ;;  %v13940_v45 = vld [vmem:[#allocation9 + $0xb4c] ss:$16 sps:$4 sm:$0xff]   ;;  %v8314_v36 = vunpack.c.l.b16 %v8293_v26 }
 0x3f8   :  { %v8120_v30 = vpack.c.b16 %v8119_v21, %v8119_v21  ;;  %v13929_v53 = vld [vmem:[#allocation9 + $0xb20] ss:$16 sps:$4 sm:$0xff]   ;;  %v13968_v26 = vld [vmem:[#allocation9 + $0xbe8] ss:$16 sps:$4 sm:$0xff]  }
 0x3f9   :  { %8012 = vmatpush1.bf16.msra.mxu0 %v13887_v33  ;;  %8053 = vmatpush1.bf16.msra.mxu1 %v13890_v35  ;;  %v8290_v32 = vld [vmem:[#allocation3 + $0x16] sm:$0x1] }
 0x3fa   :  { %8013 = vmatprep.subr.bf16.mxu0 %v13895_v12  ;;  %8054 = vmatprep.subr.bf16.mxu1 %v13898_v39  ;;  %v8292_v44 = vpack.c.bf16 %v8290_v32, %v8290_v32  ;;  %v8685_v32 = vld [vmem:[#allocation3 + $0x40] sm:$0x1] }
 0x3fd   :  { %8014 = vmatpush1.bf16.msra.mxu0 %v13893_v0  ;;  %8055 = vmatpush1.bf16.msra.mxu1 %v13896_v1 }
 0x3fe   :  { %8204 = vmatprep.subr.bf16.mxu0 %v13901_v41  ;;  %8245 = vmatprep.subr.bf16.mxu1 %v13904_v42  ;;  %v13935_v41 = vld [vmem:[#allocation9 + $0xb40] ss:$16 sps:$4 sm:$0xff]   ;;  %v13938_v42 = vld [vmem:[#allocation9 + $0xb48] ss:$16 sps:$4 sm:$0xff]  }
 0x400   :  { %11896 = vmatmul.mubr.msk.bf16.vlgmr.msra.gmra.mrb[148].mxu0 %vm4092_vm7, %v7923_v47  ;;  %11897 = vmatmul.mubr.msk.bf16.vlgmr.msra.gmra.mrb[136].mxu1 %vm4092_vm7, %v7923_v47  ;;  %v13946_v47 = vld [vmem:[#allocation9 + $0xb6c] ss:$16 sps:$4 sm:$0xff]  }
 0x401   :  { %8205 = vmatpush1.bf16.msra.mxu0 %v13899_v46  ;;  %8246 = vmatpush1.bf16.msra.mxu1 %v13902_v15  ;;  %v13943_v15 = vld [vmem:[#allocation9 + $0xb64] ss:$16 sps:$4 sm:$0xff]  }
 0x402   :  { %8206 = vmatprep.subr.bf16.mxu0 %v13907_v48  ;;  %8247 = vmatprep.subr.bf16.mxu1 %v13910_v49  ;;  %v8315_v48 = vrot.slane %v8314_v36, 7  ;;  %v13941_v49 = vld [vmem:[#allocation9 + $0xb60] ss:$16 sps:$4 sm:$0xff]  }
 0x403   :  { %v5480_v56 = vpop.f32.mrb[96].mxu0  ;;  %v5521_v57 = vpop.f32.mrb[84].mxu1  ;;  %8236 = vmatprep.mubr.bf16.mxu0 %v14441_v5  ;;  %8277 = vmatprep.mubr.bf16.mxu1 %v14441_v5 }
 0x404   :  { %v5528_v4 = vadd.f32 %v5480_v56, %v5331_v58  ;;  %v5530_v60 = vadd.f32 %v5521_v57, %v5333_v7  ;;  %v5482_v61 = vpop.f32.mrb[97].mxu0  ;;  %v5523_v63 = vpop.f32.mrb[85].mxu1  ;;  %v13931_v58 = vld [vmem:[#allocation9 + $0xb24] ss:$16 sps:$4 sm:$0xff]   ;;  %v13934_v7 = vld [vmem:[#allocation9 + $0xb2c] ss:$16 sps:$4 sm:$0xff]  }
 0x405   :  { %v5529_v2 = vadd.f32 %v5482_v61, %v5332_v28  ;;  %v5531_v31 = vadd.f32 %v5523_v63, %v5334_v29  ;;  %v5484_v3 = vpop.f32.mrb[98].mxu0  ;;  %v5525_v6 = vpop.f32.mrb[86].mxu1  ;;  %8207 = vmatpush1.bf16.msra.mxu0 %v13905_v23  ;;  %8248 = vmatpush1.bf16.msra.mxu1 %v13908_v51  ;;  %v13932_v28 = vld [vmem:[#allocation9 + $0xb28] ss:$16 sps:$4 sm:$0xff]   ;;  %v13937_v29 = vld [vmem:[#allocation9 + $0xb44] ss:$16 sps:$4 sm:$0xff]   ;;  %v8313_v23 = vunpack.c.l.b16 %v8292_v44  ;;  %v8490_v61 = vpack.c.bf16 %v8488_v55, %v8488_v55 }
 0x406   :  { %v5485_v11 = vpop.f32.mrb[99].mxu0  ;;  %v5526_v13 = vpop.f32.mrb[87].mxu1  ;;  %8208 = vmatprep.subr.bf16.mxu0 %v13913_v54  ;;  %8249 = vmatprep.subr.bf16.mxu1 %v13916_v34  ;;  %v13949_v51 = vld [vmem:[#allocation9 + $0xb84] ss:$16 sps:$4 sm:$0xff]   ;;  %v13952_v54 = vld [vmem:[#allocation9 + $0xb8c] ss:$16 sps:$4 sm:$0xff]  }
 0x407   :  { %v8316_v34 = vsel %vm4009_vm6, %v8315_v48, %v8313_v23  ;;  %v13947_v56 = vld [vmem:[#allocation9 + $0xb80] ss:$16 sps:$4 sm:$0xff]   ;;  %v13950_v57 = vld [vmem:[#allocation9 + $0xb88] ss:$16 sps:$4 sm:$0xff]   ;;  %v13964_v3 = vld [vmem:[#allocation9 + $0xbcc] ss:$16 sps:$4 sm:$0xff]   ;;  %v8511_v62 = vunpack.c.l.b16 %v8490_v61 }
 0x408   :  { %v8317_v59 = vpack.c.b16 %v8316_v34, %v8316_v34  ;;  %v13953_v63 = vld [vmem:[#allocation9 + $0xba0] ss:$16 sps:$4 sm:$0xff]   ;;  %v13992_v61 = vld [vmem:[#allocation9 + $0xc68] ss:$16 sps:$4 sm:$0xff]  }
 0x409   :  { %8209 = vmatpush1.bf16.msra.mxu0 %v13911_v9  ;;  %8250 = vmatpush1.bf16.msra.mxu1 %v13914_v10  ;;  %v8487_v6 = vld [vmem:[#allocation3 + $0x17] sm:$0x1] }
 0x40a   :  { %8210 = vmatprep.subr.bf16.mxu0 %v13919_v14  ;;  %8251 = vmatprep.subr.bf16.mxu1 %v13922_v16  ;;  %v8489_v21 = vpack.c.bf16 %v8487_v6, %v8487_v6  ;;  %v8882_v6 = vld [vmem:[#allocation3 + $0x41] sm:$0x1] }
 0x40d   :  { %8211 = vmatpush1.bf16.msra.mxu0 %v13917_v52  ;;  %8252 = vmatpush1.bf16.msra.mxu1 %v13920_v18 }
 0x40e   :  { %8401 = vmatprep.subr.bf16.mxu0 %v13925_v8  ;;  %8442 = vmatprep.subr.bf16.mxu1 %v13928_v20  ;;  %v13959_v8 = vld [vmem:[#allocation9 + $0xbc0] ss:$16 sps:$4 sm:$0xff]   ;;  %v13962_v20 = vld [vmem:[#allocation9 + $0xbc8] ss:$16 sps:$4 sm:$0xff]  }
 0x410   :  { %11914 = vmatmul.mubr.msk.bf16.vlgmr.msra.gmra.mrb[152].mxu0 %vm4092_vm7, %v8120_v30  ;;  %11915 = vmatmul.mubr.msk.bf16.vlgmr.msra.gmra.mrb[140].mxu1 %vm4092_vm7, %v8120_v30  ;;  %v13970_v30 = vld [vmem:[#allocation9 + $0xbec] ss:$16 sps:$4 sm:$0xff]  }
 0x411   :  { %8402 = vmatpush1.bf16.msra.mxu0 %v13923_v27  ;;  %8443 = vmatpush1.bf16.msra.mxu1 %v13926_v25  ;;  %v13967_v25 = vld [vmem:[#allocation9 + $0xbe4] ss:$16 sps:$4 sm:$0xff]  }
 0x412   :  { %8403 = vmatprep.subr.bf16.mxu0 %v13931_v58  ;;  %8444 = vmatprep.subr.bf16.mxu1 %v13934_v7  ;;  %v8512_v58 = vrot.slane %v8511_v62, 7  ;;  %v13965_v7 = vld [vmem:[#allocation9 + $0xbe0] ss:$16 sps:$4 sm:$0xff]  }
 0x413   :  { %v5677_v33 = vpop.f32.mrb[100].mxu0  ;;  %v5718_v35 = vpop.f32.mrb[88].mxu1  ;;  %8433 = vmatprep.mubr.bf16.mxu0 %v14441_v5  ;;  %8474 = vmatprep.mubr.bf16.mxu1 %v14441_v5 }
 0x414   :  { %v5725_v37 = vadd.f32 %v5677_v33, %v5528_v4  ;;  %v5727_v38 = vadd.f32 %v5718_v35, %v5530_v60  ;;  %v5679_v12 = vpop.f32.mrb[101].mxu0  ;;  %v5720_v39 = vpop.f32.mrb[89].mxu1  ;;  %v13955_v4 = vld [vmem:[#allocation9 + $0xba4] ss:$16 sps:$4 sm:$0xff]   ;;  %v13958_v60 = vld [vmem:[#allocation9 + $0xbac] ss:$16 sps:$4 sm:$0xff]  }
 0x415   :  { %v5726_v40 = vadd.f32 %v5679_v12, %v5529_v2  ;;  %v5728_v0 = vadd.f32 %v5720_v39, %v5531_v31  ;;  %v5681_v1 = vpop.f32.mrb[102].mxu0  ;;  %v5722_v22 = vpop.f32.mrb[90].mxu1  ;;  %8404 = vmatpush1.bf16.msra.mxu0 %v13929_v53  ;;  %8445 = vmatpush1.bf16.msra.mxu1 %v13932_v28  ;;  %v13956_v2 = vld [vmem:[#allocation9 + $0xba8] ss:$16 sps:$4 sm:$0xff]   ;;  %v13961_v31 = vld [vmem:[#allocation9 + $0xbc4] ss:$16 sps:$4 sm:$0xff]   ;;  %v8510_v53 = vunpack.c.l.b16 %v8489_v21  ;;  %v8687_v12 = vpack.c.bf16 %v8685_v32, %v8685_v32 }
 0x416   :  { %v5682_v43 = vpop.f32.mrb[103].mxu0  ;;  %v5723_v46 = vpop.f32.mrb[91].mxu1  ;;  %8405 = vmatprep.subr.bf16.mxu0 %v13937_v29  ;;  %8446 = vmatprep.subr.bf16.mxu1 %v13940_v45  ;;  %v13973_v28 = vld [vmem:[#allocation9 + $0xc04] ss:$16 sps:$4 sm:$0xff]   ;;  %v13976_v29 = vld [vmem:[#allocation9 + $0xc0c] ss:$16 sps:$4 sm:$0xff]  }
 0x417   :  { %v8513_v45 = vsel %vm4009_vm6, %v8512_v58, %v8510_v53  ;;  %v13971_v33 = vld [vmem:[#allocation9 + $0xc00] ss:$16 sps:$4 sm:$0xff]   ;;  %v13974_v35 = vld [vmem:[#allocation9 + $0xc08] ss:$16 sps:$4 sm:$0xff]   ;;  %v13988_v1 = vld [vmem:[#allocation9 + $0xc4c] ss:$16 sps:$4 sm:$0xff]   ;;  %v8708_v44 = vunpack.c.l.b16 %v8687_v12 }
 0x418   :  { %v8514_v36 = vpack.c.b16 %v8513_v45, %v8513_v45  ;;  %v13977_v39 = vld [vmem:[#allocation9 + $0xc20] ss:$16 sps:$4 sm:$0xff]   ;;  %v8684_v22 = vld [vmem:[#allocation3 + $0x18] sm:$0x1]  ;;  %v14016_v12 = vld [vmem:[#allocation9 + $0xce8] ss:$16 sps:$4 sm:$0xff]  }
 0x419   :  { %8406 = vmatpush1.bf16.msra.mxu0 %v13935_v41  ;;  %8447 = vmatpush1.bf16.msra.mxu1 %v13938_v42  ;;  %v8686_v34 = vpack.c.bf16 %v8684_v22, %v8684_v22  ;;  %v9079_v22 = vld [vmem:[#allocation3 + $0x42] sm:$0x1] }
 0x41a   :  { %8407 = vmatprep.subr.bf16.mxu0 %v13943_v15  ;;  %8448 = vmatprep.subr.bf16.mxu1 %v13946_v47 }
 0x41d   :  { %8408 = vmatpush1.bf16.msra.mxu0 %v13941_v49  ;;  %8449 = vmatpush1.bf16.msra.mxu1 %v13944_v50 }
 0x41e   :  { %8598 = vmatprep.subr.bf16.mxu0 %v13949_v51  ;;  %8639 = vmatprep.subr.bf16.mxu1 %v13952_v54  ;;  %v13983_v51 = vld [vmem:[#allocation9 + $0xc40] ss:$16 sps:$4 sm:$0xff]   ;;  %v13986_v54 = vld [vmem:[#allocation9 + $0xc48] ss:$16 sps:$4 sm:$0xff]  }
 0x420   :  { %11932 = vmatmul.mubr.msk.bf16.vlgmr.msra.gmra.mrb[156].mxu0 %vm4092_vm7, %v8317_v59  ;;  %11933 = vmatmul.mubr.msk.bf16.vlgmr.msra.gmra.mrb[144].mxu1 %vm4092_vm7, %v8317_v59  ;;  %v13994_v59 = vld [vmem:[#allocation9 + $0xc6c] ss:$16 sps:$4 sm:$0xff]  }
 0x421   :  { %8599 = vmatpush1.bf16.msra.mxu0 %v13947_v56  ;;  %8640 = vmatpush1.bf16.msra.mxu1 %v13950_v57  ;;  %v13991_v57 = vld [vmem:[#allocation9 + $0xc64] ss:$16 sps:$4 sm:$0xff]  }
 0x422   :  { %8600 = vmatprep.subr.bf16.mxu0 %v13955_v4  ;;  %8641 = vmatprep.subr.bf16.mxu1 %v13958_v60  ;;  %v8709_v4 = vrot.slane %v8708_v44, 7  ;;  %v13989_v60 = vld [vmem:[#allocation9 + $0xc60] ss:$16 sps:$4 sm:$0xff]  }
 0x423   :  { %v5874_v9 = vpop.f32.mrb[104].mxu0  ;;  %v5915_v10 = vpop.f32.mrb[92].mxu1  ;;  %8630 = vmatprep.mubr.bf16.mxu0 %v14441_v5  ;;  %8671 = vmatprep.mubr.bf16.mxu1 %v14441_v5 }
 0x424   :  { %v5922_v11 = vadd.f32 %v5874_v9, %v5725_v37  ;;  %v5924_v13 = vadd.f32 %v5915_v10, %v5727_v38  ;;  %v5876_v14 = vpop.f32.mrb[105].mxu0  ;;  %v5917_v16 = vpop.f32.mrb[93].mxu1  ;;  %v13979_v37 = vld [vmem:[#allocation9 + $0xc24] ss:$16 sps:$4 sm:$0xff]   ;;  %v13982_v38 = vld [vmem:[#allocation9 + $0xc2c] ss:$16 sps:$4 sm:$0xff]  }
 0x425   :  { %v5923_v17 = vadd.f32 %v5876_v14, %v5726_v40  ;;  %v5925_v52 = vadd.f32 %v5917_v16, %v5728_v0  ;;  %v5878_v18 = vpop.f32.mrb[106].mxu0  ;;  %v5919_v19 = vpop.f32.mrb[94].mxu1  ;;  %8601 = vmatpush1.bf16.msra.mxu0 %v13953_v63  ;;  %8642 = vmatpush1.bf16.msra.mxu1 %v13956_v2  ;;  %v13980_v40 = vld [vmem:[#allocation9 + $0xc28] ss:$16 sps:$4 sm:$0xff]   ;;  %v13985_v0 = vld [vmem:[#allocation9 + $0xc44] ss:$16 sps:$4 sm:$0xff]   ;;  %v8707_v63 = vunpack.c.l.b16 %v8686_v34  ;;  %v8884_v14 = vpack.c.bf16 %v8882_v6, %v8882_v6 }
 0x426   :  { %v5879_v24 = vpop.f32.mrb[107].mxu0  ;;  %v5920_v27 = vpop.f32.mrb[95].mxu1  ;;  %8602 = vmatprep.subr.bf16.mxu0 %v13961_v31  ;;  %8643 = vmatprep.subr.bf16.mxu1 %v13964_v3  ;;  %v13997_v2 = vld [vmem:[#allocation9 + $0xc84] ss:$16 sps:$4 sm:$0xff]   ;;  %v14000_v31 = vld [vmem:[#allocation9 + $0xc8c] ss:$16 sps:$4 sm:$0xff]  }
 0x427   :  { %v8710_v3 = vsel %vm4009_vm6, %v8709_v4, %v8707_v63  ;;  %v13995_v9 = vld [vmem:[#allocation9 + $0xc80] ss:$16 sps:$4 sm:$0xff]   ;;  %v13998_v10 = vld [vmem:[#allocation9 + $0xc88] ss:$16 sps:$4 sm:$0xff]   ;;  %v14012_v18 = vld [vmem:[#allocation9 + $0xccc] ss:$16 sps:$4 sm:$0xff]   ;;  %v8905_v21 = vunpack.c.l.b16 %v8884_v14 }
 0x428   :  { %v8711_v62 = vpack.c.b16 %v8710_v3, %v8710_v3  ;;  %v14001_v16 = vld [vmem:[#allocation9 + $0xca0] ss:$16 sps:$4 sm:$0xff]   ;;  %v8881_v19 = vld [vmem:[#allocation3 + $0x19] sm:$0x1]  ;;  %v14040_v14 = vld [vmem:[#allocation9 + $0xd68] ss:$16 sps:$4 sm:$0xff]  }
 0x429   :  { %8603 = vmatpush1.bf16.msra.mxu0 %v13959_v8  ;;  %8644 = vmatpush1.bf16.msra.mxu1 %v13962_v20  ;;  %v8883_v45 = vpack.c.bf16 %v8881_v19, %v8881_v19  ;;  %v9276_v19 = vld [vmem:[#allocation3 + $0x43] sm:$0x1] }
 0x42a   :  { %8604 = vmatprep.subr.bf16.mxu0 %v13967_v25  ;;  %8645 = vmatprep.subr.bf16.mxu1 %v13970_v30 }
 0x42d   :  { %8605 = vmatpush1.bf16.msra.mxu0 %v13965_v7  ;;  %8646 = vmatpush1.bf16.msra.mxu1 %v13968_v26 }
 0x42e   :  { %8795 = vmatprep.subr.bf16.mxu0 %v13973_v28  ;;  %8836 = vmatprep.subr.bf16.mxu1 %v13976_v29  ;;  %v14007_v28 = vld [vmem:[#allocation9 + $0xcc0] ss:$16 sps:$4 sm:$0xff]   ;;  %v14010_v29 = vld [vmem:[#allocation9 + $0xcc8] ss:$16 sps:$4 sm:$0xff]  }
 0x430   :  { %11950 = vmatmul.mubr.msk.bf16.vlgmr.msra.gmra.mrb[160].mxu0 %vm4092_vm7, %v8514_v36  ;;  %11951 = vmatmul.mubr.msk.bf16.vlgmr.msra.gmra.mrb[148].mxu1 %vm4092_vm7, %v8514_v36  ;;  %v14018_v36 = vld [vmem:[#allocation9 + $0xcec] ss:$16 sps:$4 sm:$0xff]  }
 0x431   :  { %8796 = vmatpush1.bf16.msra.mxu0 %v13971_v33  ;;  %8837 = vmatpush1.bf16.msra.mxu1 %v13974_v35  ;;  %v14015_v35 = vld [vmem:[#allocation9 + $0xce4] ss:$16 sps:$4 sm:$0xff]  }
 0x432   :  { %8797 = vmatprep.subr.bf16.mxu0 %v13979_v37  ;;  %8838 = vmatprep.subr.bf16.mxu1 %v13982_v38  ;;  %v8906_v37 = vrot.slane %v8905_v21, 7  ;;  %v14013_v38 = vld [vmem:[#allocation9 + $0xce0] ss:$16 sps:$4 sm:$0xff]  }
 0x433   :  { %v6071_v41 = vpop.f32.mrb[108].mxu0  ;;  %v6112_v42 = vpop.f32.mrb[96].mxu1  ;;  %8827 = vmatprep.mubr.bf16.mxu0 %v14441_v5  ;;  %8868 = vmatprep.mubr.bf16.mxu1 %v14441_v5 }
 0x434   :  { %v6119_v43 = vadd.f32 %v6071_v41, %v5922_v11  ;;  %v6121_v46 = vadd.f32 %v6112_v42, %v5924_v13  ;;  %v6073_v15 = vpop.f32.mrb[109].mxu0  ;;  %v6114_v47 = vpop.f32.mrb[97].mxu1  ;;  %v14003_v11 = vld [vmem:[#allocation9 + $0xca4] ss:$16 sps:$4 sm:$0xff]   ;;  %v14006_v13 = vld [vmem:[#allocation9 + $0xcac] ss:$16 sps:$4 sm:$0xff]  }
 0x435   :  { %v6120_v48 = vadd.f32 %v6073_v15, %v5923_v17  ;;  %v6122_v49 = vadd.f32 %v6114_v47, %v5925_v52  ;;  %v6075_v50 = vpop.f32.mrb[110].mxu0  ;;  %v6116_v23 = vpop.f32.mrb[98].mxu1  ;;  %8798 = vmatpush1.bf16.msra.mxu0 %v13977_v39  ;;  %8839 = vmatpush1.bf16.msra.mxu1 %v13980_v40  ;;  %v14004_v17 = vld [vmem:[#allocation9 + $0xca8] ss:$16 sps:$4 sm:$0xff]   ;;  %v14009_v52 = vld [vmem:[#allocation9 + $0xcc4] ss:$16 sps:$4 sm:$0xff]   ;;  %v8904_v39 = vunpack.c.l.b16 %v8883_v45  ;;  %v9081_v15 = vpack.c.bf16 %v9079_v22, %v9079_v22 }
 0x436   :  { %v6076_v55 = vpop.f32.mrb[111].mxu0  ;;  %v6117_v56 = vpop.f32.mrb[99].mxu1  ;;  %8799 = vmatprep.subr.bf16.mxu0 %v13985_v0  ;;  %8840 = vmatprep.subr.bf16.mxu1 %v13988_v1  ;;  %v14021_v40 = vld [vmem:[#allocation9 + $0xd04] ss:$16 sps:$4 sm:$0xff]   ;;  %v14024_v0 = vld [vmem:[#allocation9 + $0xd0c] ss:$16 sps:$4 sm:$0xff]  }
 0x437   :  { %v8907_v1 = vsel %vm4009_vm6, %v8906_v37, %v8904_v39  ;;  %v14019_v41 = vld [vmem:[#allocation9 + $0xd00] ss:$16 sps:$4 sm:$0xff]   ;;  %v14022_v42 = vld [vmem:[#allocation9 + $0xd08] ss:$16 sps:$4 sm:$0xff]   ;;  %v14036_v50 = vld [vmem:[#allocation9 + $0xd4c] ss:$16 sps:$4 sm:$0xff]   ;;  %v9102_v34 = vunpack.c.l.b16 %v9081_v15 }
 0x438   :  { %v8908_v44 = vpack.c.b16 %v8907_v1, %v8907_v1  ;;  %v14025_v47 = vld [vmem:[#allocation9 + $0xd20] ss:$16 sps:$4 sm:$0xff]   ;;  %v9078_v23 = vld [vmem:[#allocation3 + $0x1a] sm:$0x1]  ;;  %v14064_v15 = vld [vmem:[#allocation9 + $0xde8] ss:$16 sps:$4 sm:$0xff]  }
 0x439   :  { %8800 = vmatpush1.bf16.msra.mxu0 %v13983_v51  ;;  %8841 = vmatpush1.bf16.msra.mxu1 %v13986_v54  ;;  %v9080_v3 = vpack.c.bf16 %v9078_v23, %v9078_v23  ;;  %v9473_v23 = vld [vmem:[#allocation3 + $0x44] sm:$0x1] }
 0x43a   :  { %8801 = vmatprep.subr.bf16.mxu0 %v13991_v57  ;;  %8842 = vmatprep.subr.bf16.mxu1 %v13994_v59 }
 0x43d   :  { %8802 = vmatpush1.bf16.msra.mxu0 %v13989_v60  ;;  %8843 = vmatpush1.bf16.msra.mxu1 %v13992_v61 }
 0x43e   :  { %8992 = vmatprep.subr.bf16.mxu0 %v13997_v2  ;;  %9033 = vmatprep.subr.bf16.mxu1 %v14000_v31  ;;  %v14031_v2 = vld [vmem:[#allocation9 + $0xd40] ss:$16 sps:$4 sm:$0xff]   ;;  %v14034_v31 = vld [vmem:[#allocation9 + $0xd48] ss:$16 sps:$4 sm:$0xff]  }
 0x440   :  { %11968 = vmatmul.mubr.msk.bf16.vlgmr.msra.gmra.mrb[164].mxu0 %vm4092_vm7, %v8711_v62  ;;  %11969 = vmatmul.mubr.msk.bf16.vlgmr.msra.gmra.mrb[152].mxu1 %vm4092_vm7, %v8711_v62  ;;  %v14042_v62 = vld [vmem:[#allocation9 + $0xd6c] ss:$16 sps:$4 sm:$0xff]  }
 0x441   :  { %8993 = vmatpush1.bf16.msra.mxu0 %v13995_v9  ;;  %9034 = vmatpush1.bf16.msra.mxu1 %v13998_v10  ;;  %v14039_v10 = vld [vmem:[#allocation9 + $0xd64] ss:$16 sps:$4 sm:$0xff]  }
 0x442   :  { %8994 = vmatprep.subr.bf16.mxu0 %v14003_v11  ;;  %9035 = vmatprep.subr.bf16.mxu1 %v14006_v13  ;;  %v9103_v11 = vrot.slane %v9102_v34, 7  ;;  %v14037_v13 = vld [vmem:[#allocation9 + $0xd60] ss:$16 sps:$4 sm:$0xff]  }
 0x443   :  { %v6268_v8 = vpop.f32.mrb[112].mxu0  ;;  %v6309_v20 = vpop.f32.mrb[100].mxu1  ;;  %9024 = vmatprep.mubr.bf16.mxu0 %v14441_v5  ;;  %9065 = vmatprep.mubr.bf16.mxu1 %v14441_v5 }
 0x444   :  { %v6316_v24 = vadd.f32 %v6268_v8, %v6119_v43  ;;  %v6318_v27 = vadd.f32 %v6309_v20, %v6121_v46  ;;  %v6270_v25 = vpop.f32.mrb[113].mxu0  ;;  %v6311_v30 = vpop.f32.mrb[101].mxu1  ;;  %v14027_v43 = vld [vmem:[#allocation9 + $0xd24] ss:$16 sps:$4 sm:$0xff]   ;;  %v14030_v46 = vld [vmem:[#allocation9 + $0xd2c] ss:$16 sps:$4 sm:$0xff]  }
 0x445   :  { %v6317_v58 = vadd.f32 %v6270_v25, %v6120_v48  ;;  %v6319_v7 = vadd.f32 %v6311_v30, %v6122_v49  ;;  %v6272_v26 = vpop.f32.mrb[114].mxu0  ;;  %v6313_v53 = vpop.f32.mrb[102].mxu1  ;;  %8995 = vmatpush1.bf16.msra.mxu0 %v14001_v16  ;;  %9036 = vmatpush1.bf16.msra.mxu1 %v14004_v17  ;;  %v14028_v48 = vld [vmem:[#allocation9 + $0xd28] ss:$16 sps:$4 sm:$0xff]   ;;  %v14033_v49 = vld [vmem:[#allocation9 + $0xd44] ss:$16 sps:$4 sm:$0xff]   ;;  %v9101_v16 = vunpack.c.l.b16 %v9080_v3  ;;  %v9278_v25 = vpack.c.bf16 %v9276_v19, %v9276_v19 }
 0x446   :  { %v6273_v32 = vpop.f32.mrb[115].mxu0  ;;  %v6314_v33 = vpop.f32.mrb[103].mxu1  ;;  %8996 = vmatprep.subr.bf16.mxu0 %v14009_v52  ;;  %9037 = vmatprep.subr.bf16.mxu1 %v14012_v18  ;;  %v14045_v17 = vld [vmem:[#allocation9 + $0xd84] ss:$16 sps:$4 sm:$0xff]   ;;  %v14048_v52 = vld [vmem:[#allocation9 + $0xd8c] ss:$16 sps:$4 sm:$0xff]  }
 0x447   :  { %v9104_v18 = vsel %vm4009_vm6, %v9103_v11, %v9101_v16  ;;  %v14043_v8 = vld [vmem:[#allocation9 + $0xd80] ss:$16 sps:$4 sm:$0xff]   ;;  %v14046_v20 = vld [vmem:[#allocation9 + $0xd88] ss:$16 sps:$4 sm:$0xff]   ;;  %v14060_v26 = vld [vmem:[#allocation9 + $0xdcc] ss:$16 sps:$4 sm:$0xff]   ;;  %v9299_v45 = vunpack.c.l.b16 %v9278_v25 }
 0x448   :  { %v9105_v21 = vpack.c.b16 %v9104_v18, %v9104_v18  ;;  %v14049_v30 = vld [vmem:[#allocation9 + $0xda0] ss:$16 sps:$4 sm:$0xff]   ;;  %v9275_v53 = vld [vmem:[#allocation3 + $0x1b] sm:$0x1]  ;;  %v14088_v25 = vld [vmem:[#allocation9 + $0xe68] ss:$16 sps:$4 sm:$0xff]  }
 0x449   :  { %8997 = vmatpush1.bf16.msra.mxu0 %v14007_v28  ;;  %9038 = vmatpush1.bf16.msra.mxu1 %v14010_v29  ;;  %v9277_v1 = vpack.c.bf16 %v9275_v53, %v9275_v53  ;;  %v9670_v53 = vld [vmem:[#allocation3 + $0x45] sm:$0x1] }
 0x44a   :  { %8998 = vmatprep.subr.bf16.mxu0 %v14015_v35  ;;  %9039 = vmatprep.subr.bf16.mxu1 %v14018_v36 }
 0x44d   :  { %8999 = vmatpush1.bf16.msra.mxu0 %v14013_v38  ;;  %9040 = vmatpush1.bf16.msra.mxu1 %v14016_v12 }
 0x44e   :  { %9189 = vmatprep.subr.bf16.mxu0 %v14021_v40  ;;  %9230 = vmatprep.subr.bf16.mxu1 %v14024_v0  ;;  %v14055_v40 = vld [vmem:[#allocation9 + $0xdc0] ss:$16 sps:$4 sm:$0xff]   ;;  %v14058_v0 = vld [vmem:[#allocation9 + $0xdc8] ss:$16 sps:$4 sm:$0xff]  }
 0x450   :  { %11986 = vmatmul.mubr.msk.bf16.vlgmr.msra.gmra.mrb[168].mxu0 %vm4092_vm7, %v8908_v44  ;;  %11987 = vmatmul.mubr.msk.bf16.vlgmr.msra.gmra.mrb[156].mxu1 %vm4092_vm7, %v8908_v44  ;;  %v14066_v44 = vld [vmem:[#allocation9 + $0xdec] ss:$16 sps:$4 sm:$0xff]  }
 0x451   :  { %9190 = vmatpush1.bf16.msra.mxu0 %v14019_v41  ;;  %9231 = vmatpush1.bf16.msra.mxu1 %v14022_v42  ;;  %v14063_v42 = vld [vmem:[#allocation9 + $0xde4] ss:$16 sps:$4 sm:$0xff]  }
 0x452   :  { %9191 = vmatprep.subr.bf16.mxu0 %v14027_v43  ;;  %9232 = vmatprep.subr.bf16.mxu1 %v14030_v46  ;;  %v9300_v43 = vrot.slane %v9299_v45, 7  ;;  %v14061_v46 = vld [vmem:[#allocation9 + $0xde0] ss:$16 sps:$4 sm:$0xff]  }
 0x453   :  { %v6465_v51 = vpop.f32.mrb[116].mxu0  ;;  %v6506_v54 = vpop.f32.mrb[104].mxu1  ;;  %9221 = vmatprep.mubr.bf16.mxu0 %v14441_v5  ;;  %9262 = vmatprep.mubr.bf16.mxu1 %v14441_v5 }
 0x454   :  { %v6513_v55 = vadd.f32 %v6465_v51, %v6316_v24  ;;  %v6515_v56 = vadd.f32 %v6506_v54, %v6318_v27  ;;  %v6467_v57 = vpop.f32.mrb[117].mxu0  ;;  %v6508_v59 = vpop.f32.mrb[105].mxu1  ;;  %v14051_v24 = vld [vmem:[#allocation9 + $0xda4] ss:$16 sps:$4 sm:$0xff]   ;;  %v14054_v27 = vld [vmem:[#allocation9 + $0xdac] ss:$16 sps:$4 sm:$0xff]  }
 0x455   :  { %v6514_v4 = vadd.f32 %v6467_v57, %v6317_v58  ;;  %v6516_v60 = vadd.f32 %v6508_v59, %v6319_v7  ;;  %v6469_v61 = vpop.f32.mrb[118].mxu0  ;;  %v6510_v63 = vpop.f32.mrb[106].mxu1  ;;  %9192 = vmatpush1.bf16.msra.mxu0 %v14025_v47  ;;  %9233 = vmatpush1.bf16.msra.mxu1 %v14028_v48  ;;  %v14052_v58 = vld [vmem:[#allocation9 + $0xda8] ss:$16 sps:$4 sm:$0xff]   ;;  %v14057_v7 = vld [vmem:[#allocation9 + $0xdc4] ss:$16 sps:$4 sm:$0xff]   ;;  %v9298_v47 = vunpack.c.l.b16 %v9277_v1  ;;  %v9475_v57 = vpack.c.bf16 %v9473_v23, %v9473_v23 }
 0x456   :  { %v6470_v6 = vpop.f32.mrb[119].mxu0  ;;  %v6511_v9 = vpop.f32.mrb[107].mxu1  ;;  %9193 = vmatprep.subr.bf16.mxu0 %v14033_v49  ;;  %9234 = vmatprep.subr.bf16.mxu1 %v14036_v50  ;;  %v14069_v48 = vld [vmem:[#allocation9 + $0xe04] ss:$16 sps:$4 sm:$0xff]   ;;  %v14072_v49 = vld [vmem:[#allocation9 + $0xe0c] ss:$16 sps:$4 sm:$0xff]  }
 0x457   :  { %v9301_v50 = vsel %vm4009_vm6, %v9300_v43, %v9298_v47  ;;  %v14067_v51 = vld [vmem:[#allocation9 + $0xe00] ss:$16 sps:$4 sm:$0xff]   ;;  %v14070_v54 = vld [vmem:[#allocation9 + $0xe08] ss:$16 sps:$4 sm:$0xff]   ;;  %v14084_v61 = vld [vmem:[#allocation9 + $0xe4c] ss:$16 sps:$4 sm:$0xff]   ;;  %v9496_v3 = vunpack.c.l.b16 %v9475_v57 }
 0x458   :  { %v9302_v34 = vpack.c.b16 %v9301_v50, %v9301_v50  ;;  %v14073_v59 = vld [vmem:[#allocation9 + $0xe20] ss:$16 sps:$4 sm:$0xff]   ;;  %v9472_v63 = vld [vmem:[#allocation3 + $0x1c] sm:$0x1] }
 0x459   :  { %9194 = vmatpush1.bf16.msra.mxu0 %v14031_v2  ;;  %9235 = vmatpush1.bf16.msra.mxu1 %v14034_v31  ;;  %v9474_v18 = vpack.c.bf16 %v9472_v63, %v9472_v63  ;;  %v14112_v57 = vld [vmem:[#allocation9 + $0xee8] ss:$16 sps:$4 sm:$0xff]   ;;  %v9867_v63 = vld [vmem:[#allocation3 + $0x46] sm:$0x1] }
 0x45a   :  { %9195 = vmatprep.subr.bf16.mxu0 %v14039_v10  ;;  %9236 = vmatprep.subr.bf16.mxu1 %v14042_v62 }
 0x45d   :  { %9196 = vmatpush1.bf16.msra.mxu0 %v14037_v13  ;;  %9237 = vmatpush1.bf16.msra.mxu1 %v14040_v14 }
 0x45e   :  { %9386 = vmatprep.subr.bf16.mxu0 %v14045_v17  ;;  %9427 = vmatprep.subr.bf16.mxu1 %v14048_v52  ;;  %v14079_v17 = vld [vmem:[#allocation9 + $0xe40] ss:$16 sps:$4 sm:$0xff]   ;;  %v14082_v52 = vld [vmem:[#allocation9 + $0xe48] ss:$16 sps:$4 sm:$0xff]  }
 0x460   :  { %12004 = vmatmul.mubr.msk.bf16.vlgmr.msra.gmra.mrb[172].mxu0 %vm4092_vm7, %v9105_v21  ;;  %12005 = vmatmul.mubr.msk.bf16.vlgmr.msra.gmra.mrb[160].mxu1 %vm4092_vm7, %v9105_v21  ;;  %v14090_v21 = vld [vmem:[#allocation9 + $0xe6c] ss:$16 sps:$4 sm:$0xff]  }
 0x461   :  { %9387 = vmatpush1.bf16.msra.mxu0 %v14043_v8  ;;  %9428 = vmatpush1.bf16.msra.mxu1 %v14046_v20  ;;  %v14087_v20 = vld [vmem:[#allocation9 + $0xe64] ss:$16 sps:$4 sm:$0xff]  }
 0x462   :  { %9388 = vmatprep.subr.bf16.mxu0 %v14051_v24  ;;  %9429 = vmatprep.subr.bf16.mxu1 %v14054_v27  ;;  %v9497_v24 = vrot.slane %v9496_v3, 7  ;;  %v14085_v27 = vld [vmem:[#allocation9 + $0xe60] ss:$16 sps:$4 sm:$0xff]  }
 0x463   :  { %v6662_v28 = vpop.f32.mrb[120].mxu0  ;;  %v6703_v29 = vpop.f32.mrb[108].mxu1  ;;  %9418 = vmatprep.mubr.bf16.mxu0 %v14441_v5  ;;  %9459 = vmatprep.mubr.bf16.mxu1 %v14441_v5 }
 0x464   :  { %v6710_v32 = vadd.f32 %v6662_v28, %v6513_v55  ;;  %v6712_v33 = vadd.f32 %v6703_v29, %v6515_v56  ;;  %v6664_v35 = vpop.f32.mrb[121].mxu0  ;;  %v6705_v36 = vpop.f32.mrb[109].mxu1  ;;  %v14075_v55 = vld [vmem:[#allocation9 + $0xe24] ss:$16 sps:$4 sm:$0xff]   ;;  %v14078_v56 = vld [vmem:[#allocation9 + $0xe2c] ss:$16 sps:$4 sm:$0xff]  }
 0x465   :  { %v6711_v37 = vadd.f32 %v6664_v35, %v6514_v4  ;;  %v6713_v38 = vadd.f32 %v6705_v36, %v6516_v60  ;;  %v6666_v12 = vpop.f32.mrb[122].mxu0  ;;  %v6707_v39 = vpop.f32.mrb[110].mxu1  ;;  %9389 = vmatpush1.bf16.msra.mxu0 %v14049_v30  ;;  %9430 = vmatpush1.bf16.msra.mxu1 %v14052_v58  ;;  %v14076_v4 = vld [vmem:[#allocation9 + $0xe28] ss:$16 sps:$4 sm:$0xff]   ;;  %v14081_v60 = vld [vmem:[#allocation9 + $0xe44] ss:$16 sps:$4 sm:$0xff]   ;;  %v9495_v30 = vunpack.c.l.b16 %v9474_v18  ;;  %v9672_v35 = vpack.c.bf16 %v9670_v53, %v9670_v53 }
 0x466   :  { %v6667_v22 = vpop.f32.mrb[123].mxu0  ;;  %v6708_v41 = vpop.f32.mrb[111].mxu1  ;;  %9390 = vmatprep.subr.bf16.mxu0 %v14057_v7  ;;  %9431 = vmatprep.subr.bf16.mxu1 %v14060_v26  ;;  %v14093_v58 = vld [vmem:[#allocation9 + $0xe84] ss:$16 sps:$4 sm:$0xff]   ;;  %v14096_v7 = vld [vmem:[#allocation9 + $0xe8c] ss:$16 sps:$4 sm:$0xff]  }
 0x467   :  { %v9498_v26 = vsel %vm4009_vm6, %v9497_v24, %v9495_v30  ;;  %v14091_v28 = vld [vmem:[#allocation9 + $0xe80] ss:$16 sps:$4 sm:$0xff]   ;;  %v14094_v29 = vld [vmem:[#allocation9 + $0xe88] ss:$16 sps:$4 sm:$0xff]   ;;  %v14108_v12 = vld [vmem:[#allocation9 + $0xecc] ss:$16 sps:$4 sm:$0xff]   ;;  %v9693_v1 = vunpack.c.l.b16 %v9672_v35 }
 0x468   :  { %v9499_v45 = vpack.c.b16 %v9498_v26, %v9498_v26  ;;  %v14097_v36 = vld [vmem:[#allocation9 + $0xea0] ss:$16 sps:$4 sm:$0xff]   ;;  %v9669_v39 = vld [vmem:[#allocation3 + $0x1d] sm:$0x1] }
 0x469   :  { %9391 = vmatpush1.bf16.msra.mxu0 %v14055_v40  ;;  %9432 = vmatpush1.bf16.msra.mxu1 %v14058_v0  ;;  %v9671_v50 = vpack.c.bf16 %v9669_v39, %v9669_v39  ;;  %v14136_v35 = vld [vmem:[#allocation9 + $0xf68] ss:$16 sps:$4 sm:$0xff]   ;;  %v10064_v39 = vld [vmem:[#allocation3 + $0x47] sm:$0x1] }
 0x46a   :  { %9392 = vmatprep.subr.bf16.mxu0 %v14063_v42  ;;  %9433 = vmatprep.subr.bf16.mxu1 %v14066_v44 }
 0x46d   :  { %9393 = vmatpush1.bf16.msra.mxu0 %v14061_v46  ;;  %9434 = vmatpush1.bf16.msra.mxu1 %v14064_v15 }
 0x46e   :  { %9583 = vmatprep.subr.bf16.mxu0 %v14069_v48  ;;  %9624 = vmatprep.subr.bf16.mxu1 %v14072_v49  ;;  %v14103_v48 = vld [vmem:[#allocation9 + $0xec0] ss:$16 sps:$4 sm:$0xff]   ;;  %v14106_v49 = vld [vmem:[#allocation9 + $0xec8] ss:$16 sps:$4 sm:$0xff]  }
 0x470   :  { %12022 = vmatmul.mubr.msk.bf16.vlgmr.msra.gmra.mrb[176].mxu0 %vm4092_vm7, %v9302_v34  ;;  %12023 = vmatmul.mubr.msk.bf16.vlgmr.msra.gmra.mrb[164].mxu1 %vm4092_vm7, %v9302_v34  ;;  %v14114_v34 = vld [vmem:[#allocation9 + $0xeec] ss:$16 sps:$4 sm:$0xff]  }
 0x471   :  { %9584 = vmatpush1.bf16.msra.mxu0 %v14067_v51  ;;  %9625 = vmatpush1.bf16.msra.mxu1 %v14070_v54  ;;  %v14111_v54 = vld [vmem:[#allocation9 + $0xee4] ss:$16 sps:$4 sm:$0xff]  }
 0x472   :  { %9585 = vmatprep.subr.bf16.mxu0 %v14075_v55  ;;  %9626 = vmatprep.subr.bf16.mxu1 %v14078_v56  ;;  %v9694_v55 = vrot.slane %v9693_v1, 7  ;;  %v14109_v56 = vld [vmem:[#allocation9 + $0xee0] ss:$16 sps:$4 sm:$0xff]  }
 0x473   :  { %v6859_v2 = vpop.f32.mrb[124].mxu0  ;;  %v6900_v31 = vpop.f32.mrb[112].mxu1  ;;  %9615 = vmatprep.mubr.bf16.mxu0 %v14441_v5  ;;  %9656 = vmatprep.mubr.bf16.mxu1 %v14441_v5 }
 0x474   :  { %v6907_v6 = vadd.f32 %v6859_v2, %v6710_v32  ;;  %v6909_v9 = vadd.f32 %v6900_v31, %v6712_v33  ;;  %v6861_v10 = vpop.f32.mrb[125].mxu0  ;;  %v6902_v62 = vpop.f32.mrb[113].mxu1  ;;  %v14099_v32 = vld [vmem:[#allocation9 + $0xea4] ss:$16 sps:$4 sm:$0xff]   ;;  %v14102_v33 = vld [vmem:[#allocation9 + $0xeac] ss:$16 sps:$4 sm:$0xff]  }
 0x475   :  { %v6908_v11 = vadd.f32 %v6861_v10, %v6711_v37  ;;  %v6910_v13 = vadd.f32 %v6902_v62, %v6713_v38  ;;  %v6863_v14 = vpop.f32.mrb[126].mxu0  ;;  %v6904_v16 = vpop.f32.mrb[114].mxu1  ;;  %9586 = vmatpush1.bf16.msra.mxu0 %v14073_v59  ;;  %9627 = vmatpush1.bf16.msra.mxu1 %v14076_v4  ;;  %v14100_v37 = vld [vmem:[#allocation9 + $0xea8] ss:$16 sps:$4 sm:$0xff]   ;;  %v14105_v38 = vld [vmem:[#allocation9 + $0xec4] ss:$16 sps:$4 sm:$0xff]   ;;  %v9692_v59 = vunpack.c.l.b16 %v9671_v50  ;;  %v9869_v10 = vpack.c.bf16 %v9867_v63, %v9867_v63 }
 0x476   :  { %v6864_v19 = vpop.f32.mrb[127].mxu0  ;;  %v6905_v8 = vpop.f32.mrb[115].mxu1  ;;  %9587 = vmatprep.subr.bf16.mxu0 %v14081_v60  ;;  %9628 = vmatprep.subr.bf16.mxu1 %v14084_v61  ;;  %v14117_v4 = vld [vmem:[#allocation9 + $0xf04] ss:$16 sps:$4 sm:$0xff]   ;;  %v14120_v60 = vld [vmem:[#allocation9 + $0xf0c] ss:$16 sps:$4 sm:$0xff]  }
 0x477   :  { %v9695_v61 = vsel %vm4009_vm6, %v9694_v55, %v9692_v59  ;;  %v14115_v2 = vld [vmem:[#allocation9 + $0xf00] ss:$16 sps:$4 sm:$0xff]   ;;  %v14118_v31 = vld [vmem:[#allocation9 + $0xf08] ss:$16 sps:$4 sm:$0xff]   ;;  %v14132_v14 = vld [vmem:[#allocation9 + $0xf4c] ss:$16 sps:$4 sm:$0xff]   ;;  %v9890_v18 = vunpack.c.l.b16 %v9869_v10 }
 0x478   :  { %v9696_v3 = vpack.c.b16 %v9695_v61, %v9695_v61  ;;  %v14121_v62 = vld [vmem:[#allocation9 + $0xf20] ss:$16 sps:$4 sm:$0xff]   ;;  %v9866_v16 = vld [vmem:[#allocation3 + $0x1e] sm:$0x1] }
 0x479   :  { %9588 = vmatpush1.bf16.msra.mxu0 %v14079_v17  ;;  %9629 = vmatpush1.bf16.msra.mxu1 %v14082_v52  ;;  %v9868_v26 = vpack.c.bf16 %v9866_v16, %v9866_v16  ;;  %v14160_v10 = vld [vmem:[#allocation9 + $0xfe8] ss:$16 sps:$4 sm:$0xff]   ;;  %v10261_v16 = vld [vmem:[#allocation3 + $0x48] sm:$0x1] }
 0x47a   :  { %9589 = vmatprep.subr.bf16.mxu0 %v14087_v20  ;;  %9630 = vmatprep.subr.bf16.mxu1 %v14090_v21 }
 0x47d   :  { %9590 = vmatpush1.bf16.msra.mxu0 %v14085_v27  ;;  %9631 = vmatpush1.bf16.msra.mxu1 %v14088_v25 }
 0x47e   :  { %9780 = vmatprep.subr.bf16.mxu0 %v14093_v58  ;;  %9821 = vmatprep.subr.bf16.mxu1 %v14096_v7  ;;  %v14127_v58 = vld [vmem:[#allocation9 + $0xf40] ss:$16 sps:$4 sm:$0xff]   ;;  %v14130_v7 = vld [vmem:[#allocation9 + $0xf48] ss:$16 sps:$4 sm:$0xff]  }
 0x480   :  { %12040 = vmatmul.mubr.msk.bf16.vlgmr.msra.gmra.mrb[180].mxu0 %vm4092_vm7, %v9499_v45  ;;  %12041 = vmatmul.mubr.msk.bf16.vlgmr.msra.gmra.mrb[168].mxu1 %vm4092_vm7, %v9499_v45  ;;  %v14138_v45 = vld [vmem:[#allocation9 + $0xf6c] ss:$16 sps:$4 sm:$0xff]  }
 0x481   :  { %9781 = vmatpush1.bf16.msra.mxu0 %v14091_v28  ;;  %9822 = vmatpush1.bf16.msra.mxu1 %v14094_v29  ;;  %v14135_v29 = vld [vmem:[#allocation9 + $0xf64] ss:$16 sps:$4 sm:$0xff]  }
 0x482   :  { %9782 = vmatprep.subr.bf16.mxu0 %v14099_v32  ;;  %9823 = vmatprep.subr.bf16.mxu1 %v14102_v33  ;;  %v9891_v32 = vrot.slane %v9890_v18, 7  ;;  %v14133_v33 = vld [vmem:[#allocation9 + $0xf60] ss:$16 sps:$4 sm:$0xff]  }
 0x483   :  { %v7056_v40 = vpop.f32.mrb[128].mxu0  ;;  %v7097_v0 = vpop.f32.mrb[116].mxu1  ;;  %9812 = vmatprep.mubr.bf16.mxu0 %v14441_v5  ;;  %9853 = vmatprep.mubr.bf16.mxu1 %v14441_v5 }
 0x484   :  { %v7104_v22 = vadd.f32 %v7056_v40, %v6907_v6  ;;  %v7106_v41 = vadd.f32 %v7097_v0, %v6909_v9  ;;  %v7058_v42 = vpop.f32.mrb[129].mxu0  ;;  %v7099_v44 = vpop.f32.mrb[117].mxu1  ;;  %v14123_v6 = vld [vmem:[#allocation9 + $0xf24] ss:$16 sps:$4 sm:$0xff]   ;;  %v14126_v9 = vld [vmem:[#allocation9 + $0xf2c] ss:$16 sps:$4 sm:$0xff]  }
 0x485   :  { %v7105_v43 = vadd.f32 %v7058_v42, %v6908_v11  ;;  %v7107_v46 = vadd.f32 %v7099_v44, %v6910_v13  ;;  %v7060_v15 = vpop.f32.mrb[130].mxu0  ;;  %v7101_v47 = vpop.f32.mrb[118].mxu1  ;;  %9783 = vmatpush1.bf16.msra.mxu0 %v14097_v36  ;;  %9824 = vmatpush1.bf16.msra.mxu1 %v14100_v37  ;;  %v14124_v11 = vld [vmem:[#allocation9 + $0xf28] ss:$16 sps:$4 sm:$0xff]   ;;  %v14129_v13 = vld [vmem:[#allocation9 + $0xf44] ss:$16 sps:$4 sm:$0xff]   ;;  %v9889_v36 = vunpack.c.l.b16 %v9868_v26  ;;  %v10066_v42 = vpack.c.bf16 %v10064_v39, %v10064_v39 }
 0x486   :  { %v7061_v23 = vpop.f32.mrb[131].mxu0  ;;  %v7102_v51 = vpop.f32.mrb[119].mxu1  ;;  %9784 = vmatprep.subr.bf16.mxu0 %v14105_v38  ;;  %9825 = vmatprep.subr.bf16.mxu1 %v14108_v12  ;;  %v14141_v37 = vld [vmem:[#allocation9 + $0xf84] ss:$16 sps:$4 sm:$0xff]   ;;  %v14144_v38 = vld [vmem:[#allocation9 + $0xf8c] ss:$16 sps:$4 sm:$0xff]  }
 0x487   :  { %v9892_v12 = vsel %vm4009_vm6, %v9891_v32, %v9889_v36  ;;  %v14139_v40 = vld [vmem:[#allocation9 + $0xf80] ss:$16 sps:$4 sm:$0xff]   ;;  %v14142_v0 = vld [vmem:[#allocation9 + $0xf88] ss:$16 sps:$4 sm:$0xff]   ;;  %v14156_v15 = vld [vmem:[#allocation9 + $0xfcc] ss:$16 sps:$4 sm:$0xff]   ;;  %v10087_v50 = vunpack.c.l.b16 %v10066_v42 }
 0x488   :  { %v9893_v1 = vpack.c.b16 %v9892_v12, %v9892_v12  ;;  %v14145_v44 = vld [vmem:[#allocation9 + $0xfa0] ss:$16 sps:$4 sm:$0xff]   ;;  %v10063_v47 = vld [vmem:[#allocation3 + $0x1f] sm:$0x1] }
 0x489   :  { %9785 = vmatpush1.bf16.msra.mxu0 %v14103_v48  ;;  %9826 = vmatpush1.bf16.msra.mxu1 %v14106_v49  ;;  %v10065_v61 = vpack.c.bf16 %v10063_v47, %v10063_v47  ;;  %v14184_v42 = vld [vmem:[#allocation9 + $0x1068] ss:$16 sps:$4 sm:$0xff]   ;;  %v10458_v47 = vld [vmem:[#allocation3 + $0x49] sm:$0x1] }
 0x48a   :  { %9786 = vmatprep.subr.bf16.mxu0 %v14111_v54  ;;  %9827 = vmatprep.subr.bf16.mxu1 %v14114_v34 }
 0x48d   :  { %9787 = vmatpush1.bf16.msra.mxu0 %v14109_v56  ;;  %9828 = vmatpush1.bf16.msra.mxu1 %v14112_v57 }
 0x48e   :  { %9977 = vmatprep.subr.bf16.mxu0 %v14117_v4  ;;  %10018 = vmatprep.subr.bf16.mxu1 %v14120_v60  ;;  %v14151_v4 = vld [vmem:[#allocation9 + $0xfc0] ss:$16 sps:$4 sm:$0xff]   ;;  %v14154_v60 = vld [vmem:[#allocation9 + $0xfc8] ss:$16 sps:$4 sm:$0xff]  }
 0x490   :  { %12058 = vmatmul.mubr.msk.bf16.vlgmr.msra.gmra.mrb[184].mxu0 %vm4092_vm7, %v9696_v3  ;;  %12059 = vmatmul.mubr.msk.bf16.vlgmr.msra.gmra.mrb[172].mxu1 %vm4092_vm7, %v9696_v3  ;;  %v14162_v3 = vld [vmem:[#allocation9 + $0xfec] ss:$16 sps:$4 sm:$0xff]  }
 0x491   :  { %9978 = vmatpush1.bf16.msra.mxu0 %v14115_v2  ;;  %10019 = vmatpush1.bf16.msra.mxu1 %v14118_v31  ;;  %v14159_v31 = vld [vmem:[#allocation9 + $0xfe4] ss:$16 sps:$4 sm:$0xff]  }
 0x492   :  { %9979 = vmatprep.subr.bf16.mxu0 %v14123_v6  ;;  %10020 = vmatprep.subr.bf16.mxu1 %v14126_v9  ;;  %v10088_v6 = vrot.slane %v10087_v50, 7  ;;  %v14157_v9 = vld [vmem:[#allocation9 + $0xfe0] ss:$16 sps:$4 sm:$0xff]  }
 0x493   :  { %v7253_v17 = vpop.f32.mrb[132].mxu0  ;;  %v7294_v52 = vpop.f32.mrb[120].mxu1  ;;  %10009 = vmatprep.mubr.bf16.mxu0 %v14441_v5  ;;  %10050 = vmatprep.mubr.bf16.mxu1 %v14441_v5 }
 0x494   :  { %v7301_v19 = vadd.f32 %v7253_v17, %v7104_v22  ;;  %v7303_v8 = vadd.f32 %v7294_v52, %v7106_v41  ;;  %v7255_v20 = vpop.f32.mrb[133].mxu0  ;;  %v7296_v21 = vpop.f32.mrb[121].mxu1  ;;  %v14147_v22 = vld [vmem:[#allocation9 + $0xfa4] ss:$16 sps:$4 sm:$0xff]   ;;  %v14150_v41 = vld [vmem:[#allocation9 + $0xfac] ss:$16 sps:$4 sm:$0xff]  }
 0x495   :  { %v7302_v24 = vadd.f32 %v7255_v20, %v7105_v43  ;;  %v7304_v27 = vadd.f32 %v7296_v21, %v7107_v46  ;;  %v7257_v25 = vpop.f32.mrb[134].mxu0  ;;  %v7298_v30 = vpop.f32.mrb[122].mxu1  ;;  %9980 = vmatpush1.bf16.msra.mxu0 %v14121_v62  ;;  %10021 = vmatpush1.bf16.msra.mxu1 %v14124_v11  ;;  %v14148_v43 = vld [vmem:[#allocation9 + $0xfa8] ss:$16 sps:$4 sm:$0xff]   ;;  %v14153_v46 = vld [vmem:[#allocation9 + $0xfc4] ss:$16 sps:$4 sm:$0xff]   ;;  %v10086_v62 = vunpack.c.l.b16 %v10065_v61  ;;  %v10263_v20 = vpack.c.bf16 %v10261_v16, %v10261_v16 }
 0x496   :  { %v7258_v53 = vpop.f32.mrb[135].mxu0  ;;  %v7299_v28 = vpop.f32.mrb[123].mxu1  ;;  %9981 = vmatprep.subr.bf16.mxu0 %v14129_v13  ;;  %10022 = vmatprep.subr.bf16.mxu1 %v14132_v14  ;;  %v14165_v11 = vld [vmem:[#allocation9 + $0x1004] ss:$16 sps:$4 sm:$0xff]   ;;  %v14168_v13 = vld [vmem:[#allocation9 + $0x100c] ss:$16 sps:$4 sm:$0xff]  }
 0x497   :  { %v10089_v14 = vsel %vm4009_vm6, %v10088_v6, %v10086_v62  ;;  %v14163_v17 = vld [vmem:[#allocation9 + $0x1000] ss:$16 sps:$4 sm:$0xff]   ;;  %v14166_v52 = vld [vmem:[#allocation9 + $0x1008] ss:$16 sps:$4 sm:$0xff]   ;;  %v14180_v25 = vld [vmem:[#allocation9 + $0x104c] ss:$16 sps:$4 sm:$0xff]   ;;  %v10284_v26 = vunpack.c.l.b16 %v10263_v20 }
 0x498   :  { %v10090_v18 = vpack.c.b16 %v10089_v14, %v10089_v14  ;;  %v14169_v21 = vld [vmem:[#allocation9 + $0x1020] ss:$16 sps:$4 sm:$0xff]   ;;  %v10260_v30 = vld [vmem:[#allocation3 + $0x20] sm:$0x1]  ;;  %v14208_v20 = vld [vmem:[#allocation9 + $0x10e8] ss:$16 sps:$4 sm:$0xff]  }
 0x499   :  { %9982 = vmatpush1.bf16.msra.mxu0 %v14127_v58  ;;  %10023 = vmatpush1.bf16.msra.mxu1 %v14130_v7  ;;  %v10262_v12 = vpack.c.bf16 %v10260_v30, %v10260_v30  ;;  %v10655_v30 = vld [vmem:[#allocation3 + $0x4a] sm:$0x1] }
 0x49a   :  { %9983 = vmatprep.subr.bf16.mxu0 %v14135_v29  ;;  %10024 = vmatprep.subr.bf16.mxu1 %v14138_v45 }
 0x49d   :  { %9984 = vmatpush1.bf16.msra.mxu0 %v14133_v33  ;;  %10025 = vmatpush1.bf16.msra.mxu1 %v14136_v35 }
 0x49e   :  { %10174 = vmatprep.subr.bf16.mxu0 %v14141_v37  ;;  %10215 = vmatprep.subr.bf16.mxu1 %v14144_v38  ;;  %v14175_v37 = vld [vmem:[#allocation9 + $0x1040] ss:$16 sps:$4 sm:$0xff]   ;;  %v14178_v38 = vld [vmem:[#allocation9 + $0x1048] ss:$16 sps:$4 sm:$0xff]  }
 0x4a0   :  { %12076 = vmatmul.mubr.msk.bf16.vlgmr.msra.gmra.mrb[188].mxu0 %vm4092_vm7, %v9893_v1  ;;  %12077 = vmatmul.mubr.msk.bf16.vlgmr.msra.gmra.mrb[176].mxu1 %vm4092_vm7, %v9893_v1  ;;  %v14186_v1 = vld [vmem:[#allocation9 + $0x106c] ss:$16 sps:$4 sm:$0xff]  }
 0x4a1   :  { %10175 = vmatpush1.bf16.msra.mxu0 %v14139_v40  ;;  %10216 = vmatpush1.bf16.msra.mxu1 %v14142_v0  ;;  %v14183_v0 = vld [vmem:[#allocation9 + $0x1064] ss:$16 sps:$4 sm:$0xff]  }
 0x4a2   :  { %10176 = vmatprep.subr.bf16.mxu0 %v14147_v22  ;;  %10217 = vmatprep.subr.bf16.mxu1 %v14150_v41  ;;  %v10285_v22 = vrot.slane %v10284_v26, 7  ;;  %v14181_v41 = vld [vmem:[#allocation9 + $0x1060] ss:$16 sps:$4 sm:$0xff]  }
 0x4a3   :  { %v7450_v48 = vpop.f32.mrb[136].mxu0  ;;  %v7491_v49 = vpop.f32.mrb[124].mxu1  ;;  %10206 = vmatprep.mubr.bf16.mxu0 %v14441_v5  ;;  %10247 = vmatprep.mubr.bf16.mxu1 %v14441_v5 }
 0x4a4   :  { %v7498_v23 = vadd.f32 %v7450_v48, %v7301_v19  ;;  %v7500_v51 = vadd.f32 %v7491_v49, %v7303_v8  ;;  %v7452_v54 = vpop.f32.mrb[137].mxu0  ;;  %v7493_v34 = vpop.f32.mrb[125].mxu1  ;;  %v14171_v19 = vld [vmem:[#allocation9 + $0x1024] ss:$16 sps:$4 sm:$0xff]   ;;  %v14174_v8 = vld [vmem:[#allocation9 + $0x102c] ss:$16 sps:$4 sm:$0xff]  }
 0x4a5   :  { %v7499_v55 = vadd.f32 %v7452_v54, %v7302_v24  ;;  %v7501_v56 = vadd.f32 %v7493_v34, %v7304_v27  ;;  %v7454_v57 = vpop.f32.mrb[138].mxu0  ;;  %v7495_v59 = vpop.f32.mrb[126].mxu1  ;;  %10177 = vmatpush1.bf16.msra.mxu0 %v14145_v44  ;;  %10218 = vmatpush1.bf16.msra.mxu1 %v14148_v43  ;;  %v14172_v24 = vld [vmem:[#allocation9 + $0x1028] ss:$16 sps:$4 sm:$0xff]   ;;  %v14177_v27 = vld [vmem:[#allocation9 + $0x1044] ss:$16 sps:$4 sm:$0xff]   ;;  %v10283_v44 = vunpack.c.l.b16 %v10262_v12  ;;  %v10460_v54 = vpack.c.bf16 %v10458_v47, %v10458_v47 }
 0x4a6   :  { %v7455_v63 = vpop.f32.mrb[139].mxu0  ;;  %v7496_v2 = vpop.f32.mrb[127].mxu1  ;;  %10178 = vmatprep.subr.bf16.mxu0 %v14153_v46  ;;  %10219 = vmatprep.subr.bf16.mxu1 %v14156_v15  ;;  %v14189_v43 = vld [vmem:[#allocation9 + $0x1084] ss:$16 sps:$4 sm:$0xff]   ;;  %v14192_v46 = vld [vmem:[#allocation9 + $0x108c] ss:$16 sps:$4 sm:$0xff]  }
 0x4a7   :  { %v10286_v15 = vsel %vm4009_vm6, %v10285_v22, %v10283_v44  ;;  %v14187_v48 = vld [vmem:[#allocation9 + $0x1080] ss:$16 sps:$4 sm:$0xff]   ;;  %v14190_v49 = vld [vmem:[#allocation9 + $0x1088] ss:$16 sps:$4 sm:$0xff]   ;;  %v14204_v57 = vld [vmem:[#allocation9 + $0x10cc] ss:$16 sps:$4 sm:$0xff]   ;;  %v10481_v61 = vunpack.c.l.b16 %v10460_v54 }
 0x4a8   :  { %v10287_v50 = vpack.c.b16 %v10286_v15, %v10286_v15  ;;  %v14193_v34 = vld [vmem:[#allocation9 + $0x10a0] ss:$16 sps:$4 sm:$0xff]   ;;  %v10457_v59 = vld [vmem:[#allocation3 + $0x21] sm:$0x1]  ;;  %v14232_v54 = vld [vmem:[#allocation9 + $0x1168] ss:$16 sps:$4 sm:$0xff]  }
 0x4a9   :  { %10179 = vmatpush1.bf16.msra.mxu0 %v14151_v4  ;;  %10220 = vmatpush1.bf16.msra.mxu1 %v14154_v60  ;;  %v10459_v14 = vpack.c.bf16 %v10457_v59, %v10457_v59  ;;  %v10852_v59 = vld [vmem:[#allocation3 + $0x4b] sm:$0x1] }
 0x4aa   :  { %10180 = vmatprep.subr.bf16.mxu0 %v14159_v31  ;;  %10221 = vmatprep.subr.bf16.mxu1 %v14162_v3 }
 0x4ad   :  { %10181 = vmatpush1.bf16.msra.mxu0 %v14157_v9  ;;  %10222 = vmatpush1.bf16.msra.mxu1 %v14160_v10 }
 0x4ae   :  { %10371 = vmatprep.subr.bf16.mxu0 %v14165_v11  ;;  %10412 = vmatprep.subr.bf16.mxu1 %v14168_v13  ;;  %v14199_v11 = vld [vmem:[#allocation9 + $0x10c0] ss:$16 sps:$4 sm:$0xff]   ;;  %v14202_v13 = vld [vmem:[#allocation9 + $0x10c8] ss:$16 sps:$4 sm:$0xff]  }
 0x4b0   :  { %12094 = vmatmul.mubr.msk.bf16.vlgmr.msra.gmra.mrb[192].mxu0 %vm4092_vm7, %v10090_v18  ;;  %12095 = vmatmul.mubr.msk.bf16.vlgmr.msra.gmra.mrb[180].mxu1 %vm4092_vm7, %v10090_v18  ;;  %v14210_v18 = vld [vmem:[#allocation9 + $0x10ec] ss:$16 sps:$4 sm:$0xff]  }
 0x4b1   :  { %10372 = vmatpush1.bf16.msra.mxu0 %v14163_v17  ;;  %10413 = vmatpush1.bf16.msra.mxu1 %v14166_v52  ;;  %v14207_v52 = vld [vmem:[#allocation9 + $0x10e4] ss:$16 sps:$4 sm:$0xff]  }
 0x4b2   :  { %10373 = vmatprep.subr.bf16.mxu0 %v14171_v19  ;;  %10414 = vmatprep.subr.bf16.mxu1 %v14174_v8  ;;  %v10482_v19 = vrot.slane %v10481_v61, 7  ;;  %v14205_v8 = vld [vmem:[#allocation9 + $0x10e0] ss:$16 sps:$4 sm:$0xff]  }
 0x4b3   :  { %v7647_v58 = vpop.f32.mrb[140].mxu0  ;;  %v7688_v7 = vpop.f32.mrb[128].mxu1  ;;  %10403 = vmatprep.mubr.bf16.mxu0 %v14441_v5  ;;  %10444 = vmatprep.mubr.bf16.mxu1 %v14441_v5 }
 0x4b4   :  { %v7695_v53 = vadd.f32 %v7647_v58, %v7498_v23  ;;  %v7697_v28 = vadd.f32 %v7688_v7, %v7500_v51  ;;  %v7649_v29 = vpop.f32.mrb[141].mxu0  ;;  %v7690_v45 = vpop.f32.mrb[129].mxu1  ;;  %v14195_v23 = vld [vmem:[#allocation9 + $0x10a4] ss:$16 sps:$4 sm:$0xff]   ;;  %v14198_v51 = vld [vmem:[#allocation9 + $0x10ac] ss:$16 sps:$4 sm:$0xff]  }
 0x4b5   :  { %v7696_v32 = vadd.f32 %v7649_v29, %v7499_v55  ;;  %v7698_v33 = vadd.f32 %v7690_v45, %v7501_v56  ;;  %v7651_v35 = vpop.f32.mrb[142].mxu0  ;;  %v7692_v36 = vpop.f32.mrb[130].mxu1  ;;  %10374 = vmatpush1.bf16.msra.mxu0 %v14169_v21  ;;  %10415 = vmatpush1.bf16.msra.mxu1 %v14172_v24  ;;  %v14196_v55 = vld [vmem:[#allocation9 + $0x10a8] ss:$16 sps:$4 sm:$0xff]   ;;  %v14201_v56 = vld [vmem:[#allocation9 + $0x10c4] ss:$16 sps:$4 sm:$0xff]   ;;  %v10480_v21 = vunpack.c.l.b16 %v10459_v14  ;;  %v10657_v29 = vpack.c.bf16 %v10655_v30, %v10655_v30 }
 0x4b6   :  { %v7652_v39 = vpop.f32.mrb[143].mxu0  ;;  %v7693_v40 = vpop.f32.mrb[131].mxu1  ;;  %10375 = vmatprep.subr.bf16.mxu0 %v14177_v27  ;;  %10416 = vmatprep.subr.bf16.mxu1 %v14180_v25  ;;  %v14213_v24 = vld [vmem:[#allocation9 + $0x1104] ss:$16 sps:$4 sm:$0xff]   ;;  %v14216_v27 = vld [vmem:[#allocation9 + $0x110c] ss:$16 sps:$4 sm:$0xff]  }
 0x4b7   :  { %v10483_v25 = vsel %vm4009_vm6, %v10482_v19, %v10480_v21  ;;  %v14211_v58 = vld [vmem:[#allocation9 + $0x1100] ss:$16 sps:$4 sm:$0xff]   ;;  %v14214_v7 = vld [vmem:[#allocation9 + $0x1108] ss:$16 sps:$4 sm:$0xff]   ;;  %v14228_v35 = vld [vmem:[#allocation9 + $0x114c] ss:$16 sps:$4 sm:$0xff]   ;;  %v10678_v12 = vunpack.c.l.b16 %v10657_v29 }
 0x4b8   :  { %v10484_v26 = vpack.c.b16 %v10483_v25, %v10483_v25  ;;  %v14217_v45 = vld [vmem:[#allocation9 + $0x1120] ss:$16 sps:$4 sm:$0xff]   ;;  %v10654_v36 = vld [vmem:[#allocation3 + $0x22] sm:$0x1] }
 0x4b9   :  { %10376 = vmatpush1.bf16.msra.mxu0 %v14175_v37  ;;  %10417 = vmatpush1.bf16.msra.mxu1 %v14178_v38  ;;  %v10656_v15 = vpack.c.bf16 %v10654_v36, %v10654_v36 }
 0x4ba   :  { %10377 = vmatprep.subr.bf16.mxu0 %v14183_v0  ;;  %10418 = vmatprep.subr.bf16.mxu1 %v14186_v1 }
 0x4bd   :  { %10378 = vmatpush1.bf16.msra.mxu0 %v14181_v41  ;;  %10419 = vmatpush1.bf16.msra.mxu1 %v14184_v42 }
 0x4be   :  { %10568 = vmatprep.subr.bf16.mxu0 %v14189_v43  ;;  %10609 = vmatprep.subr.bf16.mxu1 %v14192_v46  ;;  %v14223_v43 = vld [vmem:[#allocation9 + $0x1140] ss:$16 sps:$4 sm:$0xff]   ;;  %v14226_v46 = vld [vmem:[#allocation9 + $0x1148] ss:$16 sps:$4 sm:$0xff]  }
 0x4c0   :  { %12112 = vmatmul.mubr.msk.bf16.vlgmr.msra.gmra.mrb[196].mxu0 %vm4092_vm7, %v10287_v50  ;;  %12113 = vmatmul.mubr.msk.bf16.vlgmr.msra.gmra.mrb[184].mxu1 %vm4092_vm7, %v10287_v50  ;;  %v14234_v50 = vld [vmem:[#allocation9 + $0x116c] ss:$16 sps:$4 sm:$0xff]  }
 0x4c1   :  { %10569 = vmatpush1.bf16.msra.mxu0 %v14187_v48  ;;  %10610 = vmatpush1.bf16.msra.mxu1 %v14190_v49  ;;  %v14231_v49 = vld [vmem:[#allocation9 + $0x1164] ss:$16 sps:$4 sm:$0xff]  }
 0x4c2   :  { %10570 = vmatprep.subr.bf16.mxu0 %v14195_v23  ;;  %10611 = vmatprep.subr.bf16.mxu1 %v14198_v51  ;;  %v10679_v23 = vrot.slane %v10678_v12, 7  ;;  %v14229_v51 = vld [vmem:[#allocation9 + $0x1160] ss:$16 sps:$4 sm:$0xff]  }
 0x4c3   :  { %v7844_v4 = vpop.f32.mrb[144].mxu0  ;;  %v7885_v60 = vpop.f32.mrb[132].mxu1  ;;  %10600 = vmatprep.mubr.bf16.mxu0 %v14441_v5  ;;  %10641 = vmatprep.mubr.bf16.mxu1 %v14441_v5 }
 0x4c4   :  { %v7892_v63 = vadd.f32 %v7844_v4, %v7695_v53  ;;  %v7894_v2 = vadd.f32 %v7885_v60, %v7697_v28  ;;  %v7846_v31 = vpop.f32.mrb[145].mxu0  ;;  %v7887_v3 = vpop.f32.mrb[133].mxu1  ;;  %v14219_v53 = vld [vmem:[#allocation9 + $0x1124] ss:$16 sps:$4 sm:$0xff]   ;;  %v14222_v28 = vld [vmem:[#allocation9 + $0x112c] ss:$16 sps:$4 sm:$0xff]  }
 0x4c5   :  { %v7893_v6 = vadd.f32 %v7846_v31, %v7696_v32  ;;  %v7895_v9 = vadd.f32 %v7887_v3, %v7698_v33  ;;  %v7848_v10 = vpop.f32.mrb[146].mxu0  ;;  %v7889_v62 = vpop.f32.mrb[134].mxu1  ;;  %10571 = vmatpush1.bf16.msra.mxu0 %v14193_v34  ;;  %10612 = vmatpush1.bf16.msra.mxu1 %v14196_v55  ;;  %v14220_v32 = vld [vmem:[#allocation9 + $0x1128] ss:$16 sps:$4 sm:$0xff]   ;;  %v14225_v33 = vld [vmem:[#allocation9 + $0x1144] ss:$16 sps:$4 sm:$0xff]   ;;  %v10677_v34 = vunpack.c.l.b16 %v10656_v15  ;;  %v10854_v31 = vpack.c.bf16 %v10852_v59, %v10852_v59 }
 0x4c6   :  { %v7849_v16 = vpop.f32.mrb[147].mxu0  ;;  %v7890_v17 = vpop.f32.mrb[135].mxu1  ;;  %10572 = vmatprep.subr.bf16.mxu0 %v14201_v56  ;;  %10613 = vmatprep.subr.bf16.mxu1 %v14204_v57  ;;  %v14237_v55 = vld [vmem:[#allocation9 + $0x1184] ss:$16 sps:$4 sm:$0xff]   ;;  %v14240_v56 = vld [vmem:[#allocation9 + $0x118c] ss:$16 sps:$4 sm:$0xff]  }
 0x4c7   :  { %v10680_v57 = vsel %vm4009_vm6, %v10679_v23, %v10677_v34  ;;  %v14235_v4 = vld [vmem:[#allocation9 + $0x1180] ss:$16 sps:$4 sm:$0xff]   ;;  %v14238_v60 = vld [vmem:[#allocation9 + $0x1188] ss:$16 sps:$4 sm:$0xff]   ;;  %v14252_v10 = vld [vmem:[#allocation9 + $0x11cc] ss:$16 sps:$4 sm:$0xff]   ;;  %v10875_v14 = vunpack.c.l.b16 %v10854_v31 }
 0x4c8   :  { %v10681_v61 = vpack.c.b16 %v10680_v57, %v10680_v57  ;;  %v14241_v3 = vld [vmem:[#allocation9 + $0x11a0] ss:$16 sps:$4 sm:$0xff]   ;;  %v10851_v62 = vld [vmem:[#allocation3 + $0x23] sm:$0x1] }
 0x4c9   :  { %10573 = vmatpush1.bf16.msra.mxu0 %v14199_v11  ;;  %10614 = vmatpush1.bf16.msra.mxu1 %v14202_v13  ;;  %v10853_v25 = vpack.c.bf16 %v10851_v62, %v10851_v62 }
 0x4ca   :  { %10574 = vmatprep.subr.bf16.mxu0 %v14207_v52  ;;  %10615 = vmatprep.subr.bf16.mxu1 %v14210_v18 }
 0x4cb   :  { %v10874_v29 = vunpack.c.l.b16 %v10853_v25  ;;  %v14264_v25 = vld [vmem:[%s15441_s7 + $0xc8] sm:$0xff]  }
 0x4cd   :  { %10575 = vmatpush1.bf16.msra.mxu0 %v14205_v8  ;;  %10616 = vmatpush1.bf16.msra.mxu1 %v14208_v20 }
 0x4ce   :  { %10765 = vmatprep.subr.bf16.mxu0 %v14213_v24  ;;  %10806 = vmatprep.subr.bf16.mxu1 %v14216_v27  ;;  %v14247_v24 = vld [vmem:[#allocation9 + $0x11c0] ss:$16 sps:$4 sm:$0xff]   ;;  %v14250_v27 = vld [vmem:[#allocation9 + $0x11c8] ss:$16 sps:$4 sm:$0xff]  }
 0x4d0   :  { %12130 = vmatmul.mubr.msk.bf16.vlgmr.msra.gmra.mrb[200].mxu0 %vm4092_vm7, %v10484_v26  ;;  %12131 = vmatmul.mubr.msk.bf16.vlgmr.msra.gmra.mrb[188].mxu1 %vm4092_vm7, %v10484_v26  ;;  %v10876_v26 = vrot.slane %v10875_v14, 7 }
 0x4d1   :  { %10766 = vmatpush1.bf16.msra.mxu0 %v14211_v58  ;;  %10807 = vmatpush1.bf16.msra.mxu1 %v14214_v7  ;;  %v14255_v7 = vld [vmem:[#allocation9 + $0x11e4] ss:$16 sps:$4 sm:$0xff]  }
 0x4d2   :  { %10767 = vmatprep.subr.bf16.mxu0 %v14219_v53  ;;  %10808 = vmatprep.subr.bf16.mxu1 %v14222_v28  ;;  %v14253_v53 = vld [vmem:[#allocation9 + $0x11e0] ss:$16 sps:$4 sm:$0xff]   ;;  %v14256_v28 = vld [vmem:[#allocation9 + $0x11e8] ss:$16 sps:$4 sm:$0xff]  }
 0x4d3   :  { %v8041_v37 = vpop.f32.mrb[148].mxu0  ;;  %v8082_v38 = vpop.f32.mrb[136].mxu1  ;;  %10797 = vmatprep.mubr.bf16.mxu0 %v14441_v5  ;;  %10838 = vmatprep.mubr.bf16.mxu1 %v14441_v5 }
 0x4d4   :  { %v8089_v39 = vadd.f32 %v8041_v37, %v7892_v63  ;;  %v8091_v40 = vadd.f32 %v8082_v38, %v7894_v2  ;;  %v8043_v0 = vpop.f32.mrb[149].mxu0  ;;  %v8084_v1 = vpop.f32.mrb[137].mxu1  ;;  %v14243_v63 = vld [vmem:[#allocation9 + $0x11a4] ss:$16 sps:$4 sm:$0xff]   ;;  %v14246_v2 = vld [vmem:[#allocation9 + $0x11ac] ss:$16 sps:$4 sm:$0xff]  }
 0x4d5   :  { %v8090_v22 = vadd.f32 %v8043_v0, %v7893_v6  ;;  %v8092_v41 = vadd.f32 %v8084_v1, %v7895_v9  ;;  %v8045_v42 = vpop.f32.mrb[150].mxu0  ;;  %v8086_v44 = vpop.f32.mrb[138].mxu1  ;;  %10768 = vmatpush1.bf16.msra.mxu0 %v14217_v45  ;;  %10809 = vmatpush1.bf16.msra.mxu1 %v14220_v32  ;;  %v14244_v6 = vld [vmem:[#allocation9 + $0x11a8] ss:$16 sps:$4 sm:$0xff]   ;;  %v14249_v9 = vld [vmem:[#allocation9 + $0x11c4] ss:$16 sps:$4 sm:$0xff]   ;;  %v10877_v45 = vsel %vm4009_vm6, %v10876_v26, %v10874_v29 }
 0x4d6   :  { %v8046_v47 = vpop.f32.mrb[151].mxu0  ;;  %v8087_v48 = vpop.f32.mrb[139].mxu1  ;;  %10769 = vmatprep.subr.bf16.mxu0 %v14225_v33  ;;  %10810 = vmatprep.subr.bf16.mxu1 %v14228_v35  ;;  %v10878_v32 = vpack.c.b16 %v10877_v45, %v10877_v45  ;;  %v14266_v29 = vld [vmem:[%s15441_s7 + $0x88] sm:$0xff]  }
 0x4d9   :  { %10770 = vmatpush1.bf16.msra.mxu0 %v14223_v43  ;;  %10811 = vmatpush1.bf16.msra.mxu1 %v14226_v46 }
 0x4da   :  { %10771 = vmatprep.subr.bf16.mxu0 %v14231_v49  ;;  %10812 = vmatprep.subr.bf16.mxu1 %v14234_v50 }
 0x4dd   :  { %10772 = vmatpush1.bf16.msra.mxu0 %v14229_v51  ;;  %10813 = vmatpush1.bf16.msra.mxu1 %v14232_v54 }
 0x4de   :  { %10962 = vmatprep.subr.bf16.mxu0 %v14237_v55  ;;  %11003 = vmatprep.subr.bf16.mxu1 %v14240_v56 }
 0x4e0   :  { %12148 = vmatmul.mubr.msk.bf16.vlgmr.msra.gmra.mrb[204].mxu0 %vm4092_vm7, %v10681_v61  ;;  %12149 = vmatmul.mubr.msk.bf16.vlgmr.msra.gmra.mrb[192].mxu1 %vm4092_vm7, %v10681_v61 }
 0x4e1   :  { %10963 = vmatpush1.bf16.msra.mxu0 %v14235_v4  ;;  %11004 = vmatpush1.bf16.msra.mxu1 %v14238_v60 }
 0x4e2   :  { %10964 = vmatprep.subr.bf16.mxu0 %v14243_v63  ;;  %11005 = vmatprep.subr.bf16.mxu1 %v14246_v2 }
 0x4e3   :  { %v8238_v11 = vpop.f32.mrb[152].mxu0  ;;  %v8279_v13 = vpop.f32.mrb[140].mxu1  ;;  %10994 = vmatprep.mubr.bf16.mxu0 %v14441_v5  ;;  %11035 = vmatprep.mubr.bf16.mxu1 %v14441_v5  ;;  %v14258_v5 = vld [vmem:[#allocation9 + $0x11ec] ss:$16 sps:$4 sm:$0xff]  }
 0x4e4   :  { %v8286_v16 = vadd.f32 %v8238_v11, %v8089_v39  ;;  %v8288_v17 = vadd.f32 %v8279_v13, %v8091_v40  ;;  %v8240_v52 = vpop.f32.mrb[153].mxu0  ;;  %v8281_v18 = vpop.f32.mrb[141].mxu1 }
 0x4e5   :  { %v8287_v19 = vadd.f32 %v8240_v52, %v8090_v22  ;;  %v8289_v8 = vadd.f32 %v8281_v18, %v8092_v41  ;;  %v8242_v20 = vpop.f32.mrb[154].mxu0  ;;  %v8283_v21 = vpop.f32.mrb[142].mxu1  ;;  %10965 = vmatpush1.bf16.msra.mxu0 %v14241_v3  ;;  %11006 = vmatpush1.bf16.msra.mxu1 %v14244_v6 }
 0x4e6   :  { %v8243_v30 = vpop.f32.mrb[155].mxu0  ;;  %v8284_v58 = vpop.f32.mrb[143].mxu1  ;;  %10966 = vmatprep.subr.bf16.mxu0 %v14249_v9  ;;  %11007 = vmatprep.subr.bf16.mxu1 %v14252_v10  ;;  %v14260_v20 = vld [vmem:[%s15441_s7 + $0xc0] sm:$0xff]  }
 0x4e7   :  { %v14261_v21 = vld [vmem:[%s15441_s7] sm:$0xff]  }
 0x4e9   :  { %10967 = vmatpush1.bf16.msra.mxu0 %v14247_v24  ;;  %11008 = vmatpush1.bf16.msra.mxu1 %v14250_v27  ;;  %v14262_v24 = vld [vmem:[%s15441_s7 + $0x80] sm:$0xff]   ;;  %v14263_v27 = vld [vmem:[%s15441_s7 + $0x48] sm:$0xff]  }
 0x4ea   :  { %10968 = vmatprep.subr.bf16.mxu0 %v14255_v7  ;;  %11009 = vmatprep.subr.bf16.mxu1 %v14258_v5 }
 0x4ed   :  { %10969 = vmatpush1.bf16.msra.mxu0 %v14253_v53  ;;  %11010 = vmatpush1.bf16.msra.mxu1 %v14256_v28  ;;  %v14265_v28 = vld [vmem:[%s15441_s7 + $0x8] sm:$0xff]  }
 0x4ee   :  { %12483 = vmatprep.subr.bf16.mxu1 %v14260_v20 }
 0x4f0   :  { %12166 = vmatmul.mubr.msk.bf16.vlgmr.msra.gmra.mrb[208].mxu0 %vm4092_vm7, %v10878_v32  ;;  %12167 = vmatmul.mubr.msk.bf16.vlgmr.msra.gmra.mrb[196].mxu1 %vm4092_vm7, %v10878_v32 }
 0x4f1   :  { %12484 = vmatpush3.bf16.msra.mxu1 %v14262_v24 }
 0x4f2   :  { %12485 = vmatprep.subr.bf16.mxu1 %v14264_v25 }
 0x4f3   :  { %v8435_v33 = vpop.f32.mrb[156].mxu0  ;;  %v8476_v35 = vpop.f32.mrb[144].mxu1 }
 0x4f4   :  { %v8483_v36 = vadd.f32 %v8435_v33, %v8286_v16  ;;  %v8485_v37 = vadd.f32 %v8476_v35, %v8288_v17  ;;  %v8437_v38 = vpop.f32.mrb[157].mxu0  ;;  %v8478_v12 = vpop.f32.mrb[145].mxu1 }
 0x4f5   :  { %v8484_v39 = vadd.f32 %v8437_v38, %v8287_v19  ;;  %v8486_v40 = vadd.f32 %v8478_v12, %v8289_v8  ;;  %v8439_v0 = vpop.f32.mrb[158].mxu0  ;;  %v8480_v1 = vpop.f32.mrb[146].mxu1  ;;  %v14259_v8 = vld [vmem:[%s15441_s7 + $0x40] sm:$0xff]   ;;  %12486 = vmatpush3.bf16.msra.mxu1 %v14266_v29  ;;  %v14267_v38 = vld [vmem:[%s15441_s7 + $0x50] sm:$0xff]  }
 0x4f6   :  { %v8440_v22 = vpop.f32.mrb[159].mxu0  ;;  %v8481_v41 = vpop.f32.mrb[147].mxu1  ;;  %12461 = vmatprep.subr.bf16.mxu0 %v14259_v8  ;;  %v14268_v12 = vld [vmem:[%s15441_s7 + $0xd0] sm:$0xff]   ;;  %v14271_v0 = vld [vmem:[%s15441_s7 + $0x58] sm:$0xff]  }
 0x4f7   :  { %12462 = vmatpush3.bf16.msra.mxu0 %v14261_v21  ;;  %v14272_v1 = vld [vmem:[%s15441_s7 + $0xd8] sm:$0xff]   ;;  %12487 = vmatprep.subr.bf16.mxu1 %v14268_v12 }
 0x4f8   :  { %12463 = vmatprep.subr.bf16.mxu0 %v14263_v27  ;;  %v14273_v22 = vld [vmem:[%s15441_s7 + $0x18] sm:$0xff]  }
 0x4f9   :  { %v14274_v41 = vld [vmem:[%s15441_s7 + $0x98] sm:$0xff]  }
 0x4fb   :  { %12464 = vmatpush3.bf16.msra.mxu0 %v14265_v28 }
 0x4fc   :  { %12465 = vmatprep.subr.bf16.mxu0 %v14267_v38 }
 0x503   :  { %v8632_v42 = vpop.f32.mrb[160].mxu0  ;;  %v8673_v44 = vpop.f32.mrb[148].mxu1 }
 0x504   :  { %v8680_v43 = vadd.f32 %v8632_v42, %v8483_v36  ;;  %v8682_v46 = vadd.f32 %v8673_v44, %v8485_v37  ;;  %v8634_v15 = vpop.f32.mrb[161].mxu0  ;;  %v8675_v47 = vpop.f32.mrb[149].mxu1  ;;  %v14275_v42 = vld [vmem:[%s15441_s7 + $0x60] sm:$0xff]  }
 0x505   :  { %v8681_v48 = vadd.f32 %v8634_v15, %v8484_v39  ;;  %v8683_v49 = vadd.f32 %v8675_v47, %v8486_v40  ;;  %v8636_v50 = vpop.f32.mrb[162].mxu0  ;;  %v8677_v23 = vpop.f32.mrb[150].mxu1  ;;  %v14269_v39 = vld [vmem:[%s15441_s7 + $0x10] sm:$0xff]   ;;  %v14276_v44 = vld [vmem:[%s15441_s7 + $0xe0] sm:$0xff]   ;;  %v14279_v15 = vld [vmem:[%s15441_s7 + $0x68] sm:$0xff]  }
 0x506   :  { %v8637_v51 = vpop.f32.mrb[163].mxu0  ;;  %v8678_v54 = vpop.f32.mrb[151].mxu1  ;;  %v14270_v40 = vld [vmem:[%s15441_s7 + $0x90] sm:$0xff]   ;;  %12466 = vmatpush3.bf16.msra.mxu0 %v14269_v39  ;;  %v14280_v47 = vld [vmem:[%s15441_s7 + $0xe8] sm:$0xff]  }
 0x507   :  { %12488 = vmatpush3.bf16.msra.mxu1 %v14270_v40  ;;  %12467 = vmatprep.subr.bf16.mxu0 %v14271_v0 }
 0x508   :  { %12489 = vmatprep.subr.bf16.mxu1 %v14272_v1 }
 0x50a   :  { %12468 = vmatpush3.bf16.msra.mxu0 %v14273_v22 }
 0x50b   :  { %12490 = vmatpush3.bf16.msra.mxu1 %v14274_v41  ;;  %12469 = vmatprep.subr.bf16.mxu0 %v14275_v42 }
 0x50c   :  { %12491 = vmatprep.subr.bf16.mxu1 %v14276_v44 }
 0x513   :  { %v8829_v34 = vpop.f32.mrb[164].mxu0  ;;  %v8870_v55 = vpop.f32.mrb[152].mxu1 }
 0x514   :  { %v8877_v56 = vadd.f32 %v8829_v34, %v8680_v43  ;;  %v8879_v57 = vadd.f32 %v8870_v55, %v8682_v46  ;;  %v8831_v59 = vpop.f32.mrb[165].mxu0  ;;  %v8872_v4 = vpop.f32.mrb[153].mxu1  ;;  %v14277_v43 = vld [vmem:[%s15441_s7 + $0x20] sm:$0xff]   ;;  %v14281_v34 = vld [vmem:[%s15441_s7 + $0x28] sm:$0xff]  }
 0x515   :  { %v8878_v60 = vadd.f32 %v8831_v59, %v8681_v48  ;;  %v8880_v61 = vadd.f32 %v8872_v4, %v8683_v49  ;;  %v8833_v63 = vpop.f32.mrb[166].mxu0  ;;  %v8874_v2 = vpop.f32.mrb[154].mxu1  ;;  %v14278_v46 = vld [vmem:[%s15441_s7 + $0xa0] sm:$0xff]   ;;  %12470 = vmatpush3.bf16.msra.mxu0 %v14277_v43  ;;  %v14282_v55 = vld [vmem:[%s15441_s7 + $0xa8] sm:$0xff]  }
 0x516   :  { %v8834_v31 = vpop.f32.mrb[167].mxu0  ;;  %v8875_v3 = vpop.f32.mrb[155].mxu1  ;;  %12492 = vmatpush3.bf16.msra.mxu1 %v14278_v46  ;;  %12471 = vmatprep.subr.bf16.mxu0 %v14279_v15  ;;  %v14283_v63 = vld [vmem:[%s15441_s7 + $0x70] sm:$0xff]  }
 0x517   :  { %12493 = vmatprep.subr.bf16.mxu1 %v14280_v47  ;;  %v14284_v2 = vld [vmem:[%s15441_s7 + $0xf0] sm:$0xff]  }
 0x518   :  { %v14285_v31 = vld [vmem:[%s15441_s7 + $0x30] sm:$0xff]  }
 0x519   :  { %12472 = vmatpush3.bf16.msra.mxu0 %v14281_v34  ;;  %v14286_v3 = vld [vmem:[%s15441_s7 + $0xb0] sm:$0xff]  }
 0x51a   :  { %12494 = vmatpush3.bf16.msra.mxu1 %v14282_v55  ;;  %12473 = vmatprep.subr.bf16.mxu0 %v14283_v63 }
 0x51b   :  { %12495 = vmatprep.subr.bf16.mxu1 %v14284_v2 }
 0x51d   :  { %12474 = vmatpush3.bf16.msra.mxu0 %v14285_v31 }
 0x51e   :  { %12496 = vmatpush3.bf16.msra.mxu1 %v14286_v3 }
 0x523   :  { %v9026_v6 = vpop.f32.mrb[168].mxu0  ;;  %v9067_v9 = vpop.f32.mrb[156].mxu1 }
 0x524   :  { %v9074_v10 = vadd.f32 %v9026_v6, %v8877_v56  ;;  %v9076_v62 = vadd.f32 %v9067_v9, %v8879_v57  ;;  %v9028_v11 = vpop.f32.mrb[169].mxu0  ;;  %v9069_v13 = vpop.f32.mrb[157].mxu1  ;;  %v14287_v6 = vld [vmem:[%s15441_s7 + $0x78] sm:$0xff]  }
 0x525   :  { %v9075_v14 = vadd.f32 %v9028_v11, %v8878_v60  ;;  %v9077_v16 = vadd.f32 %v9069_v13, %v8880_v61  ;;  %v9030_v17 = vpop.f32.mrb[170].mxu0  ;;  %v9071_v52 = vpop.f32.mrb[158].mxu1  ;;  %v14288_v9 = vld [vmem:[%s15441_s7 + $0xf8] sm:$0xff]   ;;  %12475 = vmatprep.subr.bf16.mxu0 %v14287_v6 }
 0x526   :  { %v9031_v18 = vpop.f32.mrb[171].mxu0  ;;  %v9072_v19 = vpop.f32.mrb[159].mxu1  ;;  %12497 = vmatprep.subr.bf16.mxu1 %v14288_v9 }
 0x533   :  { %v9223_v30 = vpop.f32.mrb[172].mxu0  ;;  %v9264_v58 = vpop.f32.mrb[160].mxu1 }
 0x534   :  { %v9271_v7 = vadd.f32 %v9223_v30, %v9074_v10  ;;  %v9273_v5 = vadd.f32 %v9264_v58, %v9076_v62  ;;  %v9225_v26 = vpop.f32.mrb[173].mxu0  ;;  %v9266_v53 = vpop.f32.mrb[161].mxu1  ;;  %v14289_v10 = vld [vmem:[%s15441_s7 + $0x38] sm:$0xff]  }
 0x535   :  { %v9272_v45 = vadd.f32 %v9225_v26, %v9075_v14  ;;  %v9274_v32 = vadd.f32 %v9266_v53, %v9077_v16  ;;  %v9227_v33 = vpop.f32.mrb[174].mxu0  ;;  %v9268_v35 = vpop.f32.mrb[162].mxu1  ;;  %v14290_v62 = vld [vmem:[%s15441_s7 + $0xb8] sm:$0xff]   ;;  %12476 = vmatpush3.bf16.msra.mxu0 %v14289_v10  ;;  %s14442_s7 = smov [#allocation13]  }
 0x536   :  { %v9228_v36 = vpop.f32.mrb[175].mxu0  ;;  %v9269_v37 = vpop.f32.mrb[163].mxu1  ;;  %12498 = vmatpush3.bf16.msra.mxu1 %v14290_v62  ;;  %s11433_s6 = sshll.u32 %s14442_s7, 4  ;;  %s11434_s6 = int_to_ptr.vmem [resolvable:$true] %s11433_s6 }
 0x537   :  { %s14401_s12 = scalar_lea.vmem %s11434_s6, 32  ;;  %p14406_p13 = scmp.lt.s32.totalorder %s11434_s6, %s11434_s6 }
 0x538   :  { %p14402_p12 = scmp.ne.s32.totalorder %s11434_s6, %s14401_s12  ;;  %p14407_p0 = scmp.lt.s32.totalorder %s14401_s12, %s14401_s12 }
 0x53a   :  { %p14408_p1 = por %p14407_p0, %p14406_p13 }
 0x53c   :  { %p14409_p2 = pnand %p14408_p1, %p14402_p12 }
 0x543   :  { %v9420_v48 = vpop.f32.mrb[176].mxu0  ;;  %v9461_v49 = vpop.f32.mrb[164].mxu1 }
 0x544   :  { %v9468_v50 = vadd.f32 %v9420_v48, %v9271_v7  ;;  %v9470_v23 = vadd.f32 %v9461_v49, %v9273_v5  ;;  %v9422_v51 = vpop.f32.mrb[177].mxu0  ;;  %v9463_v54 = vpop.f32.mrb[165].mxu1 }
 0x545   :  { %v9469_v56 = vadd.f32 %v9422_v51, %v9272_v45  ;;  %v9471_v57 = vadd.f32 %v9463_v54, %v9274_v32  ;;  %v9424_v59 = vpop.f32.mrb[178].mxu0  ;;  %v9465_v4 = vpop.f32.mrb[166].mxu1 }
 0x546   :  { %v9425_v60 = vpop.f32.mrb[179].mxu0  ;;  %v9466_v61 = vpop.f32.mrb[167].mxu1 }
 0x553   :  { %v9617_v11 = vpop.f32.mrb[180].mxu0  ;;  %v9658_v13 = vpop.f32.mrb[168].mxu1 }
 0x554   :  { %v9665_v14 = vadd.f32 %v9617_v11, %v9468_v50  ;;  %v9667_v16 = vadd.f32 %v9658_v13, %v9470_v23  ;;  %v9619_v17 = vpop.f32.mrb[181].mxu0  ;;  %v9660_v52 = vpop.f32.mrb[169].mxu1 }
 0x555   :  { %v9666_v18 = vadd.f32 %v9619_v17, %v9469_v56  ;;  %v9668_v19 = vadd.f32 %v9660_v52, %v9471_v57  ;;  %v9621_v8 = vpop.f32.mrb[182].mxu0  ;;  %v9662_v20 = vpop.f32.mrb[170].mxu1 }
 0x556   :  { %v9622_v21 = vpop.f32.mrb[183].mxu0  ;;  %v9663_v24 = vpop.f32.mrb[171].mxu1 }
 0x563   :  { %v9814_v27 = vpop.f32.mrb[184].mxu0  ;;  %v9855_v25 = vpop.f32.mrb[172].mxu1 }
 0x564   :  { %v9862_v30 = vadd.f32 %v9814_v27, %v9665_v14  ;;  %v9864_v58 = vadd.f32 %v9855_v25, %v9667_v16  ;;  %v9816_v7 = vpop.f32.mrb[185].mxu0  ;;  %v9857_v5 = vpop.f32.mrb[173].mxu1 }
 0x565   :  { %v9863_v26 = vadd.f32 %v9816_v7, %v9666_v18  ;;  %v9865_v53 = vadd.f32 %v9857_v5, %v9668_v19  ;;  %v9818_v28 = vpop.f32.mrb[186].mxu0  ;;  %v9859_v29 = vpop.f32.mrb[174].mxu1 }
 0x566   :  { %v9819_v45 = vpop.f32.mrb[187].mxu0  ;;  %v9860_v32 = vpop.f32.mrb[175].mxu1  ;;  %v11050_v28 = vlaneseq }
 0x568   :  { %v11051_v29 = vshrl.u32 %v11050_v28, 7 }
 0x56a   :  { %v11052_v45 = vsub.s32 0, %v11051_v29  ;;  %v11060_v32 = vsub.s32 2, %v11051_v29 }
 0x573   :  { %v10011_v33 = vpop.f32.mrb[188].mxu0  ;;  %v10052_v35 = vpop.f32.mrb[176].mxu1 }
 0x574   :  { %v10059_v36 = vadd.f32 %v10011_v33, %v9862_v30  ;;  %v10061_v37 = vadd.f32 %v10052_v35, %v9864_v58  ;;  %v10013_v38 = vpop.f32.mrb[189].mxu0  ;;  %v10054_v12 = vpop.f32.mrb[177].mxu1  ;;  %v11048_v33 = vld [vmem:[#allocation10] sm:$0xf]  ;;  %v11056_v35 = vsub.s32 1, %v11051_v29 }
 0x575   :  { %v10060_v39 = vadd.f32 %v10013_v38, %v9863_v26  ;;  %v10062_v40 = vadd.f32 %v10054_v12, %v9865_v53  ;;  %v10015_v0 = vpop.f32.mrb[190].mxu0  ;;  %v10056_v1 = vpop.f32.mrb[178].mxu1  ;;  %v11061_v38 = vrot.slane %v11048_v33, %v11060_v32 }
 0x576   :  { %v10016_v22 = vpop.f32.mrb[191].mxu0  ;;  %v10057_v41 = vpop.f32.mrb[179].mxu1 }
 0x583   :  { %v10208_v42 = vpop.f32.mrb[192].mxu0  ;;  %v10249_v44 = vpop.f32.mrb[180].mxu1 }
 0x584   :  { %v10256_v43 = vadd.f32 %v10208_v42, %v10059_v36  ;;  %v10258_v46 = vadd.f32 %v10249_v44, %v10061_v37  ;;  %v10210_v15 = vpop.f32.mrb[193].mxu0  ;;  %v10251_v47 = vpop.f32.mrb[181].mxu1  ;;  %v11064_v36 = vsub.s32 3, %v11051_v29  ;;  %v11053_v37 = vrot.slane %v11048_v33, %v11052_v45 }
 0x585   :  { %v10257_v48 = vadd.f32 %v10210_v15, %v10060_v39  ;;  %v10259_v49 = vadd.f32 %v10251_v47, %v10062_v40  ;;  %v10212_v50 = vpop.f32.mrb[194].mxu0  ;;  %v10253_v23 = vpop.f32.mrb[182].mxu1  ;;  %v11057_v40 = vrot.slane %v11048_v33, %v11056_v35 }
 0x586   :  { %v10213_v51 = vpop.f32.mrb[195].mxu0  ;;  %v10254_v54 = vpop.f32.mrb[183].mxu1  ;;  %v11065_v0 = vrot.slane %v11048_v33, %v11064_v36 }
 0x593   :  { %v10405_v34 = vpop.f32.mrb[196].mxu0  ;;  %v10446_v55 = vpop.f32.mrb[184].mxu1 }
 0x594   :  { %v10453_v56 = vadd.f32 %v10405_v34, %v10256_v43  ;;  %v10455_v57 = vadd.f32 %v10446_v55, %v10258_v46  ;;  %v10407_v59 = vpop.f32.mrb[197].mxu0  ;;  %v10448_v4 = vpop.f32.mrb[185].mxu1 }
 0x595   :  { %v10454_v60 = vadd.f32 %v10407_v59, %v10257_v48  ;;  %v10456_v61 = vadd.f32 %v10448_v4, %v10259_v49  ;;  %v10409_v63 = vpop.f32.mrb[198].mxu0  ;;  %v10450_v2 = vpop.f32.mrb[186].mxu1 }
 0x596   :  { %v10410_v31 = vpop.f32.mrb[199].mxu0  ;;  %v10451_v3 = vpop.f32.mrb[187].mxu1  ;;  %v12168_v2 = vld [vmem:[#allocation12] ss:$0 sm:$0xff] }
 0x5a3   :  { %v10602_v6 = vpop.f32.mrb[200].mxu0  ;;  %v10643_v9 = vpop.f32.mrb[188].mxu1 }
 0x5a4   :  { %v10650_v10 = vadd.f32 %v10602_v6, %v10453_v56  ;;  %v10652_v62 = vadd.f32 %v10643_v9, %v10455_v57  ;;  %v10604_v11 = vpop.f32.mrb[201].mxu0  ;;  %v10645_v13 = vpop.f32.mrb[189].mxu1 }
 0x5a5   :  { %v10651_v14 = vadd.f32 %v10604_v11, %v10454_v60  ;;  %v10653_v16 = vadd.f32 %v10645_v13, %v10456_v61  ;;  %v10606_v17 = vpop.f32.mrb[202].mxu0  ;;  %v10647_v52 = vpop.f32.mrb[190].mxu1 }
 0x5a6   :  { %v10607_v18 = vpop.f32.mrb[203].mxu0  ;;  %v10648_v19 = vpop.f32.mrb[191].mxu1 }
 0x5b3   :  { %v10799_v8 = vpop.f32.mrb[204].mxu0  ;;  %v10840_v20 = vpop.f32.mrb[192].mxu1 }
 0x5b4   :  { %v10847_v21 = vadd.f32 %v10799_v8, %v10650_v10  ;;  %v10849_v24 = vadd.f32 %v10840_v20, %v10652_v62  ;;  %v10801_v27 = vpop.f32.mrb[205].mxu0  ;;  %v10842_v25 = vpop.f32.mrb[193].mxu1 }
 0x5b5   :  { %v10848_v30 = vadd.f32 %v10801_v27, %v10651_v14  ;;  %v10850_v58 = vadd.f32 %v10842_v25, %v10653_v16  ;;  %v10803_v7 = vpop.f32.mrb[206].mxu0  ;;  %v10844_v5 = vpop.f32.mrb[194].mxu1 }
 0x5b6   :  { %v10804_v26 = vpop.f32.mrb[207].mxu0  ;;  %v10845_v53 = vpop.f32.mrb[195].mxu1 }
 0x5c3   :  { %v10996_v12 = vpop.f32.mrb[208].mxu0  ;;  %v11037_v39 = vpop.f32.mrb[196].mxu1 }
 0x5c4   :  { %v11044_v1 = vadd.f32 %v10996_v12, %v10847_v21  ;;  %v11046_v22 = vadd.f32 %v11037_v39, %v10849_v24  ;;  %v10998_v41 = vpop.f32.mrb[209].mxu0  ;;  %v11039_v42 = vpop.f32.mrb[197].mxu1 }
 0x5c5   :  { %v11045_v44 = vadd.f32 %v10998_v41, %v10848_v30  ;;  %v11047_v43 = vadd.f32 %v11039_v42, %v10850_v58  ;;  %v11000_v46 = vpop.f32.mrb[210].mxu0  ;;  %v11041_v15 = vpop.f32.mrb[198].mxu1 }
 0x5c6   :  { %v11070_v47 = vadd.f32 %v11053_v37, %v11044_v1  ;;  %v11072_v48 = vadd.f32 %v11061_v38, %v11046_v22  ;;  %v11001_v49 = vpop.f32.mrb[211].mxu0  ;;  %v11042_v50 = vpop.f32.mrb[199].mxu1 }
 0x5c7   :  { %v11071_v23 = vadd.f32 %v11057_v40, %v11045_v44  ;;  %v11073_v51 = vadd.f32 %v11065_v0, %v11047_v43 }
 0x5c8   :  { %v11074_v54 = vmax.f32 %v11070_v47, 0.0  ;;  %v11076_v34 = vmax.f32 %v11072_v48, 0.0 }
 0x5c9   :  { %v11075_v55 = vmax.f32 %v11071_v23, 0.0  ;;  %v11077_v56 = vmax.f32 %v11073_v51, 0.0 }
 0x5ca   :  { %v11078_v4 = vpack.c.bf16 %v11074_v54, %v11074_v54  ;;  %v11080_v60 = vpack.c.bf16 %v11076_v34, %v11076_v34 }
 0x5cb   :  { %v11079_v57 = vpack.c.bf16 %v11075_v55, %v11075_v55  ;;  %v11081_v59 = vpack.c.bf16 %v11077_v56, %v11077_v56 }
 0x5cd   :  { %11377 = vmatprep.mubr.bf16.mxu0 %v11079_v57  ;;  %11417 = vmatprep.mubr.bf16.mxu1 %v11081_v59 }
 0x5ce   :  { %11378 = vmatmul.mubr.bf16.vlgmr.msra.gmra.mrb[212].mxu0 %v11078_v4  ;;  %11418 = vmatmul.mubr.bf16.vlgmr.msra.gmra.mrb[200].mxu1 %v11080_v60 }
 0x6a1   :  { %v12477_v61 = vpop.f32.mrb[212].mxu0  ;;  %v12499_v63 = vpop.f32.mrb[200].mxu1 }
 0x6a2   :  { %v12478_v31 = vpop.f32.mrb[213].mxu0  ;;  %v12500_v3 = vpop.f32.mrb[201].mxu1 }
 0x6a3   :  { %v12479_v6 = vadd.f32 %v12478_v31, %v12477_v61  ;;  %v12501_v9 = vadd.f32 %v12500_v3, %v12499_v63  ;;  %v12480_v10 = vpop.f32.mrb[214].mxu0  ;;  %v12502_v62 = vpop.f32.mrb[202].mxu1 }
 0x6a4   :  { %v12481_v11 = vpop.f32.mrb[215].mxu0  ;;  %v12503_v13 = vpop.f32.mrb[203].mxu1 }
 0x6a5   :  { %v11380_v14 = vadd.f32 %v12479_v6, %v12168_v2 }
 0x6a7   :  { %v11420_v16 = vadd.f32 %v12501_v9, %v11380_v14 }
 0x6a9   :  { %11426 = vst.msk [vmem:[#allocation13] sm:$0x3] %vm11425_vm8, %v11420_v16 }
 0x6aa   :  { %14412 = shalt.err (!%p14409_p2)
}
 0x6ab   :  { %s14413_s16 = scalar_lea.hbm %s15443_s9, 32 }
 0x6ac   :  { %p14414_p3 = scmp.ne.s32.totalorder %s15443_s9, %s14413_s16  ;;  %p14417_p4 = scmp.lt.u32.totalorder %s14413_s16, %s15443_s9 }
 0x6ae   :  { %p14419_p5 = pnand %p14417_p4, %p14414_p3 }
 0x6b0   :  { %14422 = shalt.err (!%p14419_p5)
}
 0x6b1   :  { %11436 = dma.vmem_to_hbm [thread:$0]  %s11434_s6, 32, %s15443_s9, [#allocation6]  }
 0x6b2   :  { %14429 = dma.done.wait [#allocation6], 32  }
 0x6b3   :  { %14430 = vsyncadd [#allocation6], 4294967264 }
 0x6b4   :  { %11440 = vsyncpa [#allocation5], 1 }
 0x6b5   :  { %11441 = vsyncpa [#allocation8], 1 }
 0x6b6   :  { %11442 = vsyncpa [#allocation11], 1 }
 0x6b7   :  { %11443 = vsyncpa [#allocation6], 1 }

</bundles_post_ra>
